<compile_context>
chip_gen: v7x
topology: tpu7x:2x2x1
jax: 0.10.0
libtpu: 0.0.40
codegen_flags: <defaults>
</compile_context>

<pallas_src>
import functools

import jax
import jax.numpy as jnp
from jax.experimental import pallas as pl
from jax.experimental.pallas import tpu as pltpu

EPS = 1e-5
LANE = 128


def _rup(x, m):
    return ((x + m - 1) // m) * m


# ------------------------------------------------------------------ Pallas kernels
def _conv_bn_stats_kernel(x_ref, w_ref, scale_ref, bias_ref,
                          y_ref, stats_ref, xp_ref, *, apply_relu):
    """One image per grid step.

    pre-activation (per-channel scale/bias [+relu]) -> zero-padded im2col ->
    single big-K MXU matmul -> raw conv output + per-image BN partial stats.

    x_ref    : (1, H, W, Cin)    f32   input tile
    w_ref    : (9*Cin, Cout)     bf16  tap-major flattened 3x3 weights (resident)
    scale_ref: (1, Cin)          f32   folded pre-activation scale
    bias_ref : (1, Cin)          f32   folded pre-activation bias
    y_ref    : (1, H, W, Cout)   f32   raw conv output
    stats_ref: (1, 2, Cout)      f32   per-image [sum, sum_sq] of conv output
    xp_ref   : (H+2, W+2, Cin)   f32   VMEM scratch: zero-bordered padded conv input
    """
    _, H, W, Cin = x_ref.shape
    Cout = y_ref.shape[-1]

    # Zero only the 1-pixel border strips (interior is fully overwritten below).
    xp_ref[0:1, :, :] = jnp.zeros((1, W + 2, Cin), xp_ref.dtype)
    xp_ref[H + 1:H + 2, :, :] = jnp.zeros((1, W + 2, Cin), xp_ref.dtype)
    xp_ref[:, 0:1, :] = jnp.zeros((H + 2, 1, Cin), xp_ref.dtype)
    xp_ref[:, W + 1:W + 2, :] = jnp.zeros((H + 2, 1, Cin), xp_ref.dtype)

    # Pre-activation in f32 (folded BN affine of the *previous* conv applied here).
    h = x_ref[0] * scale_ref[...] + bias_ref[...]
    if apply_relu:
        h = jnp.maximum(h, 0.0)
    xp_ref[1:H + 1, 1:W + 1, :] = h

    # im2col patch (H*W, 9*Cin); bf16 on the MXU, f32 accumulation.
    taps = [xp_ref[kh:kh + H, kw:kw + W, :]
            for kh in range(3) for kw in range(3)]
    patch = jnp.concatenate(taps, axis=-1).reshape(H * W, 9 * Cin)
    y = jnp.dot(patch.astype(jnp.bfloat16), w_ref[...],
                preferred_element_type=jnp.float32)

    y_ref[0] = y.reshape(H, W, Cout)
    # BN partial statistics fused into the conv epilogue (while y is live in VMEM).
    ssum = jnp.sum(y, axis=0, keepdims=True)
    ssq = jnp.sum(y * y, axis=0, keepdims=True)
    stats_ref[0] = jnp.concatenate([ssum, ssq], axis=0)


def _bn_act_kernel(y_ref, scale_ref, bias_ref, o_ref, *, apply_relu):
    """out = [relu](y * scale + bias), element-wise per image (stem normalize)."""
    h = y_ref[0] * scale_ref[...] + bias_ref[...]
    if apply_relu:
        h = jnp.maximum(h, 0.0)
    o_ref[0] = h


def _residual_out_kernel(y_ref, x_ref, scale_ref, bias_ref, o_ref):
    """out = relu(bn2(conv2_out) + identity_shortcut), element-wise per image."""
    o_ref[0] = jnp.maximum(
        y_ref[0] * scale_ref[...] + bias_ref[...] + x_ref[0], 0.0)


def _pool_linear_kernel(x_ref, w_ref, o_ref, *, pool):
    """avg_pool2d(pool) + flatten + linear (no bias), one image per grid step.

    x_ref : (1, H, W, Cp)            f32
    w_ref : (Hp*Wp, Cp, Npad)        f32   linear weights permuted to NHWC flatten order
    o_ref : (1, 1, Npad)             f32   logits (padded classes)
    """
    _, H, W, Cp = x_ref.shape
    hp, wp = H // pool, W // pool
    npad = o_ref.shape[-1]
    inv = 1.0 / float(pool * pool)

    acc = jnp.zeros((1, npad), jnp.float32)
    for ph in range(hp):
        for pw in range(wp):
            win = x_ref[0, ph * pool:(ph + 1) * pool, pw * pool:(pw + 1) * pool, :]
            pooled = (jnp.sum(win, axis=(0, 1), keepdims=True) * inv).reshape(1, Cp)
            acc = acc + jnp.dot(pooled, w_ref[ph * wp + pw],
                                preferred_element_type=jnp.float32)
    o_ref[0] = acc


# ------------------------------------------------------------------ pallas_call wrappers
_COMPILER_PARAMS = pltpu.CompilerParams(
    dimension_semantics=("parallel",),
    vmem_limit_bytes=32 * 1024 * 1024,
)


def _conv_bn_stats_call(x, w_flat, scale, bias, *, apply_relu):
    N, H, W, Cin = x.shape
    Cout = w_flat.shape[-1]
    kernel = functools.partial(_conv_bn_stats_kernel, apply_relu=apply_relu)
    x_spec = pl.BlockSpec((1, H, W, Cin), lambda n: (n, 0, 0, 0))
    y_spec = pl.BlockSpec((1, H, W, Cout), lambda n: (n, 0, 0, 0))
    y, stats = pl.pallas_call(
        kernel,
        grid=(N,),
        in_specs=[
            x_spec,                                            # activations: pipelined
            pl.BlockSpec((9 * Cin, Cout), lambda n: (0, 0)),   # weights: resident
            pl.BlockSpec((1, Cin), lambda n: (0, 0)),          # scale: resident
            pl.BlockSpec((1, Cin), lambda n: (0, 0)),          # bias: resident
        ],
        out_specs=[
            y_spec,
            pl.BlockSpec((1, 2, Cout), lambda n: (n, 0, 0)),
        ],
        out_shape=[
            jax.ShapeDtypeStruct((N, H, W, Cout), jnp.float32),
            jax.ShapeDtypeStruct((N, 2, Cout), jnp.float32),
        ],
        scratch_shapes=[pltpu.VMEM((H + 2, W + 2, Cin), jnp.float32)],
        compiler_params=_COMPILER_PARAMS,
    )(x, w_flat, scale, bias)
    return y, stats


def _bn_act_call(y, scale, bias, *, apply_relu):
    N, H, W, Cp = y.shape
    act_spec = pl.BlockSpec((1, H, W, Cp), lambda n: (n, 0, 0, 0))
    kernel = functools.partial(_bn_act_kernel, apply_relu=apply_relu)
    return pl.pallas_call(
        kernel,
        grid=(N,),
        in_specs=[act_spec,
                  pl.BlockSpec((1, Cp), lambda n: (0, 0)),
                  pl.BlockSpec((1, Cp), lambda n: (0, 0))],
        out_specs=act_spec,
        out_shape=jax.ShapeDtypeStruct((N, H, W, Cp), jnp.float32),
        compiler_params=_COMPILER_PARAMS,
    )(y, scale, bias)


def _residual_call(y2, x, scale, bias):
    N, H, W, Cp = x.shape
    act_spec = pl.BlockSpec((1, H, W, Cp), lambda n: (n, 0, 0, 0))
    return pl.pallas_call(
        _residual_out_kernel,
        grid=(N,),
        in_specs=[act_spec, act_spec,
                  pl.BlockSpec((1, Cp), lambda n: (0, 0)),
                  pl.BlockSpec((1, Cp), lambda n: (0, 0))],
        out_specs=act_spec,
        out_shape=jax.ShapeDtypeStruct((N, H, W, Cp), jnp.float32),
        compiler_params=_COMPILER_PARAMS,
    )(y2, x, scale, bias)


def _pool_linear_call(x, w_k, *, pool):
    N, H, W, Cp = x.shape
    hp, wp = H // pool, W // pool
    npad = w_k.shape[-1]
    kernel = functools.partial(_pool_linear_kernel, pool=pool)
    out = pl.pallas_call(
        kernel,
        grid=(N,),
        in_specs=[
            pl.BlockSpec((1, H, W, Cp), lambda n: (n, 0, 0, 0)),
            pl.BlockSpec((hp * wp, Cp, npad), lambda n: (0, 0, 0)),   # resident
        ],
        out_specs=pl.BlockSpec((1, 1, npad), lambda n: (n, 0, 0)),
        out_shape=jax.ShapeDtypeStruct((N, 1, npad), jnp.float32),
        compiler_params=_COMPILER_PARAMS,
    )(x, w_k)
    return out[:, 0, :]


# ------------------------------------------------------------------ BN folding & layers
def _fold_bn(stats, gamma, beta, count):
    """Reduce per-image partial stats and fold BN into per-channel scale/bias."""
    s = jnp.sum(stats[:, 0, :], axis=0)
    ss = jnp.sum(stats[:, 1, :], axis=0)
    mean = s / count
    var = jnp.maximum(ss / count - mean * mean, 0.0)
    scale = gamma * jax.lax.rsqrt(var + EPS)
    bias = beta - mean * scale
    return scale.reshape(1, -1), bias.reshape(1, -1)


def stem_forward_nhwc(x_pad, w_flat, g, b):
    """relu(bn(conv3x3(x))) on channel-padded NHWC activations."""
    N, H, W, Cin = x_pad.shape
    count = float(N * H * W)
    ones = jnp.ones((1, Cin), jnp.float32)
    zeros = jnp.zeros((1, Cin), jnp.float32)
    y, st = _conv_bn_stats_call(x_pad, w_flat, ones, zeros, apply_relu=False)
    s, bi = _fold_bn(st, g, b, count)
    return _bn_act_call(y, s, bi, apply_relu=True)


def basic_block_forward_nhwc(x_pad, w1_flat, g1, b1, w2_flat, g2, b2):
    """Identity-shortcut BasicBlock on channel-padded (lane-dense) activations."""
    N, H, W, Cp = x_pad.shape
    count = float(N * H * W)
    ones = jnp.ones((1, Cp), jnp.float32)
    zeros = jnp.zeros((1, Cp), jnp.float32)

    # conv1 + fused BN1 partial stats (pre-activation = identity).
    y1, st1 = _conv_bn_stats_call(x_pad, w1_flat, ones, zeros, apply_relu=False)
    s1, bi1 = _fold_bn(st1, g1, b1, count)
    # relu(bn1(.)) applied on-the-fly while reading; conv2 + fused BN2 partial stats.
    y2, st2 = _conv_bn_stats_call(y1, w2_flat, s1, bi1, apply_relu=True)
    s2, bi2 = _fold_bn(st2, g2, b2, count)
    # bn2 + identity shortcut + relu.
    return _residual_call(y2, x_pad, s2, bi2)


# ------------------------------------------------------------------ param packing
def _pad_axis(a, target, axis):
    pad = [(0, 0)] * a.ndim
    pad[axis] = (0, target - a.shape[axis])
    return jnp.pad(a, pad)


def _pack_conv_weight(w_hwio, cin_p, cout_p):
    """(3,3,Cin,Cout) HWIO -> zero-pad channels -> tap-major (9*Cin_p, Cout_p) bf16."""
    w = _pad_axis(_pad_axis(w_hwio.astype(jnp.float32), cin_p, 2), cout_p, 3)
    return w.reshape(9 * cin_p, cout_p).astype(jnp.bfloat16)


def _pack_linear_weight(w_lin, c, hp, wp, cp, npad):
    """torch (ncls, C*Hp*Wp) NCHW-flatten-order -> (Hp*Wp, Cp, Npad) f32."""
    ncls = w_lin.shape[0]
    w = w_lin.reshape(ncls, c, hp, wp).astype(jnp.float32)
    w = jnp.transpose(w, (2, 3, 1, 0))                  # (hp, wp, c, ncls)
    w = _pad_axis(_pad_axis(w, cp, 2), npad, 3)
    return w.reshape(hp * wp, cp, npad)


@jax.jit
def resnet_small_forward(x_nchw, params):
    """NCHW (torch-convention) adapter: stem -> layer1 BasicBlocks -> avgpool+linear."""
    N, C, H, W = x_nchw.shape
    planes = params["stem"]["g"].shape[0]
    num_classes = params["linear"]["w"].shape[0]
    cin_p = _rup(C, LANE)
    cp = _rup(planes, LANE)

    x = jnp.transpose(x_nchw, (0, 2, 3, 1)).astype(jnp.float32)   # NCHW -> NHWC
    x = _pad_axis(x, cin_p, 3)

    # Stem: conv3x3(C -> planes) + BN(batch stats) + ReLU.
    w_stem = _pack_conv_weight(params["stem"]["w"], cin_p, cp)
    g_stem = _pad_axis(params["stem"]["g"].astype(jnp.float32), cp, 0)
    b_stem = _pad_axis(params["stem"]["b"].astype(jnp.float32), cp, 0)
    h = stem_forward_nhwc(x, w_stem, g_stem, b_stem)

    # layer1: identity-shortcut BasicBlocks (stride=1, in_planes == planes).
    for blk in params["blocks"]:
        w1 = _pack_conv_weight(blk["w1"], cp, cp)
        w2 = _pack_conv_weight(blk["w2"], cp, cp)
        g1 = _pad_axis(blk["g1"].astype(jnp.float32), cp, 0)
        b1 = _pad_axis(blk["b1"].astype(jnp.float32), cp, 0)
        g2 = _pad_axis(blk["g2"].astype(jnp.float32), cp, 0)
        b2 = _pad_axis(blk["b2"].astype(jnp.float32), cp, 0)
        h = basic_block_forward_nhwc(h, w1, g1, b1, w2, g2, b2)

    # Head: avg_pool2d(4) + flatten (NCHW order) + linear (no bias).
    pool = 4
    hp, wp = H // pool, W // pool
    npad = _rup(num_classes, LANE)
    w_lin = _pack_linear_weight(params["linear"]["w"], planes, hp, wp, cp, npad)
    logits = _pool_linear_call(h, w_lin, pool=pool)
    return logits[:, :num_classes]


# ------------------------------------------------------------------ pure-JAX references
def _conv3x3_ref(x_nhwc, w_hwio):
    return jax.lax.conv_general_dilated(
        x_nhwc, w_hwio, window_strides=(1, 1), padding=((1, 1), (1, 1)),
        dimension_numbers=("NHWC", "HWIO", "NHWC"),
        precision=jax.lax.Precision.HIGHEST)


def _bn_ref(x, g, b):
    mean = jnp.mean(x, axis=(0, 1, 2), keepdims=True)
    var = jnp.mean((x - mean) ** 2, axis=(0, 1, 2), keepdims=True)
    return ((x - mean) * jax.lax.rsqrt(var + EPS) * g.reshape(1, 1, 1, -1)
            + b.reshape(1, 1, 1, -1))


@functools.partial(jax.jit, static_argnames=("match_bf16",))
def resnet_small_ref(x_nchw, params, *, match_bf16):
    # match_bf16=True mirrors the kernel's bf16 cast points (MXU inputs); accumulation
    # and BN are f32 in both.  match_bf16=False is the pure-f32 torch-equivalent math.
    def q(a):
        return a.astype(jnp.bfloat16).astype(jnp.float32) if match_bf16 else a

    x = jnp.transpose(x_nchw, (0, 2, 3, 1)).astype(jnp.float32)
    h = _conv3x3_ref(q(x), q(params["stem"]["w"].astype(jnp.float32)))
    h = jnp.maximum(_bn_ref(h, params["stem"]["g"], params["stem"]["b"]), 0.0)
    for blk in params["blocks"]:
        y = _conv3x3_ref(q(h), q(blk["w1"].astype(jnp.float32)))
        y = jnp.maximum(_bn_ref(y, blk["g1"], blk["b1"]), 0.0)
        y = _conv3x3_ref(q(y), q(blk["w2"].astype(jnp.float32)))
        y = _bn_ref(y, blk["g2"], blk["b2"])
        h = jnp.maximum(y + h, 0.0)
    N, H, W, C = h.shape
    pool = 4
    hp, wp = H // pool, W // pool
    p = h.reshape(N, hp, pool, wp, pool, C).mean(axis=(2, 4))     # avg_pool2d(4), NHWC
    feats = jnp.transpose(p, (0, 3, 1, 2)).reshape(N, -1)         # torch .view order
    return jnp.dot(feats, params["linear"]["w"].astype(jnp.float32).T,
                   precision=jax.lax.Precision.HIGHEST)


# ------------------------------------------------------------------ demo / self-test
if __name__ == "__main__":
    N, C, H, W = 2, 3, 16, 16
    planes, num_blocks, num_classes = 64, 2, 10
    pool = 4
    hp, wp = H // pool, W // pool

    key = jax.random.PRNGKey(0)
    keys = iter(jax.random.split(key, 32))

    def nrm(shape, scale=1.0):
        return scale * jax.random.normal(next(keys), shape, jnp.float32)

    params = {
        "stem": {"w": nrm((3, 3, C, planes), 0.1),
                 "g": 1.0 + 0.1 * nrm((planes,)),
                 "b": 0.1 * nrm((planes,))},
        "blocks": [
            {"w1": nrm((3, 3, planes, planes), 0.05),
             "g1": 1.0 + 0.1 * nrm((planes,)),
             "b1": 0.1 * nrm((planes,)),
             "w2": nrm((3, 3, planes, planes), 0.05),
             "g2": 1.0 + 0.1 * nrm((planes,)),
             "b2": 0.1 * nrm((planes,))}
            for _ in range(num_blocks)
        ],
        "linear": {"w": nrm((num_classes, planes * hp * wp), 0.05)},
    }
    x_nchw = nrm((N, C, H, W))

    out = jax.block_until_ready(resnet_small_forward(x_nchw, params))
    assert out.shape == (N, num_classes)

    # Kernel-logic check: reference with matching bf16 cast points (tight tolerance).
    ref_bf16 = jax.block_until_ready(
        resnet_small_ref(x_nchw, params, match_bf16=True))
    assert jnp.allclose(out, ref_bf16, rtol=5e-3, atol=5e-3), (
        f"max abs diff vs bf16-matched ref: "
        f"{float(jnp.max(jnp.abs(out - ref_bf16)))}")

    # End-to-end check vs full-f32 reference; tolerance reflects bf16 MXU inputs
    # across 5 chained convolutions.
    ref_f32 = jax.block_until_ready(
        resnet_small_ref(x_nchw, params, match_bf16=False))
    assert jnp.allclose(out, ref_f32, rtol=1e-1, atol=1e-1), (
        f"max abs diff vs f32 ref: {float(jnp.max(jnp.abs(out - ref_f32)))}")

    print("KERNEL_OK")
</pallas_src>

<mosaic_0001>
module attributes {stable_mosaic.version = 11 : i64} {
  func.func @_bn_act_kernel(%arg0: i32, %arg1: memref<1x16x16x128xf32, #tpu.memory_space<vmem>>, %arg2: memref<1x128xf32, #tpu.memory_space<vmem>>, %arg3: memref<1x128xf32, #tpu.memory_space<vmem>>, %arg4: memref<1x16x16x128xf32, #tpu.memory_space<vmem>>) attributes {dimension_semantics = [#tpu.dimension_semantics<parallel>], iteration_bounds = array<i64: 2>, scalar_prefetch = 0 : i64, scratch_operands = 0 : i64, tpu.core_type = #tpu.core_type<tc>, window_params = [{transform_indices = @transform_0, window_bounds = array<i64: 1, 16, 16, 128>}, {pipeline_mode = #tpu.pipeline_mode<synchronous>, transform_indices = @transform_1, window_bounds = array<i64: 1, 128>}, {pipeline_mode = #tpu.pipeline_mode<synchronous>, transform_indices = @transform_2, window_bounds = array<i64: 1, 128>}, {transform_indices = @transform_3, window_bounds = array<i64: 1, 16, 16, 128>}]} {
    %c0 = arith.constant 0 : index
    %c0_0 = arith.constant 0 : index
    %c0_1 = arith.constant 0 : index
    %c0_2 = arith.constant 0 : index
    %0 = vector.load %arg1[%c0, %c0_0, %c0_1, %c0_2] : memref<1x16x16x128xf32, #tpu.memory_space<vmem>>, vector<1x16x16x128xf32>
    %1 = vector.shape_cast %0 : vector<1x16x16x128xf32> to vector<16x16x128xf32>
    %c0_3 = arith.constant 0 : index
    %c0_4 = arith.constant 0 : index
    %2 = vector.load %arg2[%c0_3, %c0_4] : memref<1x128xf32, #tpu.memory_space<vmem>>, vector<1x128xf32>
    %3 = vector.shape_cast %2 : vector<1x128xf32> to vector<1x1x128xf32>
    %4 = vector.broadcast %3 : vector<1x1x128xf32> to vector<16x16x128xf32>
    %5 = arith.mulf %1, %4 : vector<16x16x128xf32>
    %c0_5 = arith.constant 0 : index
    %c0_6 = arith.constant 0 : index
    %6 = vector.load %arg3[%c0_5, %c0_6] : memref<1x128xf32, #tpu.memory_space<vmem>>, vector<1x128xf32>
    %7 = vector.shape_cast %6 : vector<1x128xf32> to vector<1x1x128xf32>
    %8 = vector.broadcast %7 : vector<1x1x128xf32> to vector<16x16x128xf32>
    %9 = arith.addf %5, %8 : vector<16x16x128xf32>
    %cst = arith.constant 0.000000e+00 : f32
    %10 = vector.broadcast %cst : f32 to vector<16x16x128xf32>
    %11 = arith.maximumf %9, %10 : vector<16x16x128xf32>
    %c0_7 = arith.constant 0 : index
    %c0_8 = arith.constant 0 : index
    %c0_9 = arith.constant 0 : index
    %c0_10 = arith.constant 0 : index
    %12 = vector.load %arg4[%c0_7, %c0_8, %c0_9, %c0_10] : memref<1x16x16x128xf32, #tpu.memory_space<vmem>>, vector<1x16x16x128xf32>
    %13 = vector.shape_cast %12 : vector<1x16x16x128xf32> to vector<16x16x128xf32>
    %14 = vector.shape_cast %11 : vector<16x16x128xf32> to vector<1x16x16x128xf32>
    tpu.vector_store %arg4[%c0_7, %c0_8, %c0_9, %c0_10], %14 {strides = array<i32>} : memref<1x16x16x128xf32, #tpu.memory_space<vmem>>, vector<1x16x16x128xf32>,
    return
  }
  func.func @transform_0(%arg0: i32) -> (i32, i32, i32, i32) {
    %c0_i32 = arith.constant 0 : i32
    %c0_i32_0 = arith.constant 0 : i32
    %c0_i32_1 = arith.constant 0 : i32
    %c0_i32_2 = arith.constant 0 : i32
    return %arg0, %c0_i32, %c0_i32_0, %c0_i32_1 : i32, i32, i32, i32
  }
  func.func @transform_1(%arg0: i32) -> (i32, i32) {
    %c0_i32 = arith.constant 0 : i32
    %c0_i32_0 = arith.constant 0 : i32
    %c0_i32_1 = arith.constant 0 : i32
    return %c0_i32, %c0_i32_0 : i32, i32
  }
  func.func @transform_2(%arg0: i32) -> (i32, i32) {
    %c0_i32 = arith.constant 0 : i32
    %c0_i32_0 = arith.constant 0 : i32
    %c0_i32_1 = arith.constant 0 : i32
    return %c0_i32, %c0_i32_0 : i32, i32
  }
  func.func @transform_3(%arg0: i32) -> (i32, i32, i32, i32) {
    %c0_i32 = arith.constant 0 : i32
    %c0_i32_0 = arith.constant 0 : i32
    %c0_i32_1 = arith.constant 0 : i32
    %c0_i32_2 = arith.constant 0 : i32
    return %arg0, %c0_i32, %c0_i32_0, %c0_i32_1 : i32, i32, i32, i32
  }
}

module attributes {stable_mosaic.version = 11 : i64} {
  func.func @_conv_bn_stats_kernel(%arg0: i32, %arg1: memref<1x16x16x128xf32, #tpu.memory_space<vmem>>, %arg2: memref<1152x128xbf16, #tpu.memory_space<vmem>>, %arg3: memref<1x128xf32, #tpu.memory_space<vmem>>, %arg4: memref<1x128xf32, #tpu.memory_space<vmem>>, %arg5: memref<1x16x16x128xf32, #tpu.memory_space<vmem>>, %arg6: memref<1x2x128xf32, #tpu.memory_space<vmem>>, %arg7: memref<18x18x128xf32, #tpu.memory_space<vmem>>) attributes {dimension_semantics = [#tpu.dimension_semantics<parallel>], iteration_bounds = array<i64: 2>, scalar_prefetch = 0 : i64, scratch_operands = 1 : i64, tpu.core_type = #tpu.core_type<tc>, window_params = [{transform_indices = @transform_0, window_bounds = array<i64: 1, 16, 16, 128>}, {pipeline_mode = #tpu.pipeline_mode<synchronous>, transform_indices = @transform_1, window_bounds = array<i64: 1152, 128>}, {pipeline_mode = #tpu.pipeline_mode<synchronous>, transform_indices = @transform_2, window_bounds = array<i64: 1, 128>}, {pipeline_mode = #tpu.pipeline_mode<synchronous>, transform_indices = @transform_3, window_bounds = array<i64: 1, 128>}, {transform_indices = @transform_4, window_bounds = array<i64: 1, 16, 16, 128>}, {transform_indices = @transform_5, window_bounds = array<i64: 1, 2, 128>}]} {
    %cst = arith.constant 0.000000e+00 : f32
    %0 = vector.broadcast %cst : f32 to vector<1x18x128xf32>
    %c0 = arith.constant 0 : index
    %c0_0 = arith.constant 0 : index
    %c0_1 = arith.constant 0 : index
    %1 = vector.load %arg7[%c0, %c0_0, %c0_1] : memref<18x18x128xf32, #tpu.memory_space<vmem>>, vector<1x18x128xf32>
    tpu.vector_store %arg7[%c0, %c0_0, %c0_1], %0 {strides = array<i32>} : memref<18x18x128xf32, #tpu.memory_space<vmem>>, vector<1x18x128xf32>,
    %cst_2 = arith.constant 0.000000e+00 : f32
    %2 = vector.broadcast %cst_2 : f32 to vector<1x18x128xf32>
    %c17 = arith.constant 17 : index
    %c0_3 = arith.constant 0 : index
    %c0_4 = arith.constant 0 : index
    %3 = vector.load %arg7[%c17, %c0_3, %c0_4] : memref<18x18x128xf32, #tpu.memory_space<vmem>>, vector<1x18x128xf32>
    tpu.vector_store %arg7[%c17, %c0_3, %c0_4], %2 {strides = array<i32>} : memref<18x18x128xf32, #tpu.memory_space<vmem>>, vector<1x18x128xf32>,
    %cst_5 = arith.constant 0.000000e+00 : f32
    %4 = vector.broadcast %cst_5 : f32 to vector<18x1x128xf32>
    %c0_6 = arith.constant 0 : index
    %c0_7 = arith.constant 0 : index
    %c0_8 = arith.constant 0 : index
    %5 = vector.load %arg7[%c0_6, %c0_7, %c0_8] : memref<18x18x128xf32, #tpu.memory_space<vmem>>, vector<18x1x128xf32>
    tpu.vector_store %arg7[%c0_6, %c0_7, %c0_8], %4 {strides = array<i32>} : memref<18x18x128xf32, #tpu.memory_space<vmem>>, vector<18x1x128xf32>,
    %cst_9 = arith.constant 0.000000e+00 : f32
    %6 = vector.broadcast %cst_9 : f32 to vector<18x1x128xf32>
    %c0_10 = arith.constant 0 : index
    %c17_11 = arith.constant 17 : index
    %c0_12 = arith.constant 0 : index
    %7 = vector.load %arg7[%c0_10, %c17_11, %c0_12] : memref<18x18x128xf32, #tpu.memory_space<vmem>>, vector<18x1x128xf32>
    tpu.vector_store %arg7[%c0_10, %c17_11, %c0_12], %6 {strides = array<i32>} : memref<18x18x128xf32, #tpu.memory_space<vmem>>, vector<18x1x128xf32>,
    %c0_13 = arith.constant 0 : index
    %c0_14 = arith.constant 0 : index
    %c0_15 = arith.constant 0 : index
    %c0_16 = arith.constant 0 : index
    %8 = vector.load %arg1[%c0_13, %c0_14, %c0_15, %c0_16] : memref<1x16x16x128xf32, #tpu.memory_space<vmem>>, vector<1x16x16x128xf32>
    %9 = vector.shape_cast %8 : vector<1x16x16x128xf32> to vector<16x16x128xf32>
    %c0_17 = arith.constant 0 : index
    %c0_18 = arith.constant 0 : index
    %10 = vector.load %arg3[%c0_17, %c0_18] : memref<1x128xf32, #tpu.memory_space<vmem>>, vector<1x128xf32>
    %11 = vector.shape_cast %10 : vector<1x128xf32> to vector<1x1x128xf32>
    %12 = vector.broadcast %11 : vector<1x1x128xf32> to vector<16x16x128xf32>
    %13 = arith.mulf %9, %12 : vector<16x16x128xf32>
    %c0_19 = arith.constant 0 : index
    %c0_20 = arith.constant 0 : index
    %14 = vector.load %arg4[%c0_19, %c0_20] : memref<1x128xf32, #tpu.memory_space<vmem>>, vector<1x128xf32>
    %15 = vector.shape_cast %14 : vector<1x128xf32> to vector<1x1x128xf32>
    %16 = vector.broadcast %15 : vector<1x1x128xf32> to vector<16x16x128xf32>
    %17 = arith.addf %13, %16 : vector<16x16x128xf32>
    %c1 = arith.constant 1 : index
    %c1_21 = arith.constant 1 : index
    %c0_22 = arith.constant 0 : index
    %18 = vector.load %arg7[%c1, %c1_21, %c0_22] : memref<18x18x128xf32, #tpu.memory_space<vmem>>, vector<16x16x128xf32>
    tpu.vector_store %arg7[%c1, %c1_21, %c0_22], %17 {strides = array<i32>} : memref<18x18x128xf32, #tpu.memory_space<vmem>>, vector<16x16x128xf32>,
    %c0_23 = arith.constant 0 : index
    %c0_24 = arith.constant 0 : index
    %c0_25 = arith.constant 0 : index
    %19 = vector.load %arg7[%c0_23, %c0_24, %c0_25] : memref<18x18x128xf32, #tpu.memory_space<vmem>>, vector<16x16x128xf32>
    %c0_26 = arith.constant 0 : index
    %c1_27 = arith.constant 1 : index
    %c0_28 = arith.constant 0 : index
    %20 = vector.load %arg7[%c0_26, %c1_27, %c0_28] : memref<18x18x128xf32, #tpu.memory_space<vmem>>, vector<16x16x128xf32>
    %c0_29 = arith.constant 0 : index
    %c2 = arith.constant 2 : index
    %c0_30 = arith.constant 0 : index
    %21 = vector.load %arg7[%c0_29, %c2, %c0_30] : memref<18x18x128xf32, #tpu.memory_space<vmem>>, vector<16x16x128xf32>
    %c1_31 = arith.constant 1 : index
    %c0_32 = arith.constant 0 : index
    %c0_33 = arith.constant 0 : index
    %22 = vector.load %arg7[%c1_31, %c0_32, %c0_33] : memref<18x18x128xf32, #tpu.memory_space<vmem>>, vector<16x16x128xf32>
    %c1_34 = arith.constant 1 : index
    %c1_35 = arith.constant 1 : index
    %c0_36 = arith.constant 0 : index
    %23 = vector.load %arg7[%c1_34, %c1_35, %c0_36] : memref<18x18x128xf32, #tpu.memory_space<vmem>>, vector<16x16x128xf32>
    %c1_37 = arith.constant 1 : index
    %c2_38 = arith.constant 2 : index
    %c0_39 = arith.constant 0 : index
    %24 = vector.load %arg7[%c1_37, %c2_38, %c0_39] : memref<18x18x128xf32, #tpu.memory_space<vmem>>, vector<16x16x128xf32>
    %c2_40 = arith.constant 2 : index
    %c0_41 = arith.constant 0 : index
    %c0_42 = arith.constant 0 : index
    %25 = vector.load %arg7[%c2_40, %c0_41, %c0_42] : memref<18x18x128xf32, #tpu.memory_space<vmem>>, vector<16x16x128xf32>
    %c2_43 = arith.constant 2 : index
    %c1_44 = arith.constant 1 : index
    %c0_45 = arith.constant 0 : index
    %26 = vector.load %arg7[%c2_43, %c1_44, %c0_45] : memref<18x18x128xf32, #tpu.memory_space<vmem>>, vector<16x16x128xf32>
    %c2_46 = arith.constant 2 : index
    %c2_47 = arith.constant 2 : index
    %c0_48 = arith.constant 0 : index
    %27 = vector.load %arg7[%c2_46, %c2_47, %c0_48] : memref<18x18x128xf32, #tpu.memory_space<vmem>>, vector<16x16x128xf32>
    %28 = tpu.concatenate %19, %20, %21, %22, %23, %24, %25, %26, %27 in 2 : vector<16x16x128xf32>, vector<16x16x128xf32>, vector<16x16x128xf32>, vector<16x16x128xf32>, vector<16x16x128xf32>, vector<16x16x128xf32>, vector<16x16x128xf32>, vector<16x16x128xf32>, vector<16x16x128xf32> -> vector<16x16x1152xf32>
    %29 = vector.shape_cast %28 : vector<16x16x1152xf32> to vector<256x1152xf32>
    %30 = arith.truncf %29 : vector<256x1152xf32> to vector<256x1152xbf16>
    %c0_49 = arith.constant 0 : index
    %c0_50 = arith.constant 0 : index
    %31 = vector.load %arg2[%c0_49, %c0_50] : memref<1152x128xbf16, #tpu.memory_space<vmem>>, vector<1152x128xbf16>
    %cst_51 = arith.constant dense<0.000000e+00> : vector<256x128xf32>
    %32 = tpu.matmul %30, %31, %cst_51 {dimension_numbers = #tpu.dot_dimension_numbers<[1], [0], [0], [1], [0, 0, 1, 1], [], []>} : vector<256x1152xbf16>, vector<1152x128xbf16>, vector<256x128xf32> -> vector<256x128xf32>
    %33 = vector.shape_cast %32 : vector<256x128xf32> to vector<16x16x128xf32>
    %c0_52 = arith.constant 0 : index
    %c0_53 = arith.constant 0 : index
    %c0_54 = arith.constant 0 : index
    %c0_55 = arith.constant 0 : index
    %34 = vector.load %arg5[%c0_52, %c0_53, %c0_54, %c0_55] : memref<1x16x16x128xf32, #tpu.memory_space<vmem>>, vector<1x16x16x128xf32>
    %35 = vector.shape_cast %34 : vector<1x16x16x128xf32> to vector<16x16x128xf32>
    %36 = vector.shape_cast %33 : vector<16x16x128xf32> to vector<1x16x16x128xf32>
    tpu.vector_store %arg5[%c0_52, %c0_53, %c0_54, %c0_55], %36 {strides = array<i32>} : memref<1x16x16x128xf32, #tpu.memory_space<vmem>>, vector<1x16x16x128xf32>,
    %cst_56 = arith.constant dense<0.000000e+00> : vector<128xf32>
    %37 = vector.multi_reduction <add>, %32, %cst_56 [0] : vector<256x128xf32> to vector<128xf32>
    %38 = vector.shape_cast %37 : vector<128xf32> to vector<1x128xf32>
    %39 = arith.mulf %32, %32 : vector<256x128xf32>
    %cst_57 = arith.constant dense<0.000000e+00> : vector<128xf32>
    %40 = vector.multi_reduction <add>, %39, %cst_57 [0] : vector<256x128xf32> to vector<128xf32>
    %41 = vector.shape_cast %40 : vector<128xf32> to vector<1x128xf32>
    %42 = tpu.concatenate %38, %41 in 0 : vector<1x128xf32>, vector<1x128xf32> -> vector<2x128xf32>
    %c0_58 = arith.constant 0 : index
    %c0_59 = arith.constant 0 : index
    %c0_60 = arith.constant 0 : index
    %43 = vector.load %arg6[%c0_58, %c0_59, %c0_60] : memref<1x2x128xf32, #tpu.memory_space<vmem>>, vector<1x2x128xf32>
    %44 = vector.shape_cast %43 : vector<1x2x128xf32> to vector<2x128xf32>
    %45 = vector.shape_cast %42 : vector<2x128xf32> to vector<1x2x128xf32>
    tpu.vector_store %arg6[%c0_58, %c0_59, %c0_60], %45 {strides = array<i32>} : memref<1x2x128xf32, #tpu.memory_space<vmem>>, vector<1x2x128xf32>,
    return
  }
  func.func @transform_0(%arg0: i32) -> (i32, i32, i32, i32) {
    %c0_i32 = arith.constant 0 : i32
    %c0_i32_0 = arith.constant 0 : i32
    %c0_i32_1 = arith.constant 0 : i32
    %c0_i32_2 = arith.constant 0 : i32
    return %arg0, %c0_i32, %c0_i32_0, %c0_i32_1 : i32, i32, i32, i32
  }
  func.func @transform_1(%arg0: i32) -> (i32, i32) {
    %c0_i32 = arith.constant 0 : i32
    %c0_i32_0 = arith.constant 0 : i32
    %c0_i32_1 = arith.constant 0 : i32
    return %c0_i32, %c0_i32_0 : i32, i32
  }
  func.func @transform_2(%arg0: i32) -> (i32, i32) {
    %c0_i32 = arith.constant 0 : i32
    %c0_i32_0 = arith.constant 0 : i32
    %c0_i32_1 = arith.constant 0 : i32
    return %c0_i32, %c0_i32_0 : i32, i32
  }
  func.func @transform_3(%arg0: i32) -> (i32, i32) {
    %c0_i32 = arith.constant 0 : i32
    %c0_i32_0 = arith.constant 0 : i32
    %c0_i32_1 = arith.constant 0 : i32
    return %c0_i32, %c0_i32_0 : i32, i32
  }
  func.func @transform_4(%arg0: i32) -> (i32, i32, i32, i32) {
    %c0_i32 = arith.constant 0 : i32
    %c0_i32_0 = arith.constant 0 : i32
    %c0_i32_1 = arith.constant 0 : i32
    %c0_i32_2 = arith.constant 0 : i32
    return %arg0, %c0_i32, %c0_i32_0, %c0_i32_1 : i32, i32, i32, i32
  }
  func.func @transform_5(%arg0: i32) -> (i32, i32, i32) {
    %c0_i32 = arith.constant 0 : i32
    %c0_i32_0 = arith.constant 0 : i32
    %c0_i32_1 = arith.constant 0 : i32
    return %arg0, %c0_i32, %c0_i32_0 : i32, i32, i32
  }
}

module attributes {stable_mosaic.version = 11 : i64} {
  func.func @_conv_bn_stats_kernel(%arg0: i32, %arg1: memref<1x16x16x128xf32, #tpu.memory_space<vmem>>, %arg2: memref<1152x128xbf16, #tpu.memory_space<vmem>>, %arg3: memref<1x128xf32, #tpu.memory_space<vmem>>, %arg4: memref<1x128xf32, #tpu.memory_space<vmem>>, %arg5: memref<1x16x16x128xf32, #tpu.memory_space<vmem>>, %arg6: memref<1x2x128xf32, #tpu.memory_space<vmem>>, %arg7: memref<18x18x128xf32, #tpu.memory_space<vmem>>) attributes {dimension_semantics = [#tpu.dimension_semantics<parallel>], iteration_bounds = array<i64: 2>, scalar_prefetch = 0 : i64, scratch_operands = 1 : i64, tpu.core_type = #tpu.core_type<tc>, window_params = [{transform_indices = @transform_0, window_bounds = array<i64: 1, 16, 16, 128>}, {pipeline_mode = #tpu.pipeline_mode<synchronous>, transform_indices = @transform_1, window_bounds = array<i64: 1152, 128>}, {pipeline_mode = #tpu.pipeline_mode<synchronous>, transform_indices = @transform_2, window_bounds = array<i64: 1, 128>}, {pipeline_mode = #tpu.pipeline_mode<synchronous>, transform_indices = @transform_3, window_bounds = array<i64: 1, 128>}, {transform_indices = @transform_4, window_bounds = array<i64: 1, 16, 16, 128>}, {transform_indices = @transform_5, window_bounds = array<i64: 1, 2, 128>}]} {
    %cst = arith.constant 0.000000e+00 : f32
    %0 = vector.broadcast %cst : f32 to vector<1x18x128xf32>
    %c0 = arith.constant 0 : index
    %c0_0 = arith.constant 0 : index
    %c0_1 = arith.constant 0 : index
    %1 = vector.load %arg7[%c0, %c0_0, %c0_1] : memref<18x18x128xf32, #tpu.memory_space<vmem>>, vector<1x18x128xf32>
    tpu.vector_store %arg7[%c0, %c0_0, %c0_1], %0 {strides = array<i32>} : memref<18x18x128xf32, #tpu.memory_space<vmem>>, vector<1x18x128xf32>,
    %cst_2 = arith.constant 0.000000e+00 : f32
    %2 = vector.broadcast %cst_2 : f32 to vector<1x18x128xf32>
    %c17 = arith.constant 17 : index
    %c0_3 = arith.constant 0 : index
    %c0_4 = arith.constant 0 : index
    %3 = vector.load %arg7[%c17, %c0_3, %c0_4] : memref<18x18x128xf32, #tpu.memory_space<vmem>>, vector<1x18x128xf32>
    tpu.vector_store %arg7[%c17, %c0_3, %c0_4], %2 {strides = array<i32>} : memref<18x18x128xf32, #tpu.memory_space<vmem>>, vector<1x18x128xf32>,
    %cst_5 = arith.constant 0.000000e+00 : f32
    %4 = vector.broadcast %cst_5 : f32 to vector<18x1x128xf32>
    %c0_6 = arith.constant 0 : index
    %c0_7 = arith.constant 0 : index
    %c0_8 = arith.constant 0 : index
    %5 = vector.load %arg7[%c0_6, %c0_7, %c0_8] : memref<18x18x128xf32, #tpu.memory_space<vmem>>, vector<18x1x128xf32>
    tpu.vector_store %arg7[%c0_6, %c0_7, %c0_8], %4 {strides = array<i32>} : memref<18x18x128xf32, #tpu.memory_space<vmem>>, vector<18x1x128xf32>,
    %cst_9 = arith.constant 0.000000e+00 : f32
    %6 = vector.broadcast %cst_9 : f32 to vector<18x1x128xf32>
    %c0_10 = arith.constant 0 : index
    %c17_11 = arith.constant 17 : index
    %c0_12 = arith.constant 0 : index
    %7 = vector.load %arg7[%c0_10, %c17_11, %c0_12] : memref<18x18x128xf32, #tpu.memory_space<vmem>>, vector<18x1x128xf32>
    tpu.vector_store %arg7[%c0_10, %c17_11, %c0_12], %6 {strides = array<i32>} : memref<18x18x128xf32, #tpu.memory_space<vmem>>, vector<18x1x128xf32>,
    %c0_13 = arith.constant 0 : index
    %c0_14 = arith.constant 0 : index
    %c0_15 = arith.constant 0 : index
    %c0_16 = arith.constant 0 : index
    %8 = vector.load %arg1[%c0_13, %c0_14, %c0_15, %c0_16] : memref<1x16x16x128xf32, #tpu.memory_space<vmem>>, vector<1x16x16x128xf32>
    %9 = vector.shape_cast %8 : vector<1x16x16x128xf32> to vector<16x16x128xf32>
    %c0_17 = arith.constant 0 : index
    %c0_18 = arith.constant 0 : index
    %10 = vector.load %arg3[%c0_17, %c0_18] : memref<1x128xf32, #tpu.memory_space<vmem>>, vector<1x128xf32>
    %11 = vector.shape_cast %10 : vector<1x128xf32> to vector<1x1x128xf32>
    %12 = vector.broadcast %11 : vector<1x1x128xf32> to vector<16x16x128xf32>
    %13 = arith.mulf %9, %12 : vector<16x16x128xf32>
    %c0_19 = arith.constant 0 : index
    %c0_20 = arith.constant 0 : index
    %14 = vector.load %arg4[%c0_19, %c0_20] : memref<1x128xf32, #tpu.memory_space<vmem>>, vector<1x128xf32>
    %15 = vector.shape_cast %14 : vector<1x128xf32> to vector<1x1x128xf32>
    %16 = vector.broadcast %15 : vector<1x1x128xf32> to vector<16x16x128xf32>
    %17 = arith.addf %13, %16 : vector<16x16x128xf32>
    %cst_21 = arith.constant 0.000000e+00 : f32
    %18 = vector.broadcast %cst_21 : f32 to vector<16x16x128xf32>
    %19 = arith.maximumf %17, %18 : vector<16x16x128xf32>
    %c1 = arith.constant 1 : index
    %c1_22 = arith.constant 1 : index
    %c0_23 = arith.constant 0 : index
    %20 = vector.load %arg7[%c1, %c1_22, %c0_23] : memref<18x18x128xf32, #tpu.memory_space<vmem>>, vector<16x16x128xf32>
    tpu.vector_store %arg7[%c1, %c1_22, %c0_23], %19 {strides = array<i32>} : memref<18x18x128xf32, #tpu.memory_space<vmem>>, vector<16x16x128xf32>,
    %c0_24 = arith.constant 0 : index
    %c0_25 = arith.constant 0 : index
    %c0_26 = arith.constant 0 : index
    %21 = vector.load %arg7[%c0_24, %c0_25, %c0_26] : memref<18x18x128xf32, #tpu.memory_space<vmem>>, vector<16x16x128xf32>
    %c0_27 = arith.constant 0 : index
    %c1_28 = arith.constant 1 : index
    %c0_29 = arith.constant 0 : index
    %22 = vector.load %arg7[%c0_27, %c1_28, %c0_29] : memref<18x18x128xf32, #tpu.memory_space<vmem>>, vector<16x16x128xf32>
    %c0_30 = arith.constant 0 : index
    %c2 = arith.constant 2 : index
    %c0_31 = arith.constant 0 : index
    %23 = vector.load %arg7[%c0_30, %c2, %c0_31] : memref<18x18x128xf32, #tpu.memory_space<vmem>>, vector<16x16x128xf32>
    %c1_32 = arith.constant 1 : index
    %c0_33 = arith.constant 0 : index
    %c0_34 = arith.constant 0 : index
    %24 = vector.load %arg7[%c1_32, %c0_33, %c0_34] : memref<18x18x128xf32, #tpu.memory_space<vmem>>, vector<16x16x128xf32>
    %c1_35 = arith.constant 1 : index
    %c1_36 = arith.constant 1 : index
    %c0_37 = arith.constant 0 : index
    %25 = vector.load %arg7[%c1_35, %c1_36, %c0_37] : memref<18x18x128xf32, #tpu.memory_space<vmem>>, vector<16x16x128xf32>
    %c1_38 = arith.constant 1 : index
    %c2_39 = arith.constant 2 : index
    %c0_40 = arith.constant 0 : index
    %26 = vector.load %arg7[%c1_38, %c2_39, %c0_40] : memref<18x18x128xf32, #tpu.memory_space<vmem>>, vector<16x16x128xf32>
    %c2_41 = arith.constant 2 : index
    %c0_42 = arith.constant 0 : index
    %c0_43 = arith.constant 0 : index
    %27 = vector.load %arg7[%c2_41, %c0_42, %c0_43] : memref<18x18x128xf32, #tpu.memory_space<vmem>>, vector<16x16x128xf32>
    %c2_44 = arith.constant 2 : index
    %c1_45 = arith.constant 1 : index
    %c0_46 = arith.constant 0 : index
    %28 = vector.load %arg7[%c2_44, %c1_45, %c0_46] : memref<18x18x128xf32, #tpu.memory_space<vmem>>, vector<16x16x128xf32>
    %c2_47 = arith.constant 2 : index
    %c2_48 = arith.constant 2 : index
    %c0_49 = arith.constant 0 : index
    %29 = vector.load %arg7[%c2_47, %c2_48, %c0_49] : memref<18x18x128xf32, #tpu.memory_space<vmem>>, vector<16x16x128xf32>
    %30 = tpu.concatenate %21, %22, %23, %24, %25, %26, %27, %28, %29 in 2 : vector<16x16x128xf32>, vector<16x16x128xf32>, vector<16x16x128xf32>, vector<16x16x128xf32>, vector<16x16x128xf32>, vector<16x16x128xf32>, vector<16x16x128xf32>, vector<16x16x128xf32>, vector<16x16x128xf32> -> vector<16x16x1152xf32>
    %31 = vector.shape_cast %30 : vector<16x16x1152xf32> to vector<256x1152xf32>
    %32 = arith.truncf %31 : vector<256x1152xf32> to vector<256x1152xbf16>
    %c0_50 = arith.constant 0 : index
    %c0_51 = arith.constant 0 : index
    %33 = vector.load %arg2[%c0_50, %c0_51] : memref<1152x128xbf16, #tpu.memory_space<vmem>>, vector<1152x128xbf16>
    %cst_52 = arith.constant dense<0.000000e+00> : vector<256x128xf32>
    %34 = tpu.matmul %32, %33, %cst_52 {dimension_numbers = #tpu.dot_dimension_numbers<[1], [0], [0], [1], [0, 0, 1, 1], [], []>} : vector<256x1152xbf16>, vector<1152x128xbf16>, vector<256x128xf32> -> vector<256x128xf32>
    %35 = vector.shape_cast %34 : vector<256x128xf32> to vector<16x16x128xf32>
    %c0_53 = arith.constant 0 : index
    %c0_54 = arith.constant 0 : index
    %c0_55 = arith.constant 0 : index
    %c0_56 = arith.constant 0 : index
    %36 = vector.load %arg5[%c0_53, %c0_54, %c0_55, %c0_56] : memref<1x16x16x128xf32, #tpu.memory_space<vmem>>, vector<1x16x16x128xf32>
    %37 = vector.shape_cast %36 : vector<1x16x16x128xf32> to vector<16x16x128xf32>
    %38 = vector.shape_cast %35 : vector<16x16x128xf32> to vector<1x16x16x128xf32>
    tpu.vector_store %arg5[%c0_53, %c0_54, %c0_55, %c0_56], %38 {strides = array<i32>} : memref<1x16x16x128xf32, #tpu.memory_space<vmem>>, vector<1x16x16x128xf32>,
    %cst_57 = arith.constant dense<0.000000e+00> : vector<128xf32>
    %39 = vector.multi_reduction <add>, %34, %cst_57 [0] : vector<256x128xf32> to vector<128xf32>
    %40 = vector.shape_cast %39 : vector<128xf32> to vector<1x128xf32>
    %41 = arith.mulf %34, %34 : vector<256x128xf32>
    %cst_58 = arith.constant dense<0.000000e+00> : vector<128xf32>
    %42 = vector.multi_reduction <add>, %41, %cst_58 [0] : vector<256x128xf32> to vector<128xf32>
    %43 = vector.shape_cast %42 : vector<128xf32> to vector<1x128xf32>
    %44 = tpu.concatenate %40, %43 in 0 : vector<1x128xf32>, vector<1x128xf32> -> vector<2x128xf32>
    %c0_59 = arith.constant 0 : index
    %c0_60 = arith.constant 0 : index
    %c0_61 = arith.constant 0 : index
    %45 = vector.load %arg6[%c0_59, %c0_60, %c0_61] : memref<1x2x128xf32, #tpu.memory_space<vmem>>, vector<1x2x128xf32>
    %46 = vector.shape_cast %45 : vector<1x2x128xf32> to vector<2x128xf32>
    %47 = vector.shape_cast %44 : vector<2x128xf32> to vector<1x2x128xf32>
    tpu.vector_store %arg6[%c0_59, %c0_60, %c0_61], %47 {strides = array<i32>} : memref<1x2x128xf32, #tpu.memory_space<vmem>>, vector<1x2x128xf32>,
    return
  }
  func.func @transform_0(%arg0: i32) -> (i32, i32, i32, i32) {
    %c0_i32 = arith.constant 0 : i32
    %c0_i32_0 = arith.constant 0 : i32
    %c0_i32_1 = arith.constant 0 : i32
    %c0_i32_2 = arith.constant 0 : i32
    return %arg0, %c0_i32, %c0_i32_0, %c0_i32_1 : i32, i32, i32, i32
  }
  func.func @transform_1(%arg0: i32) -> (i32, i32) {
    %c0_i32 = arith.constant 0 : i32
    %c0_i32_0 = arith.constant 0 : i32
    %c0_i32_1 = arith.constant 0 : i32
    return %c0_i32, %c0_i32_0 : i32, i32
  }
  func.func @transform_2(%arg0: i32) -> (i32, i32) {
    %c0_i32 = arith.constant 0 : i32
    %c0_i32_0 = arith.constant 0 : i32
    %c0_i32_1 = arith.constant 0 : i32
    return %c0_i32, %c0_i32_0 : i32, i32
  }
  func.func @transform_3(%arg0: i32) -> (i32, i32) {
    %c0_i32 = arith.constant 0 : i32
    %c0_i32_0 = arith.constant 0 : i32
    %c0_i32_1 = arith.constant 0 : i32
    return %c0_i32, %c0_i32_0 : i32, i32
  }
  func.func @transform_4(%arg0: i32) -> (i32, i32, i32, i32) {
    %c0_i32 = arith.constant 0 : i32
    %c0_i32_0 = arith.constant 0 : i32
    %c0_i32_1 = arith.constant 0 : i32
    %c0_i32_2 = arith.constant 0 : i32
    return %arg0, %c0_i32, %c0_i32_0, %c0_i32_1 : i32, i32, i32, i32
  }
  func.func @transform_5(%arg0: i32) -> (i32, i32, i32) {
    %c0_i32 = arith.constant 0 : i32
    %c0_i32_0 = arith.constant 0 : i32
    %c0_i32_1 = arith.constant 0 : i32
    return %arg0, %c0_i32, %c0_i32_0 : i32, i32, i32
  }
}

module attributes {stable_mosaic.version = 11 : i64} {
  func.func @_residual_out_kernel(%arg0: i32, %arg1: memref<1x16x16x128xf32, #tpu.memory_space<vmem>>, %arg2: memref<1x16x16x128xf32, #tpu.memory_space<vmem>>, %arg3: memref<1x128xf32, #tpu.memory_space<vmem>>, %arg4: memref<1x128xf32, #tpu.memory_space<vmem>>, %arg5: memref<1x16x16x128xf32, #tpu.memory_space<vmem>>) attributes {dimension_semantics = [#tpu.dimension_semantics<parallel>], iteration_bounds = array<i64: 2>, scalar_prefetch = 0 : i64, scratch_operands = 0 : i64, tpu.core_type = #tpu.core_type<tc>, window_params = [{transform_indices = @transform_0, window_bounds = array<i64: 1, 16, 16, 128>}, {transform_indices = @transform_1, window_bounds = array<i64: 1, 16, 16, 128>}, {pipeline_mode = #tpu.pipeline_mode<synchronous>, transform_indices = @transform_2, window_bounds = array<i64: 1, 128>}, {pipeline_mode = #tpu.pipeline_mode<synchronous>, transform_indices = @transform_3, window_bounds = array<i64: 1, 128>}, {transform_indices = @transform_4, window_bounds = array<i64: 1, 16, 16, 128>}]} {
    %c0 = arith.constant 0 : index
    %c0_0 = arith.constant 0 : index
    %c0_1 = arith.constant 0 : index
    %c0_2 = arith.constant 0 : index
    %0 = vector.load %arg1[%c0, %c0_0, %c0_1, %c0_2] : memref<1x16x16x128xf32, #tpu.memory_space<vmem>>, vector<1x16x16x128xf32>
    %1 = vector.shape_cast %0 : vector<1x16x16x128xf32> to vector<16x16x128xf32>
    %c0_3 = arith.constant 0 : index
    %c0_4 = arith.constant 0 : index
    %2 = vector.load %arg3[%c0_3, %c0_4] : memref<1x128xf32, #tpu.memory_space<vmem>>, vector<1x128xf32>
    %3 = vector.shape_cast %2 : vector<1x128xf32> to vector<1x1x128xf32>
    %4 = vector.broadcast %3 : vector<1x1x128xf32> to vector<16x16x128xf32>
    %5 = arith.mulf %1, %4 : vector<16x16x128xf32>
    %c0_5 = arith.constant 0 : index
    %c0_6 = arith.constant 0 : index
    %6 = vector.load %arg4[%c0_5, %c0_6] : memref<1x128xf32, #tpu.memory_space<vmem>>, vector<1x128xf32>
    %7 = vector.shape_cast %6 : vector<1x128xf32> to vector<1x1x128xf32>
    %8 = vector.broadcast %7 : vector<1x1x128xf32> to vector<16x16x128xf32>
    %9 = arith.addf %5, %8 : vector<16x16x128xf32>
    %c0_7 = arith.constant 0 : index
    %c0_8 = arith.constant 0 : index
    %c0_9 = arith.constant 0 : index
    %c0_10 = arith.constant 0 : index
    %10 = vector.load %arg2[%c0_7, %c0_8, %c0_9, %c0_10] : memref<1x16x16x128xf32, #tpu.memory_space<vmem>>, vector<1x16x16x128xf32>
    %11 = vector.shape_cast %10 : vector<1x16x16x128xf32> to vector<16x16x128xf32>
    %12 = arith.addf %9, %11 : vector<16x16x128xf32>
    %cst = arith.constant 0.000000e+00 : f32
    %13 = vector.broadcast %cst : f32 to vector<16x16x128xf32>
    %14 = arith.maximumf %12, %13 : vector<16x16x128xf32>
    %c0_11 = arith.constant 0 : index
    %c0_12 = arith.constant 0 : index
    %c0_13 = arith.constant 0 : index
    %c0_14 = arith.constant 0 : index
    %15 = vector.load %arg5[%c0_11, %c0_12, %c0_13, %c0_14] : memref<1x16x16x128xf32, #tpu.memory_space<vmem>>, vector<1x16x16x128xf32>
    %16 = vector.shape_cast %15 : vector<1x16x16x128xf32> to vector<16x16x128xf32>
    %17 = vector.shape_cast %14 : vector<16x16x128xf32> to vector<1x16x16x128xf32>
    tpu.vector_store %arg5[%c0_11, %c0_12, %c0_13, %c0_14], %17 {strides = array<i32>} : memref<1x16x16x128xf32, #tpu.memory_space<vmem>>, vector<1x16x16x128xf32>,
    return
  }
  func.func @transform_0(%arg0: i32) -> (i32, i32, i32, i32) {
    %c0_i32 = arith.constant 0 : i32
    %c0_i32_0 = arith.constant 0 : i32
    %c0_i32_1 = arith.constant 0 : i32
    %c0_i32_2 = arith.constant 0 : i32
    return %arg0, %c0_i32, %c0_i32_0, %c0_i32_1 : i32, i32, i32, i32
  }
  func.func @transform_1(%arg0: i32) -> (i32, i32, i32, i32) {
    %c0_i32 = arith.constant 0 : i32
    %c0_i32_0 = arith.constant 0 : i32
    %c0_i32_1 = arith.constant 0 : i32
    %c0_i32_2 = arith.constant 0 : i32
    return %arg0, %c0_i32, %c0_i32_0, %c0_i32_1 : i32, i32, i32, i32
  }
  func.func @transform_2(%arg0: i32) -> (i32, i32) {
    %c0_i32 = arith.constant 0 : i32
    %c0_i32_0 = arith.constant 0 : i32
    %c0_i32_1 = arith.constant 0 : i32
    return %c0_i32, %c0_i32_0 : i32, i32
  }
  func.func @transform_3(%arg0: i32) -> (i32, i32) {
    %c0_i32 = arith.constant 0 : i32
    %c0_i32_0 = arith.constant 0 : i32
    %c0_i32_1 = arith.constant 0 : i32
    return %c0_i32, %c0_i32_0 : i32, i32
  }
  func.func @transform_4(%arg0: i32) -> (i32, i32, i32, i32) {
    %c0_i32 = arith.constant 0 : i32
    %c0_i32_0 = arith.constant 0 : i32
    %c0_i32_1 = arith.constant 0 : i32
    %c0_i32_2 = arith.constant 0 : i32
    return %arg0, %c0_i32, %c0_i32_0, %c0_i32_1 : i32, i32, i32, i32
  }
}

module attributes {stable_mosaic.version = 11 : i64} {
  func.func @_pool_linear_kernel(%arg0: i32, %arg1: memref<1x16x16x128xf32, #tpu.memory_space<vmem>>, %arg2: memref<16x128x128xf32, #tpu.memory_space<vmem>>, %arg3: memref<1x1x128xf32, #tpu.memory_space<vmem>>) attributes {dimension_semantics = [#tpu.dimension_semantics<parallel>], iteration_bounds = array<i64: 2>, scalar_prefetch = 0 : i64, scratch_operands = 0 : i64, tpu.core_type = #tpu.core_type<tc>, window_params = [{transform_indices = @transform_0, window_bounds = array<i64: 1, 16, 16, 128>}, {pipeline_mode = #tpu.pipeline_mode<synchronous>, transform_indices = @transform_1, window_bounds = array<i64: 16, 128, 128>}, {transform_indices = @transform_2, window_bounds = array<i64: 1, 1, 128>}]} {
    %cst = arith.constant 0.000000e+00 : f32
    %0 = vector.broadcast %cst : f32 to vector<1x128xf32>
    %c0 = arith.constant 0 : index
    %c0_0 = arith.constant 0 : index
    %c0_1 = arith.constant 0 : index
    %c0_2 = arith.constant 0 : index
    %1 = vector.load %arg1[%c0, %c0_0, %c0_1, %c0_2] : memref<1x16x16x128xf32, #tpu.memory_space<vmem>>, vector<1x4x4x128xf32>
    %2 = vector.shape_cast %1 : vector<1x4x4x128xf32> to vector<4x4x128xf32>
    %cst_3 = arith.constant dense<0.000000e+00> : vector<128xf32>
    %3 = vector.multi_reduction <add>, %2, %cst_3 [0, 1] : vector<4x4x128xf32> to vector<128xf32>
    %4 = vector.shape_cast %3 : vector<128xf32> to vector<1x1x128xf32>
    %cst_4 = arith.constant 6.250000e-02 : f32
    %5 = vector.broadcast %cst_4 : f32 to vector<1x1x128xf32>
    %6 = arith.mulf %4, %5 : vector<1x1x128xf32>
    %7 = vector.shape_cast %6 : vector<1x1x128xf32> to vector<1x128xf32>
    %c0_5 = arith.constant 0 : index
    %c0_6 = arith.constant 0 : index
    %c0_7 = arith.constant 0 : index
    %8 = vector.load %arg2[%c0_5, %c0_6, %c0_7] : memref<16x128x128xf32, #tpu.memory_space<vmem>>, vector<1x128x128xf32>
    %9 = vector.shape_cast %8 : vector<1x128x128xf32> to vector<128x128xf32>
    %cst_8 = arith.constant dense<0.000000e+00> : vector<1x128xf32>
    %10 = tpu.matmul %7, %9, %cst_8 {dimension_numbers = #tpu.dot_dimension_numbers<[1], [0], [0], [1], [0, 0, 1, 1], [], []>} : vector<1x128xf32>, vector<128x128xf32>, vector<1x128xf32> -> vector<1x128xf32>
    %11 = arith.addf %0, %10 : vector<1x128xf32>
    %c0_9 = arith.constant 0 : index
    %c0_10 = arith.constant 0 : index
    %c4 = arith.constant 4 : index
    %c0_11 = arith.constant 0 : index
    %12 = vector.load %arg1[%c0_9, %c0_10, %c4, %c0_11] : memref<1x16x16x128xf32, #tpu.memory_space<vmem>>, vector<1x4x4x128xf32>
    %13 = vector.shape_cast %12 : vector<1x4x4x128xf32> to vector<4x4x128xf32>
    %cst_12 = arith.constant dense<0.000000e+00> : vector<128xf32>
    %14 = vector.multi_reduction <add>, %13, %cst_12 [0, 1] : vector<4x4x128xf32> to vector<128xf32>
    %15 = vector.shape_cast %14 : vector<128xf32> to vector<1x1x128xf32>
    %cst_13 = arith.constant 6.250000e-02 : f32
    %16 = vector.broadcast %cst_13 : f32 to vector<1x1x128xf32>
    %17 = arith.mulf %15, %16 : vector<1x1x128xf32>
    %18 = vector.shape_cast %17 : vector<1x1x128xf32> to vector<1x128xf32>
    %c1 = arith.constant 1 : index
    %c0_14 = arith.constant 0 : index
    %c0_15 = arith.constant 0 : index
    %19 = vector.load %arg2[%c1, %c0_14, %c0_15] : memref<16x128x128xf32, #tpu.memory_space<vmem>>, vector<1x128x128xf32>
    %20 = vector.shape_cast %19 : vector<1x128x128xf32> to vector<128x128xf32>
    %cst_16 = arith.constant dense<0.000000e+00> : vector<1x128xf32>
    %21 = tpu.matmul %18, %20, %cst_16 {dimension_numbers = #tpu.dot_dimension_numbers<[1], [0], [0], [1], [0, 0, 1, 1], [], []>} : vector<1x128xf32>, vector<128x128xf32>, vector<1x128xf32> -> vector<1x128xf32>
    %22 = arith.addf %11, %21 : vector<1x128xf32>
    %c0_17 = arith.constant 0 : index
    %c0_18 = arith.constant 0 : index
    %c8 = arith.constant 8 : index
    %c0_19 = arith.constant 0 : index
    %23 = vector.load %arg1[%c0_17, %c0_18, %c8, %c0_19] : memref<1x16x16x128xf32, #tpu.memory_space<vmem>>, vector<1x4x4x128xf32>
    %24 = vector.shape_cast %23 : vector<1x4x4x128xf32> to vector<4x4x128xf32>
    %cst_20 = arith.constant dense<0.000000e+00> : vector<128xf32>
    %25 = vector.multi_reduction <add>, %24, %cst_20 [0, 1] : vector<4x4x128xf32> to vector<128xf32>
    %26 = vector.shape_cast %25 : vector<128xf32> to vector<1x1x128xf32>
    %cst_21 = arith.constant 6.250000e-02 : f32
    %27 = vector.broadcast %cst_21 : f32 to vector<1x1x128xf32>
    %28 = arith.mulf %26, %27 : vector<1x1x128xf32>
    %29 = vector.shape_cast %28 : vector<1x1x128xf32> to vector<1x128xf32>
    %c2 = arith.constant 2 : index
    %c0_22 = arith.constant 0 : index
    %c0_23 = arith.constant 0 : index
    %30 = vector.load %arg2[%c2, %c0_22, %c0_23] : memref<16x128x128xf32, #tpu.memory_space<vmem>>, vector<1x128x128xf32>
    %31 = vector.shape_cast %30 : vector<1x128x128xf32> to vector<128x128xf32>
    %cst_24 = arith.constant dense<0.000000e+00> : vector<1x128xf32>
    %32 = tpu.matmul %29, %31, %cst_24 {dimension_numbers = #tpu.dot_dimension_numbers<[1], [0], [0], [1], [0, 0, 1, 1], [], []>} : vector<1x128xf32>, vector<128x128xf32>, vector<1x128xf32> -> vector<1x128xf32>
    %33 = arith.addf %22, %32 : vector<1x128xf32>
    %c0_25 = arith.constant 0 : index
    %c0_26 = arith.constant 0 : index
    %c12 = arith.constant 12 : index
    %c0_27 = arith.constant 0 : index
    %34 = vector.load %arg1[%c0_25, %c0_26, %c12, %c0_27] : memref<1x16x16x128xf32, #tpu.memory_space<vmem>>, vector<1x4x4x128xf32>
    %35 = vector.shape_cast %34 : vector<1x4x4x128xf32> to vector<4x4x128xf32>
    %cst_28 = arith.constant dense<0.000000e+00> : vector<128xf32>
    %36 = vector.multi_reduction <add>, %35, %cst_28 [0, 1] : vector<4x4x128xf32> to vector<128xf32>
    %37 = vector.shape_cast %36 : vector<128xf32> to vector<1x1x128xf32>
    %cst_29 = arith.constant 6.250000e-02 : f32
    %38 = vector.broadcast %cst_29 : f32 to vector<1x1x128xf32>
    %39 = arith.mulf %37, %38 : vector<1x1x128xf32>
    %40 = vector.shape_cast %39 : vector<1x1x128xf32> to vector<1x128xf32>
    %c3 = arith.constant 3 : index
    %c0_30 = arith.constant 0 : index
    %c0_31 = arith.constant 0 : index
    %41 = vector.load %arg2[%c3, %c0_30, %c0_31] : memref<16x128x128xf32, #tpu.memory_space<vmem>>, vector<1x128x128xf32>
    %42 = vector.shape_cast %41 : vector<1x128x128xf32> to vector<128x128xf32>
    %cst_32 = arith.constant dense<0.000000e+00> : vector<1x128xf32>
    %43 = tpu.matmul %40, %42, %cst_32 {dimension_numbers = #tpu.dot_dimension_numbers<[1], [0], [0], [1], [0, 0, 1, 1], [], []>} : vector<1x128xf32>, vector<128x128xf32>, vector<1x128xf32> -> vector<1x128xf32>
    %44 = arith.addf %33, %43 : vector<1x128xf32>
    %c0_33 = arith.constant 0 : index
    %c4_34 = arith.constant 4 : index
    %c0_35 = arith.constant 0 : index
    %c0_36 = arith.constant 0 : index
    %45 = vector.load %arg1[%c0_33, %c4_34, %c0_35, %c0_36] : memref<1x16x16x128xf32, #tpu.memory_space<vmem>>, vector<1x4x4x128xf32>
    %46 = vector.shape_cast %45 : vector<1x4x4x128xf32> to vector<4x4x128xf32>
    %cst_37 = arith.constant dense<0.000000e+00> : vector<128xf32>
    %47 = vector.multi_reduction <add>, %46, %cst_37 [0, 1] : vector<4x4x128xf32> to vector<128xf32>
    %48 = vector.shape_cast %47 : vector<128xf32> to vector<1x1x128xf32>
    %cst_38 = arith.constant 6.250000e-02 : f32
    %49 = vector.broadcast %cst_38 : f32 to vector<1x1x128xf32>
    %50 = arith.mulf %48, %49 : vector<1x1x128xf32>
    %51 = vector.shape_cast %50 : vector<1x1x128xf32> to vector<1x128xf32>
    %c4_39 = arith.constant 4 : index
    %c0_40 = arith.constant 0 : index
    %c0_41 = arith.constant 0 : index
    %52 = vector.load %arg2[%c4_39, %c0_40, %c0_41] : memref<16x128x128xf32, #tpu.memory_space<vmem>>, vector<1x128x128xf32>
    %53 = vector.shape_cast %52 : vector<1x128x128xf32> to vector<128x128xf32>
    %cst_42 = arith.constant dense<0.000000e+00> : vector<1x128xf32>
    %54 = tpu.matmul %51, %53, %cst_42 {dimension_numbers = #tpu.dot_dimension_numbers<[1], [0], [0], [1], [0, 0, 1, 1], [], []>} : vector<1x128xf32>, vector<128x128xf32>, vector<1x128xf32> -> vector<1x128xf32>
    %55 = arith.addf %44, %54 : vector<1x128xf32>
    %c0_43 = arith.constant 0 : index
    %c4_44 = arith.constant 4 : index
    %c4_45 = arith.constant 4 : index
    %c0_46 = arith.constant 0 : index
    %56 = vector.load %arg1[%c0_43, %c4_44, %c4_45, %c0_46] : memref<1x16x16x128xf32, #tpu.memory_space<vmem>>, vector<1x4x4x128xf32>
    %57 = vector.shape_cast %56 : vector<1x4x4x128xf32> to vector<4x4x128xf32>
    %cst_47 = arith.constant dense<0.000000e+00> : vector<128xf32>
    %58 = vector.multi_reduction <add>, %57, %cst_47 [0, 1] : vector<4x4x128xf32> to vector<128xf32>
    %59 = vector.shape_cast %58 : vector<128xf32> to vector<1x1x128xf32>
    %cst_48 = arith.constant 6.250000e-02 : f32
    %60 = vector.broadcast %cst_48 : f32 to vector<1x1x128xf32>
    %61 = arith.mulf %59, %60 : vector<1x1x128xf32>
    %62 = vector.shape_cast %61 : vector<1x1x128xf32> to vector<1x128xf32>
    %c5 = arith.constant 5 : index
    %c0_49 = arith.constant 0 : index
    %c0_50 = arith.constant 0 : index
    %63 = vector.load %arg2[%c5, %c0_49, %c0_50] : memref<16x128x128xf32, #tpu.memory_space<vmem>>, vector<1x128x128xf32>
    %64 = vector.shape_cast %63 : vector<1x128x128xf32> to vector<128x128xf32>
    %cst_51 = arith.constant dense<0.000000e+00> : vector<1x128xf32>
    %65 = tpu.matmul %62, %64, %cst_51 {dimension_numbers = #tpu.dot_dimension_numbers<[1], [0], [0], [1], [0, 0, 1, 1], [], []>} : vector<1x128xf32>, vector<128x128xf32>, vector<1x128xf32> -> vector<1x128xf32>
    %66 = arith.addf %55, %65 : vector<1x128xf32>
    %c0_52 = arith.constant 0 : index
    %c4_53 = arith.constant 4 : index
    %c8_54 = arith.constant 8 : index
    %c0_55 = arith.constant 0 : index
    %67 = vector.load %arg1[%c0_52, %c4_53, %c8_54, %c0_55] : memref<1x16x16x128xf32, #tpu.memory_space<vmem>>, vector<1x4x4x128xf32>
    %68 = vector.shape_cast %67 : vector<1x4x4x128xf32> to vector<4x4x128xf32>
    %cst_56 = arith.constant dense<0.000000e+00> : vector<128xf32>
    %69 = vector.multi_reduction <add>, %68, %cst_56 [0, 1] : vector<4x4x128xf32> to vector<128xf32>
    %70 = vector.shape_cast %69 : vector<128xf32> to vector<1x1x128xf32>
    %cst_57 = arith.constant 6.250000e-02 : f32
    %71 = vector.broadcast %cst_57 : f32 to vector<1x1x128xf32>
    %72 = arith.mulf %70, %71 : vector<1x1x128xf32>
    %73 = vector.shape_cast %72 : vector<1x1x128xf32> to vector<1x128xf32>
    %c6 = arith.constant 6 : index
    %c0_58 = arith.constant 0 : index
    %c0_59 = arith.constant 0 : index
    %74 = vector.load %arg2[%c6, %c0_58, %c0_59] : memref<16x128x128xf32, #tpu.memory_space<vmem>>, vector<1x128x128xf32>
    %75 = vector.shape_cast %74 : vector<1x128x128xf32> to vector<128x128xf32>
    %cst_60 = arith.constant dense<0.000000e+00> : vector<1x128xf32>
    %76 = tpu.matmul %73, %75, %cst_60 {dimension_numbers = #tpu.dot_dimension_numbers<[1], [0], [0], [1], [0, 0, 1, 1], [], []>} : vector<1x128xf32>, vector<128x128xf32>, vector<1x128xf32> -> vector<1x128xf32>
    %77 = arith.addf %66, %76 : vector<1x128xf32>
    %c0_61 = arith.constant 0 : index
    %c4_62 = arith.constant 4 : index
    %c12_63 = arith.constant 12 : index
    %c0_64 = arith.constant 0 : index
    %78 = vector.load %arg1[%c0_61, %c4_62, %c12_63, %c0_64] : memref<1x16x16x128xf32, #tpu.memory_space<vmem>>, vector<1x4x4x128xf32>
    %79 = vector.shape_cast %78 : vector<1x4x4x128xf32> to vector<4x4x128xf32>
    %cst_65 = arith.constant dense<0.000000e+00> : vector<128xf32>
    %80 = vector.multi_reduction <add>, %79, %cst_65 [0, 1] : vector<4x4x128xf32> to vector<128xf32>
    %81 = vector.shape_cast %80 : vector<128xf32> to vector<1x1x128xf32>
    %cst_66 = arith.constant 6.250000e-02 : f32
    %82 = vector.broadcast %cst_66 : f32 to vector<1x1x128xf32>
    %83 = arith.mulf %81, %82 : vector<1x1x128xf32>
    %84 = vector.shape_cast %83 : vector<1x1x128xf32> to vector<1x128xf32>
    %c7 = arith.constant 7 : index
    %c0_67 = arith.constant 0 : index
    %c0_68 = arith.constant 0 : index
    %85 = vector.load %arg2[%c7, %c0_67, %c0_68] : memref<16x128x128xf32, #tpu.memory_space<vmem>>, vector<1x128x128xf32>
    %86 = vector.shape_cast %85 : vector<1x128x128xf32> to vector<128x128xf32>
    %cst_69 = arith.constant dense<0.000000e+00> : vector<1x128xf32>
    %87 = tpu.matmul %84, %86, %cst_69 {dimension_numbers = #tpu.dot_dimension_numbers<[1], [0], [0], [1], [0, 0, 1, 1], [], []>} : vector<1x128xf32>, vector<128x128xf32>, vector<1x128xf32> -> vector<1x128xf32>
    %88 = arith.addf %77, %87 : vector<1x128xf32>
    %c0_70 = arith.constant 0 : index
    %c8_71 = arith.constant 8 : index
    %c0_72 = arith.constant 0 : index
    %c0_73 = arith.constant 0 : index
    %89 = vector.load %arg1[%c0_70, %c8_71, %c0_72, %c0_73] : memref<1x16x16x128xf32, #tpu.memory_space<vmem>>, vector<1x4x4x128xf32>
    %90 = vector.shape_cast %89 : vector<1x4x4x128xf32> to vector<4x4x128xf32>
    %cst_74 = arith.constant dense<0.000000e+00> : vector<128xf32>
    %91 = vector.multi_reduction <add>, %90, %cst_74 [0, 1] : vector<4x4x128xf32> to vector<128xf32>
    %92 = vector.shape_cast %91 : vector<128xf32> to vector<1x1x128xf32>
    %cst_75 = arith.constant 6.250000e-02 : f32
    %93 = vector.broadcast %cst_75 : f32 to vector<1x1x128xf32>
    %94 = arith.mulf %92, %93 : vector<1x1x128xf32>
    %95 = vector.shape_cast %94 : vector<1x1x128xf32> to vector<1x128xf32>
    %c8_76 = arith.constant 8 : index
    %c0_77 = arith.constant 0 : index
    %c0_78 = arith.constant 0 : index
    %96 = vector.load %arg2[%c8_76, %c0_77, %c0_78] : memref<16x128x128xf32, #tpu.memory_space<vmem>>, vector<1x128x128xf32>
    %97 = vector.shape_cast %96 : vector<1x128x128xf32> to vector<128x128xf32>
    %cst_79 = arith.constant dense<0.000000e+00> : vector<1x128xf32>
    %98 = tpu.matmul %95, %97, %cst_79 {dimension_numbers = #tpu.dot_dimension_numbers<[1], [0], [0], [1], [0, 0, 1, 1], [], []>} : vector<1x128xf32>, vector<128x128xf32>, vector<1x128xf32> -> vector<1x128xf32>
    %99 = arith.addf %88, %98 : vector<1x128xf32>
    %c0_80 = arith.constant 0 : index
    %c8_81 = arith.constant 8 : index
    %c4_82 = arith.constant 4 : index
    %c0_83 = arith.constant 0 : index
    %100 = vector.load %arg1[%c0_80, %c8_81, %c4_82, %c0_83] : memref<1x16x16x128xf32, #tpu.memory_space<vmem>>, vector<1x4x4x128xf32>
    %101 = vector.shape_cast %100 : vector<1x4x4x128xf32> to vector<4x4x128xf32>
    %cst_84 = arith.constant dense<0.000000e+00> : vector<128xf32>
    %102 = vector.multi_reduction <add>, %101, %cst_84 [0, 1] : vector<4x4x128xf32> to vector<128xf32>
    %103 = vector.shape_cast %102 : vector<128xf32> to vector<1x1x128xf32>
    %cst_85 = arith.constant 6.250000e-02 : f32
    %104 = vector.broadcast %cst_85 : f32 to vector<1x1x128xf32>
    %105 = arith.mulf %103, %104 : vector<1x1x128xf32>
    %106 = vector.shape_cast %105 : vector<1x1x128xf32> to vector<1x128xf32>
    %c9 = arith.constant 9 : index
    %c0_86 = arith.constant 0 : index
    %c0_87 = arith.constant 0 : index
    %107 = vector.load %arg2[%c9, %c0_86, %c0_87] : memref<16x128x128xf32, #tpu.memory_space<vmem>>, vector<1x128x128xf32>
    %108 = vector.shape_cast %107 : vector<1x128x128xf32> to vector<128x128xf32>
    %cst_88 = arith.constant dense<0.000000e+00> : vector<1x128xf32>
    %109 = tpu.matmul %106, %108, %cst_88 {dimension_numbers = #tpu.dot_dimension_numbers<[1], [0], [0], [1], [0, 0, 1, 1], [], []>} : vector<1x128xf32>, vector<128x128xf32>, vector<1x128xf32> -> vector<1x128xf32>
    %110 = arith.addf %99, %109 : vector<1x128xf32>
    %c0_89 = arith.constant 0 : index
    %c8_90 = arith.constant 8 : index
    %c8_91 = arith.constant 8 : index
    %c0_92 = arith.constant 0 : index
    %111 = vector.load %arg1[%c0_89, %c8_90, %c8_91, %c0_92] : memref<1x16x16x128xf32, #tpu.memory_space<vmem>>, vector<1x4x4x128xf32>
    %112 = vector.shape_cast %111 : vector<1x4x4x128xf32> to vector<4x4x128xf32>
    %cst_93 = arith.constant dense<0.000000e+00> : vector<128xf32>
    %113 = vector.multi_reduction <add>, %112, %cst_93 [0, 1] : vector<4x4x128xf32> to vector<128xf32>
    %114 = vector.shape_cast %113 : vector<128xf32> to vector<1x1x128xf32>
    %cst_94 = arith.constant 6.250000e-02 : f32
    %115 = vector.broadcast %cst_94 : f32 to vector<1x1x128xf32>
    %116 = arith.mulf %114, %115 : vector<1x1x128xf32>
    %117 = vector.shape_cast %116 : vector<1x1x128xf32> to vector<1x128xf32>
    %c10 = arith.constant 10 : index
    %c0_95 = arith.constant 0 : index
    %c0_96 = arith.constant 0 : index
    %118 = vector.load %arg2[%c10, %c0_95, %c0_96] : memref<16x128x128xf32, #tpu.memory_space<vmem>>, vector<1x128x128xf32>
    %119 = vector.shape_cast %118 : vector<1x128x128xf32> to vector<128x128xf32>
    %cst_97 = arith.constant dense<0.000000e+00> : vector<1x128xf32>
    %120 = tpu.matmul %117, %119, %cst_97 {dimension_numbers = #tpu.dot_dimension_numbers<[1], [0], [0], [1], [0, 0, 1, 1], [], []>} : vector<1x128xf32>, vector<128x128xf32>, vector<1x128xf32> -> vector<1x128xf32>
    %121 = arith.addf %110, %120 : vector<1x128xf32>
    %c0_98 = arith.constant 0 : index
    %c8_99 = arith.constant 8 : index
    %c12_100 = arith.constant 12 : index
    %c0_101 = arith.constant 0 : index
    %122 = vector.load %arg1[%c0_98, %c8_99, %c12_100, %c0_101] : memref<1x16x16x128xf32, #tpu.memory_space<vmem>>, vector<1x4x4x128xf32>
    %123 = vector.shape_cast %122 : vector<1x4x4x128xf32> to vector<4x4x128xf32>
    %cst_102 = arith.constant dense<0.000000e+00> : vector<128xf32>
    %124 = vector.multi_reduction <add>, %123, %cst_102 [0, 1] : vector<4x4x128xf32> to vector<128xf32>
    %125 = vector.shape_cast %124 : vector<128xf32> to vector<1x1x128xf32>
    %cst_103 = arith.constant 6.250000e-02 : f32
    %126 = vector.broadcast %cst_103 : f32 to vector<1x1x128xf32>
    %127 = arith.mulf %125, %126 : vector<1x1x128xf32>
    %128 = vector.shape_cast %127 : vector<1x1x128xf32> to vector<1x128xf32>
    %c11 = arith.constant 11 : index
    %c0_104 = arith.constant 0 : index
    %c0_105 = arith.constant 0 : index
    %129 = vector.load %arg2[%c11, %c0_104, %c0_105] : memref<16x128x128xf32, #tpu.memory_space<vmem>>, vector<1x128x128xf32>
    %130 = vector.shape_cast %129 : vector<1x128x128xf32> to vector<128x128xf32>
    %cst_106 = arith.constant dense<0.000000e+00> : vector<1x128xf32>
    %131 = tpu.matmul %128, %130, %cst_106 {dimension_numbers = #tpu.dot_dimension_numbers<[1], [0], [0], [1], [0, 0, 1, 1], [], []>} : vector<1x128xf32>, vector<128x128xf32>, vector<1x128xf32> -> vector<1x128xf32>
    %132 = arith.addf %121, %131 : vector<1x128xf32>
    %c0_107 = arith.constant 0 : index
    %c12_108 = arith.constant 12 : index
    %c0_109 = arith.constant 0 : index
    %c0_110 = arith.constant 0 : index
    %133 = vector.load %arg1[%c0_107, %c12_108, %c0_109, %c0_110] : memref<1x16x16x128xf32, #tpu.memory_space<vmem>>, vector<1x4x4x128xf32>
    %134 = vector.shape_cast %133 : vector<1x4x4x128xf32> to vector<4x4x128xf32>
    %cst_111 = arith.constant dense<0.000000e+00> : vector<128xf32>
    %135 = vector.multi_reduction <add>, %134, %cst_111 [0, 1] : vector<4x4x128xf32> to vector<128xf32>
    %136 = vector.shape_cast %135 : vector<128xf32> to vector<1x1x128xf32>
    %cst_112 = arith.constant 6.250000e-02 : f32
    %137 = vector.broadcast %cst_112 : f32 to vector<1x1x128xf32>
    %138 = arith.mulf %136, %137 : vector<1x1x128xf32>
    %139 = vector.shape_cast %138 : vector<1x1x128xf32> to vector<1x128xf32>
    %c12_113 = arith.constant 12 : index
    %c0_114 = arith.constant 0 : index
    %c0_115 = arith.constant 0 : index
    %140 = vector.load %arg2[%c12_113, %c0_114, %c0_115] : memref<16x128x128xf32, #tpu.memory_space<vmem>>, vector<1x128x128xf32>
    %141 = vector.shape_cast %140 : vector<1x128x128xf32> to vector<128x128xf32>
    %cst_116 = arith.constant dense<0.000000e+00> : vector<1x128xf32>
    %142 = tpu.matmul %139, %141, %cst_116 {dimension_numbers = #tpu.dot_dimension_numbers<[1], [0], [0], [1], [0, 0, 1, 1], [], []>} : vector<1x128xf32>, vector<128x128xf32>, vector<1x128xf32> -> vector<1x128xf32>
    %143 = arith.addf %132, %142 : vector<1x128xf32>
    %c0_117 = arith.constant 0 : index
    %c12_118 = arith.constant 12 : index
    %c4_119 = arith.constant 4 : index
    %c0_120 = arith.constant 0 : index
    %144 = vector.load %arg1[%c0_117, %c12_118, %c4_119, %c0_120] : memref<1x16x16x128xf32, #tpu.memory_space<vmem>>, vector<1x4x4x128xf32>
    %145 = vector.shape_cast %144 : vector<1x4x4x128xf32> to vector<4x4x128xf32>
    %cst_121 = arith.constant dense<0.000000e+00> : vector<128xf32>
    %146 = vector.multi_reduction <add>, %145, %cst_121 [0, 1] : vector<4x4x128xf32> to vector<128xf32>
    %147 = vector.shape_cast %146 : vector<128xf32> to vector<1x1x128xf32>
    %cst_122 = arith.constant 6.250000e-02 : f32
    %148 = vector.broadcast %cst_122 : f32 to vector<1x1x128xf32>
    %149 = arith.mulf %147, %148 : vector<1x1x128xf32>
    %150 = vector.shape_cast %149 : vector<1x1x128xf32> to vector<1x128xf32>
    %c13 = arith.constant 13 : index
    %c0_123 = arith.constant 0 : index
    %c0_124 = arith.constant 0 : index
    %151 = vector.load %arg2[%c13, %c0_123, %c0_124] : memref<16x128x128xf32, #tpu.memory_space<vmem>>, vector<1x128x128xf32>
    %152 = vector.shape_cast %151 : vector<1x128x128xf32> to vector<128x128xf32>
    %cst_125 = arith.constant dense<0.000000e+00> : vector<1x128xf32>
    %153 = tpu.matmul %150, %152, %cst_125 {dimension_numbers = #tpu.dot_dimension_numbers<[1], [0], [0], [1], [0, 0, 1, 1], [], []>} : vector<1x128xf32>, vector<128x128xf32>, vector<1x128xf32> -> vector<1x128xf32>
    %154 = arith.addf %143, %153 : vector<1x128xf32>
    %c0_126 = arith.constant 0 : index
    %c12_127 = arith.constant 12 : index
    %c8_128 = arith.constant 8 : index
    %c0_129 = arith.constant 0 : index
    %155 = vector.load %arg1[%c0_126, %c12_127, %c8_128, %c0_129] : memref<1x16x16x128xf32, #tpu.memory_space<vmem>>, vector<1x4x4x128xf32>
    %156 = vector.shape_cast %155 : vector<1x4x4x128xf32> to vector<4x4x128xf32>
    %cst_130 = arith.constant dense<0.000000e+00> : vector<128xf32>
    %157 = vector.multi_reduction <add>, %156, %cst_130 [0, 1] : vector<4x4x128xf32> to vector<128xf32>
    %158 = vector.shape_cast %157 : vector<128xf32> to vector<1x1x128xf32>
    %cst_131 = arith.constant 6.250000e-02 : f32
    %159 = vector.broadcast %cst_131 : f32 to vector<1x1x128xf32>
    %160 = arith.mulf %158, %159 : vector<1x1x128xf32>
    %161 = vector.shape_cast %160 : vector<1x1x128xf32> to vector<1x128xf32>
    %c14 = arith.constant 14 : index
    %c0_132 = arith.constant 0 : index
    %c0_133 = arith.constant 0 : index
    %162 = vector.load %arg2[%c14, %c0_132, %c0_133] : memref<16x128x128xf32, #tpu.memory_space<vmem>>, vector<1x128x128xf32>
    %163 = vector.shape_cast %162 : vector<1x128x128xf32> to vector<128x128xf32>
    %cst_134 = arith.constant dense<0.000000e+00> : vector<1x128xf32>
    %164 = tpu.matmul %161, %163, %cst_134 {dimension_numbers = #tpu.dot_dimension_numbers<[1], [0], [0], [1], [0, 0, 1, 1], [], []>} : vector<1x128xf32>, vector<128x128xf32>, vector<1x128xf32> -> vector<1x128xf32>
    %165 = arith.addf %154, %164 : vector<1x128xf32>
    %c0_135 = arith.constant 0 : index
    %c12_136 = arith.constant 12 : index
    %c12_137 = arith.constant 12 : index
    %c0_138 = arith.constant 0 : index
    %166 = vector.load %arg1[%c0_135, %c12_136, %c12_137, %c0_138] : memref<1x16x16x128xf32, #tpu.memory_space<vmem>>, vector<1x4x4x128xf32>
    %167 = vector.shape_cast %166 : vector<1x4x4x128xf32> to vector<4x4x128xf32>
    %cst_139 = arith.constant dense<0.000000e+00> : vector<128xf32>
    %168 = vector.multi_reduction <add>, %167, %cst_139 [0, 1] : vector<4x4x128xf32> to vector<128xf32>
    %169 = vector.shape_cast %168 : vector<128xf32> to vector<1x1x128xf32>
    %cst_140 = arith.constant 6.250000e-02 : f32
    %170 = vector.broadcast %cst_140 : f32 to vector<1x1x128xf32>
    %171 = arith.mulf %169, %170 : vector<1x1x128xf32>
    %172 = vector.shape_cast %171 : vector<1x1x128xf32> to vector<1x128xf32>
    %c15 = arith.constant 15 : index
    %c0_141 = arith.constant 0 : index
    %c0_142 = arith.constant 0 : index
    %173 = vector.load %arg2[%c15, %c0_141, %c0_142] : memref<16x128x128xf32, #tpu.memory_space<vmem>>, vector<1x128x128xf32>
    %174 = vector.shape_cast %173 : vector<1x128x128xf32> to vector<128x128xf32>
    %cst_143 = arith.constant dense<0.000000e+00> : vector<1x128xf32>
    %175 = tpu.matmul %172, %174, %cst_143 {dimension_numbers = #tpu.dot_dimension_numbers<[1], [0], [0], [1], [0, 0, 1, 1], [], []>} : vector<1x128xf32>, vector<128x128xf32>, vector<1x128xf32> -> vector<1x128xf32>
    %176 = arith.addf %165, %175 : vector<1x128xf32>
    %c0_144 = arith.constant 0 : index
    %c0_145 = arith.constant 0 : index
    %c0_146 = arith.constant 0 : index
    %177 = vector.load %arg3[%c0_144, %c0_145, %c0_146] : memref<1x1x128xf32, #tpu.memory_space<vmem>>, vector<1x1x128xf32>
    %178 = vector.shape_cast %177 : vector<1x1x128xf32> to vector<1x128xf32>
    %179 = vector.shape_cast %176 : vector<1x128xf32> to vector<1x1x128xf32>
    tpu.vector_store %arg3[%c0_144, %c0_145, %c0_146], %179 {strides = array<i32>} : memref<1x1x128xf32, #tpu.memory_space<vmem>>, vector<1x1x128xf32>,
    return
  }
  func.func @transform_0(%arg0: i32) -> (i32, i32, i32, i32) {
    %c0_i32 = arith.constant 0 : i32
    %c0_i32_0 = arith.constant 0 : i32
    %c0_i32_1 = arith.constant 0 : i32
    %c0_i32_2 = arith.constant 0 : i32
    return %arg0, %c0_i32, %c0_i32_0, %c0_i32_1 : i32, i32, i32, i32
  }
  func.func @transform_1(%arg0: i32) -> (i32, i32, i32) {
    %c0_i32 = arith.constant 0 : i32
    %c0_i32_0 = arith.constant 0 : i32
    %c0_i32_1 = arith.constant 0 : i32
    %c0_i32_2 = arith.constant 0 : i32
    return %c0_i32, %c0_i32_0, %c0_i32_1 : i32, i32, i32
  }
  func.func @transform_2(%arg0: i32) -> (i32, i32, i32) {
    %c0_i32 = arith.constant 0 : i32
    %c0_i32_0 = arith.constant 0 : i32
    %c0_i32_1 = arith.constant 0 : i32
    return %arg0, %c0_i32, %c0_i32_0 : i32, i32, i32
  }
}

</mosaic_0001>

<bundles_post_ra>
// kernel: resnet_small_forward.10
= control target key start
LH: loop header
LB: loop body
LE: loop exit
PB: predicated region body
PF: predicated region fallthrough
CT: control target
= control target key end

     0   :  { %s451_s12 = smov 0   ;;  %s610_s0 = inlined_call_operand.vmem [shape: f32[2,16,16,128], index: 0, kind: input, shape index: {}]   ;;  %s611_s1 = inlined_call_operand.vmem [shape: f32[1,128], index: 1, kind: input, shape index: {}]   ;;  %s612_s2 = inlined_call_operand.vmem [shape: f32[1,128], index: 2, kind: input, shape index: {}]   ;;  %s613_s3 = inlined_call_operand.vmem [shape: f32[2,16,16,128], index: 3, kind: output, shape index: {}]  }
   0x1 LB: > { %s400_s13 = sadd.s32 4294967295, %s429_s12   ;;  %p404_p0 = scmp.ge.s32.totalorder %s429_s12, 1  ;;  %s429_s12 = sphi %s451_s12, %s13_s12  }
   0x2   : > { %p137_p1 = scmp.lt.s32.totalorder %s429_s12, 3 }
   0x4   : > { %p138_p2 = pnand %p404_p0, %p137_p1 }
   0x5   : > { %p161_p3 = scmp.lt.s32.totalorder (!%p138_p2), %s400_s13, 1  ;;  %v462_v0 = vld [vmem:[%s611_s1] ss:$0 sm:$0xff] (!%p138_p2) }
   0x6   : > { %141 = sbr.rel (%p138_p2) target bundleno = 46 (0x2e), region = 32  ;;  %v472_v1 = vld [vmem:[%s612_s2] ss:$0 sm:$0xff] (!%p138_p2) }
   0xd   : > { %s615_s13 = smov (!%p161_p3, %s400_s13), 1 }
   0xe   : > { %s413_s14 = sshll.u32 %s615_s13, 8 }
   0xf   : > { %s467_s19 = scalar_lea.vmem %s610_s0, %s413_s14  ;;  %s495_s24 = scalar_lea.vmem %s613_s3, %s413_s14 }
  0x10   : > { %v171_v2 = vld [vmem:[%s467_s19] sm:$0xff]  ;;  %v172_v3 = vld [vmem:[%s467_s19 + $0x8] sm:$0xff]  ;;  %v173_v4 = vld [vmem:[%s467_s19 + $0x10] sm:$0xff] }
  0x11   : > { %v210_v5 = vmul.f32 %v462_v0, %v171_v2  ;;  %v211_v6 = vmul.f32 %v462_v0, %v172_v3  ;;  %v212_v7 = vmul.f32 %v462_v0, %v173_v4  ;;  %v174_v8 = vld [vmem:[%s467_s19 + $0x18] sm:$0xff]  ;;  %v175_v9 = vld [vmem:[%s467_s19 + $0x20] sm:$0xff]  ;;  %v176_v10 = vld [vmem:[%s467_s19 + $0x28] sm:$0xff] }
  0x12   : > { %v213_v11 = vmul.f32 %v462_v0, %v174_v8  ;;  %v214_v12 = vmul.f32 %v462_v0, %v175_v9  ;;  %v215_v13 = vmul.f32 %v462_v0, %v176_v10  ;;  %v177_v14 = vld [vmem:[%s467_s19 + $0x30] sm:$0xff]  ;;  %v178_v15 = vld [vmem:[%s467_s19 + $0x38] sm:$0xff]  ;;  %v179_v24 = vld [vmem:[%s467_s19 + $0x40] sm:$0xff] }
  0x13   : > { %v249_v16 = vadd.f32 %v472_v1, %v210_v5  ;;  %v250_v17 = vadd.f32 %v472_v1, %v211_v6  ;;  %v251_v18 = vadd.f32 %v472_v1, %v212_v7  ;;  %v216_v19 = vmul.f32 %v462_v0, %v177_v14  ;;  %v180_v25 = vld [vmem:[%s467_s19 + $0x48] sm:$0xff]  ;;  %v181_v26 = vld [vmem:[%s467_s19 + $0x50] sm:$0xff]  ;;  %v182_v31 = vld [vmem:[%s467_s19 + $0x58] sm:$0xff] }
  0x14   : > { %v252_v20 = vadd.f32 %v472_v1, %v213_v11  ;;  %v253_v21 = vadd.f32 %v472_v1, %v214_v12  ;;  %v254_v22 = vadd.f32 %v472_v1, %v215_v13  ;;  %v217_v23 = vmul.f32 %v462_v0, %v178_v15  ;;  %v183_v32 = vld [vmem:[%s467_s19 + $0x60] sm:$0xff]  ;;  %v184_v33 = vld [vmem:[%s467_s19 + $0x68] sm:$0xff]  ;;  %v185_v38 = vld [vmem:[%s467_s19 + $0x70] sm:$0xff] }
  0x15   : > { %v281_v27 = vmax.f32 %v249_v16, 0.0  ;;  %v282_v28 = vmax.f32 %v250_v17, 0.0  ;;  %v283_v29 = vmax.f32 %v251_v18, 0.0  ;;  %v255_v30 = vadd.f32 %v472_v1, %v216_v19  ;;  %v186_v43 = vld [vmem:[%s467_s19 + $0x78] sm:$0xff]  ;;  %v187_v56 = vld [vmem:[%s467_s19 + $0x80] sm:$0xff]  ;;  %v188_v57 = vld [vmem:[%s467_s19 + $0x88] sm:$0xff] }
  0x16   : > { %v284_v34 = vmax.f32 %v252_v20, 0.0  ;;  %v285_v35 = vmax.f32 %v253_v21, 0.0  ;;  %v286_v36 = vmax.f32 %v254_v22, 0.0  ;;  %v256_v37 = vadd.f32 %v472_v1, %v217_v23  ;;  %v189_v58 = vld [vmem:[%s467_s19 + $0x90] sm:$0xff]  ;;  %v190_v63 = vld [vmem:[%s467_s19 + $0x98] sm:$0xff]  ;;  %v191_v2 = vld [vmem:[%s467_s19 + $0xa0] sm:$0xff] }
  0x17   : > { %313 = vst [vmem:[%s495_s24] sm:$0xff] %v281_v27  ;;  %314 = vst [vmem:[%s495_s24 + $0x8] sm:$0xff] %v282_v28  ;;  %v287_v39 = vmax.f32 %v255_v30, 0.0  ;;  %v218_v40 = vmul.f32 %v462_v0, %v179_v24  ;;  %v219_v41 = vmul.f32 %v462_v0, %v180_v25  ;;  %v220_v42 = vmul.f32 %v462_v0, %v181_v26  ;;  %v192_v3 = vld [vmem:[%s467_s19 + $0xa8] sm:$0xff]  ;;  %v193_v8 = vld [vmem:[%s467_s19 + $0xb0] sm:$0xff] }
  0x18   : > { %315 = vst [vmem:[%s495_s24 + $0x10] sm:$0xff] %v283_v29  ;;  %316 = vst [vmem:[%s495_s24 + $0x18] sm:$0xff] %v284_v34  ;;  %v288_v44 = vmax.f32 %v256_v37, 0.0  ;;  %v221_v45 = vmul.f32 %v462_v0, %v182_v31  ;;  %v222_v46 = vmul.f32 %v462_v0, %v183_v32  ;;  %v223_v47 = vmul.f32 %v462_v0, %v184_v33  ;;  %v194_v13 = vld [vmem:[%s467_s19 + $0xb8] sm:$0xff]  ;;  %v195_v26 = vld [vmem:[%s467_s19 + $0xc0] sm:$0xff] }
  0x19   : > { %317 = vst [vmem:[%s495_s24 + $0x20] sm:$0xff] %v285_v35  ;;  %318 = vst [vmem:[%s495_s24 + $0x28] sm:$0xff] %v286_v36  ;;  %v257_v48 = vadd.f32 %v472_v1, %v218_v40  ;;  %v258_v49 = vadd.f32 %v472_v1, %v219_v41  ;;  %v259_v50 = vadd.f32 %v472_v1, %v220_v42  ;;  %v196_v27 = vld [vmem:[%s467_s19 + $0xc8] sm:$0xff]  ;;  %v197_v28 = vld [vmem:[%s467_s19 + $0xd0] sm:$0xff] }
  0x1a   : > { %319 = vst [vmem:[%s495_s24 + $0x30] sm:$0xff] %v287_v39  ;;  %v224_v51 = vmul.f32 %v462_v0, %v185_v38  ;;  %320 = vst [vmem:[%s495_s24 + $0x38] sm:$0xff] %v288_v44  ;;  %v260_v52 = vadd.f32 %v472_v1, %v221_v45  ;;  %v261_v53 = vadd.f32 %v472_v1, %v222_v46  ;;  %v198_v33 = vld [vmem:[%s467_s19 + $0xd8] sm:$0xff]  ;;  %v199_v34 = vld [vmem:[%s467_s19 + $0xe0] sm:$0xff] }
  0x1b   : > { %v262_v54 = vadd.f32 %v472_v1, %v223_v47  ;;  %v225_v55 = vmul.f32 %v462_v0, %v186_v43  ;;  %v289_v59 = vmax.f32 %v257_v48, 0.0  ;;  %v290_v60 = vmax.f32 %v258_v49, 0.0  ;;  %v200_v35 = vld [vmem:[%s467_s19 + $0xe8] sm:$0xff]  ;;  %v201_v40 = vld [vmem:[%s467_s19 + $0xf0] sm:$0xff]  ;;  %v202_v45 = vld [vmem:[%s467_s19 + $0xf8] sm:$0xff] }
  0x1c   : > { %v291_v61 = vmax.f32 %v259_v50, 0.0  ;;  %v263_v62 = vadd.f32 %v472_v1, %v224_v51  ;;  %v292_v4 = vmax.f32 %v260_v52, 0.0  ;;  %v293_v5 = vmax.f32 %v261_v53, 0.0 }
  0x1d   : > { %v294_v6 = vmax.f32 %v262_v54, 0.0  ;;  %v264_v7 = vadd.f32 %v472_v1, %v225_v55  ;;  %321 = vst [vmem:[%s495_s24 + $0x40] sm:$0xff] %v289_v59  ;;  %322 = vst [vmem:[%s495_s24 + $0x48] sm:$0xff] %v290_v60  ;;  %v226_v10 = vmul.f32 %v462_v0, %v187_v56  ;;  %v227_v11 = vmul.f32 %v462_v0, %v188_v57 }
  0x1e   : > { %323 = vst [vmem:[%s495_s24 + $0x50] sm:$0xff] %v291_v61  ;;  %v295_v9 = vmax.f32 %v263_v62, 0.0  ;;  %v228_v12 = vmul.f32 %v462_v0, %v189_v58  ;;  %324 = vst [vmem:[%s495_s24 + $0x58] sm:$0xff] %v292_v4  ;;  %v229_v15 = vmul.f32 %v462_v0, %v190_v63  ;;  %v230_v16 = vmul.f32 %v462_v0, %v191_v2 }
  0x1f   : > { %325 = vst [vmem:[%s495_s24 + $0x60] sm:$0xff] %v293_v5  ;;  %326 = vst [vmem:[%s495_s24 + $0x68] sm:$0xff] %v294_v6  ;;  %v296_v14 = vmax.f32 %v264_v7, 0.0  ;;  %v231_v17 = vmul.f32 %v462_v0, %v192_v3  ;;  %v265_v18 = vadd.f32 %v472_v1, %v226_v10  ;;  %v266_v19 = vadd.f32 %v472_v1, %v227_v11 }
  0x20   : > { %327 = vst [vmem:[%s495_s24 + $0x70] sm:$0xff] %v295_v9  ;;  %v267_v20 = vadd.f32 %v472_v1, %v228_v12  ;;  %v232_v21 = vmul.f32 %v462_v0, %v193_v8  ;;  %v268_v22 = vadd.f32 %v472_v1, %v229_v15  ;;  %v269_v23 = vadd.f32 %v472_v1, %v230_v16 }
  0x21   : > { %328 = vst [vmem:[%s495_s24 + $0x78] sm:$0xff] %v296_v14  ;;  %v270_v24 = vadd.f32 %v472_v1, %v231_v17  ;;  %v233_v25 = vmul.f32 %v462_v0, %v194_v13  ;;  %v297_v29 = vmax.f32 %v265_v18, 0.0  ;;  %v298_v30 = vmax.f32 %v266_v19, 0.0 }
  0x22   : > { %v299_v31 = vmax.f32 %v267_v20, 0.0  ;;  %v271_v32 = vadd.f32 %v472_v1, %v232_v21  ;;  %v300_v36 = vmax.f32 %v268_v22, 0.0  ;;  %v301_v37 = vmax.f32 %v269_v23, 0.0 }
  0x23   : > { %v302_v38 = vmax.f32 %v270_v24, 0.0  ;;  %v272_v39 = vadd.f32 %v472_v1, %v233_v25  ;;  %329 = vst [vmem:[%s495_s24 + $0x80] sm:$0xff] %v297_v29  ;;  %330 = vst [vmem:[%s495_s24 + $0x88] sm:$0xff] %v298_v30  ;;  %v234_v42 = vmul.f32 %v462_v0, %v195_v26  ;;  %v235_v43 = vmul.f32 %v462_v0, %v196_v27 }
  0x24   : > { %331 = vst [vmem:[%s495_s24 + $0x90] sm:$0xff] %v299_v31  ;;  %v303_v41 = vmax.f32 %v271_v32, 0.0  ;;  %v236_v44 = vmul.f32 %v462_v0, %v197_v28  ;;  %332 = vst [vmem:[%s495_s24 + $0x98] sm:$0xff] %v300_v36  ;;  %v237_v47 = vmul.f32 %v462_v0, %v198_v33  ;;  %v238_v48 = vmul.f32 %v462_v0, %v199_v34 }
  0x25   : > { %333 = vst [vmem:[%s495_s24 + $0xa0] sm:$0xff] %v301_v37  ;;  %334 = vst [vmem:[%s495_s24 + $0xa8] sm:$0xff] %v302_v38  ;;  %v304_v46 = vmax.f32 %v272_v39, 0.0  ;;  %v239_v49 = vmul.f32 %v462_v0, %v200_v35  ;;  %v273_v50 = vadd.f32 %v472_v1, %v234_v42  ;;  %v274_v51 = vadd.f32 %v472_v1, %v235_v43 }
  0x26   : > { %335 = vst [vmem:[%s495_s24 + $0xb0] sm:$0xff] %v303_v41  ;;  %v275_v52 = vadd.f32 %v472_v1, %v236_v44  ;;  %v240_v53 = vmul.f32 %v462_v0, %v201_v40  ;;  %v276_v54 = vadd.f32 %v472_v1, %v237_v47  ;;  %v277_v55 = vadd.f32 %v472_v1, %v238_v48 }
  0x27   : > { %336 = vst [vmem:[%s495_s24 + $0xb8] sm:$0xff] %v304_v46  ;;  %v278_v56 = vadd.f32 %v472_v1, %v239_v49  ;;  %v241_v57 = vmul.f32 %v462_v0, %v202_v45  ;;  %v305_v58 = vmax.f32 %v273_v50, 0.0  ;;  %v306_v59 = vmax.f32 %v274_v51, 0.0 }
  0x28   : > { %v307_v60 = vmax.f32 %v275_v52, 0.0  ;;  %v279_v61 = vadd.f32 %v472_v1, %v240_v53  ;;  %v308_v62 = vmax.f32 %v276_v54, 0.0  ;;  %v309_v63 = vmax.f32 %v277_v55, 0.0 }
  0x29   : > { %v310_v2 = vmax.f32 %v278_v56, 0.0  ;;  %v280_v3 = vadd.f32 %v472_v1, %v241_v57  ;;  %337 = vst [vmem:[%s495_s24 + $0xc0] sm:$0xff] %v305_v58  ;;  %338 = vst [vmem:[%s495_s24 + $0xc8] sm:$0xff] %v306_v59 }
  0x2a   : > { %339 = vst [vmem:[%s495_s24 + $0xd0] sm:$0xff] %v307_v60  ;;  %v311_v4 = vmax.f32 %v279_v61, 0.0  ;;  %340 = vst [vmem:[%s495_s24 + $0xd8] sm:$0xff] %v308_v62 }
  0x2b   : > { %341 = vst [vmem:[%s495_s24 + $0xe0] sm:$0xff] %v309_v63  ;;  %342 = vst [vmem:[%s495_s24 + $0xe8] sm:$0xff] %v310_v2  ;;  %v312_v0 = vmax.f32 %v280_v3, 0.0 }
  0x2c   : > { %343 = vst [vmem:[%s495_s24 + $0xf0] sm:$0xff] %v311_v4 }
  0x2d   : > { %344 = vst [vmem:[%s495_s24 + $0xf8] sm:$0xff] %v312_v0 }
  0x2e PF: > { %s13_s12 = sadd.s32 1, %s429_s12  }
  0x2f   : > { %p10_p4 = scmp.ge.s32.totalorder %s13_s12, 4  }
  0x31   :  { %12 = sbr.rel (!%p10_p4) target bundleno = 1 (0x1), region = 62 }

// kernel: resnet_small_forward.13
= control target key start
LH: loop header
LB: loop body
LE: loop exit
PB: predicated region body
PF: predicated region fallthrough
CT: control target
= control target key end

     0   :  { %s582_s15 = smov 0   ;;  %s783_s0 = inlined_call_operand.vmem [shape: f32[2,16,16,128], index: 0, kind: input, shape index: {}]   ;;  %s784_s1 = inlined_call_operand.vmem [shape: f32[2,16,16,128], index: 1, kind: input, shape index: {}]   ;;  %s785_s2 = inlined_call_operand.vmem [shape: f32[1,128], index: 2, kind: input, shape index: {}]   ;;  %s786_s3 = inlined_call_operand.vmem [shape: f32[1,128], index: 3, kind: input, shape index: {}]   ;;  %s787_s4 = inlined_call_operand.vmem [shape: f32[2,16,16,128], index: 4, kind: output, shape index: {}]  }
   0x1 LB: > { %s523_s16 = sadd.s32 4294967295, %s555_s15   ;;  %p527_p0 = scmp.ge.s32.totalorder %s555_s15, 1  ;;  %s555_s15 = sphi %s582_s15, %s14_s15  }
   0x2   : > { %p172_p1 = scmp.lt.s32.totalorder %s555_s15, 3 }
   0x4   : > { %p173_p2 = pnand %p527_p0, %p172_p1 }
   0x5   : > { %p203_p3 = scmp.lt.s32.totalorder (!%p173_p2), %s523_s16, 1  ;;  %v595_v0 = vld [vmem:[%s785_s2] ss:$0 sm:$0xff] (!%p173_p2) }
   0x6   : > { %176 = sbr.rel (%p173_p2) target bundleno = 55 (0x37), region = 36  ;;  %v613_v2 = vld [vmem:[%s786_s3] ss:$0 sm:$0xff] (!%p173_p2) }
   0xd   : > { %s789_s16 = smov (!%p203_p3, %s523_s16), 1 }
   0xe   : > { %s590_s17 = sshll.u32 %s789_s16, 8 }
   0xf   : > { %s601_s22 = scalar_lea.vmem %s783_s0, %s590_s17  ;;  %s607_s25 = scalar_lea.vmem %s784_s1, %s590_s17 }
  0x10   : > { %v218_v1 = vld [vmem:[%s601_s22] sm:$0xff]  ;;  %v219_v3 = vld [vmem:[%s601_s22 + $0x8] sm:$0xff]  ;;  %v220_v7 = vld [vmem:[%s601_s22 + $0x10] sm:$0xff]  ;;  %s643_s30 = scalar_lea.vmem %s787_s4, %s590_s17 }
  0x11   : > { %v257_v4 = vmul.f32 %v595_v0, %v218_v1  ;;  %v328_v5 = vld [vmem:[%s607_s25] sm:$0xff]  ;;  %v258_v6 = vmul.f32 %v595_v0, %v219_v3  ;;  %v329_v8 = vld [vmem:[%s607_s25 + $0x8] sm:$0xff]  ;;  %v259_v9 = vmul.f32 %v595_v0, %v220_v7  ;;  %v221_v10 = vld [vmem:[%s601_s22 + $0x18] sm:$0xff] }
  0x12   : > { %v222_v11 = vld [vmem:[%s601_s22 + $0x20] sm:$0xff]  ;;  %v330_v14 = vld [vmem:[%s607_s25 + $0x10] sm:$0xff]  ;;  %v260_v15 = vmul.f32 %v595_v0, %v221_v10  ;;  %v331_v16 = vld [vmem:[%s607_s25 + $0x18] sm:$0xff] }
  0x13   : > { %v296_v12 = vadd.f32 %v613_v2, %v257_v4  ;;  %v297_v13 = vadd.f32 %v613_v2, %v258_v6  ;;  %v261_v17 = vmul.f32 %v595_v0, %v222_v11  ;;  %v223_v18 = vld [vmem:[%s601_s22 + $0x28] sm:$0xff]  ;;  %v298_v19 = vadd.f32 %v613_v2, %v259_v9  ;;  %v332_v20 = vld [vmem:[%s607_s25 + $0x20] sm:$0xff]  ;;  %v224_v22 = vld [vmem:[%s601_s22 + $0x30] sm:$0xff] }
  0x14   : > { %v262_v21 = vmul.f32 %v595_v0, %v223_v18  ;;  %v225_v23 = vld [vmem:[%s601_s22 + $0x38] sm:$0xff]  ;;  %v299_v26 = vadd.f32 %v613_v2, %v260_v15  ;;  %v333_v28 = vld [vmem:[%s607_s25 + $0x28] sm:$0xff]  ;;  %v263_v31 = vmul.f32 %v595_v0, %v224_v22  ;;  %v226_v33 = vld [vmem:[%s601_s22 + $0x40] sm:$0xff] }
  0x15   : > { %v360_v24 = vadd.f32 %v328_v5, %v296_v12  ;;  %v361_v25 = vadd.f32 %v329_v8, %v297_v13  ;;  %v300_v27 = vadd.f32 %v613_v2, %v261_v17  ;;  %v362_v29 = vadd.f32 %v330_v14, %v298_v19  ;;  %v227_v34 = vld [vmem:[%s601_s22 + $0x48] sm:$0xff]  ;;  %v334_v39 = vld [vmem:[%s607_s25 + $0x30] sm:$0xff]  ;;  %v335_v40 = vld [vmem:[%s607_s25 + $0x38] sm:$0xff] }
  0x16   : > { %v301_v30 = vadd.f32 %v613_v2, %v262_v21  ;;  %v264_v32 = vmul.f32 %v595_v0, %v225_v23  ;;  %v363_v37 = vadd.f32 %v331_v16, %v299_v26  ;;  %v228_v41 = vld [vmem:[%s601_s22 + $0x50] sm:$0xff]  ;;  %v302_v44 = vadd.f32 %v613_v2, %v263_v31  ;;  %v229_v46 = vld [vmem:[%s601_s22 + $0x58] sm:$0xff]  ;;  %v230_v47 = vld [vmem:[%s601_s22 + $0x60] sm:$0xff] }
  0x17   : > { %v392_v35 = vmax.f32 %v360_v24, 0.0  ;;  %v393_v36 = vmax.f32 %v361_v25, 0.0  ;;  %v364_v38 = vadd.f32 %v332_v20, %v300_v27  ;;  %v394_v42 = vmax.f32 %v362_v29, 0.0  ;;  %v231_v52 = vld [vmem:[%s601_s22 + $0x68] sm:$0xff]  ;;  %v336_v56 = vld [vmem:[%s607_s25 + $0x40] sm:$0xff]  ;;  %v338_v61 = vld [vmem:[%s607_s25 + $0x50] sm:$0xff] }
  0x18   : > { %v365_v43 = vadd.f32 %v333_v28, %v301_v30  ;;  %v303_v45 = vadd.f32 %v613_v2, %v264_v32  ;;  %v395_v48 = vmax.f32 %v363_v37, 0.0  ;;  %v265_v50 = vmul.f32 %v595_v0, %v226_v33  ;;  %v337_v57 = vld [vmem:[%s607_s25 + $0x48] sm:$0xff]  ;;  %v232_v1 = vld [vmem:[%s601_s22 + $0x70] sm:$0xff]  ;;  %v233_v3 = vld [vmem:[%s601_s22 + $0x78] sm:$0xff] }
  0x19   : > { %424 = vst [vmem:[%s643_s30] sm:$0xff] %v392_v35  ;;  %425 = vst [vmem:[%s643_s30 + $0x8] sm:$0xff] %v393_v36  ;;  %v396_v49 = vmax.f32 %v364_v38, 0.0  ;;  %v266_v51 = vmul.f32 %v595_v0, %v227_v34  ;;  %v366_v54 = vadd.f32 %v334_v39, %v302_v44  ;;  %v267_v58 = vmul.f32 %v595_v0, %v228_v41  ;;  %v339_v7 = vld [vmem:[%s607_s25 + $0x58] sm:$0xff]  ;;  %v340_v8 = vld [vmem:[%s607_s25 + $0x60] sm:$0xff] }
  0x1a   : > { %426 = vst [vmem:[%s643_s30 + $0x10] sm:$0xff] %v394_v42  ;;  %v397_v53 = vmax.f32 %v365_v43, 0.0  ;;  %v367_v55 = vadd.f32 %v335_v40, %v303_v45  ;;  %427 = vst [vmem:[%s643_s30 + $0x18] sm:$0xff] %v395_v48  ;;  %v304_v59 = vadd.f32 %v613_v2, %v265_v50  ;;  %v268_v62 = vmul.f32 %v595_v0, %v229_v46  ;;  %v341_v14 = vld [vmem:[%s607_s25 + $0x68] sm:$0xff]  ;;  %v234_v19 = vld [vmem:[%s601_s22 + $0x80] sm:$0xff] }
  0x1b   : > { %428 = vst [vmem:[%s643_s30 + $0x20] sm:$0xff] %v396_v49  ;;  %v305_v60 = vadd.f32 %v613_v2, %v266_v51  ;;  %v269_v63 = vmul.f32 %v595_v0, %v230_v47  ;;  %v398_v4 = vmax.f32 %v366_v54, 0.0  ;;  %v306_v6 = vadd.f32 %v613_v2, %v267_v58  ;;  %v235_v20 = vld [vmem:[%s601_s22 + $0x88] sm:$0xff]  ;;  %v342_v25 = vld [vmem:[%s607_s25 + $0x70] sm:$0xff]  ;;  %v343_v26 = vld [vmem:[%s607_s25 + $0x78] sm:$0xff] }
  0x1c   : > { %429 = vst [vmem:[%s643_s30 + $0x28] sm:$0xff] %v397_v53  ;;  %v399_v5 = vmax.f32 %v367_v55, 0.0  ;;  %v270_v9 = vmul.f32 %v595_v0, %v231_v52  ;;  %v368_v10 = vadd.f32 %v336_v56, %v304_v59  ;;  %v307_v12 = vadd.f32 %v613_v2, %v268_v62  ;;  %v236_v27 = vld [vmem:[%s601_s22 + $0x90] sm:$0xff]  ;;  %v237_v32 = vld [vmem:[%s601_s22 + $0x98] sm:$0xff]  ;;  %v238_v33 = vld [vmem:[%s601_s22 + $0xa0] sm:$0xff] }
  0x1d   : > { %v369_v11 = vadd.f32 %v337_v57, %v305_v60  ;;  %v308_v13 = vadd.f32 %v613_v2, %v269_v63  ;;  %430 = vst [vmem:[%s643_s30 + $0x30] sm:$0xff] %v398_v4  ;;  %v370_v15 = vadd.f32 %v338_v61, %v306_v6  ;;  %v271_v17 = vmul.f32 %v595_v0, %v232_v1  ;;  %v239_v38 = vld [vmem:[%s601_s22 + $0xa8] sm:$0xff]  ;;  %v344_v42 = vld [vmem:[%s607_s25 + $0x80] sm:$0xff]  ;;  %v346_v47 = vld [vmem:[%s607_s25 + $0x90] sm:$0xff] }
  0x1e   : > { %431 = vst [vmem:[%s643_s30 + $0x38] sm:$0xff] %v399_v5  ;;  %v309_v16 = vadd.f32 %v613_v2, %v270_v9  ;;  %v272_v18 = vmul.f32 %v595_v0, %v233_v3  ;;  %v400_v21 = vmax.f32 %v368_v10, 0.0  ;;  %v371_v23 = vadd.f32 %v339_v7, %v307_v12  ;;  %v345_v43 = vld [vmem:[%s607_s25 + $0x88] sm:$0xff]  ;;  %v240_v50 = vld [vmem:[%s601_s22 + $0xb0] sm:$0xff]  ;;  %v241_v51 = vld [vmem:[%s601_s22 + $0xb8] sm:$0xff] }
  0x1f   : > { %v401_v22 = vmax.f32 %v369_v11, 0.0  ;;  %v372_v24 = vadd.f32 %v340_v8, %v308_v13  ;;  %v402_v28 = vmax.f32 %v370_v15, 0.0  ;;  %v310_v30 = vadd.f32 %v613_v2, %v271_v17  ;;  %v347_v55 = vld [vmem:[%s607_s25 + $0x98] sm:$0xff]  ;;  %v348_v56 = vld [vmem:[%s607_s25 + $0xa0] sm:$0xff]  ;;  %v349_v62 = vld [vmem:[%s607_s25 + $0xa8] sm:$0xff] }
  0x20   : > { %v373_v29 = vadd.f32 %v341_v14, %v309_v16  ;;  %v311_v31 = vadd.f32 %v613_v2, %v272_v18  ;;  %432 = vst [vmem:[%s643_s30 + $0x40] sm:$0xff] %v400_v21  ;;  %v403_v34 = vmax.f32 %v371_v23, 0.0  ;;  %v273_v36 = vmul.f32 %v595_v0, %v234_v19  ;;  %v242_v5 = vld [vmem:[%s601_s22 + $0xc0] sm:$0xff]  ;;  %v243_v6 = vld [vmem:[%s601_s22 + $0xc8] sm:$0xff]  ;;  %v350_v11 = vld [vmem:[%s607_s25 + $0xb0] sm:$0xff] }
  0x21   : > { %433 = vst [vmem:[%s643_s30 + $0x48] sm:$0xff] %v401_v22  ;;  %v404_v35 = vmax.f32 %v372_v24, 0.0  ;;  %v274_v37 = vmul.f32 %v595_v0, %v235_v20  ;;  %434 = vst [vmem:[%s643_s30 + $0x50] sm:$0xff] %v402_v28  ;;  %v374_v40 = vadd.f32 %v342_v25, %v310_v30  ;;  %v275_v44 = vmul.f32 %v595_v0, %v236_v27  ;;  %v351_v12 = vld [vmem:[%s607_s25 + $0xb8] sm:$0xff]  ;;  %v244_v13 = vld [vmem:[%s601_s22 + $0xd0] sm:$0xff] }
  0x22   : > { %v405_v39 = vmax.f32 %v373_v29, 0.0  ;;  %v375_v41 = vadd.f32 %v343_v26, %v311_v31  ;;  %435 = vst [vmem:[%s643_s30 + $0x58] sm:$0xff] %v403_v34  ;;  %v312_v45 = vadd.f32 %v613_v2, %v273_v36  ;;  %v276_v48 = vmul.f32 %v595_v0, %v237_v32  ;;  %v245_v18 = vld [vmem:[%s601_s22 + $0xd8] sm:$0xff]  ;;  %v246_v19 = vld [vmem:[%s601_s22 + $0xe0] sm:$0xff]  ;;  %v247_v24 = vld [vmem:[%s601_s22 + $0xe8] sm:$0xff] }
  0x23   : > { %436 = vst [vmem:[%s643_s30 + $0x60] sm:$0xff] %v404_v35  ;;  %v313_v46 = vadd.f32 %v613_v2, %v274_v37  ;;  %v277_v49 = vmul.f32 %v595_v0, %v238_v33  ;;  %v406_v52 = vmax.f32 %v374_v40, 0.0  ;;  %v314_v54 = vadd.f32 %v613_v2, %v275_v44  ;;  %v352_v28 = vld [vmem:[%s607_s25 + $0xc0] sm:$0xff]  ;;  %v353_v29 = vld [vmem:[%s607_s25 + $0xc8] sm:$0xff]  ;;  %v354_v33 = vld [vmem:[%s607_s25 + $0xd0] sm:$0xff] }
  0x24   : > { %437 = vst [vmem:[%s643_s30 + $0x68] sm:$0xff] %v405_v39  ;;  %v407_v53 = vmax.f32 %v375_v41, 0.0  ;;  %v278_v57 = vmul.f32 %v595_v0, %v239_v38  ;;  %v376_v58 = vadd.f32 %v344_v42, %v312_v45  ;;  %v315_v60 = vadd.f32 %v613_v2, %v276_v48  ;;  %v248_v36 = vld [vmem:[%s601_s22 + $0xf0] sm:$0xff]  ;;  %v249_v37 = vld [vmem:[%s601_s22 + $0xf8] sm:$0xff]  ;;  %v356_v42 = vld [vmem:[%s607_s25 + $0xe0] sm:$0xff] }
  0x25   : > { %v377_v59 = vadd.f32 %v345_v43, %v313_v46  ;;  %v316_v61 = vadd.f32 %v613_v2, %v277_v49  ;;  %438 = vst [vmem:[%s643_s30 + $0x70] sm:$0xff] %v406_v52  ;;  %v378_v63 = vadd.f32 %v346_v47, %v314_v54  ;;  %v279_v3 = vmul.f32 %v595_v0, %v240_v50  ;;  %v355_v41 = vld [vmem:[%s607_s25 + $0xd8] sm:$0xff]  ;;  %v357_v48 = vld [vmem:[%s607_s25 + $0xe8] sm:$0xff] }
  0x26   : > { %439 = vst [vmem:[%s643_s30 + $0x78] sm:$0xff] %v407_v53  ;;  %v317_v1 = vadd.f32 %v613_v2, %v278_v57  ;;  %v280_v4 = vmul.f32 %v595_v0, %v241_v51  ;;  %v408_v7 = vmax.f32 %v376_v58, 0.0  ;;  %v379_v9 = vadd.f32 %v347_v55, %v315_v60  ;;  %v358_v57 = vld [vmem:[%s607_s25 + $0xf0] sm:$0xff]  ;;  %v359_v58 = vld [vmem:[%s607_s25 + $0xf8] sm:$0xff] }
  0x27   : > { %v409_v8 = vmax.f32 %v377_v59, 0.0  ;;  %v380_v10 = vadd.f32 %v348_v56, %v316_v61  ;;  %v410_v14 = vmax.f32 %v378_v63, 0.0  ;;  %v318_v16 = vadd.f32 %v613_v2, %v279_v3 }
  0x28   : > { %v381_v15 = vadd.f32 %v349_v62, %v317_v1  ;;  %v319_v17 = vadd.f32 %v613_v2, %v280_v4  ;;  %440 = vst [vmem:[%s643_s30 + $0x80] sm:$0xff] %v408_v7  ;;  %v411_v20 = vmax.f32 %v379_v9, 0.0  ;;  %v281_v22 = vmul.f32 %v595_v0, %v242_v5 }
  0x29   : > { %441 = vst [vmem:[%s643_s30 + $0x88] sm:$0xff] %v409_v8  ;;  %v412_v21 = vmax.f32 %v380_v10, 0.0  ;;  %v282_v23 = vmul.f32 %v595_v0, %v243_v6  ;;  %442 = vst [vmem:[%s643_s30 + $0x90] sm:$0xff] %v410_v14  ;;  %v382_v26 = vadd.f32 %v350_v11, %v318_v16  ;;  %v283_v30 = vmul.f32 %v595_v0, %v244_v13 }
  0x2a   : > { %v413_v25 = vmax.f32 %v381_v15, 0.0  ;;  %v383_v27 = vadd.f32 %v351_v12, %v319_v17  ;;  %443 = vst [vmem:[%s643_s30 + $0x98] sm:$0xff] %v411_v20  ;;  %v320_v31 = vadd.f32 %v613_v2, %v281_v22  ;;  %v284_v34 = vmul.f32 %v595_v0, %v245_v18 }
  0x2b   : > { %444 = vst [vmem:[%s643_s30 + $0xa0] sm:$0xff] %v412_v21  ;;  %v321_v32 = vadd.f32 %v613_v2, %v282_v23  ;;  %v285_v35 = vmul.f32 %v595_v0, %v246_v19  ;;  %v414_v38 = vmax.f32 %v382_v26, 0.0  ;;  %v322_v40 = vadd.f32 %v613_v2, %v283_v30 }
  0x2c   : > { %445 = vst [vmem:[%s643_s30 + $0xa8] sm:$0xff] %v413_v25  ;;  %v415_v39 = vmax.f32 %v383_v27, 0.0  ;;  %v286_v43 = vmul.f32 %v595_v0, %v247_v24  ;;  %v384_v44 = vadd.f32 %v352_v28, %v320_v31  ;;  %v323_v46 = vadd.f32 %v613_v2, %v284_v34 }
  0x2d   : > { %v385_v45 = vadd.f32 %v353_v29, %v321_v32  ;;  %v324_v47 = vadd.f32 %v613_v2, %v285_v35  ;;  %446 = vst [vmem:[%s643_s30 + $0xb0] sm:$0xff] %v414_v38  ;;  %v386_v49 = vadd.f32 %v354_v33, %v322_v40  ;;  %v287_v51 = vmul.f32 %v595_v0, %v248_v36 }
  0x2e   : > { %447 = vst [vmem:[%s643_s30 + $0xb8] sm:$0xff] %v415_v39  ;;  %v325_v50 = vadd.f32 %v613_v2, %v286_v43  ;;  %v288_v52 = vmul.f32 %v595_v0, %v249_v37  ;;  %v416_v53 = vmax.f32 %v384_v44, 0.0  ;;  %v387_v55 = vadd.f32 %v355_v41, %v323_v46 }
  0x2f   : > { %v417_v54 = vmax.f32 %v385_v45, 0.0  ;;  %v388_v56 = vadd.f32 %v356_v42, %v324_v47  ;;  %v418_v59 = vmax.f32 %v386_v49, 0.0  ;;  %v326_v61 = vadd.f32 %v613_v2, %v287_v51 }
  0x30   : > { %v389_v60 = vadd.f32 %v357_v48, %v325_v50  ;;  %v327_v62 = vadd.f32 %v613_v2, %v288_v52  ;;  %448 = vst [vmem:[%s643_s30 + $0xc0] sm:$0xff] %v416_v53  ;;  %v419_v0 = vmax.f32 %v387_v55, 0.0 }
  0x31   : > { %449 = vst [vmem:[%s643_s30 + $0xc8] sm:$0xff] %v417_v54  ;;  %v420_v63 = vmax.f32 %v388_v56, 0.0  ;;  %450 = vst [vmem:[%s643_s30 + $0xd0] sm:$0xff] %v418_v59  ;;  %v390_v3 = vadd.f32 %v358_v57, %v326_v61 }
  0x32   : > { %v421_v1 = vmax.f32 %v389_v60, 0.0  ;;  %v391_v4 = vadd.f32 %v359_v58, %v327_v62  ;;  %451 = vst [vmem:[%s643_s30 + $0xd8] sm:$0xff] %v419_v0 }
  0x33   : > { %452 = vst [vmem:[%s643_s30 + $0xe0] sm:$0xff] %v420_v63  ;;  %v422_v5 = vmax.f32 %v390_v3, 0.0 }
  0x34   : > { %453 = vst [vmem:[%s643_s30 + $0xe8] sm:$0xff] %v421_v1  ;;  %v423_v6 = vmax.f32 %v391_v4, 0.0 }
  0x35   : > { %454 = vst [vmem:[%s643_s30 + $0xf0] sm:$0xff] %v422_v5 }
  0x36   : > { %455 = vst [vmem:[%s643_s30 + $0xf8] sm:$0xff] %v423_v6 }
  0x37 PF: > { %s14_s15 = sadd.s32 1, %s555_s15  }
  0x38   : > { %p11_p4 = scmp.ge.s32.totalorder %s14_s15, 4  }
  0x3a   :  { %13 = sbr.rel (!%p11_p4) target bundleno = 1 (0x1), region = 69 }

// kernel: resnet_small_forward.12
= control target key start
LH: loop header
LB: loop body
LE: loop exit
PB: predicated region body
PF: predicated region fallthrough
CT: control target
= control target key end

     0   :  { %s3241_s18 = smov 0   ;;  %s4319_s0 = inlined_call_operand.vmem [shape: f32[2,16,16,128], index: 0, kind: input, shape index: {}]   ;;  %s4320_s1 = inlined_call_operand.vmem [shape: bf16[1152,128], index: 1, kind: input, shape index: {}]   ;;  %s4321_s2 = inlined_call_operand.vmem [shape: f32[1,128], index: 2, kind: input, shape index: {}]   ;;  %s4322_s3 = inlined_call_operand.vmem [shape: f32[1,128], index: 3, kind: input, shape index: {}]   ;;  %s4323_s4 = inlined_call_operand.vmem [shape: f32[2,16,16,128], index: 4, kind: output, shape index: {0}]   ;;  %s4324_s5 = inlined_call_operand.vmem [shape: f32[2,2,128], index: 5, kind: output, shape index: {1}]  }
   0x1 LB: > { %s2496_s19 = sadd.s32 4294967295, %s3208_s18   ;;  %p2500_p0 = scmp.ge.s32.totalorder %s3208_s18, 1  ;;  %s3208_s18 = sphi %s3241_s18, %s16_s18  }
   0x2   : > { %p190_p1 = scmp.lt.s32.totalorder %s3208_s18, 3 }
   0x4   : > { %p191_p2 = pnand %p2500_p0, %p190_p1 }
   0x5   : > { %v3129_v0 = vld [vmem:[%s4320_s1 + $0x40] sm:$0xff] (!%p191_p2)   ;;  %v3210_v2 = vmov (!%p191_p2), 0.0   ;;  %v3131_v3 = vld [vmem:[%s4320_s1 + $0x48] sm:$0xff] (!%p191_p2)   ;;  %p222_p3 = scmp.lt.s32.totalorder (!%p191_p2), %s2496_s19, 1  ;;  %v3133_v5 = vld [vmem:[%s4320_s1 + $0x50] sm:$0xff] (!%p191_p2)   ;;  %vm2407_vm0 = vcmask (!%p191_p2), 1040384  }
   0x6   : > { %194 = sbr.rel (%p191_p2) target bundleno = 558 (0x22e), region = 36  ;;  %v3130_v1 = vld [vmem:[%s4320_s1] sm:$0xff] (!%p191_p2)   ;;  %237 = vst [vmem:[#allocation2] sm:$0xff] (!%p191_p2), %v3210_v2  ;;  %238 = vst [vmem:[#allocation2 + $0x8] sm:$0xff] (!%p191_p2), %v3210_v2  ;;  %2584 = vmatprep.subr.bf16.mxu0 (!%p191_p2), %v3129_v0  ;;  %3104 = vmatprep.subr.bf16.mxu1 (!%p191_p2), %v3129_v0  ;;  %v3132_v4 = vld [vmem:[%s4320_s1 + $0x8] sm:$0xff] (!%p191_p2)  }
   0x7   : > { %239 = vst [vmem:[#allocation2 + $0x10] sm:$0x3] (!%p191_p2), %v3210_v2  ;;  %241 = vst [vmem:[#allocation2 + $0x198] sm:$0xff] (!%p191_p2), %v3210_v2  ;;  %2585 = vmatpush3.bf16.msra.mxu0 (!%p191_p2), %v3130_v1  ;;  %3112 = vmatpush3.bf16.msra.mxu1 (!%p191_p2), %v3130_v1  ;;  %v3134_v6 = vld [vmem:[%s4320_s1 + $0x10] sm:$0xff] (!%p191_p2)   ;;  %v3135_v7 = vld [vmem:[%s4320_s1 + $0x58] sm:$0xff] (!%p191_p2)  }
   0x8   : > { %242 = vst [vmem:[#allocation2 + $0x1a0] sm:$0xff] (!%p191_p2), %v3210_v2  ;;  %243 = vst [vmem:[#allocation2 + $0x1a8] sm:$0x3] (!%p191_p2), %v3210_v2  ;;  %2586 = vmatprep.subr.bf16.mxu0 (!%p191_p2), %v3131_v3  ;;  %3105 = vmatprep.subr.bf16.mxu1 (!%p191_p2), %v3131_v3  ;;  %v3136_v8 = vld [vmem:[%s4320_s1 + $0x18] sm:$0xff] (!%p191_p2)   ;;  %v3137_v9 = vld [vmem:[%s4320_s1 + $0x60] sm:$0xff] (!%p191_p2)  }
   0x9   : > { %245 = vst [vmem:[#allocation2 + $0x18] sm:$0x1] (!%p191_p2), %v3210_v2  ;;  %246 = vst [vmem:[#allocation2 + $0x30] sm:$0x1] (!%p191_p2), %v3210_v2  ;;  %v3138_v10 = vld [vmem:[%s4320_s1 + $0x20] sm:$0xff] (!%p191_p2)   ;;  %v3139_v11 = vld [vmem:[%s4320_s1 + $0x68] sm:$0xff] (!%p191_p2)  }
   0xa   : > { %247 = vst [vmem:[#allocation2 + $0x48] sm:$0x1] (!%p191_p2), %v3210_v2  ;;  %248 = vst [vmem:[#allocation2 + $0x60] sm:$0x1] (!%p191_p2), %v3210_v2  ;;  %v3343_v17 = vld [vmem:[%s4321_s2] ss:$0 sm:$0xff] (!%p191_p2) }
   0xb   : > { %249 = vst [vmem:[#allocation2 + $0x78] sm:$0x1] (!%p191_p2), %v3210_v2  ;;  %250 = vst [vmem:[#allocation2 + $0x90] sm:$0x1] (!%p191_p2), %v3210_v2  ;;  %2587 = vmatpush3.bf16.msra.mxu0 (!%p191_p2), %v3132_v4  ;;  %3113 = vmatpush3.bf16.msra.mxu1 (!%p191_p2), %v3132_v4  ;;  %v3348_v18 = vld [vmem:[%s4322_s3] ss:$0 sm:$0xff] (!%p191_p2) }
   0xc   : > { %251 = vst [vmem:[#allocation2 + $0xa8] sm:$0x1] (!%p191_p2), %v3210_v2  ;;  %252 = vst [vmem:[#allocation2 + $0xc0] sm:$0x1] (!%p191_p2), %v3210_v2  ;;  %2588 = vmatprep.subr.bf16.mxu0 (!%p191_p2), %v3133_v5  ;;  %3106 = vmatprep.subr.bf16.mxu1 (!%p191_p2), %v3133_v5  ;;  %v3140_v21 = vld [vmem:[%s4320_s1 + $0x28] sm:$0xff] (!%p191_p2)   ;;  %v3141_v22 = vld [vmem:[%s4320_s1 + $0x70] sm:$0xff] (!%p191_p2)  }
   0xd   : > { %253 = vst [vmem:[#allocation2 + $0xd8] sm:$0x1] %v3210_v2  ;;  %254 = vst [vmem:[#allocation2 + $0xf0] sm:$0x1] %v3210_v2  ;;  %s4326_s19 = smov (!%p222_p3, %s2496_s19), 1  ;;  %v487_v12 = vld [vmem:[#allocation2 + $0x1] sm:$0xff] }
   0xe   : > { %255 = vst [vmem:[#allocation2 + $0x108] sm:$0x1] %v3210_v2  ;;  %256 = vst [vmem:[#allocation2 + $0x120] sm:$0x1] %v3210_v2  ;;  %s2582_s9 = sshll.u32 %s4326_s19, 8  ;;  %v488_v13 = vld [vmem:[#allocation2 + $0x9] sm:$0xff] }
   0xf   : > { %257 = vst [vmem:[#allocation2 + $0x138] sm:$0x1] %v3210_v2  ;;  %258 = vst [vmem:[#allocation2 + $0x150] sm:$0x1] %v3210_v2  ;;  %2589 = vmatpush3.bf16.msra.mxu0 %v3134_v6  ;;  %3114 = vmatpush3.bf16.msra.mxu1 %v3134_v6  ;;  %s3330_s16 = scalar_lea.vmem %s4319_s0, %s2582_s9  ;;  %v745_v15 = vpack.c.bf16 %v488_v13, %v487_v12  ;;  %v3142_v25 = vld [vmem:[%s4320_s1 + $0x30] sm:$0xff]   ;;  %v3143_v28 = vld [vmem:[%s4320_s1 + $0x78] sm:$0xff]   ;;  %s4228_s24 = scalar_lea.vmem %s4323_s4, %s2582_s9 }
  0x10   : > { %259 = vst [vmem:[#allocation2 + $0x168] sm:$0x1] %v3210_v2  ;;  %260 = vst [vmem:[#allocation2 + $0x180] sm:$0x1] %v3210_v2  ;;  %2590 = vmatprep.subr.bf16.mxu0 %v3135_v7  ;;  %3107 = vmatprep.subr.bf16.mxu1 %v3135_v7  ;;  %v302_v14 = vld [vmem:[%s3330_s16 + $0xb0] sm:$0xff]  ;;  %v303_v16 = vld [vmem:[%s3330_s16 + $0xb8] sm:$0xff] }
  0x11   : > { %263 = vst [vmem:[#allocation2 + $0x29] sm:$0x1] %v3210_v2  ;;  %264 = vst [vmem:[#allocation2 + $0x41] sm:$0x1] %v3210_v2  ;;  %v341_v19 = vmul.f32 %v3343_v17, %v302_v14  ;;  %v342_v20 = vmul.f32 %v3343_v17, %v303_v16  ;;  %1496 = vmatprep.mubr.bf16.mxu0 %v745_v15  ;;  %v280_v30 = vld [vmem:[%s3330_s16] sm:$0xff]  ;;  %v281_v31 = vld [vmem:[%s3330_s16 + $0x8] sm:$0xff] }
  0x12   : > { %265 = vst [vmem:[#allocation2 + $0x59] sm:$0x1] %v3210_v2  ;;  %266 = vst [vmem:[#allocation2 + $0x71] sm:$0x1] %v3210_v2  ;;  %v3144_v32 = vld [vmem:[%s4320_s1 + $0x38] sm:$0xff]   ;;  %v319_v33 = vmul.f32 %v3343_v17, %v280_v30  ;;  %v320_v34 = vmul.f32 %v3343_v17, %v281_v31  ;;  %v304_v35 = vld [vmem:[%s3330_s16 + $0xc0] sm:$0xff] }
  0x13   : > { %267 = vst [vmem:[#allocation2 + $0x89] sm:$0x1] %v3210_v2  ;;  %268 = vst [vmem:[#allocation2 + $0xa1] sm:$0x1] %v3210_v2  ;;  %2591 = vmatpush3.bf16.msra.mxu0 %v3136_v8  ;;  %3115 = vmatpush3.bf16.msra.mxu1 %v3136_v8  ;;  %v380_v23 = vadd.f32 %v3348_v18, %v341_v19  ;;  %v381_v24 = vadd.f32 %v3348_v18, %v342_v20  ;;  %v305_v36 = vld [vmem:[%s3330_s16 + $0xc8] sm:$0xff]  ;;  %v3145_v40 = vld [vmem:[%s4320_s1 + $0xc0] sm:$0xff]  }
  0x14   : > { %269 = vst [vmem:[#allocation2 + $0xb9] sm:$0x1] %v3210_v2  ;;  %270 = vst [vmem:[#allocation2 + $0xd1] sm:$0x1] %v3210_v2  ;;  %2592 = vmatprep.subr.bf16.mxu0 %v3137_v9  ;;  %3108 = vmatprep.subr.bf16.mxu1 %v3137_v9  ;;  %v343_v38 = vmul.f32 %v3343_v17, %v304_v35  ;;  %v344_v39 = vmul.f32 %v3343_v17, %v305_v36  ;;  %v3146_v43 = vld [vmem:[%s4320_s1 + $0x140] sm:$0xff]   ;;  %v3149_v51 = vld [vmem:[%s4320_s1 + $0xc8] sm:$0xff]  }
  0x15   : > { %271 = vst [vmem:[#allocation2 + $0xe9] sm:$0x1] %v3210_v2  ;;  %272 = vst [vmem:[#allocation2 + $0x101] sm:$0x1] %v3210_v2  ;;  %v412_v26 = vmax.f32 %v380_v23, 0.0  ;;  %v413_v27 = vmax.f32 %v381_v24, 0.0  ;;  %v358_v41 = vadd.f32 %v3348_v18, %v319_v33  ;;  %v359_v42 = vadd.f32 %v3348_v18, %v320_v34 }
  0x16   : > { %273 = vst [vmem:[#allocation2 + $0x119] sm:$0x1] %v3210_v2  ;;  %274 = vst [vmem:[#allocation2 + $0x131] sm:$0x1] %v3210_v2  ;;  %v382_v44 = vadd.f32 %v3348_v18, %v343_v38  ;;  %v383_v45 = vadd.f32 %v3348_v18, %v344_v39  ;;  %v3147_v46 = vld [vmem:[%s4320_s1 + $0x80] sm:$0xff]   ;;  %v3154_v58 = vld [vmem:[%s4320_s1 + $0x148] sm:$0xff]  }
  0x17   : > { %275 = vst [vmem:[#allocation2 + $0x149] sm:$0x1] %v3210_v2  ;;  %276 = vst [vmem:[#allocation2 + $0x161] sm:$0x1] %v3210_v2  ;;  %2593 = vmatpush3.bf16.msra.mxu0 %v3138_v10  ;;  %3116 = vmatpush3.bf16.msra.mxu1 %v3138_v10  ;;  %v853_v29 = vpack.c.bf16 %v413_v27, %v412_v26  ;;  %v3148_v47 = vld [vmem:[%s4320_s1 + $0x100] sm:$0xff]   ;;  %v390_v48 = vmax.f32 %v358_v41, 0.0 }
  0x18   : > { %277 = vst [vmem:[#allocation2 + $0x179] sm:$0x1] %v3210_v2  ;;  %278 = vst [vmem:[#allocation2 + $0x191] sm:$0x1] %v3210_v2  ;;  %2594 = vmatprep.subr.bf16.mxu0 %v3139_v11  ;;  %3109 = vmatprep.subr.bf16.mxu1 %v3139_v11  ;;  %v391_v49 = vmax.f32 %v359_v42, 0.0  ;;  %v414_v52 = vmax.f32 %v382_v44, 0.0 }
  0x19   : > { %262 = vst [vmem:[#allocation2 + $0x11] sm:$0x1] %v3210_v2  ;;  %244 = vst [vmem:[#allocation2] sm:$0x1] %v3210_v2  ;;  %1592 = vmatprep.mubr.bf16.mxu1 %v853_v29  ;;  %v415_v53 = vmax.f32 %v383_v45, 0.0  ;;  %v282_v59 = vld [vmem:[%s3330_s16 + $0x10] sm:$0xff] }
  0x1a   : > { %261 = vst [vmem:[#allocation2 + $0x198] sm:$0x1] %v3210_v2  ;;  %279 = vst [vmem:[#allocation2 + $0x1a9] sm:$0x1] %v3210_v2  ;;  %v3397_v57 = vpack.c.bf16 %v391_v49, %v390_v48  ;;  %v283_v61 = vld [vmem:[%s3330_s16 + $0x18] sm:$0xff]  ;;  %v321_v62 = vmul.f32 %v3343_v17, %v282_v59  ;;  %v306_v63 = vld [vmem:[%s3330_s16 + $0xd0] sm:$0xff] }
  0x1b   : > { %2595 = vmatpush3.bf16.msra.mxu0 %v3140_v21  ;;  %3117 = vmatpush3.bf16.msra.mxu1 %v3140_v21  ;;  %445 = vst [vmem:[#allocation2 + $0x121] sm:$0xff] %v412_v26  ;;  %446 = vst [vmem:[#allocation2 + $0x129] sm:$0xff] %v413_v27  ;;  %v862_v60 = vpack.c.bf16 %v415_v53, %v414_v52  ;;  %v307_v0 = vld [vmem:[%s3330_s16 + $0xd8] sm:$0xff]  ;;  %v3150_v1 = vld [vmem:[%s4320_s1 + $0x88] sm:$0xff]   ;;  %v345_v3 = vmul.f32 %v3343_v17, %v306_v63  ;;  %s2505_s9 = sshll.u32 %s4326_s19, 1 }
  0x1c   : > { %2596 = vmatprep.subr.bf16.mxu0 %v3141_v22  ;;  %3110 = vmatprep.subr.bf16.mxu1 %v3141_v22  ;;  %423 = vst [vmem:[#allocation2 + $0x19] sm:$0xff] %v390_v48  ;;  %424 = vst [vmem:[#allocation2 + $0x21] sm:$0xff] %v391_v49  ;;  %v346_v4 = vmul.f32 %v3343_v17, %v307_v0  ;;  %v3156_v5 = vld [vmem:[%s4320_s1 + $0x108] sm:$0xff]   ;;  %v360_v6 = vadd.f32 %v3348_v18, %v321_v62  ;;  %v3151_v7 = vld [vmem:[%s4320_s1 + $0xd0] sm:$0xff]   ;;  %s235_s27 = scalar_lea.vmem %s4324_s5, %s2505_s9 }
  0x1d   : > { %447 = vst [vmem:[#allocation2 + $0x139] sm:$0xff] %v414_v52  ;;  %448 = vst [vmem:[#allocation2 + $0x141] sm:$0xff] %v415_v53  ;;  %v384_v9 = vadd.f32 %v3348_v18, %v345_v3  ;;  %v3152_v11 = vld [vmem:[%s4320_s1 + $0x90] sm:$0xff]   ;;  %v3153_v15 = vld [vmem:[%s4320_s1 + $0xd8] sm:$0xff]  }
  0x1e   : > { %v385_v10 = vadd.f32 %v3348_v18, %v346_v4  ;;  %v392_v12 = vmax.f32 %v360_v6, 0.0  ;;  %v284_v21 = vld [vmem:[%s3330_s16 + $0x20] sm:$0xff]  ;;  %v3155_v33 = vld [vmem:[%s4320_s1 + $0x98] sm:$0xff]   ;;  %v3162_v38 = vld [vmem:[%s4320_s1 + $0x150] sm:$0xff]  }
  0x1f   : > { %2597 = vmatpush3.bf16.msra.mxu0 %v3142_v25  ;;  %3118 = vmatpush3.bf16.msra.mxu1 %v3142_v25  ;;  %v416_v19 = vmax.f32 %v384_v9, 0.0  ;;  %v285_v25 = vld [vmem:[%s3330_s16 + $0x28] sm:$0xff]  ;;  %v323_v26 = vmul.f32 %v3343_v17, %v284_v21  ;;  %v308_v31 = vld [vmem:[%s3330_s16 + $0xe0] sm:$0xff]  ;;  %v3164_v44 = vld [vmem:[%s4320_s1 + $0x110] sm:$0xff]  }
  0x20   : > { %v455_v37 = vld [vmem:[#allocation2] sm:$0xff]  ;;  %2598 = vmatprep.subr.bf16.mxu0 %v3143_v28  ;;  %3111 = vmatprep.subr.bf16.mxu1 %v3143_v28  ;;  %v417_v20 = vmax.f32 %v385_v10, 0.0  ;;  %425 = vst [vmem:[#allocation2 + $0x31] sm:$0xff] %v392_v12  ;;  %v324_v30 = vmul.f32 %v3343_v17, %v285_v25  ;;  %v347_v35 = vmul.f32 %v3343_v17, %v308_v31  ;;  %v287_v59 = vld [vmem:[%s3330_s16 + $0x38] sm:$0xff]  ;;  %v3160_v62 = vld [vmem:[%s4320_s1 + $0xa8] sm:$0xff]  }
  0x21   : > { %v744_v50 = vpack.c.bf16 %v3210_v2, %v455_v37  ;;  %v322_v2 = vmul.f32 %v3343_v17, %v283_v61  ;;  %449 = vst [vmem:[#allocation2 + $0x151] sm:$0xff] %v416_v19  ;;  %v362_v34 = vadd.f32 %v3348_v18, %v323_v26  ;;  %v3157_v39 = vld [vmem:[%s4320_s1 + $0xe0] sm:$0xff]   ;;  %v326_v61 = vmul.f32 %v3343_v17, %v287_v59  ;;  %v3161_v63 = vld [vmem:[%s4320_s1 + $0xf0] sm:$0xff]   ;;  %v3169_v3 = vld [vmem:[%s4320_s1 + $0x158] sm:$0xff]  }
  0x22   : > { %v479_v54 = vld [vmem:[#allocation2 + $0x120] sm:$0xff]  ;;  %v480_v55 = vld [vmem:[#allocation2 + $0x128] sm:$0xff]  ;;  %450 = vst [vmem:[#allocation2 + $0x159] sm:$0xff] %v417_v20  ;;  %v871_v29 = vpack.c.bf16 %v417_v20, %v416_v19  ;;  %v363_v37 = vadd.f32 %v3348_v18, %v324_v30  ;;  %v386_v41 = vadd.f32 %v3348_v18, %v347_v35  ;;  %v3165_v19 = vld [vmem:[%s4320_s1 + $0xf8] sm:$0xff]  }
  0x23   : > { %2599 = vmatpush3.bf16.msra.mxu0 %v3144_v32  ;;  %3119 = vmatpush3.bf16.msra.mxu1 %v3144_v32  ;;  %v852_v56 = vpack.c.bf16 %v480_v55, %v479_v54  ;;  %v361_v8 = vadd.f32 %v3348_v18, %v322_v2  ;;  %v457_v13 = vld [vmem:[#allocation2 + $0x18] sm:$0xff]  ;;  %v458_v14 = vld [vmem:[#allocation2 + $0x20] sm:$0xff]  ;;  %v309_v32 = vld [vmem:[%s3330_s16 + $0xe8] sm:$0xff] }
  0x24   : > { %2696 = vmatprep.subr.bf16.mxu1 %v3145_v40  ;;  %2808 = vmatprep.subr.bf16.mxu0 %v3146_v43  ;;  %v3431_v22 = vpack.c.bf16 %v458_v14, %v457_v13  ;;  %v481_v23 = vld [vmem:[#allocation2 + $0x138] sm:$0xff]  ;;  %v482_v24 = vld [vmem:[#allocation2 + $0x140] sm:$0xff]  ;;  %v348_v36 = vmul.f32 %v3343_v17, %v309_v32  ;;  %v394_v40 = vmax.f32 %v362_v34, 0.0  ;;  %v395_v43 = vmax.f32 %v363_v37, 0.0  ;;  %v3159_v55 = vld [vmem:[%s4320_s1 + $0xe8] sm:$0xff]  }
  0x25   : > { %v393_v16 = vmax.f32 %v361_v8, 0.0  ;;  %v3435_v27 = vpack.c.bf16 %v482_v24, %v481_v23  ;;  %v3158_v45 = vld [vmem:[%s4320_s1 + $0xa0] sm:$0xff]   ;;  %v3163_v13 = vld [vmem:[%s4320_s1 + $0xb0] sm:$0xff]   ;;  %v291_v23 = vld [vmem:[%s3330_s16 + $0x58] sm:$0xff] }
  0x26   : > { %1497 = vmatmul.mubr.bf16.vlgmr.msra.gmra.mrb[0].mxu0 %v744_v50  ;;  %1593 = vmatmul.mubr.bf16.vlgmr.msra.gmra.mrb[0].mxu1 %v852_v56  ;;  %v387_v42 = vadd.f32 %v3348_v18, %v348_v36  ;;  %427 = vst [vmem:[#allocation2 + $0x49] sm:$0xff] %v394_v40  ;;  %428 = vst [vmem:[#allocation2 + $0x51] sm:$0xff] %v395_v43  ;;  %v3466_v52 = vpack.c.bf16 %v395_v43, %v394_v40  ;;  %v290_v21 = vld [vmem:[%s3330_s16 + $0x50] sm:$0xff]  ;;  %v3166_v24 = vld [vmem:[%s4320_s1 + $0xb8] sm:$0xff]  }
  0x27   : > { %2697 = vmatpush3.bf16.msra.mxu1 %v3147_v46  ;;  %2809 = vmatpush3.bf16.msra.mxu0 %v3148_v47  ;;  %426 = vst [vmem:[#allocation2 + $0x39] sm:$0xff] %v393_v16  ;;  %v3437_v28 = vpack.c.bf16 %v393_v16, %v392_v12  ;;  %v418_v46 = vmax.f32 %v386_v41, 0.0  ;;  %v459_v48 = vld [vmem:[#allocation2 + $0x30] sm:$0xff]  ;;  %v519_v25 = vld [vmem:[#allocation2 + $0x2] sm:$0xff]  ;;  %v329_v30 = vmul.f32 %v3343_v17, %v290_v21 }
  0x28   : > { %2698 = vmatprep.subr.bf16.mxu1 %v3149_v51  ;;  %1504 = vmatprep.mubr.bf16.mxu0 %v3397_v57  ;;  %v419_v47 = vmax.f32 %v387_v42, 0.0  ;;  %v483_v50 = vld [vmem:[#allocation2 + $0x150] sm:$0xff]  ;;  %v330_v31 = vmul.f32 %v3343_v17, %v291_v23  ;;  %v3167_v34 = vld [vmem:[%s4320_s1 + $0x1c0] sm:$0xff]   ;;  %v293_v43 = vld [vmem:[%s3330_s16 + $0x68] sm:$0xff] }
  0x29   : > { %1600 = vmatprep.mubr.bf16.mxu1 %v862_v60  ;;  %2810 = vmatprep.subr.bf16.mxu0 %v3154_v58  ;;  %v484_v51 = vld [vmem:[#allocation2 + $0x158] sm:$0xff]  ;;  %451 = vst [vmem:[#allocation2 + $0x169] sm:$0xff] %v418_v46  ;;  %v286_v58 = vld [vmem:[%s3330_s16 + $0x30] sm:$0xff]  ;;  %v3531_v36 = vadd.f32 %v3348_v18, %v329_v30  ;;  %v292_v42 = vld [vmem:[%s3330_s16 + $0x60] sm:$0xff] }
  0x2a   : > { %452 = vst [vmem:[#allocation2 + $0x171] sm:$0xff] %v419_v47  ;;  %v3470_v54 = vpack.c.bf16 %v484_v51, %v483_v50  ;;  %v880_v56 = vpack.c.bf16 %v419_v47, %v418_v46  ;;  %v325_v60 = vmul.f32 %v3343_v17, %v286_v58  ;;  %v520_v26 = vld [vmem:[#allocation2 + $0xa] sm:$0xff]  ;;  %v369_v37 = vadd.f32 %v3348_v18, %v330_v31  ;;  %v521_v51 = vld [vmem:[#allocation2 + $0x1a] sm:$0xff] }
  0x2b   : > { %2699 = vmatpush3.bf16.msra.mxu1 %v3150_v1  ;;  %2811 = vmatpush3.bf16.msra.mxu0 %v3156_v5  ;;  %v365_v1 = vadd.f32 %v3348_v18, %v326_v61  ;;  %v400_v40 = vmax.f32 %v3531_v36, 0.0  ;;  %v746_v46 = vpack.c.bf16 %v520_v26, %v519_v25  ;;  %v332_v47 = vmul.f32 %v3343_v17, %v293_v43  ;;  %v3175_v59 = vld [vmem:[%s4320_s1 + $0x168] sm:$0xff]   ;;  %v295_v61 = vld [vmem:[%s3330_s16 + $0x78] sm:$0xff]  ;;  %v3178_v23 = vld [vmem:[%s4320_s1 + $0x190] sm:$0xff]  }
  0x2c   : > { %2700 = vmatprep.subr.bf16.mxu1 %v3151_v7  ;;  %2812 = vmatprep.subr.bf16.mxu0 %v3162_v38  ;;  %v364_v0 = vadd.f32 %v3348_v18, %v325_v60  ;;  %v3170_v7 = vld [vmem:[%s4320_s1 + $0x118] sm:$0xff]   ;;  %v401_v41 = vmax.f32 %v369_v37, 0.0  ;;  %v294_v60 = vld [vmem:[%s3330_s16 + $0x70] sm:$0xff] }
  0x2d   : > { %v461_v2 = vld [vmem:[#allocation2 + $0x48] sm:$0xff]  ;;  %v462_v4 = vld [vmem:[#allocation2 + $0x50] sm:$0xff]  ;;  %v397_v6 = vmax.f32 %v365_v1, 0.0  ;;  %433 = vst [vmem:[#allocation2 + $0x91] sm:$0xff] %v400_v40  ;;  %v3557_v58 = vadd.f32 %v3348_v18, %v332_v47  ;;  %v3181_v43 = vld [vmem:[%s4320_s1 + $0x1d8] sm:$0xff]  }
  0x2e   : > { %1505 = vmatmul.mubr.bf16.gmra.mrb[4].mxu0 %v3431_v22  ;;  %1601 = vmatmul.mubr.bf16.gmra.mrb[4].mxu1 %v3435_v27  ;;  %v460_v49 = vld [vmem:[#allocation2 + $0x38] sm:$0xff]  ;;  %v396_v5 = vmax.f32 %v364_v0, 0.0  ;;  %v3496_v8 = vpack.c.bf16 %v462_v4, %v461_v2  ;;  %434 = vst [vmem:[#allocation2 + $0x99] sm:$0xff] %v401_v41  ;;  %v3176_v1 = vld [vmem:[%s4320_s1 + $0x128] sm:$0xff]   ;;  %v333_v2 = vmul.f32 %v3343_v17, %v294_v60  ;;  %v3179_v26 = vld [vmem:[%s4320_s1 + $0x170] sm:$0xff]  }
  0x2f   : > { %2701 = vmatpush3.bf16.msra.mxu1 %v3152_v11  ;;  %1512 = vmatprep.mubr.bf16.mxu0 %v3437_v28  ;;  %v3468_v53 = vpack.c.bf16 %v460_v49, %v459_v48  ;;  %v288_v11 = vld [vmem:[%s3330_s16 + $0x40] sm:$0xff]  ;;  %430 = vst [vmem:[#allocation2 + $0x69] sm:$0xff] %v397_v6  ;;  %v403_v0 = vmax.f32 %v3557_v58, 0.0  ;;  %v3174_v4 = vld [vmem:[%s4320_s1 + $0x188] sm:$0xff]   ;;  %v3599_v21 = vpack.c.bf16 %v401_v41, %v400_v40  ;;  %v3180_v30 = vld [vmem:[%s4320_s1 + $0x130] sm:$0xff]  }
  0x30   : > { %2702 = vmatprep.subr.bf16.mxu1 %v3153_v15  ;;  %1608 = vmatprep.mubr.bf16.mxu1 %v871_v29  ;;  %v485_v9 = vld [vmem:[#allocation2 + $0x168] sm:$0xff]  ;;  %429 = vst [vmem:[#allocation2 + $0x61] sm:$0xff] %v396_v5  ;;  %v3504_v14 = vpack.c.bf16 %v397_v6, %v396_v5  ;;  %v327_v16 = vmul.f32 %v3343_v17, %v288_v11  ;;  %v3168_v49 = vld [vmem:[%s4320_s1 + $0x180] sm:$0xff]   ;;  %v298_v31 = vld [vmem:[%s3330_s16 + $0x90] sm:$0xff] }
  0x31   : > { %2813 = vmatpush3.bf16.msra.mxu0 %v3164_v44  ;;  %v486_v10 = vld [vmem:[#allocation2 + $0x170] sm:$0xff]  ;;  %v289_v15 = vld [vmem:[%s3330_s16 + $0x48] sm:$0xff]  ;;  %436 = vst [vmem:[#allocation2 + $0xb1] sm:$0xff] %v403_v0  ;;  %v3582_v6 = vadd.f32 %v3348_v18, %v333_v2  ;;  %v296_v11 = vld [vmem:[%s3330_s16 + $0x80] sm:$0xff]  ;;  %v337_v36 = vmul.f32 %v3343_v17, %v298_v31 }
  0x32   : > { %2814 = vmatprep.subr.bf16.mxu0 %v3169_v3  ;;  %v3499_v12 = vpack.c.bf16 %v486_v10, %v485_v9  ;;  %v328_v20 = vmul.f32 %v3343_v17, %v289_v15  ;;  %v366_v29 = vadd.f32 %v3348_v18, %v327_v16  ;;  %v334_v3 = vmul.f32 %v3343_v17, %v295_v61  ;;  %v3177_v9 = vld [vmem:[%s4320_s1 + $0x1d0] sm:$0xff]   ;;  %v3183_v47 = vld [vmem:[%s4320_s1 + $0x178] sm:$0xff]  }
  0x33   : > { %2703 = vmatpush3.bf16.msra.mxu1 %v3155_v33  ;;  %v3171_v33 = vld [vmem:[%s4320_s1 + $0x160] sm:$0xff]   ;;  %v404_v16 = vmax.f32 %v3582_v6, 0.0  ;;  %v3634_v41 = vadd.f32 %v3348_v18, %v337_v36  ;;  %v525_v61 = vld [vmem:[#allocation2 + $0x4a] sm:$0xff] }
  0x34   : > { %2704 = vmatprep.subr.bf16.mxu1 %v3157_v39  ;;  %v367_v32 = vadd.f32 %v3348_v18, %v328_v20  ;;  %v398_v35 = vmax.f32 %v366_v29, 0.0  ;;  %v3173_v39 = vld [vmem:[%s4320_s1 + $0x120] sm:$0xff]   ;;  %v335_v20 = vmul.f32 %v3343_v17, %v296_v11 }
  0x35   : > { %2815 = vmatpush3.bf16.msra.mxu0 %v3170_v7  ;;  %v3585_v7 = vadd.f32 %v3348_v18, %v334_v3  ;;  %437 = vst [vmem:[#allocation2 + $0xc1] sm:$0xff] %v404_v16  ;;  %v3689_v3 = vld [vmem:[%s4320_s1 + $0x200] sm:$0xff]  }
  0x36   : > { %1513 = vmatmul.mubr.bf16.gmra.mrb[8].mxu0 %v3468_v53  ;;  %1609 = vmatmul.mubr.bf16.gmra.mrb[8].mxu1 %v3470_v54  ;;  %v399_v38 = vmax.f32 %v367_v32, 0.0  ;;  %431 = vst [vmem:[#allocation2 + $0x79] sm:$0xff] %v398_v35  ;;  %v3610_v25 = vadd.f32 %v3348_v18, %v335_v20  ;;  %v299_v32 = vld [vmem:[%s3330_s16 + $0x98] sm:$0xff]  ;;  %v3188_v20 = vld [vmem:[%s4320_s1 + $0x1e8] sm:$0xff]  }
  0x37   : > { %2705 = vmatpush3.bf16.msra.mxu1 %v3158_v45  ;;  %1520 = vmatprep.mubr.bf16.mxu0 %v3466_v52  ;;  %v463_v44 = vld [vmem:[#allocation2 + $0x60] sm:$0xff]  ;;  %v464_v45 = vld [vmem:[#allocation2 + $0x68] sm:$0xff]  ;;  %v338_v37 = vmul.f32 %v3343_v17, %v299_v32  ;;  %v3193_v32 = vld [vmem:[%s4320_s1 + $0x1b0] sm:$0xff]  }
  0x38   : > { %2706 = vmatprep.subr.bf16.mxu1 %v3159_v55  ;;  %1616 = vmatprep.mubr.bf16.mxu1 %v880_v56  ;;  %432 = vst [vmem:[#allocation2 + $0x81] sm:$0xff] %v399_v38  ;;  %v3543_v48 = vpack.c.bf16 %v464_v45, %v463_v44  ;;  %v3548_v50 = vpack.c.bf16 %v399_v38, %v398_v35  ;;  %v3172_v55 = vld [vmem:[%s4320_s1 + $0x1c8] sm:$0xff]   ;;  %v406_v35 = vmax.f32 %v3610_v25, 0.0  ;;  %v467_v38 = vld [vmem:[#allocation2 + $0x90] sm:$0xff]  ;;  %v3194_v25 = vld [vmem:[%s4320_s1 + $0x1f8] sm:$0xff]  }
  0x39   : > { %2816 = vmatprep.subr.bf16.mxu0 %v3171_v33  ;;  %v523_v33 = vld [vmem:[#allocation2 + $0x32] sm:$0xff]  ;;  %v527_v6 = vld [vmem:[#allocation2 + $0x62] sm:$0xff] }
  0x3a   : > { %2817 = vmatpush3.bf16.msra.mxu0 %v3173_v39  ;;  %v468_v39 = vld [vmem:[#allocation2 + $0x98] sm:$0xff]  ;;  %439 = vst [vmem:[#allocation2 + $0xd9] sm:$0xff] %v406_v35 }
  0x3b   : > { %2707 = vmatpush3.bf16.msra.mxu1 %v3160_v62  ;;  %v522_v62 = vld [vmem:[#allocation2 + $0x22] sm:$0xff]  ;;  %2818 = vmatprep.subr.bf16.mxu0 %v3175_v59  ;;  %v3647_v44 = vpack.c.bf16 %v468_v39, %v467_v38  ;;  %v311_v38 = vld [vmem:[%s3330_s16 + $0xf8] sm:$0xff] }
  0x3c   : > { %2708 = vmatprep.subr.bf16.mxu1 %v3161_v63  ;;  %v301_v59 = vld [vmem:[%s3330_s16 + $0xa8] sm:$0xff] }
  0x3d   : > { %v465_v5 = vld [vmem:[#allocation2 + $0x78] sm:$0xff]  ;;  %v340_v58 = vmul.f32 %v3343_v17, %v301_v59 }
  0x3e   : > { %1521 = vmatmul.mubr.bf16.gmra.mrb[12].mxu0 %v3496_v8  ;;  %1617 = vmatmul.mubr.bf16.gmra.mrb[12].mxu1 %v3499_v12 }
  0x3f   : > { %2709 = vmatpush3.bf16.msra.mxu1 %v3163_v13  ;;  %1528 = vmatprep.mubr.bf16.mxu0 %v3504_v14  ;;  %v466_v10 = vld [vmem:[#allocation2 + $0x80] sm:$0xff]  ;;  %v297_v13 = vld [vmem:[%s3330_s16 + $0x88] sm:$0xff]  ;;  %v3684_v2 = vadd.f32 %v3348_v18, %v340_v58 }
  0x40   : > { %2710 = vmatprep.subr.bf16.mxu1 %v3165_v19  ;;  %1657 = vmatprep.mubr.bf16.mxu1 %v3431_v22  ;;  %v331_v22 = vmul.f32 %v3343_v17, %v292_v42  ;;  %v3594_v15 = vpack.c.bf16 %v466_v10, %v465_v5  ;;  %v405_v19 = vmax.f32 %v3585_v7, 0.0  ;;  %v3637_v42 = vadd.f32 %v3348_v18, %v338_v37  ;;  %v3190_v7 = vld [vmem:[%s4320_s1 + $0x1a8] sm:$0xff]   ;;  %v310_v37 = vld [vmem:[%s3330_s16 + $0xf0] sm:$0xff] }
  0x41   : > { %2819 = vmatpush3.bf16.msra.mxu0 %v3176_v1  ;;  %v411_v5 = vmax.f32 %v3684_v2, 0.0  ;;  %v530_v36 = vld [vmem:[#allocation2 + $0x82] sm:$0xff]  ;;  %v349_v39 = vmul.f32 %v3343_v17, %v310_v37 }
  0x42   : > { %v3554_v56 = vadd.f32 %v3348_v18, %v331_v22  ;;  %438 = vst [vmem:[#allocation2 + $0xc9] sm:$0xff] %v405_v19  ;;  %2820 = vmatprep.subr.bf16.mxu0 %v3179_v26  ;;  %v409_v22 = vmax.f32 %v3637_v42, 0.0  ;;  %v532_v42 = vld [vmem:[#allocation2 + $0x9a] sm:$0xff] }
  0x43   : > { %2711 = vmatpush3.bf16.msra.mxu1 %v3166_v24  ;;  %v336_v24 = vmul.f32 %v3343_v17, %v297_v13  ;;  %v3705_v13 = vpack.c.bf16 %v405_v19, %v404_v16  ;;  %444 = vst [vmem:[#allocation2 + $0x111] sm:$0xff] %v411_v5  ;;  %v471_v16 = vld [vmem:[#allocation2 + $0xc0] sm:$0xff] }
  0x44   : > { %2920 = vmatprep.subr.bf16.mxu1 %v3167_v34  ;;  %v402_v63 = vmax.f32 %v3554_v56, 0.0  ;;  %v524_v34 = vld [vmem:[#allocation2 + $0x3a] sm:$0xff]  ;;  %442 = vst [vmem:[#allocation2 + $0xf9] sm:$0xff] %v409_v22 }
  0x45   : > { %v3616_v29 = vadd.f32 %v3348_v18, %v336_v24  ;;  %2821 = vmatpush3.bf16.msra.mxu0 %v3180_v30  ;;  %v3649_v45 = vpack.c.bf16 %v524_v34, %v523_v33  ;;  %v3191_v24 = vld [vmem:[%s4320_s1 + $0x1f0] sm:$0xff]   ;;  %v473_v33 = vld [vmem:[#allocation2 + $0xd8] sm:$0xff] }
  0x46   : > { %1529 = vmatmul.mubr.bf16.gmra.mrb[16].mxu0 %v3543_v48  ;;  %1658 = vmatmul.mubr.bf16.vlgmr.msra.gmra.mrb[16].mxu1 %v746_v46  ;;  %435 = vst [vmem:[#allocation2 + $0xa9] sm:$0xff] %v402_v63  ;;  %v408_v46 = vmax.f32 %v3634_v41, 0.0  ;;  %v529_v34 = vld [vmem:[#allocation2 + $0x7a] sm:$0xff] }
  0x47   : > { %2921 = vmatpush3.bf16.msra.mxu1 %v3168_v49  ;;  %1536 = vmatprep.mubr.bf16.mxu0 %v3548_v50  ;;  %v407_v40 = vmax.f32 %v3616_v29, 0.0  ;;  %v3184_v49 = vld [vmem:[%s4320_s1 + $0x138] sm:$0xff]  }
  0x48   : > { %1665 = vmatprep.mubr.bf16.mxu1 %v3468_v53  ;;  %2922 = vmatprep.subr.bf16.mxu1 %v3172_v55  ;;  %v3590_v53 = vpack.c.bf16 %v522_v62, %v521_v51  ;;  %v3663_v51 = vpack.c.bf16 %v403_v0, %v402_v63  ;;  %441 = vst [vmem:[#allocation2 + $0xf1] sm:$0xff] %v408_v46  ;;  %v300_v55 = vld [vmem:[%s3330_s16 + $0xa0] sm:$0xff]  ;;  %v526_v62 = vld [vmem:[#allocation2 + $0x52] sm:$0xff] }
  0x49   : > { %440 = vst [vmem:[#allocation2 + $0xe1] sm:$0xff] %v407_v40  ;;  %2822 = vmatprep.subr.bf16.mxu0 %v3183_v47  ;;  %v339_v56 = vmul.f32 %v3343_v17, %v300_v55  ;;  %v3185_v63 = vld [vmem:[%s4320_s1 + $0x1e0] sm:$0xff]   ;;  %v3698_v11 = vpack.c.bf16 %v526_v62, %v525_v61  ;;  %v472_v19 = vld [vmem:[#allocation2 + $0xc8] sm:$0xff]  ;;  %v3732_v31 = vpack.c.bf16 %v407_v40, %v406_v35  ;;  %v3196_v35 = vld [vmem:[%s4320_s1 + $0x1b8] sm:$0xff]  }
  0x4a   : > { %2823 = vmatpush3.bf16.msra.mxu0 %v3184_v49  ;;  %v3724_v26 = vpack.c.bf16 %v472_v19, %v471_v16  ;;  %v3759_v47 = vpack.c.bf16 %v409_v22, %v408_v46  ;;  %v388_v49 = vadd.f32 %v3348_v18, %v349_v39  ;;  %v535_v2 = vld [vmem:[#allocation2 + $0xc2] sm:$0xff] }
  0x4b   : > { %2923 = vmatpush3.bf16.msra.mxu1 %v3174_v4  ;;  %v3681_v1 = vadd.f32 %v3348_v18, %v339_v56  ;;  %3056 = vmatprep.subr.bf16.mxu0 %v3689_v3  ;;  %v573_v19 = vld [vmem:[#allocation2 + $0x120] sm:$0xff] }
  0x4c   : > { %2924 = vmatprep.subr.bf16.mxu1 %v3177_v9  ;;  %v3187_v9 = vld [vmem:[%s4320_s1 + $0x1a0] sm:$0xff]   ;;  %v420_v59 = vmax.f32 %v388_v49, 0.0 }
  0x4d   : > { %v469_v60 = vld [vmem:[#allocation2 + $0xa8] sm:$0xff]  ;;  %v470_v0 = vld [vmem:[#allocation2 + $0xb0] sm:$0xff]  ;;  %v410_v4 = vmax.f32 %v3681_v1, 0.0  ;;  %v548_v49 = vld [vmem:[#allocation2 + $0x15a] sm:$0xff] }
  0x4e   : > { %1537 = vmatmul.mubr.bf16.gmra.mrb[20].mxu0 %v3594_v15  ;;  %1666 = vmatmul.mubr.bf16.gmra.mrb[20].mxu1 %v3590_v53  ;;  %v3696_v10 = vpack.c.bf16 %v470_v0, %v469_v60  ;;  %v531_v60 = vld [vmem:[#allocation2 + $0x92] sm:$0xff]  ;;  %453 = vst [vmem:[#allocation2 + $0x181] sm:$0xff] %v420_v59  ;;  %v533_v62 = vld [vmem:[#allocation2 + $0xaa] sm:$0xff]  ;;  %v546_v39 = vld [vmem:[#allocation2 + $0x142] sm:$0xff] }
  0x4f   : > { %1544 = vmatprep.mubr.bf16.mxu0 %v3599_v21  ;;  %1673 = vmatprep.mubr.bf16.mxu1 %v3496_v8  ;;  %v3182_v8 = vld [vmem:[%s4320_s1 + $0x198] sm:$0xff]   ;;  %443 = vst [vmem:[#allocation2 + $0x109] sm:$0xff] %v410_v4  ;;  %v3769_v22 = vpack.c.bf16 %v532_v42, %v531_v60 }
  0x50   : > { %2925 = vmatpush3.bf16.msra.mxu1 %v3178_v23  ;;  %v528_v23 = vld [vmem:[#allocation2 + $0x6a] sm:$0xff]  ;;  %v474_v29 = vld [vmem:[#allocation2 + $0xe0] sm:$0xff]  ;;  %v476_v41 = vld [vmem:[#allocation2 + $0xf8] sm:$0xff] }
  0x51   : > { %2926 = vmatprep.subr.bf16.mxu1 %v3181_v43  ;;  %v3726_v30 = vpack.c.bf16 %v528_v23, %v527_v6  ;;  %v3750_v40 = vpack.c.bf16 %v474_v29, %v473_v33  ;;  %v3752_v43 = vpack.c.bf16 %v530_v36, %v529_v34  ;;  %v537_v6 = vld [vmem:[#allocation2 + $0xda] sm:$0xff]  ;;  %v574_v23 = vld [vmem:[#allocation2 + $0x128] sm:$0xff]  ;;  %v542_v34 = vld [vmem:[#allocation2 + $0x112] sm:$0xff] }
  0x52   : > { %v3818_v33 = vpack.c.bf16 %v574_v23, %v573_v19  ;;  %v3199_v36 = vld [vmem:[%s4320_s1 + $0x230] sm:$0xff]   ;;  %v543_v29 = vld [vmem:[#allocation2 + $0x122] sm:$0xff] }
  0x53   : > { %v608_v19 = vld [vmem:[#allocation2 + $0x141] sm:$0xff] }
  0x54   : > { %2927 = vmatpush3.bf16.msra.mxu1 %v3182_v8  ;;  %v350_v8 = vmul.f32 %v3343_v17, %v311_v38  ;;  %v475_v17 = vld [vmem:[#allocation2 + $0xf0] sm:$0xff]  ;;  %v545_v38 = vld [vmem:[#allocation2 + $0x13a] sm:$0xff] }
  0x55   : > { %2928 = vmatprep.subr.bf16.mxu1 %v3185_v63  ;;  %v3767_v46 = vpack.c.bf16 %v476_v41, %v475_v17  ;;  %v534_v63 = vld [vmem:[#allocation2 + $0xb2] sm:$0xff] }
  0x56   : > { %1545 = vmatmul.mubr.bf16.gmra.mrb[24].mxu0 %v3647_v44  ;;  %1674 = vmatmul.mubr.bf16.gmra.mrb[24].mxu1 %v3649_v45  ;;  %v389_v55 = vadd.f32 %v3348_v18, %v350_v8  ;;  %v3775_v18 = vpack.c.bf16 %v411_v5, %v410_v4  ;;  %v477_v56 = vld [vmem:[#allocation2 + $0x108] sm:$0xff]  ;;  %v478_v58 = vld [vmem:[#allocation2 + $0x110] sm:$0xff]  ;;  %v681_v41 = vld [vmem:[#allocation2 + $0x39] sm:$0xff] }
  0x57   : > { %1552 = vmatprep.mubr.bf16.mxu0 %v3663_v51  ;;  %1681 = vmatprep.mubr.bf16.mxu1 %v3543_v48  ;;  %v3781_v0 = vpack.c.bf16 %v478_v58, %v477_v56  ;;  %v536_v4 = vld [vmem:[#allocation2 + $0xca] sm:$0xff]  ;;  %v547_v8 = vld [vmem:[#allocation2 + $0x152] sm:$0xff] }
  0x58   : > { %2929 = vmatpush3.bf16.msra.mxu1 %v3187_v9  ;;  %v421_v61 = vmax.f32 %v389_v55, 0.0  ;;  %v3783_v9 = vpack.c.bf16 %v534_v63, %v533_v62  ;;  %v3791_v5 = vpack.c.bf16 %v536_v4, %v535_v2  ;;  %v581_v55 = vld [vmem:[#allocation2 + $0x180] sm:$0xff]  ;;  %v3851_v60 = vpack.c.bf16 %v548_v49, %v547_v8  ;;  %v680_v17 = vld [vmem:[#allocation2 + $0x31] sm:$0xff]  ;;  %v682_v63 = vld [vmem:[#allocation2 + $0x49] sm:$0xff] }
  0x59   : > { %2930 = vmatprep.subr.bf16.mxu1 %v3188_v20  ;;  %v3189_v20 = vld [vmem:[%s4320_s1 + $0x208] sm:$0xff]   ;;  %v751_v62 = vpack.c.bf16 %v681_v41, %v680_v17  ;;  %v648_v56 = vld [vmem:[#allocation2 + $0x30] sm:$0xff]  ;;  %v649_v58 = vld [vmem:[#allocation2 + $0x38] sm:$0xff] }
  0x5a   : > { %454 = vst [vmem:[#allocation2 + $0x189] sm:$0xff] %v421_v61  ;;  %v3785_v1 = vpack.c.bf16 %v421_v61, %v420_v59  ;;  %v549_v61 = vld [vmem:[#allocation2 + $0x16a] sm:$0xff]  ;;  %v750_v4 = vpack.c.bf16 %v649_v58, %v648_v56 }
  0x5b   : > { %v683_v2 = vld [vmem:[#allocation2 + $0x51] sm:$0xff] }
  0x5c   : > { %2931 = vmatpush3.bf16.msra.mxu1 %v3190_v7  ;;  %v538_v7 = vld [vmem:[#allocation2 + $0xe2] sm:$0xff] }
  0x5d   : > { %2932 = vmatprep.subr.bf16.mxu1 %v3191_v24  ;;  %v3804_v16 = vpack.c.bf16 %v538_v7, %v537_v6  ;;  %v3197_v24 = vld [vmem:[%s4320_s1 + $0x220] sm:$0xff]   ;;  %v650_v6 = vld [vmem:[#allocation2 + $0x48] sm:$0xff]  ;;  %v651_v7 = vld [vmem:[#allocation2 + $0x50] sm:$0xff] }
  0x5e   : > { %1553 = vmatmul.mubr.bf16.gmra.mrb[28].mxu0 %v3696_v10  ;;  %1682 = vmatmul.mubr.bf16.gmra.mrb[28].mxu1 %v3698_v11 }
  0x5f   : > { %1560 = vmatprep.mubr.bf16.mxu0 %v3705_v13  ;;  %1689 = vmatprep.mubr.bf16.mxu1 %v3594_v15 }
  0x60   : > { %2933 = vmatpush3.bf16.msra.mxu1 %v3193_v32 }
  0x61   : > { %2934 = vmatprep.subr.bf16.mxu1 %v3194_v25  ;;  %v582_v59 = vld [vmem:[#allocation2 + $0x188] sm:$0xff] }
  0x64   : > { %2935 = vmatpush3.bf16.msra.mxu1 %v3196_v35  ;;  %v544_v35 = vld [vmem:[#allocation2 + $0x12a] sm:$0xff] }
  0x65   : > { %v3839_v37 = vpack.c.bf16 %v544_v35, %v543_v29 }
  0x66   : > { %1561 = vmatmul.mubr.bf16.gmra.mrb[32].mxu0 %v3724_v26  ;;  %1690 = vmatmul.mubr.bf16.gmra.mrb[32].mxu1 %v3726_v30 }
  0x67   : > { %1568 = vmatprep.mubr.bf16.mxu0 %v3732_v31  ;;  %1697 = vmatprep.mubr.bf16.mxu1 %v3647_v44 }
  0x6e   : > { %1569 = vmatmul.mubr.bf16.gmra.mrb[36].mxu0 %v3750_v40  ;;  %1698 = vmatmul.mubr.bf16.gmra.mrb[36].mxu1 %v3752_v43 }
  0x6f   : > { %1576 = vmatprep.mubr.bf16.mxu0 %v3759_v47  ;;  %1705 = vmatprep.mubr.bf16.mxu1 %v3696_v10 }
  0x76   : > { %1577 = vmatmul.mubr.bf16.gmra.mrb[40].mxu0 %v3767_v46  ;;  %1706 = vmatmul.mubr.bf16.gmra.mrb[40].mxu1 %v3769_v22 }
  0x77   : > { %1584 = vmatprep.mubr.bf16.mxu0 %v3775_v18  ;;  %1713 = vmatprep.mubr.bf16.mxu1 %v3724_v26 }
  0x7e   : > { %1585 = vmatmul.mubr.bf16.gmra.mrb[44].mxu0 %v3781_v0  ;;  %1714 = vmatmul.mubr.bf16.gmra.mrb[44].mxu1 %v3783_v9 }
  0x7f   : > { %1721 = vmatprep.mubr.bf16.mxu1 %v3750_v40  ;;  %1818 = vmatprep.mubr.bf16.mxu0 %v3590_v53  ;;  %v3192_v53 = vld [vmem:[%s4320_s1 + $0x210] sm:$0xff]  }
  0x86   : > { %1722 = vmatmul.mubr.bf16.gmra.mrb[48].mxu1 %v3791_v5  ;;  %1819 = vmatmul.mubr.bf16.vlgmr.msra.gmra.mrb[48].mxu0 %v3397_v57  ;;  %v3195_v57 = vld [vmem:[%s4320_s1 + $0x218] sm:$0xff]  }
  0x87   : > { %3057 = vmatpush3.bf16.msra.mxu0 %v3689_v3  ;;  %1729 = vmatprep.mubr.bf16.mxu1 %v3767_v46  ;;  %v540_v3 = vld [vmem:[#allocation2 + $0xfa] sm:$0xff] }
  0x88   : > { %1826 = vmatprep.mubr.bf16.mxu0 %v3649_v45  ;;  %3058 = vmatprep.subr.bf16.mxu0 %v3189_v20  ;;  %v539_v45 = vld [vmem:[#allocation2 + $0xf2] sm:$0xff] }
  0x89   : > { %v3816_v32 = vpack.c.bf16 %v540_v3, %v539_v45  ;;  %v606_v45 = vld [vmem:[#allocation2 + $0x129] sm:$0xff] }
  0x8b   : > { %3059 = vmatpush3.bf16.msra.mxu0 %v3189_v20  ;;  %v760_v20 = vpack.c.bf16 %v683_v2, %v682_v63 }
  0x8c   : > { %3060 = vmatprep.subr.bf16.mxu0 %v3192_v53 }
  0x8e   : > { %1730 = vmatmul.mubr.bf16.gmra.mrb[52].mxu1 %v3804_v16  ;;  %1827 = vmatmul.mubr.bf16.gmra.mrb[52].mxu0 %v3437_v28  ;;  %v3198_v28 = vld [vmem:[%s4320_s1 + $0x228] sm:$0xff]  }
  0x8f   : > { %1737 = vmatprep.mubr.bf16.mxu1 %v3781_v0  ;;  %1834 = vmatprep.mubr.bf16.mxu0 %v3698_v11  ;;  %v541_v11 = vld [vmem:[#allocation2 + $0x10a] sm:$0xff] }
  0x90   : > { %3061 = vmatpush3.bf16.msra.mxu0 %v3192_v53  ;;  %v3830_v25 = vpack.c.bf16 %v542_v34, %v541_v11  ;;  %v759_v53 = vpack.c.bf16 %v651_v7, %v650_v6 }
  0x91   : > { %3062 = vmatprep.subr.bf16.mxu0 %v3195_v57 }
  0x94   : > { %3063 = vmatpush3.bf16.msra.mxu0 %v3195_v57  ;;  %v605_v57 = vld [vmem:[#allocation2 + $0x121] sm:$0xff] }
  0x95   : > { %3064 = vmatprep.subr.bf16.mxu0 %v3197_v24  ;;  %v3873_v3 = vpack.c.bf16 %v606_v45, %v605_v57 }
  0x96   : > { %1738 = vmatmul.mubr.bf16.gmra.mrb[56].mxu1 %v3816_v32  ;;  %1835 = vmatmul.mubr.bf16.gmra.mrb[56].mxu0 %v3466_v52  ;;  %v3200_v52 = vld [vmem:[%s4320_s1 + $0x238] sm:$0xff]  }
  0x97   : > { %1745 = vmatprep.mubr.bf16.mxu1 %v3818_v33  ;;  %1842 = vmatprep.mubr.bf16.mxu0 %v3726_v30 }
  0x98   : > { %3065 = vmatpush3.bf16.msra.mxu0 %v3197_v24 }
  0x99   : > { %3066 = vmatprep.subr.bf16.mxu0 %v3198_v28 }
  0x9c   : > { %3067 = vmatpush3.bf16.msra.mxu0 %v3198_v28  ;;  %v645_v28 = vld [vmem:[#allocation2 + $0x182] sm:$0xff] }
  0x9d   : > { %3068 = vmatprep.subr.bf16.mxu0 %v3199_v36 }
  0x9e   : > { %1746 = vmatmul.mubr.bf16.gmra.mrb[60].mxu1 %v3830_v25  ;;  %1843 = vmatmul.mubr.bf16.gmra.mrb[60].mxu0 %v3504_v14 }
  0x9f   : > { %1753 = vmatprep.mubr.bf16.mxu1 %v3435_v27  ;;  %1850 = vmatprep.mubr.bf16.mxu0 %v3752_v43  ;;  %v3845_v27 = vpack.c.bf16 %v546_v39, %v545_v38 }
  0xa0   : > { %3069 = vmatpush3.bf16.msra.mxu0 %v3199_v36 }
  0xa1   : > { %3070 = vmatprep.subr.bf16.mxu0 %v3200_v52 }
  0xa4   : > { %3071 = vmatpush3.bf16.msra.mxu0 %v3200_v52 }
  0xa6   : > { %1754 = vmatmul.mubr.bf16.gmra.mrb[64].mxu1 %v3839_v37  ;;  %1851 = vmatmul.mubr.bf16.gmra.mrb[64].mxu0 %v3548_v50 }
  0xa7   : > { %1761 = vmatprep.mubr.bf16.mxu1 %v3470_v54  ;;  %1858 = vmatprep.mubr.bf16.mxu0 %v3769_v22  ;;  %v3853_v54 = vpack.c.bf16 %v582_v59, %v581_v55 }
  0xae   : > { %1762 = vmatmul.mubr.bf16.gmra.mrb[68].mxu1 %v3845_v27  ;;  %1859 = vmatmul.mubr.bf16.gmra.mrb[68].mxu0 %v3599_v21 }
  0xaf   : > { %1769 = vmatprep.mubr.bf16.mxu1 %v3499_v12  ;;  %1866 = vmatprep.mubr.bf16.mxu0 %v3783_v9  ;;  %v550_v12 = vld [vmem:[#allocation2 + $0x172] sm:$0xff] }
  0xb0   : > { %v3859_v42 = vpack.c.bf16 %v550_v12, %v549_v61  ;;  %v715_v12 = vld [vmem:[#allocation2 + $0x52] sm:$0xff] }
  0xb6   : > { %1770 = vmatmul.mubr.bf16.gmra.mrb[72].mxu1 %v3851_v60  ;;  %1867 = vmatmul.mubr.bf16.gmra.mrb[72].mxu0 %v3663_v51 }
  0xb7   : > { %1777 = vmatprep.mubr.bf16.mxu1 %v3853_v54  ;;  %1874 = vmatprep.mubr.bf16.mxu0 %v3791_v5 }
  0xbe   : > { %1778 = vmatmul.mubr.bf16.gmra.mrb[76].mxu1 %v3859_v42  ;;  %1875 = vmatmul.mubr.bf16.gmra.mrb[76].mxu0 %v3705_v13 }
  0xbf   : > { %1882 = vmatprep.mubr.bf16.mxu0 %v3804_v16  ;;  %1979 = vmatprep.mubr.bf16.mxu1 %v751_v62 }
  0xc6   : > { %1883 = vmatmul.mubr.bf16.gmra.mrb[80].mxu0 %v3732_v31  ;;  %1980 = vmatmul.mubr.bf16.vlgmr.msra.gmra.mrb[80].mxu1 %v750_v4 }
  0xc7   : > { %1890 = vmatprep.mubr.bf16.mxu0 %v3816_v32  ;;  %1987 = vmatprep.mubr.bf16.mxu1 %v760_v20 }
  0xce   : > { %1891 = vmatmul.mubr.bf16.gmra.mrb[84].mxu0 %v3759_v47  ;;  %1988 = vmatmul.mubr.bf16.gmra.mrb[84].mxu1 %v759_v53 }
  0xcf   : > { %1898 = vmatprep.mubr.bf16.mxu0 %v3830_v25  ;;  %1995 = vmatprep.mubr.bf16.mxu1 %v3504_v14  ;;  %v607_v14 = vld [vmem:[#allocation2 + $0x139] sm:$0xff] }
  0xd0   : > { %v3879_v23 = vpack.c.bf16 %v608_v19, %v607_v14 }
  0xd6   : > { %1899 = vmatmul.mubr.bf16.gmra.mrb[88].mxu0 %v3775_v18  ;;  %1996 = vmatmul.mubr.bf16.gmra.mrb[88].mxu1 %v3543_v48  ;;  %v609_v48 = vld [vmem:[#allocation2 + $0x151] sm:$0xff] }
  0xd7   : > { %1906 = vmatprep.mubr.bf16.mxu0 %v3839_v37  ;;  %2003 = vmatprep.mubr.bf16.mxu1 %v3548_v50  ;;  %v610_v50 = vld [vmem:[#allocation2 + $0x159] sm:$0xff] }
  0xd8   : > { %v3885_v24 = vpack.c.bf16 %v610_v50, %v609_v48 }
  0xde   : > { %1907 = vmatmul.mubr.bf16.gmra.mrb[92].mxu0 %v3873_v3  ;;  %2004 = vmatmul.mubr.bf16.gmra.mrb[92].mxu1 %v3594_v15  ;;  %v611_v15 = vld [vmem:[#allocation2 + $0x169] sm:$0xff] }
  0xdf   : > { %1914 = vmatprep.mubr.bf16.mxu0 %v3845_v27  ;;  %2011 = vmatprep.mubr.bf16.mxu1 %v3599_v21  ;;  %v612_v21 = vld [vmem:[#allocation2 + $0x171] sm:$0xff] }
  0xe0   : > { %v3891_v11 = vpack.c.bf16 %v612_v21, %v611_v15 }
  0xe6   : > { %1915 = vmatmul.mubr.bf16.gmra.mrb[96].mxu0 %v3879_v23  ;;  %2012 = vmatmul.mubr.bf16.gmra.mrb[96].mxu1 %v3647_v44  ;;  %v646_v44 = vld [vmem:[#allocation2 + $0x18a] sm:$0xff] }
  0xe7   : > { %1922 = vmatprep.mubr.bf16.mxu0 %v3851_v60  ;;  %2019 = vmatprep.mubr.bf16.mxu1 %v3663_v51  ;;  %v3893_v34 = vpack.c.bf16 %v646_v44, %v645_v28  ;;  %v712_v51 = vld [vmem:[#allocation2 + $0x32] sm:$0xff] }
  0xee   : > { %1923 = vmatmul.mubr.bf16.gmra.mrb[100].mxu0 %v3885_v24  ;;  %2020 = vmatmul.mubr.bf16.gmra.mrb[100].mxu1 %v3696_v10  ;;  %v713_v10 = vld [vmem:[#allocation2 + $0x3a] sm:$0xff] }
  0xef   : > { %1930 = vmatprep.mubr.bf16.mxu0 %v3859_v42  ;;  %2027 = vmatprep.mubr.bf16.mxu1 %v3705_v13  ;;  %v752_v49 = vpack.c.bf16 %v713_v10, %v712_v51 }
  0xf6   : > { %1931 = vmatmul.mubr.bf16.gmra.mrb[104].mxu0 %v3891_v11  ;;  %2028 = vmatmul.mubr.bf16.gmra.mrb[104].mxu1 %v3724_v26 }
  0xf7   : > { %1938 = vmatprep.mubr.bf16.mxu0 %v3893_v34  ;;  %2035 = vmatprep.mubr.bf16.mxu1 %v3732_v31  ;;  %v714_v31 = vld [vmem:[#allocation2 + $0x4a] sm:$0xff] }
  0xf8   : > { %v761_v58 = vpack.c.bf16 %v715_v12, %v714_v31 }
  0xf9   : > { %v2600_v36 = vpop.f32.mrb[0].mxu0  ;;  %v2672_v13 = vpop.f32.mrb[0].mxu1 }
  0xfa   : > { %v2601_v52 = vpop.f32.mrb[1].mxu0  ;;  %v2673_v29 = vpop.f32.mrb[1].mxu1 }
  0xfb   : > { %v3899_v35 = vadd.f32 %v2601_v52, %v2600_v36  ;;  %v3901_v38 = vadd.f32 %v2673_v29, %v2672_v13  ;;  %v2603_v39 = vpop.f32.mrb[2].mxu0  ;;  %v2675_v8 = vpop.f32.mrb[2].mxu1 }
  0xfc   : > { %v2604_v55 = vpop.f32.mrb[3].mxu0  ;;  %v2676_v59 = vpop.f32.mrb[3].mxu1 }
  0xfd   : > { %v3903_v26 = vadd.f32 %v2604_v55, %v2603_v39  ;;  %v3905_v61 = vadd.f32 %v2676_v59, %v2675_v8 }
  0xfe   : > { %1939 = vmatmul.mubr.bf16.gmra.mrb[108].mxu0 %v3785_v1  ;;  %2036 = vmatmul.mubr.bf16.gmra.mrb[108].mxu1 %v3750_v40 }
  0xff   : > { %2043 = vmatprep.mubr.bf16.mxu1 %v3759_v47  ;;  %3072 = vmatprep.mubr.bf16.mxu0 %v752_v49 }
 0x101   : > { %v2606_v17 = vpop.f32.mrb[4].mxu0  ;;  %v2678_v41 = vpop.f32.mrb[4].mxu1 }
 0x102   : > { %v2607_v62 = vpop.f32.mrb[5].mxu0  ;;  %v2679_v56 = vpop.f32.mrb[5].mxu1 }
 0x103   : > { %v3910_v63 = vadd.f32 %v2607_v62, %v2606_v17  ;;  %v3912_v2 = vadd.f32 %v2679_v56, %v2678_v41  ;;  %v2609_v4 = vpop.f32.mrb[6].mxu0  ;;  %v2681_v20 = vpop.f32.mrb[6].mxu1 }
 0x104   : > { %v2610_v6 = vpop.f32.mrb[7].mxu0  ;;  %v2682_v7 = vpop.f32.mrb[7].mxu1 }
 0x105   : > { %v3914_v53 = vadd.f32 %v2610_v6, %v2609_v4  ;;  %v3916_v40 = vadd.f32 %v2682_v7, %v2681_v20  ;;  %v672_v20 = vld [vmem:[#allocation2 + $0x150] sm:$0xff]  ;;  %v673_v6 = vld [vmem:[#allocation2 + $0x158] sm:$0xff] }
 0x106   : > { %2044 = vmatmul.mubr.bf16.gmra.mrb[112].mxu1 %v3767_v46  ;;  %3073 = vmatmul.mubr.bf16.vlgmr.msra.gmra.mrb[112].mxu0 %v761_v58 }
 0x107   : > { %2051 = vmatprep.mubr.bf16.mxu1 %v3775_v18  ;;  %3076 = vmatprep.mubr.bf16.mxu0 %v3726_v30 }
 0x109   : > { %v2612_v47 = vpop.f32.mrb[8].mxu0  ;;  %v2684_v57 = vpop.f32.mrb[8].mxu1 }
 0x10a   : > { %v2613_v45 = vpop.f32.mrb[9].mxu0  ;;  %v2685_v14 = vpop.f32.mrb[9].mxu1 }
 0x10b   : > { %v3921_v19 = vadd.f32 %v2613_v45, %v2612_v47  ;;  %v3923_v48 = vadd.f32 %v2685_v14, %v2684_v57  ;;  %v2615_v50 = vpop.f32.mrb[10].mxu0  ;;  %v2687_v15 = vpop.f32.mrb[10].mxu1  ;;  %v858_v45 = vpack.c.bf16 %v673_v6, %v672_v20 }
 0x10c   : > { %v2616_v21 = vpop.f32.mrb[11].mxu0  ;;  %v2688_v28 = vpop.f32.mrb[11].mxu1 }
 0x10d   : > { %v3925_v44 = vadd.f32 %v2616_v21, %v2615_v50  ;;  %v3927_v46 = vadd.f32 %v2688_v28, %v2687_v15 }
 0x10e   : > { %2052 = vmatmul.mubr.bf16.gmra.mrb[116].mxu1 %v3781_v0  ;;  %3077 = vmatmul.mubr.bf16.gmra.mrb[116].mxu0 %v3752_v43  ;;  %v670_v43 = vld [vmem:[#allocation2 + $0x138] sm:$0xff] }
 0x10f   : > { %2059 = vmatprep.mubr.bf16.mxu1 %v3873_v3  ;;  %3080 = vmatprep.mubr.bf16.mxu0 %v3769_v22  ;;  %v671_v22 = vld [vmem:[#allocation2 + $0x140] sm:$0xff] }
 0x110   : > { %v849_v12 = vpack.c.bf16 %v671_v22, %v670_v43 }
 0x111   : > { %v2618_v30 = vpop.f32.mrb[12].mxu0  ;;  %v2690_v18 = vpop.f32.mrb[12].mxu1 }
 0x112   : > { %v2619_v51 = vpop.f32.mrb[13].mxu0  ;;  %v2691_v10 = vpop.f32.mrb[13].mxu1 }
 0x113   : > { %v3933_v36 = vadd.f32 %v2619_v51, %v2618_v30  ;;  %v3935_v13 = vadd.f32 %v2691_v10, %v2690_v18  ;;  %v2621_v52 = vpop.f32.mrb[14].mxu0  ;;  %v2693_v29 = vpop.f32.mrb[14].mxu1  ;;  %v674_v18 = vld [vmem:[#allocation2 + $0x168] sm:$0xff]  ;;  %v675_v51 = vld [vmem:[#allocation2 + $0x170] sm:$0xff] }
 0x114   : > { %v2622_v39 = vpop.f32.mrb[15].mxu0  ;;  %v2694_v8 = vpop.f32.mrb[15].mxu1 }
 0x115   : > { %v3937_v49 = vadd.f32 %v2622_v39, %v2621_v52  ;;  %v3939_v0 = vadd.f32 %v2694_v8, %v2693_v29  ;;  %v867_v39 = vpack.c.bf16 %v675_v51, %v674_v18 }
 0x116   : > { %2060 = vmatmul.mubr.bf16.gmra.mrb[120].mxu1 %v3818_v33  ;;  %3081 = vmatmul.mubr.bf16.gmra.mrb[120].mxu0 %v3783_v9 }
 0x117   : > { %2067 = vmatprep.mubr.bf16.mxu1 %v3879_v23  ;;  %3084 = vmatprep.mubr.bf16.mxu0 %v3791_v5 }
 0x119   : > { %v2624_v3 = vpop.f32.mrb[16].mxu0  ;;  %v2712_v55 = vpop.f32.mrb[16].mxu1 }
 0x11a   : > { %v2625_v59 = vpop.f32.mrb[17].mxu0  ;;  %v2713_v31 = vpop.f32.mrb[17].mxu1 }
 0x11b   : > { %v3945_v17 = vadd.f32 %v2625_v59, %v2624_v3  ;;  %v2714_v41 = vadd.f32 %v2713_v31, %v2712_v55  ;;  %v2627_v62 = vpop.f32.mrb[18].mxu0  ;;  %v2715_v56 = vpop.f32.mrb[18].mxu1  ;;  %v710_v31 = vld [vmem:[#allocation2 + $0x199] sm:$0xff] }
 0x11c   : > { %v2628_v58 = vpop.f32.mrb[19].mxu0  ;;  %v2716_v33 = vpop.f32.mrb[19].mxu1 }
 0x11d   : > { %v3948_v9 = vadd.f32 %v2714_v41, %v3899_v35  ;;  %v3950_v23 = vadd.f32 %v2628_v58, %v2627_v62  ;;  %v2717_v5 = vadd.f32 %v2716_v33, %v2715_v56 }
 0x11e   : > { %2068 = vmatmul.mubr.bf16.gmra.mrb[124].mxu1 %v849_v12  ;;  %3085 = vmatmul.mubr.bf16.gmra.mrb[124].mxu0 %v3804_v16  ;;  %v711_v12 = vld [vmem:[#allocation2 + $0x1a1] sm:$0xff] }
 0x11f   : > { %v3954_v4 = vadd.f32 %v2717_v5, %v3903_v26  ;;  %2075 = vmatprep.mubr.bf16.mxu1 %v3885_v24  ;;  %3088 = vmatprep.mubr.bf16.mxu0 %v3816_v32  ;;  %v886_v6 = vpack.c.bf16 %v711_v12, %v710_v31 }
 0x121   : > { %v2630_v7 = vpop.f32.mrb[20].mxu0  ;;  %v2718_v47 = vpop.f32.mrb[20].mxu1 }
 0x122   : > { %v2631_v57 = vpop.f32.mrb[21].mxu0  ;;  %v2719_v35 = vpop.f32.mrb[21].mxu1 }
 0x123   : > { %v3958_v14 = vadd.f32 %v2631_v57, %v2630_v7  ;;  %v2720_v50 = vadd.f32 %v2719_v35, %v2718_v47  ;;  %v2633_v15 = vpop.f32.mrb[22].mxu0  ;;  %v2721_v21 = vpop.f32.mrb[22].mxu1  ;;  %v678_v57 = vld [vmem:[#allocation2 + $0x198] sm:$0xff] }
 0x124   : > { %v2634_v16 = vpop.f32.mrb[23].mxu0  ;;  %v2722_v28 = vpop.f32.mrb[23].mxu1  ;;  %v742_v35 = vld [vmem:[#allocation2 + $0x19a] sm:$0xff] }
 0x125   : > { %v3961_v26 = vadd.f32 %v2720_v50, %v3910_v63  ;;  %v3963_v24 = vadd.f32 %v2634_v16, %v2633_v15  ;;  %v2723_v32 = vadd.f32 %v2722_v28, %v2721_v21  ;;  %v3201_v16 = vld [vmem:[#allocation2 + $0x8] sm:$0xff] }
 0x126   : > { %2076 = vmatmul.mubr.bf16.gmra.mrb[128].mxu1 %v858_v45  ;;  %3089 = vmatmul.mubr.bf16.gmra.mrb[128].mxu0 %v3830_v25  ;;  %v743_v45 = vld [vmem:[#allocation2 + $0x1a2] sm:$0xff]  ;;  %v885_v28 = vpack.c.bf16 %v3201_v16, %v678_v57 }
 0x127   : > { %v3967_v30 = vadd.f32 %v2723_v32, %v3914_v53  ;;  %2083 = vmatprep.mubr.bf16.mxu1 %v3891_v11  ;;  %3092 = vmatprep.mubr.bf16.mxu0 %v3839_v37  ;;  %v887_v32 = vpack.c.bf16 %v743_v45, %v742_v35 }
 0x129   : > { %v2636_v10 = vpop.f32.mrb[24].mxu0  ;;  %v2724_v52 = vpop.f32.mrb[24].mxu1 }
 0x12a   : > { %v2637_v29 = vpop.f32.mrb[25].mxu0  ;;  %v2725_v63 = vpop.f32.mrb[25].mxu1 }
 0x12b   : > { %v3971_v8 = vadd.f32 %v2637_v29, %v2636_v10  ;;  %v2726_v43 = vadd.f32 %v2725_v63, %v2724_v52  ;;  %v2639_v22 = vpop.f32.mrb[26].mxu0  ;;  %v2727_v3 = vpop.f32.mrb[26].mxu1 }
 0x12c   : > { %v2640_v25 = vpop.f32.mrb[27].mxu0  ;;  %v2728_v55 = vpop.f32.mrb[27].mxu1 }
 0x12d   : > { %v3974_v53 = vadd.f32 %v2726_v43, %v3921_v19  ;;  %v3976_v11 = vadd.f32 %v2640_v25, %v2639_v22  ;;  %v2729_v37 = vadd.f32 %v2728_v55, %v2727_v3 }
 0x12e   : > { %2084 = vmatmul.mubr.bf16.gmra.mrb[132].mxu1 %v867_v39  ;;  %3093 = vmatmul.mubr.bf16.gmra.mrb[132].mxu0 %v3845_v27 }
 0x12f   : > { %v3980_v59 = vadd.f32 %v2729_v37, %v3925_v44  ;;  %2091 = vmatprep.mubr.bf16.mxu1 %v3785_v1  ;;  %3096 = vmatprep.mubr.bf16.mxu0 %v3851_v60 }
 0x131   : > { %v2642_v41 = vpop.f32.mrb[28].mxu0  ;;  %v2730_v62 = vpop.f32.mrb[28].mxu1 }
 0x132   : > { %v2643_v56 = vpop.f32.mrb[29].mxu0  ;;  %v2731_v19 = vpop.f32.mrb[29].mxu1 }
 0x133   : > { %v3984_v58 = vadd.f32 %v2643_v56, %v2642_v41  ;;  %v2732_v33 = vadd.f32 %v2731_v19, %v2730_v62  ;;  %v2645_v5 = vpop.f32.mrb[30].mxu0  ;;  %v2733_v20 = vpop.f32.mrb[30].mxu1 }
 0x134   : > { %v2646_v27 = vpop.f32.mrb[31].mxu0  ;;  %v2734_v7 = vpop.f32.mrb[31].mxu1 }
 0x135   : > { %v3987_v44 = vadd.f32 %v2732_v33, %v3933_v36  ;;  %v3989_v1 = vadd.f32 %v2646_v27, %v2645_v5  ;;  %v2735_v60 = vadd.f32 %v2734_v7, %v2733_v20 }
 0x136   : > { %2092 = vmatmul.mubr.bf16.gmra.mrb[136].mxu1 %v3853_v54  ;;  %3097 = vmatmul.mubr.bf16.gmra.mrb[136].mxu0 %v3859_v42 }
 0x137   : > { %v3994_v47 = vadd.f32 %v2735_v60, %v3937_v49  ;;  %2099 = vmatprep.mubr.bf16.mxu1 %v886_v6  ;;  %3100 = vmatprep.mubr.bf16.mxu0 %v3893_v34 }
 0x139   : > { %v2648_v50 = vpop.f32.mrb[32].mxu0  ;;  %v2736_v15 = vpop.f32.mrb[32].mxu1 }
 0x13a   : > { %v2649_v36 = vpop.f32.mrb[33].mxu0  ;;  %v2737_v21 = vpop.f32.mrb[33].mxu1 }
 0x13b   : > { %v3997_v18 = vadd.f32 %v2649_v36, %v2648_v50  ;;  %v2738_v54 = vadd.f32 %v2737_v21, %v2736_v15  ;;  %v2651_v42 = vpop.f32.mrb[34].mxu0  ;;  %v2739_v51 = vpop.f32.mrb[34].mxu1 }
 0x13c   : > { %v2652_v49 = vpop.f32.mrb[35].mxu0  ;;  %v2740_v10 = vpop.f32.mrb[35].mxu1 }
 0x13d   : > { %v4000_v52 = vadd.f32 %v2738_v54, %v3945_v17  ;;  %v2653_v34 = vadd.f32 %v2652_v49, %v2651_v42  ;;  %v2741_v29 = vadd.f32 %v2740_v10, %v2739_v51 }
 0x13e   : > { %2100 = vmatmul.mubr.bf16.gmra.mrb[140].mxu1 %v885_v28  ;;  %3101 = vmatmul.mubr.bf16.gmra.mrb[140].mxu0 %v887_v32 }
 0x13f   : > { %v4003_v63 = vadd.f32 %v2741_v29, %v3950_v23 }
 0x141   : > { %v2654_v39 = vpop.f32.mrb[36].mxu0  ;;  %v2742_v43 = vpop.f32.mrb[36].mxu1 }
 0x142   : > { %v2655_v22 = vpop.f32.mrb[37].mxu0  ;;  %v2743_v3 = vpop.f32.mrb[37].mxu1 }
 0x143   : > { %v4005_v25 = vadd.f32 %v2655_v22, %v2654_v39  ;;  %v2744_v55 = vadd.f32 %v2743_v3, %v2742_v43  ;;  %v2657_v37 = vpop.f32.mrb[38].mxu0  ;;  %v2745_v31 = vpop.f32.mrb[38].mxu1 }
 0x144   : > { %v2658_v12 = vpop.f32.mrb[39].mxu0  ;;  %v2746_v41 = vpop.f32.mrb[39].mxu1 }
 0x145   : > { %v4008_v17 = vadd.f32 %v2744_v55, %v3958_v14  ;;  %v2659_v62 = vadd.f32 %v2658_v12, %v2657_v37  ;;  %v2747_v56 = vadd.f32 %v2746_v41, %v2745_v31 }
 0x147   : > { %v4011_v19 = vadd.f32 %v2747_v56, %v3963_v24 }
 0x149   : > { %v2660_v23 = vpop.f32.mrb[40].mxu0  ;;  %v2748_v33 = vpop.f32.mrb[40].mxu1 }
 0x14a   : > { %v2661_v5 = vpop.f32.mrb[41].mxu0  ;;  %v2749_v20 = vpop.f32.mrb[41].mxu1 }
 0x14b   : > { %v4013_v6 = vadd.f32 %v2661_v5, %v2660_v23  ;;  %v2750_v27 = vadd.f32 %v2749_v20, %v2748_v33  ;;  %v2663_v7 = vpop.f32.mrb[42].mxu0  ;;  %v2751_v60 = vpop.f32.mrb[42].mxu1 }
 0x14c   : > { %v2664_v57 = vpop.f32.mrb[43].mxu0  ;;  %v2752_v35 = vpop.f32.mrb[43].mxu1 }
 0x14d   : > { %v4016_v45 = vadd.f32 %v2750_v27, %v3971_v8  ;;  %v4018_v14 = vadd.f32 %v2664_v57, %v2663_v7  ;;  %v2753_v50 = vadd.f32 %v2752_v35, %v2751_v60 }
 0x14f   : > { %v4021_v24 = vadd.f32 %v2753_v50, %v3976_v11 }
 0x151   : > { %v2666_v15 = vpop.f32.mrb[44].mxu0  ;;  %v2754_v36 = vpop.f32.mrb[44].mxu1 }
 0x152   : > { %v2667_v21 = vpop.f32.mrb[45].mxu0  ;;  %v2755_v16 = vpop.f32.mrb[45].mxu1 }
 0x153   : > { %v4023_v28 = vadd.f32 %v2667_v21, %v2666_v15  ;;  %v2756_v32 = vadd.f32 %v2755_v16, %v2754_v36  ;;  %v2669_v54 = vpop.f32.mrb[46].mxu0  ;;  %v2757_v42 = vpop.f32.mrb[46].mxu1 }
 0x154   : > { %v2670_v51 = vpop.f32.mrb[47].mxu0  ;;  %v2758_v49 = vpop.f32.mrb[47].mxu1 }
 0x155   : > { %v4026_v8 = vadd.f32 %v2756_v32, %v3984_v58  ;;  %v4028_v10 = vadd.f32 %v2670_v51, %v2669_v54  ;;  %v2759_v29 = vadd.f32 %v2758_v49, %v2757_v42 }
 0x157   : > { %v4031_v11 = vadd.f32 %v2759_v29, %v3989_v1 }
 0x159   : > { %v2760_v39 = vpop.f32.mrb[48].mxu1  ;;  %v2824_v43 = vpop.f32.mrb[48].mxu0 }
 0x15a   : > { %v2761_v22 = vpop.f32.mrb[49].mxu1  ;;  %v2825_v3 = vpop.f32.mrb[49].mxu0 }
 0x15b   : > { %v2762_v55 = vadd.f32 %v2761_v22, %v2760_v39  ;;  %v2826_v37 = vadd.f32 %v2825_v3, %v2824_v43  ;;  %v2763_v31 = vpop.f32.mrb[50].mxu1  ;;  %v2827_v12 = vpop.f32.mrb[50].mxu0 }
 0x15c   : > { %v2764_v41 = vpop.f32.mrb[51].mxu1  ;;  %v2828_v56 = vpop.f32.mrb[51].mxu0 }
 0x15d   : > { %v4034_v23 = vadd.f32 %v2762_v55, %v3997_v18  ;;  %v4037_v58 = vadd.f32 %v2826_v37, %v3948_v9  ;;  %v2765_v33 = vadd.f32 %v2764_v41, %v2763_v31  ;;  %v2829_v5 = vadd.f32 %v2828_v56, %v2827_v12 }
 0x15f   : > { %v4039_v1 = vadd.f32 %v2765_v33, %v2653_v34  ;;  %v4042_v20 = vadd.f32 %v2829_v5, %v3954_v4 }
 0x161   : > { %v2766_v27 = vpop.f32.mrb[52].mxu1  ;;  %v2830_v7 = vpop.f32.mrb[52].mxu0 }
 0x162   : > { %v2767_v60 = vpop.f32.mrb[53].mxu1  ;;  %v2831_v57 = vpop.f32.mrb[53].mxu0 }
 0x163   : > { %v2768_v35 = vadd.f32 %v2767_v60, %v2766_v27  ;;  %v2832_v50 = vadd.f32 %v2831_v57, %v2830_v7  ;;  %v2769_v15 = vpop.f32.mrb[54].mxu1  ;;  %v2833_v36 = vpop.f32.mrb[54].mxu0 }
 0x164   : > { %v2770_v18 = vpop.f32.mrb[55].mxu1  ;;  %v2834_v21 = vpop.f32.mrb[55].mxu0 }
 0x165   : > { %v4045_v9 = vadd.f32 %v2768_v35, %v4005_v25  ;;  %v4048_v16 = vadd.f32 %v2832_v50, %v3961_v26  ;;  %v2771_v34 = vadd.f32 %v2770_v18, %v2769_v15  ;;  %v2835_v32 = vadd.f32 %v2834_v21, %v2833_v36 }
 0x167   : > { %v4050_v4 = vadd.f32 %v2771_v34, %v2659_v62  ;;  %v4053_v54 = vadd.f32 %v2835_v32, %v3967_v30 }
 0x169   : > { %v2772_v42 = vpop.f32.mrb[56].mxu1  ;;  %v2836_v51 = vpop.f32.mrb[56].mxu0 }
 0x16a   : > { %v2773_v49 = vpop.f32.mrb[57].mxu1  ;;  %v2837_v29 = vpop.f32.mrb[57].mxu0 }
 0x16b   : > { %v2774_v39 = vadd.f32 %v2773_v49, %v2772_v42  ;;  %v2838_v43 = vadd.f32 %v2837_v29, %v2836_v51  ;;  %v2775_v22 = vpop.f32.mrb[58].mxu1  ;;  %v2839_v3 = vpop.f32.mrb[58].mxu0 }
 0x16c   : > { %v2776_v25 = vpop.f32.mrb[59].mxu1  ;;  %v2840_v55 = vpop.f32.mrb[59].mxu0 }
 0x16d   : > { %v4056_v26 = vadd.f32 %v2774_v39, %v4013_v6  ;;  %v4059_v37 = vadd.f32 %v2838_v43, %v3974_v53  ;;  %v2777_v62 = vadd.f32 %v2776_v25, %v2775_v22  ;;  %v2841_v31 = vadd.f32 %v2840_v55, %v2839_v3 }
 0x16f   : > { %v4062_v30 = vadd.f32 %v2777_v62, %v4018_v14  ;;  %v4065_v12 = vadd.f32 %v2841_v31, %v3980_v59 }
 0x171   : > { %v2778_v41 = vpop.f32.mrb[60].mxu1  ;;  %v2842_v56 = vpop.f32.mrb[60].mxu0 }
 0x172   : > { %v2779_v33 = vpop.f32.mrb[61].mxu1  ;;  %v2843_v5 = vpop.f32.mrb[61].mxu0 }
 0x173   : > { %v2780_v27 = vadd.f32 %v2779_v33, %v2778_v41  ;;  %v2844_v7 = vadd.f32 %v2843_v5, %v2842_v56  ;;  %v2781_v60 = vpop.f32.mrb[62].mxu1  ;;  %v2845_v6 = vpop.f32.mrb[62].mxu0 }
 0x174   : > { %v2782_v57 = vpop.f32.mrb[63].mxu1  ;;  %v2846_v35 = vpop.f32.mrb[63].mxu0 }
 0x175   : > { %v4068_v53 = vadd.f32 %v2780_v27, %v4023_v28  ;;  %v4071_v50 = vadd.f32 %v2844_v7, %v3987_v44  ;;  %v2783_v14 = vadd.f32 %v2782_v57, %v2781_v60  ;;  %v2847_v15 = vadd.f32 %v2846_v35, %v2845_v6 }
 0x177   : > { %v4074_v59 = vadd.f32 %v2783_v14, %v4028_v10  ;;  %v4077_v36 = vadd.f32 %v2847_v15, %v3994_v47 }
 0x179   : > { %v2784_v18 = vpop.f32.mrb[64].mxu1  ;;  %v2848_v21 = vpop.f32.mrb[64].mxu0 }
 0x17a   : > { %v2785_v34 = vpop.f32.mrb[65].mxu1  ;;  %v2849_v32 = vpop.f32.mrb[65].mxu0 }
 0x17b   : > { %v2786_v42 = vadd.f32 %v2785_v34, %v2784_v18  ;;  %v2850_v51 = vadd.f32 %v2849_v32, %v2848_v21  ;;  %v2787_v49 = vpop.f32.mrb[66].mxu1  ;;  %v2851_v28 = vpop.f32.mrb[66].mxu0 }
 0x17c   : > { %v2788_v29 = vpop.f32.mrb[67].mxu1  ;;  %v2852_v39 = vpop.f32.mrb[67].mxu0 }
 0x17d   : > { %v4080_v44 = vadd.f32 %v2786_v42, %v3901_v38  ;;  %v4083_v43 = vadd.f32 %v2850_v51, %v4000_v52  ;;  %v2789_v10 = vadd.f32 %v2788_v29, %v2787_v49  ;;  %v2853_v22 = vadd.f32 %v2852_v39, %v2851_v28 }
 0x17f   : > { %v4086_v47 = vadd.f32 %v2789_v10, %v3905_v61  ;;  %v4089_v3 = vadd.f32 %v2853_v22, %v4003_v63 }
 0x181   : > { %v2790_v25 = vpop.f32.mrb[68].mxu1  ;;  %v2854_v55 = vpop.f32.mrb[68].mxu0 }
 0x182   : > { %v2791_v62 = vpop.f32.mrb[69].mxu1  ;;  %v2855_v31 = vpop.f32.mrb[69].mxu0 }
 0x183   : > { %v2792_v41 = vadd.f32 %v2791_v62, %v2790_v25  ;;  %v2856_v56 = vadd.f32 %v2855_v31, %v2854_v55  ;;  %v2793_v33 = vpop.f32.mrb[70].mxu1  ;;  %v2857_v38 = vpop.f32.mrb[70].mxu0 }
 0x184   : > { %v2794_v5 = vpop.f32.mrb[71].mxu1  ;;  %v2858_v27 = vpop.f32.mrb[71].mxu0 }
 0x185   : > { %v4092_v52 = vadd.f32 %v2792_v41, %v3912_v2  ;;  %v4095_v7 = vadd.f32 %v2856_v56, %v4008_v17  ;;  %v2795_v61 = vadd.f32 %v2794_v5, %v2793_v33  ;;  %v2859_v60 = vadd.f32 %v2858_v27, %v2857_v38 }
 0x187   : > { %v4098_v63 = vadd.f32 %v2795_v61, %v3916_v40  ;;  %v4101_v6 = vadd.f32 %v2859_v60, %v4011_v19 }
 0x189   : > { %v2796_v57 = vpop.f32.mrb[72].mxu1  ;;  %v2860_v35 = vpop.f32.mrb[72].mxu0 }
 0x18a   : > { %v2797_v14 = vpop.f32.mrb[73].mxu1  ;;  %v2861_v15 = vpop.f32.mrb[73].mxu0 }
 0x18b   : > { %v2798_v18 = vadd.f32 %v2797_v14, %v2796_v57  ;;  %v2862_v21 = vadd.f32 %v2861_v15, %v2860_v35  ;;  %v2799_v34 = vpop.f32.mrb[74].mxu1  ;;  %v2863_v2 = vpop.f32.mrb[74].mxu0 }
 0x18c   : > { %v2800_v32 = vpop.f32.mrb[75].mxu1  ;;  %v2864_v42 = vpop.f32.mrb[75].mxu0 }
 0x18d   : > { %v4104_v17 = vadd.f32 %v2798_v18, %v3923_v48  ;;  %v4107_v51 = vadd.f32 %v2862_v21, %v4016_v45  ;;  %v2801_v40 = vadd.f32 %v2800_v32, %v2799_v34  ;;  %v2865_v49 = vadd.f32 %v2864_v42, %v2863_v2 }
 0x18f   : > { %v4110_v19 = vadd.f32 %v2801_v40, %v3927_v46  ;;  %v4113_v28 = vadd.f32 %v2865_v49, %v4021_v24 }
 0x191   : > { %v2802_v29 = vpop.f32.mrb[76].mxu1  ;;  %v2866_v39 = vpop.f32.mrb[76].mxu0 }
 0x192   : > { %v2803_v10 = vpop.f32.mrb[77].mxu1  ;;  %v2867_v22 = vpop.f32.mrb[77].mxu0 }
 0x193   : > { %v2804_v25 = vadd.f32 %v2803_v10, %v2802_v29  ;;  %v2868_v55 = vadd.f32 %v2867_v22, %v2866_v39  ;;  %v2805_v62 = vpop.f32.mrb[78].mxu1  ;;  %v2869_v48 = vpop.f32.mrb[78].mxu0 }
 0x194   : > { %v2806_v31 = vpop.f32.mrb[79].mxu1  ;;  %v2870_v41 = vpop.f32.mrb[79].mxu0 }
 0x195   : > { %v4116_v45 = vadd.f32 %v2804_v25, %v3935_v13  ;;  %v4119_v56 = vadd.f32 %v2868_v55, %v4026_v8  ;;  %v2807_v46 = vadd.f32 %v2806_v31, %v2805_v62  ;;  %v2871_v33 = vadd.f32 %v2870_v41, %v2869_v48 }
 0x197   : > { %v4122_v24 = vadd.f32 %v2807_v46, %v3939_v0  ;;  %v4125_v38 = vadd.f32 %v2871_v33, %v4031_v11 }
 0x199   : > { %v2872_v5 = vpop.f32.mrb[80].mxu0  ;;  %v2936_v27 = vpop.f32.mrb[80].mxu1 }
 0x19a   : > { %v2873_v61 = vpop.f32.mrb[81].mxu0  ;;  %v2937_v60 = vpop.f32.mrb[81].mxu1 }
 0x19b   : > { %v2874_v57 = vadd.f32 %v2873_v61, %v2872_v5  ;;  %v2938_v35 = vadd.f32 %v2937_v60, %v2936_v27  ;;  %v2875_v14 = vpop.f32.mrb[82].mxu0  ;;  %v2939_v13 = vpop.f32.mrb[82].mxu1 }
 0x19c   : > { %v2876_v15 = vpop.f32.mrb[83].mxu0  ;;  %v2940_v18 = vpop.f32.mrb[83].mxu1 }
 0x19d   : > { %v4128_v8 = vadd.f32 %v2874_v57, %v4034_v23  ;;  %v2877_v21 = vadd.f32 %v2876_v15, %v2875_v14  ;;  %v2941_v34 = vadd.f32 %v2940_v18, %v2939_v13  ;;  %v4131_v0 = vadd.f32 %v2938_v35, %v4037_v58 }
 0x19f   : > { %v4134_v11 = vadd.f32 %v2877_v21, %v4039_v1  ;;  %v4137_v2 = vadd.f32 %v2941_v34, %v4042_v20 }
 0x1a1   : > { %v2878_v32 = vpop.f32.mrb[84].mxu0  ;;  %v2942_v42 = vpop.f32.mrb[84].mxu1 }
 0x1a2   : > { %v2879_v40 = vpop.f32.mrb[85].mxu0  ;;  %v2943_v49 = vpop.f32.mrb[85].mxu1 }
 0x1a3   : > { %v2880_v29 = vadd.f32 %v2879_v40, %v2878_v32  ;;  %v2944_v39 = vadd.f32 %v2943_v49, %v2942_v42  ;;  %v2881_v10 = vpop.f32.mrb[86].mxu0  ;;  %v2945_v23 = vpop.f32.mrb[86].mxu1 }
 0x1a4   : > { %v2882_v22 = vpop.f32.mrb[87].mxu0  ;;  %v2946_v25 = vpop.f32.mrb[87].mxu1 }
 0x1a5   : > { %v4140_v55 = vadd.f32 %v2880_v29, %v4045_v9  ;;  %v2883_v58 = vadd.f32 %v2882_v22, %v2881_v10  ;;  %v2947_v62 = vadd.f32 %v2946_v25, %v2945_v23  ;;  %v4143_v1 = vadd.f32 %v2944_v39, %v4048_v16 }
 0x1a7   : > { %v4146_v20 = vadd.f32 %v2883_v58, %v4050_v4  ;;  %v4149_v48 = vadd.f32 %v2947_v62, %v4053_v54 }
 0x1a9   : > { %v2884_v31 = vpop.f32.mrb[88].mxu0  ;;  %v2948_v41 = vpop.f32.mrb[88].mxu1 }
 0x1aa   : > { %v2885_v46 = vpop.f32.mrb[89].mxu0  ;;  %v2949_v33 = vpop.f32.mrb[89].mxu1 }
 0x1ab   : > { %v2886_v5 = vadd.f32 %v2885_v46, %v2884_v31  ;;  %v2950_v27 = vadd.f32 %v2949_v33, %v2948_v41  ;;  %v2887_v61 = vpop.f32.mrb[90].mxu0  ;;  %v2951_v9 = vpop.f32.mrb[90].mxu1 }
 0x1ac   : > { %v2888_v60 = vpop.f32.mrb[91].mxu0  ;;  %v2952_v57 = vpop.f32.mrb[91].mxu1 }
 0x1ad   : > { %v4152_v35 = vadd.f32 %v2886_v5, %v4056_v26  ;;  %v2889_v16 = vadd.f32 %v2888_v60, %v2887_v61  ;;  %v2953_v14 = vadd.f32 %v2952_v57, %v2951_v9  ;;  %v4155_v4 = vadd.f32 %v2950_v27, %v4059_v37 }
 0x1af   : > { %v4158_v54 = vadd.f32 %v2889_v16, %v4062_v30  ;;  %v4161_v13 = vadd.f32 %v2953_v14, %v4065_v12 }
 0x1b1   : > { %v2890_v15 = vpop.f32.mrb[92].mxu0  ;;  %v2954_v18 = vpop.f32.mrb[92].mxu1 }
 0x1b2   : > { %v2891_v21 = vpop.f32.mrb[93].mxu0  ;;  %v2955_v34 = vpop.f32.mrb[93].mxu1 }
 0x1b3   : > { %v2892_v32 = vadd.f32 %v2891_v21, %v2890_v15  ;;  %v2956_v42 = vadd.f32 %v2955_v34, %v2954_v18  ;;  %v2893_v40 = vpop.f32.mrb[94].mxu0  ;;  %v2957_v26 = vpop.f32.mrb[94].mxu1 }
 0x1b4   : > { %v2894_v49 = vpop.f32.mrb[95].mxu0  ;;  %v2958_v29 = vpop.f32.mrb[95].mxu1 }
 0x1b5   : > { %v4164_v39 = vadd.f32 %v2892_v32, %v4068_v53  ;;  %v2895_v37 = vadd.f32 %v2894_v49, %v2893_v40  ;;  %v2959_v10 = vadd.f32 %v2958_v29, %v2957_v26  ;;  %v4167_v30 = vadd.f32 %v2956_v42, %v4071_v50 }
 0x1b7   : > { %v4170_v12 = vadd.f32 %v2895_v37, %v4074_v59  ;;  %v4173_v23 = vadd.f32 %v2959_v10, %v4077_v36 }
 0x1b9   : > { %v2896_v22 = vpop.f32.mrb[96].mxu0  ;;  %v2960_v25 = vpop.f32.mrb[96].mxu1 }
 0x1ba   : > { %v2897_v58 = vpop.f32.mrb[97].mxu0  ;;  %v2961_v62 = vpop.f32.mrb[97].mxu1 }
 0x1bb   : > { %v2898_v31 = vadd.f32 %v2897_v58, %v2896_v22  ;;  %v2962_v41 = vadd.f32 %v2961_v62, %v2960_v25  ;;  %v2899_v46 = vpop.f32.mrb[98].mxu0  ;;  %v2963_v53 = vpop.f32.mrb[98].mxu1 }
 0x1bc   : > { %v2900_v33 = vpop.f32.mrb[99].mxu0  ;;  %v2964_v5 = vpop.f32.mrb[99].mxu1 }
 0x1bd   : > { %v4176_v27 = vadd.f32 %v2898_v31, %v4080_v44  ;;  %v2901_v50 = vadd.f32 %v2900_v33, %v2899_v46  ;;  %v2965_v61 = vadd.f32 %v2964_v5, %v2963_v53  ;;  %v4179_v59 = vadd.f32 %v2962_v41, %v4083_v43 }
 0x1bf   : > { %v4182_v36 = vadd.f32 %v2901_v50, %v4086_v47  ;;  %v4185_v9 = vadd.f32 %v2965_v61, %v4089_v3 }
 0x1c1   : > { %v2902_v60 = vpop.f32.mrb[100].mxu0  ;;  %v2966_v57 = vpop.f32.mrb[100].mxu1 }
 0x1c2   : > { %v2903_v16 = vpop.f32.mrb[101].mxu0  ;;  %v2967_v14 = vpop.f32.mrb[101].mxu1 }
 0x1c3   : > { %v2904_v15 = vadd.f32 %v2903_v16, %v2902_v60  ;;  %v2968_v18 = vadd.f32 %v2967_v14, %v2966_v57  ;;  %v2905_v21 = vpop.f32.mrb[102].mxu0  ;;  %v2969_v44 = vpop.f32.mrb[102].mxu1 }
 0x1c4   : > { %v2906_v34 = vpop.f32.mrb[103].mxu0  ;;  %v2970_v32 = vpop.f32.mrb[103].mxu1 }
 0x1c5   : > { %v4188_v42 = vadd.f32 %v2904_v15, %v4092_v52  ;;  %v2907_v43 = vadd.f32 %v2906_v34, %v2905_v21  ;;  %v2971_v40 = vadd.f32 %v2970_v32, %v2969_v44  ;;  %v4191_v47 = vadd.f32 %v2968_v18, %v4095_v7 }
 0x1c7   : > { %v4194_v3 = vadd.f32 %v2907_v43, %v4098_v63  ;;  %v4197_v26 = vadd.f32 %v2971_v40, %v4101_v6 }
 0x1c9   : > { %v2908_v49 = vpop.f32.mrb[104].mxu0  ;;  %v2972_v29 = vpop.f32.mrb[104].mxu1 }
 0x1ca   : > { %v2909_v37 = vpop.f32.mrb[105].mxu0  ;;  %v2973_v10 = vpop.f32.mrb[105].mxu1 }
 0x1cb   : > { %v2910_v22 = vadd.f32 %v2909_v37, %v2908_v49  ;;  %v2974_v25 = vadd.f32 %v2973_v10, %v2972_v29  ;;  %v2911_v58 = vpop.f32.mrb[106].mxu0  ;;  %v2975_v52 = vpop.f32.mrb[106].mxu1 }
 0x1cc   : > { %v2912_v62 = vpop.f32.mrb[107].mxu0  ;;  %v2976_v31 = vpop.f32.mrb[107].mxu1 }
 0x1cd   : > { %v4200_v41 = vadd.f32 %v2910_v22, %v4104_v17  ;;  %v2913_v7 = vadd.f32 %v2912_v62, %v2911_v58  ;;  %v2977_v46 = vadd.f32 %v2976_v31, %v2975_v52  ;;  %v4203_v63 = vadd.f32 %v2974_v25, %v4107_v51 }
 0x1cf   : > { %v4206_v6 = vadd.f32 %v2913_v7, %v4110_v19  ;;  %v4209_v53 = vadd.f32 %v2977_v46, %v4113_v28 }
 0x1d1   : > { %v2914_v33 = vpop.f32.mrb[108].mxu0  ;;  %v2978_v5 = vpop.f32.mrb[108].mxu1 }
 0x1d2   : > { %v2915_v50 = vpop.f32.mrb[109].mxu0  ;;  %v2979_v61 = vpop.f32.mrb[109].mxu1 }
 0x1d3   : > { %v2916_v60 = vadd.f32 %v2915_v50, %v2914_v33  ;;  %v2980_v57 = vadd.f32 %v2979_v61, %v2978_v5  ;;  %v2917_v17 = vpop.f32.mrb[110].mxu0  ;;  %v2981_v16 = vpop.f32.mrb[110].mxu1 }
 0x1d4   : > { %v2918_v14 = vpop.f32.mrb[111].mxu0  ;;  %v2982_v15 = vpop.f32.mrb[111].mxu1 }
 0x1d5   : > { %v4212_v51 = vadd.f32 %v2916_v60, %v4116_v45  ;;  %v2919_v18 = vadd.f32 %v2918_v14, %v2917_v17  ;;  %v2983_v19 = vadd.f32 %v2982_v15, %v2981_v16  ;;  %v4215_v21 = vadd.f32 %v2980_v57, %v4119_v56 }
 0x1d7   : > { %v4218_v28 = vadd.f32 %v2919_v18, %v4122_v24  ;;  %v4221_v44 = vadd.f32 %v2983_v19, %v4125_v38 }
 0x1d9   : > { %v2984_v34 = vpop.f32.mrb[112].mxu1  ;;  %v3074_v45 = vpop.f32.mrb[112].mxu0 }
 0x1da   : > { %v2151_v56 = vadd.f32 %v3074_v45, %v4143_v1  ;;  %v2985_v32 = vpop.f32.mrb[113].mxu1  ;;  %v2142_v24 = vpop.f32.mrb[113].mxu0 }
 0x1db   : > { %v2986_v43 = vadd.f32 %v2985_v32, %v2984_v34  ;;  %v2143_v38 = vadd.f32 %v2142_v24, %v4131_v0  ;;  %v2987_v40 = vpop.f32.mrb[114].mxu1  ;;  %v3075_v49 = vpop.f32.mrb[114].mxu0 }
 0x1dc   : > { %2271 = vst [vmem:[%s4228_s24 + $0x10] sm:$0xff] %v2151_v56  ;;  %v2154_v29 = vadd.f32 %v3075_v49, %v4149_v48  ;;  %v2988_v37 = vpop.f32.mrb[115].mxu1  ;;  %v2145_v10 = vpop.f32.mrb[115].mxu0  ;;  %v2340_v31 = vmul.f32 %v2151_v56, %v2151_v56 }
 0x1dd   : > { %2269 = vst [vmem:[%s4228_s24] sm:$0xff] %v2143_v38  ;;  %v2989_v22 = vadd.f32 %v2988_v37, %v2987_v40  ;;  %v2146_v25 = vadd.f32 %v2145_v10, %v4137_v2  ;;  %v4237_v58 = vadd.f32 %v2986_v43, %v4128_v8  ;;  %v2338_v1 = vmul.f32 %v2143_v38, %v2143_v38 }
 0x1de   : > { %2272 = vst [vmem:[%s4228_s24 + $0x18] sm:$0xff] %v2154_v29  ;;  %v2341_v5 = vmul.f32 %v2154_v29, %v2154_v29 }
 0x1df   : > { %2270 = vst [vmem:[%s4228_s24 + $0x8] sm:$0xff] %v2146_v25  ;;  %v2301_v52 = vadd.f32 %v2146_v25, %v2143_v38  ;;  %v2339_v62 = vmul.f32 %v2146_v25, %v2146_v25  ;;  %v4242_v0 = vadd.f32 %v2989_v22, %v4134_v11 }
 0x1e1   : > { %v2302_v48 = vadd.f32 %v2301_v52, %v2151_v56  ;;  %v2370_v7 = vadd.f32 %v2339_v62, %v2338_v1  ;;  %v2990_v46 = vpop.f32.mrb[116].mxu1  ;;  %v3078_v33 = vpop.f32.mrb[116].mxu0 }
 0x1e2   : > { %v2167_v2 = vadd.f32 %v3078_v33, %v4167_v30  ;;  %v2991_v8 = vpop.f32.mrb[117].mxu1  ;;  %v2158_v50 = vpop.f32.mrb[117].mxu0 }
 0x1e3   : > { %v2371_v61 = vadd.f32 %v2370_v7, %v2340_v31  ;;  %v2992_v60 = vadd.f32 %v2991_v8, %v2990_v46  ;;  %v2159_v57 = vadd.f32 %v2158_v50, %v4155_v4  ;;  %v2303_v17 = vadd.f32 %v2302_v48, %v2154_v29  ;;  %v2993_v11 = vpop.f32.mrb[118].mxu1  ;;  %v3079_v16 = vpop.f32.mrb[118].mxu0 }
 0x1e4   : > { %2275 = vst [vmem:[%s4228_s24 + $0x30] sm:$0xff] %v2167_v2  ;;  %v2170_v14 = vadd.f32 %v3079_v16, %v4173_v23  ;;  %v2994_v15 = vpop.f32.mrb[119].mxu1  ;;  %v2161_v18 = vpop.f32.mrb[119].mxu0  ;;  %v2344_v49 = vmul.f32 %v2167_v2, %v2167_v2 }
 0x1e5   : > { %2273 = vst [vmem:[%s4228_s24 + $0x20] sm:$0xff] %v2159_v57  ;;  %v2304_v19 = vadd.f32 %v2303_v17, %v2159_v57  ;;  %v2342_v34 = vmul.f32 %v2159_v57, %v2159_v57  ;;  %v2372_v30 = vadd.f32 %v2371_v61, %v2341_v5  ;;  %v2995_v45 = vadd.f32 %v2994_v15, %v2993_v11 }
 0x1e6   : > { %2276 = vst [vmem:[%s4228_s24 + $0x38] sm:$0xff] %v2170_v14  ;;  %v2162_v56 = vadd.f32 %v2161_v18, %v4161_v13  ;;  %v4252_v32 = vadd.f32 %v2992_v60, %v4140_v55  ;;  %v2345_v52 = vmul.f32 %v2170_v14, %v2170_v14 }
 0x1e7   : > { %v2373_v4 = vadd.f32 %v2372_v30, %v2342_v34  ;;  %v4255_v24 = vadd.f32 %v2995_v45, %v4146_v20 }
 0x1e8   : > { %2274 = vst [vmem:[%s4228_s24 + $0x28] sm:$0xff] %v2162_v56  ;;  %v2305_v43 = vadd.f32 %v2304_v19, %v2162_v56  ;;  %v2343_v23 = vmul.f32 %v2162_v56, %v2162_v56 }
 0x1e9   : > { %v2996_v38 = vpop.f32.mrb[120].mxu1  ;;  %v3082_v40 = vpop.f32.mrb[120].mxu0 }
 0x1ea   : > { %v2306_v29 = vadd.f32 %v2305_v43, %v2167_v2  ;;  %v2374_v37 = vadd.f32 %v2373_v4, %v2343_v23  ;;  %v2183_v10 = vadd.f32 %v3082_v40, %v4191_v47  ;;  %v2997_v13 = vpop.f32.mrb[121].mxu1  ;;  %v2174_v22 = vpop.f32.mrb[121].mxu0 }
 0x1eb   : > { %v2998_v55 = vadd.f32 %v2997_v13, %v2996_v38  ;;  %v2175_v25 = vadd.f32 %v2174_v22, %v4179_v59  ;;  %v2999_v1 = vpop.f32.mrb[122].mxu1  ;;  %v3083_v20 = vpop.f32.mrb[122].mxu0 }
 0x1ec   : > { %v2375_v62 = vadd.f32 %v2374_v37, %v2344_v49  ;;  %2279 = vst [vmem:[%s4228_s24 + $0x50] sm:$0xff] %v2183_v10  ;;  %v2307_v31 = vadd.f32 %v2306_v29, %v2170_v14  ;;  %v2186_v48 = vadd.f32 %v3083_v20, %v4197_v26  ;;  %v3000_v7 = vpop.f32.mrb[123].mxu1  ;;  %v2177_v46 = vpop.f32.mrb[123].mxu0  ;;  %v2348_v11 = vmul.f32 %v2183_v10, %v2183_v10 }
 0x1ed   : > { %2277 = vst [vmem:[%s4228_s24 + $0x40] sm:$0xff] %v2175_v25  ;;  %v2346_v33 = vmul.f32 %v2175_v25, %v2175_v25  ;;  %v3001_v47 = vadd.f32 %v3000_v7, %v2999_v1  ;;  %v2178_v5 = vadd.f32 %v2177_v46, %v4185_v9  ;;  %v4265_v2 = vadd.f32 %v2998_v55, %v4152_v35 }
 0x1ee   : > { %v2308_v59 = vadd.f32 %v2307_v31, %v2175_v25  ;;  %v2376_v8 = vadd.f32 %v2375_v62, %v2345_v52  ;;  %2280 = vst [vmem:[%s4228_s24 + $0x58] sm:$0xff] %v2186_v48  ;;  %v2349_v30 = vmul.f32 %v2186_v48, %v2186_v48 }
 0x1ef   : > { %2278 = vst [vmem:[%s4228_s24 + $0x48] sm:$0xff] %v2178_v5  ;;  %v2347_v50 = vmul.f32 %v2178_v5, %v2178_v5  ;;  %v4270_v61 = vadd.f32 %v3001_v47, %v4158_v54 }
 0x1f0   : > { %v2377_v60 = vadd.f32 %v2376_v8, %v2346_v33  ;;  %v2309_v26 = vadd.f32 %v2308_v59, %v2178_v5 }
 0x1f1   : > { %v3002_v57 = vpop.f32.mrb[124].mxu1  ;;  %v3086_v17 = vpop.f32.mrb[124].mxu0 }
 0x1f2   : > { %v2310_v16 = vadd.f32 %v2309_v26, %v2183_v10  ;;  %v2378_v9 = vadd.f32 %v2377_v60, %v2347_v50  ;;  %v2199_v35 = vadd.f32 %v3086_v17, %v4215_v21  ;;  %v3003_v14 = vpop.f32.mrb[125].mxu1  ;;  %v2190_v15 = vpop.f32.mrb[125].mxu0 }
 0x1f3   : > { %v3004_v18 = vadd.f32 %v3003_v14, %v3002_v57  ;;  %v2191_v19 = vadd.f32 %v2190_v15, %v4203_v63  ;;  %v3005_v34 = vpop.f32.mrb[126].mxu1  ;;  %v3087_v54 = vpop.f32.mrb[126].mxu0 }
 0x1f4   : > { %v2379_v45 = vadd.f32 %v2378_v9, %v2348_v11  ;;  %2283 = vst [vmem:[%s4228_s24 + $0x70] sm:$0xff] %v2199_v35  ;;  %v2311_v56 = vadd.f32 %v2310_v16, %v2186_v48  ;;  %v2202_v4 = vadd.f32 %v3087_v54, %v4221_v44  ;;  %v3006_v43 = vpop.f32.mrb[127].mxu1  ;;  %v2193_v23 = vpop.f32.mrb[127].mxu0  ;;  %v2352_v25 = vmul.f32 %v2199_v35, %v2199_v35 }
 0x1f5   : > { %2281 = vst [vmem:[%s4228_s24 + $0x60] sm:$0xff] %v2191_v19  ;;  %v2350_v38 = vmul.f32 %v2191_v19, %v2191_v19  ;;  %v3007_v21 = vadd.f32 %v3006_v43, %v3005_v34  ;;  %v2194_v40 = vadd.f32 %v2193_v23, %v4209_v53  ;;  %v2070_v49 = vadd.f32 %v3004_v18, %v4164_v39 }
 0x1f6   : > { %v2312_v63 = vadd.f32 %v2311_v56, %v2191_v19  ;;  %v2380_v29 = vadd.f32 %v2379_v45, %v2349_v30  ;;  %2284 = vst [vmem:[%s4228_s24 + $0x78] sm:$0xff] %v2202_v4 }
 0x1f7   : > { %2282 = vst [vmem:[%s4228_s24 + $0x68] sm:$0xff] %v2194_v40  ;;  %v2351_v37 = vmul.f32 %v2194_v40, %v2194_v40  ;;  %v2073_v10 = vadd.f32 %v3007_v21, %v4170_v12  ;;  %v2353_v12 = vmul.f32 %v2202_v4, %v2202_v4 }
 0x1f8   : > { %v2381_v13 = vadd.f32 %v2380_v29, %v2350_v38  ;;  %v2313_v22 = vadd.f32 %v2312_v63, %v2194_v40 }
 0x1f9   : > { %v3008_v44 = vpop.f32.mrb[128].mxu1  ;;  %v3090_v55 = vpop.f32.mrb[128].mxu0 }
 0x1fa   : > { %v2314_v1 = vadd.f32 %v2313_v22, %v2199_v35  ;;  %v2382_v20 = vadd.f32 %v2381_v13, %v2351_v37  ;;  %v2215_v53 = vadd.f32 %v3090_v55, %v4252_v32  ;;  %v3009_v52 = vpop.f32.mrb[129].mxu1  ;;  %v2206_v39 = vpop.f32.mrb[129].mxu0 }
 0x1fb   : > { %v3010_v62 = vadd.f32 %v3009_v52, %v3008_v44  ;;  %v2207_v31 = vadd.f32 %v2206_v39, %v4237_v58  ;;  %v3011_v48 = vpop.f32.mrb[130].mxu1  ;;  %v3091_v7 = vpop.f32.mrb[130].mxu0 }
 0x1fc   : > { %v2383_v46 = vadd.f32 %v2382_v20, %v2352_v25  ;;  %2287 = vst [vmem:[%s4228_s24 + $0x90] sm:$0xff] %v2215_v53  ;;  %v2315_v33 = vadd.f32 %v2314_v1, %v2202_v4  ;;  %v2218_v47 = vadd.f32 %v3091_v7, %v4255_v24  ;;  %v3012_v5 = vpop.f32.mrb[131].mxu1  ;;  %v2209_v59 = vpop.f32.mrb[131].mxu0  ;;  %v2356_v35 = vmul.f32 %v2215_v53, %v2215_v53 }
 0x1fd   : > { %2285 = vst [vmem:[%s4228_s24 + $0x80] sm:$0xff] %v2207_v31  ;;  %v2354_v8 = vmul.f32 %v2207_v31, %v2207_v31  ;;  %v3013_v32 = vadd.f32 %v3012_v5, %v3011_v48  ;;  %v2210_v50 = vadd.f32 %v2209_v59, %v4242_v0  ;;  %v2078_v60 = vadd.f32 %v3010_v62, %v4176_v27 }
 0x1fe   : > { %v2316_v58 = vadd.f32 %v2315_v33, %v2207_v31  ;;  %v2384_v26 = vadd.f32 %v2383_v46, %v2353_v12  ;;  %2288 = vst [vmem:[%s4228_s24 + $0x98] sm:$0xff] %v2218_v47 }
 0x1ff   : > { %2286 = vst [vmem:[%s4228_s24 + $0x88] sm:$0xff] %v2210_v50  ;;  %v2355_v57 = vmul.f32 %v2210_v50, %v2210_v50  ;;  %v2081_v17 = vadd.f32 %v3013_v32, %v4182_v36  ;;  %v2357_v36 = vmul.f32 %v2218_v47, %v2218_v47 }
 0x200   : > { %v2385_v11 = vadd.f32 %v2384_v26, %v2354_v8  ;;  %v2317_v16 = vadd.f32 %v2316_v58, %v2210_v50 }
 0x201   : > { %v3014_v24 = vpop.f32.mrb[132].mxu1  ;;  %v3094_v9 = vpop.f32.mrb[132].mxu0 }
 0x202   : > { %v2318_v14 = vadd.f32 %v2317_v16, %v2215_v53  ;;  %v2386_v15 = vadd.f32 %v2385_v11, %v2355_v57  ;;  %v2231_v18 = vadd.f32 %v3094_v9, %v2070_v49  ;;  %v3015_v0 = vpop.f32.mrb[133].mxu1  ;;  %v2222_v19 = vpop.f32.mrb[133].mxu0 }
 0x203   : > { %v3016_v27 = vadd.f32 %v3015_v0, %v3014_v24  ;;  %v2223_v34 = vadd.f32 %v2222_v19, %v4265_v2  ;;  %v3017_v54 = vpop.f32.mrb[134].mxu1  ;;  %v3095_v30 = vpop.f32.mrb[134].mxu0 }
 0x204   : > { %v2387_v45 = vadd.f32 %v2386_v15, %v2356_v35  ;;  %2291 = vst [vmem:[%s4228_s24 + $0xb0] sm:$0xff] %v2231_v18  ;;  %v2319_v56 = vadd.f32 %v2318_v14, %v2218_v47  ;;  %v2234_v4 = vadd.f32 %v3095_v30, %v2073_v10  ;;  %v3018_v43 = vpop.f32.mrb[135].mxu1  ;;  %v2225_v23 = vpop.f32.mrb[135].mxu0  ;;  %v2360_v55 = vmul.f32 %v2231_v18, %v2231_v18 }
 0x205   : > { %2289 = vst [vmem:[%s4228_s24 + $0xa0] sm:$0xff] %v2223_v34  ;;  %v2358_v38 = vmul.f32 %v2223_v34, %v2223_v34  ;;  %v3019_v21 = vadd.f32 %v3018_v43, %v3017_v54  ;;  %v2226_v40 = vadd.f32 %v2225_v23, %v4270_v61  ;;  %v2086_v49 = vadd.f32 %v3016_v27, %v4188_v42 }
 0x206   : > { %v2320_v63 = vadd.f32 %v2319_v56, %v2223_v34  ;;  %v2388_v2 = vadd.f32 %v2387_v45, %v2357_v36  ;;  %2292 = vst [vmem:[%s4228_s24 + $0xb8] sm:$0xff] %v2234_v4  ;;  %v2361_v31 = vmul.f32 %v2234_v4, %v2234_v4 }
 0x207   : > { %2290 = vst [vmem:[%s4228_s24 + $0xa8] sm:$0xff] %v2226_v40  ;;  %v2359_v29 = vmul.f32 %v2226_v40, %v2226_v40  ;;  %v2089_v37 = vadd.f32 %v3019_v21, %v4194_v3 }
 0x208   : > { %v2389_v13 = vadd.f32 %v2388_v2, %v2358_v38  ;;  %v2321_v22 = vadd.f32 %v2320_v63, %v2226_v40 }
 0x209   : > { %v3020_v10 = vpop.f32.mrb[136].mxu1  ;;  %v3098_v44 = vpop.f32.mrb[136].mxu0 }
 0x20a   : > { %v2322_v25 = vadd.f32 %v2321_v22, %v2231_v18  ;;  %v2390_v1 = vadd.f32 %v2389_v13, %v2359_v29  ;;  %v2247_v20 = vadd.f32 %v3098_v44, %v2086_v49  ;;  %v3021_v61 = vpop.f32.mrb[137].mxu1  ;;  %v2238_v53 = vpop.f32.mrb[137].mxu0 }
 0x20b   : > { %v3022_v42 = vadd.f32 %v3021_v61, %v3020_v10  ;;  %v2239_v52 = vadd.f32 %v2238_v53, %v2078_v60  ;;  %v3023_v39 = vpop.f32.mrb[138].mxu1  ;;  %v3099_v62 = vpop.f32.mrb[138].mxu0 }
 0x20c   : > { %v2391_v3 = vadd.f32 %v2390_v1, %v2360_v55  ;;  %2295 = vst [vmem:[%s4228_s24 + $0xd0] sm:$0xff] %v2247_v20  ;;  %v2323_v48 = vadd.f32 %v2322_v25, %v2234_v4  ;;  %v2250_v7 = vadd.f32 %v3099_v62, %v2089_v37  ;;  %v3024_v12 = vpop.f32.mrb[139].mxu1  ;;  %v2241_v46 = vpop.f32.mrb[139].mxu0  ;;  %v2364_v16 = vmul.f32 %v2247_v20, %v2247_v20 }
 0x20d   : > { %2293 = vst [vmem:[%s4228_s24 + $0xc0] sm:$0xff] %v2239_v52  ;;  %v2362_v33 = vmul.f32 %v2239_v52, %v2239_v52  ;;  %v3025_v47 = vadd.f32 %v3024_v12, %v3023_v39  ;;  %v2242_v5 = vadd.f32 %v2241_v46, %v2081_v17  ;;  %v2094_v59 = vadd.f32 %v3022_v42, %v4200_v41 }
 0x20e   : > { %v2324_v8 = vadd.f32 %v2323_v48, %v2239_v52  ;;  %v2392_v32 = vadd.f32 %v2391_v3, %v2361_v31  ;;  %2296 = vst [vmem:[%s4228_s24 + $0xd8] sm:$0xff] %v2250_v7  ;;  %v2365_v0 = vmul.f32 %v2250_v7, %v2250_v7 }
 0x20f   : > { %2294 = vst [vmem:[%s4228_s24 + $0xc8] sm:$0xff] %v2242_v5  ;;  %v2363_v50 = vmul.f32 %v2242_v5, %v2242_v5  ;;  %v2097_v60 = vadd.f32 %v3025_v47, %v4206_v6 }
 0x210   : > { %v2393_v58 = vadd.f32 %v2392_v32, %v2362_v33  ;;  %v2325_v26 = vadd.f32 %v2324_v8, %v2242_v5 }
 0x211   : > { %v3026_v57 = vpop.f32.mrb[140].mxu1  ;;  %v3102_v11 = vpop.f32.mrb[140].mxu0 }
 0x212   : > { %v2326_v24 = vadd.f32 %v2325_v26, %v2247_v20  ;;  %v2394_v9 = vadd.f32 %v2393_v58, %v2363_v50  ;;  %v3027_v35 = vpop.f32.mrb[141].mxu1  ;;  %v2254_v14 = vpop.f32.mrb[141].mxu0 }
 0x213   : > { %v3028_v17 = vadd.f32 %v3027_v35, %v3026_v57  ;;  %v2255_v15 = vadd.f32 %v2254_v14, %v2094_v59  ;;  %v3029_v41 = vpop.f32.mrb[142].mxu1  ;;  %v3103_v18 = vpop.f32.mrb[142].mxu0 }
 0x214   : > { %v2395_v19 = vadd.f32 %v2394_v9, %v2364_v16  ;;  %v2327_v27 = vadd.f32 %v2326_v24, %v2250_v7  ;;  %v3030_v6 = vpop.f32.mrb[143].mxu1  ;;  %v2257_v34 = vpop.f32.mrb[143].mxu0 }
 0x215   : > { %v2102_v54 = vadd.f32 %v3028_v17, %v4212_v51  ;;  %2297 = vst [vmem:[%s4228_s24 + $0xe0] sm:$0xff] %v2255_v15  ;;  %v2366_v30 = vmul.f32 %v2255_v15, %v2255_v15  ;;  %v3031_v36 = vadd.f32 %v3030_v6, %v3029_v41  ;;  %v2258_v45 = vadd.f32 %v2257_v34, %v2097_v60 }
 0x216   : > { %v2328_v56 = vadd.f32 %v2327_v27, %v2255_v15  ;;  %v2396_v4 = vadd.f32 %v2395_v19, %v2365_v0 }
 0x217   : > { %v2263_v43 = vadd.f32 %v3102_v11, %v2102_v54  ;;  %v2105_v23 = vadd.f32 %v3031_v36, %v4218_v28  ;;  %2298 = vst [vmem:[%s4228_s24 + $0xe8] sm:$0xff] %v2258_v45  ;;  %v2367_v38 = vmul.f32 %v2258_v45, %v2258_v45 }
 0x218   : > { %v2397_v21 = vadd.f32 %v2396_v4, %v2366_v30  ;;  %v2329_v40 = vadd.f32 %v2328_v56, %v2258_v45 }
 0x219   : > { %2299 = vst [vmem:[%s4228_s24 + $0xf0] sm:$0xff] %v2263_v43  ;;  %v2368_v49 = vmul.f32 %v2263_v43, %v2263_v43  ;;  %v2266_v63 = vadd.f32 %v3103_v18, %v2105_v23 }
 0x21a   : > { %v2330_v2 = vadd.f32 %v2329_v40, %v2263_v43  ;;  %v2398_v51 = vadd.f32 %v2397_v21, %v2367_v38 }
 0x21b   : > { %2300 = vst [vmem:[%s4228_s24 + $0xf8] sm:$0xff] %v2266_v63  ;;  %v2369_v29 = vmul.f32 %v2266_v63, %v2266_v63 }
 0x21c   : > { %v2331_v37 = vadd.f32 %v2330_v2, %v2266_v63  ;;  %v2399_v13 = vadd.f32 %v2398_v51, %v2368_v49 }
 0x21e   : > { %v2332_v22 = vrot.slane %v2331_v37, 4  ;;  %v2400_v10 = vadd.f32 %v2399_v13, %v2369_v29 }
 0x220   : > { %v2333_v44 = vadd.f32 %v2332_v22, %v2331_v37  ;;  %v2401_v55 = vrot.slane %v2400_v10, 4 }
 0x222   : > { %v2334_v25 = vrot.slane %v2333_v44, 2  ;;  %v2402_v28 = vadd.f32 %v2401_v55, %v2400_v10 }
 0x224   : > { %v2335_v1 = vadd.f32 %v2334_v25, %v2333_v44  ;;  %v2403_v20 = vrot.slane %v2402_v28, 2 }
 0x226   : > { %v2336_v61 = vrot.slane %v2335_v1, 1  ;;  %v2404_v53 = vadd.f32 %v2403_v20, %v2402_v28 }
 0x228   : > { %v2405_v42 = vrot.slane %v2404_v53, 1  ;;  %v2337_v52 = vadd.f32 %v2336_v61, %v2335_v1 }
 0x22a   : > { %v2406_v39 = vadd.f32 %v2405_v42, %v2404_v53 }
 0x22c   : > { %v2408_v62 = vsel %vm2407_vm0, %v2337_v52, %v2406_v39 }
 0x22d   : > { %2409 = vst [vmem:[%s235_s27] sm:$0x3] %v2408_v62 }
 0x22e PF: > { %s16_s18 = sadd.s32 1, %s3208_s18  }
 0x22f   : > { %p13_p4 = scmp.ge.s32.totalorder %s16_s18, 4  }
 0x231   :  { %15 = sbr.rel (!%p13_p4) target bundleno = 1 (0x1), region = 81 }

// kernel: resnet_small_forward.9
= control target key start
LH: loop header
LB: loop body
LE: loop exit
PB: predicated region body
PF: predicated region fallthrough
CT: control target
= control target key end

     0   :  { %s3209_s18 = smov 0   ;;  %s4255_s0 = inlined_call_operand.vmem [shape: f32[2,16,16,128], index: 0, kind: input, shape index: {}]   ;;  %s4256_s1 = inlined_call_operand.vmem [shape: bf16[1152,128], index: 1, kind: input, shape index: {}]   ;;  %s4257_s2 = inlined_call_operand.vmem [shape: f32[1,128], index: 2, kind: input, shape index: {}]   ;;  %s4258_s3 = inlined_call_operand.vmem [shape: f32[1,128], index: 3, kind: input, shape index: {}]   ;;  %s4259_s4 = inlined_call_operand.vmem [shape: f32[2,16,16,128], index: 4, kind: output, shape index: {0}]   ;;  %s4260_s5 = inlined_call_operand.vmem [shape: f32[2,2,128], index: 5, kind: output, shape index: {1}]  }
   0x1 LB: > { %s2464_s19 = sadd.s32 4294967295, %s3176_s18   ;;  %p2468_p0 = scmp.ge.s32.totalorder %s3176_s18, 1  ;;  %s3176_s18 = sphi %s3209_s18, %s16_s18  }
   0x2   : > { %p190_p1 = scmp.lt.s32.totalorder %s3176_s18, 3 }
   0x4   : > { %p191_p2 = pnand %p2468_p0, %p190_p1 }
   0x5   : > { %v3097_v0 = vld [vmem:[%s4256_s1 + $0x40] sm:$0xff] (!%p191_p2)   ;;  %v3178_v2 = vmov (!%p191_p2), 0.0   ;;  %v3099_v3 = vld [vmem:[%s4256_s1 + $0x48] sm:$0xff] (!%p191_p2)   ;;  %p222_p3 = scmp.lt.s32.totalorder (!%p191_p2), %s2464_s19, 1  ;;  %v3101_v5 = vld [vmem:[%s4256_s1 + $0x50] sm:$0xff] (!%p191_p2)   ;;  %vm2375_vm0 = vcmask (!%p191_p2), 1040384  }
   0x6   : > { %194 = sbr.rel (%p191_p2) target bundleno = 558 (0x22e), region = 36  ;;  %v3098_v1 = vld [vmem:[%s4256_s1] sm:$0xff] (!%p191_p2)   ;;  %237 = vst [vmem:[#allocation2] sm:$0xff] (!%p191_p2), %v3178_v2  ;;  %238 = vst [vmem:[#allocation2 + $0x8] sm:$0xff] (!%p191_p2), %v3178_v2  ;;  %2552 = vmatprep.subr.bf16.mxu0 (!%p191_p2), %v3097_v0  ;;  %3072 = vmatprep.subr.bf16.mxu1 (!%p191_p2), %v3097_v0  ;;  %v3100_v4 = vld [vmem:[%s4256_s1 + $0x8] sm:$0xff] (!%p191_p2)  }
   0x7   : > { %239 = vst [vmem:[#allocation2 + $0x10] sm:$0x3] (!%p191_p2), %v3178_v2  ;;  %241 = vst [vmem:[#allocation2 + $0x198] sm:$0xff] (!%p191_p2), %v3178_v2  ;;  %2553 = vmatpush3.bf16.msra.mxu0 (!%p191_p2), %v3098_v1  ;;  %3080 = vmatpush3.bf16.msra.mxu1 (!%p191_p2), %v3098_v1  ;;  %v3102_v6 = vld [vmem:[%s4256_s1 + $0x10] sm:$0xff] (!%p191_p2)   ;;  %v3103_v7 = vld [vmem:[%s4256_s1 + $0x58] sm:$0xff] (!%p191_p2)  }
   0x8   : > { %242 = vst [vmem:[#allocation2 + $0x1a0] sm:$0xff] (!%p191_p2), %v3178_v2  ;;  %243 = vst [vmem:[#allocation2 + $0x1a8] sm:$0x3] (!%p191_p2), %v3178_v2  ;;  %2554 = vmatprep.subr.bf16.mxu0 (!%p191_p2), %v3099_v3  ;;  %3073 = vmatprep.subr.bf16.mxu1 (!%p191_p2), %v3099_v3  ;;  %v3104_v8 = vld [vmem:[%s4256_s1 + $0x18] sm:$0xff] (!%p191_p2)   ;;  %v3105_v9 = vld [vmem:[%s4256_s1 + $0x60] sm:$0xff] (!%p191_p2)  }
   0x9   : > { %245 = vst [vmem:[#allocation2 + $0x18] sm:$0x1] (!%p191_p2), %v3178_v2  ;;  %246 = vst [vmem:[#allocation2 + $0x30] sm:$0x1] (!%p191_p2), %v3178_v2  ;;  %v3106_v10 = vld [vmem:[%s4256_s1 + $0x20] sm:$0xff] (!%p191_p2)   ;;  %v3107_v11 = vld [vmem:[%s4256_s1 + $0x68] sm:$0xff] (!%p191_p2)  }
   0xa   : > { %247 = vst [vmem:[#allocation2 + $0x48] sm:$0x1] (!%p191_p2), %v3178_v2  ;;  %248 = vst [vmem:[#allocation2 + $0x60] sm:$0x1] (!%p191_p2), %v3178_v2  ;;  %v3311_v17 = vld [vmem:[%s4257_s2] ss:$0 sm:$0xff] (!%p191_p2) }
   0xb   : > { %249 = vst [vmem:[#allocation2 + $0x78] sm:$0x1] (!%p191_p2), %v3178_v2  ;;  %250 = vst [vmem:[#allocation2 + $0x90] sm:$0x1] (!%p191_p2), %v3178_v2  ;;  %2555 = vmatpush3.bf16.msra.mxu0 (!%p191_p2), %v3100_v4  ;;  %3081 = vmatpush3.bf16.msra.mxu1 (!%p191_p2), %v3100_v4  ;;  %v3316_v18 = vld [vmem:[%s4258_s3] ss:$0 sm:$0xff] (!%p191_p2) }
   0xc   : > { %251 = vst [vmem:[#allocation2 + $0xa8] sm:$0x1] (!%p191_p2), %v3178_v2  ;;  %252 = vst [vmem:[#allocation2 + $0xc0] sm:$0x1] (!%p191_p2), %v3178_v2  ;;  %2556 = vmatprep.subr.bf16.mxu0 (!%p191_p2), %v3101_v5  ;;  %3074 = vmatprep.subr.bf16.mxu1 (!%p191_p2), %v3101_v5  ;;  %v3108_v21 = vld [vmem:[%s4256_s1 + $0x28] sm:$0xff] (!%p191_p2)   ;;  %v3109_v22 = vld [vmem:[%s4256_s1 + $0x70] sm:$0xff] (!%p191_p2)  }
   0xd   : > { %253 = vst [vmem:[#allocation2 + $0xd8] sm:$0x1] %v3178_v2  ;;  %254 = vst [vmem:[#allocation2 + $0xf0] sm:$0x1] %v3178_v2  ;;  %s4262_s19 = smov (!%p222_p3, %s2464_s19), 1  ;;  %v455_v12 = vld [vmem:[#allocation2 + $0x1] sm:$0xff] }
   0xe   : > { %255 = vst [vmem:[#allocation2 + $0x108] sm:$0x1] %v3178_v2  ;;  %256 = vst [vmem:[#allocation2 + $0x120] sm:$0x1] %v3178_v2  ;;  %s2550_s9 = sshll.u32 %s4262_s19, 8  ;;  %v456_v13 = vld [vmem:[#allocation2 + $0x9] sm:$0xff] }
   0xf   : > { %257 = vst [vmem:[#allocation2 + $0x138] sm:$0x1] %v3178_v2  ;;  %258 = vst [vmem:[#allocation2 + $0x150] sm:$0x1] %v3178_v2  ;;  %2557 = vmatpush3.bf16.msra.mxu0 %v3102_v6  ;;  %3082 = vmatpush3.bf16.msra.mxu1 %v3102_v6  ;;  %s3298_s16 = scalar_lea.vmem %s4255_s0, %s2550_s9  ;;  %v713_v15 = vpack.c.bf16 %v456_v13, %v455_v12  ;;  %v3110_v26 = vld [vmem:[%s4256_s1 + $0x30] sm:$0xff]   ;;  %v3111_v27 = vld [vmem:[%s4256_s1 + $0x78] sm:$0xff]   ;;  %s4164_s24 = scalar_lea.vmem %s4259_s4, %s2550_s9 }
  0x10   : > { %259 = vst [vmem:[#allocation2 + $0x168] sm:$0x1] %v3178_v2  ;;  %260 = vst [vmem:[#allocation2 + $0x180] sm:$0x1] %v3178_v2  ;;  %2558 = vmatprep.subr.bf16.mxu0 %v3103_v7  ;;  %3075 = vmatprep.subr.bf16.mxu1 %v3103_v7  ;;  %v302_v14 = vld [vmem:[%s3298_s16 + $0xb0] sm:$0xff]  ;;  %v303_v16 = vld [vmem:[%s3298_s16 + $0xb8] sm:$0xff] }
  0x11   : > { %263 = vst [vmem:[#allocation2 + $0x29] sm:$0x1] %v3178_v2  ;;  %264 = vst [vmem:[#allocation2 + $0x41] sm:$0x1] %v3178_v2  ;;  %v341_v19 = vmul.f32 %v3311_v17, %v302_v14  ;;  %v342_v20 = vmul.f32 %v3311_v17, %v303_v16  ;;  %1464 = vmatprep.mubr.bf16.mxu0 %v713_v15  ;;  %v280_v28 = vld [vmem:[%s3298_s16] sm:$0xff]  ;;  %v281_v29 = vld [vmem:[%s3298_s16 + $0x8] sm:$0xff] }
  0x12   : > { %265 = vst [vmem:[#allocation2 + $0x59] sm:$0x1] %v3178_v2  ;;  %266 = vst [vmem:[#allocation2 + $0x71] sm:$0x1] %v3178_v2  ;;  %v3112_v30 = vld [vmem:[%s4256_s1 + $0x38] sm:$0xff]   ;;  %v319_v31 = vmul.f32 %v3311_v17, %v280_v28  ;;  %v320_v32 = vmul.f32 %v3311_v17, %v281_v29  ;;  %v304_v33 = vld [vmem:[%s3298_s16 + $0xc0] sm:$0xff] }
  0x13   : > { %267 = vst [vmem:[#allocation2 + $0x89] sm:$0x1] %v3178_v2  ;;  %268 = vst [vmem:[#allocation2 + $0xa1] sm:$0x1] %v3178_v2  ;;  %2559 = vmatpush3.bf16.msra.mxu0 %v3104_v8  ;;  %3083 = vmatpush3.bf16.msra.mxu1 %v3104_v8  ;;  %v380_v23 = vadd.f32 %v3316_v18, %v341_v19  ;;  %v381_v24 = vadd.f32 %v3316_v18, %v342_v20  ;;  %v305_v34 = vld [vmem:[%s3298_s16 + $0xc8] sm:$0xff]  ;;  %v3113_v38 = vld [vmem:[%s4256_s1 + $0xc0] sm:$0xff]  }
  0x14   : > { %269 = vst [vmem:[#allocation2 + $0xb9] sm:$0x1] %v3178_v2  ;;  %270 = vst [vmem:[#allocation2 + $0xd1] sm:$0x1] %v3178_v2  ;;  %2560 = vmatprep.subr.bf16.mxu0 %v3105_v9  ;;  %3076 = vmatprep.subr.bf16.mxu1 %v3105_v9  ;;  %v343_v36 = vmul.f32 %v3311_v17, %v304_v33  ;;  %v344_v37 = vmul.f32 %v3311_v17, %v305_v34  ;;  %v3114_v41 = vld [vmem:[%s4256_s1 + $0x140] sm:$0xff]   ;;  %v3117_v50 = vld [vmem:[%s4256_s1 + $0xc8] sm:$0xff]  }
  0x15   : > { %271 = vst [vmem:[#allocation2 + $0xe9] sm:$0x1] %v3178_v2  ;;  %272 = vst [vmem:[#allocation2 + $0x101] sm:$0x1] %v3178_v2  ;;  %v821_v25 = vpack.c.bf16 %v381_v24, %v380_v23  ;;  %v358_v39 = vadd.f32 %v3316_v18, %v319_v31  ;;  %v359_v40 = vadd.f32 %v3316_v18, %v320_v32  ;;  %v3115_v46 = vld [vmem:[%s4256_s1 + $0x80] sm:$0xff]   ;;  %v3122_v52 = vld [vmem:[%s4256_s1 + $0x148] sm:$0xff]  }
  0x16   : > { %273 = vst [vmem:[#allocation2 + $0x119] sm:$0x1] %v3178_v2  ;;  %274 = vst [vmem:[#allocation2 + $0x131] sm:$0x1] %v3178_v2  ;;  %v382_v42 = vadd.f32 %v3316_v18, %v343_v36  ;;  %v383_v43 = vadd.f32 %v3316_v18, %v344_v37  ;;  %v3116_v49 = vld [vmem:[%s4256_s1 + $0x100] sm:$0xff]   ;;  %v282_v53 = vld [vmem:[%s3298_s16 + $0x10] sm:$0xff] }
  0x17   : > { %275 = vst [vmem:[#allocation2 + $0x149] sm:$0x1] %v3178_v2  ;;  %276 = vst [vmem:[#allocation2 + $0x161] sm:$0x1] %v3178_v2  ;;  %2561 = vmatpush3.bf16.msra.mxu0 %v3106_v10  ;;  %3084 = vmatpush3.bf16.msra.mxu1 %v3106_v10  ;;  %v3365_v51 = vpack.c.bf16 %v359_v40, %v358_v39  ;;  %v283_v54 = vld [vmem:[%s3298_s16 + $0x18] sm:$0xff]  ;;  %v3118_v55 = vld [vmem:[%s4256_s1 + $0x88] sm:$0xff]   ;;  %v321_v57 = vmul.f32 %v3311_v17, %v282_v53 }
  0x18   : > { %277 = vst [vmem:[#allocation2 + $0x179] sm:$0x1] %v3178_v2  ;;  %278 = vst [vmem:[#allocation2 + $0x191] sm:$0x1] %v3178_v2  ;;  %2562 = vmatprep.subr.bf16.mxu0 %v3107_v11  ;;  %3077 = vmatprep.subr.bf16.mxu1 %v3107_v11  ;;  %v830_v56 = vpack.c.bf16 %v383_v43, %v382_v42  ;;  %v322_v58 = vmul.f32 %v3311_v17, %v283_v54  ;;  %v306_v59 = vld [vmem:[%s3298_s16 + $0xd0] sm:$0xff]  ;;  %v307_v60 = vld [vmem:[%s3298_s16 + $0xd8] sm:$0xff] }
  0x19   : > { %262 = vst [vmem:[#allocation2 + $0x11] sm:$0x1] %v3178_v2  ;;  %244 = vst [vmem:[#allocation2] sm:$0x1] %v3178_v2  ;;  %1560 = vmatprep.mubr.bf16.mxu1 %v821_v25  ;;  %v3119_v61 = vld [vmem:[%s4256_s1 + $0xd0] sm:$0xff]   ;;  %v345_v62 = vmul.f32 %v3311_v17, %v306_v59  ;;  %v346_v63 = vmul.f32 %v3311_v17, %v307_v60  ;;  %v3124_v0 = vld [vmem:[%s4256_s1 + $0x108] sm:$0xff]   ;;  %v360_v1 = vadd.f32 %v3316_v18, %v321_v57 }
  0x1a   : > { %261 = vst [vmem:[#allocation2 + $0x198] sm:$0x1] %v3178_v2  ;;  %279 = vst [vmem:[#allocation2 + $0x1a9] sm:$0x1] %v3178_v2  ;;  %v3120_v9 = vld [vmem:[%s4256_s1 + $0x90] sm:$0xff]   ;;  %v3121_v12 = vld [vmem:[%s4256_s1 + $0xd8] sm:$0xff]  }
  0x1b   : > { %413 = vst [vmem:[#allocation2 + $0x121] sm:$0xff] %v380_v23  ;;  %414 = vst [vmem:[#allocation2 + $0x129] sm:$0xff] %v381_v24  ;;  %2563 = vmatpush3.bf16.msra.mxu0 %v3108_v21  ;;  %3085 = vmatpush3.bf16.msra.mxu1 %v3108_v21  ;;  %v384_v5 = vadd.f32 %v3316_v18, %v345_v62  ;;  %v385_v6 = vadd.f32 %v3316_v18, %v346_v63  ;;  %v284_v14 = vld [vmem:[%s3298_s16 + $0x20] sm:$0xff]  ;;  %v285_v15 = vld [vmem:[%s3298_s16 + $0x28] sm:$0xff]  ;;  %s2473_s9 = sshll.u32 %s4262_s19, 1 }
  0x1c   : > { %2564 = vmatprep.subr.bf16.mxu0 %v3109_v22  ;;  %3078 = vmatprep.subr.bf16.mxu1 %v3109_v22  ;;  %391 = vst [vmem:[#allocation2 + $0x19] sm:$0xff] %v358_v39  ;;  %392 = vst [vmem:[#allocation2 + $0x21] sm:$0xff] %v359_v40  ;;  %v308_v16 = vld [vmem:[%s3298_s16 + $0xe0] sm:$0xff]  ;;  %v323_v20 = vmul.f32 %v3311_v17, %v284_v14  ;;  %v324_v21 = vmul.f32 %v3311_v17, %v285_v15  ;;  %v309_v22 = vld [vmem:[%s3298_s16 + $0xe8] sm:$0xff]  ;;  %s235_s27 = scalar_lea.vmem %s4260_s5, %s2473_s9 }
  0x1d   : > { %415 = vst [vmem:[#allocation2 + $0x139] sm:$0xff] %v382_v42  ;;  %416 = vst [vmem:[#allocation2 + $0x141] sm:$0xff] %v383_v43  ;;  %v839_v19 = vpack.c.bf16 %v385_v6, %v384_v5  ;;  %v347_v23 = vmul.f32 %v3311_v17, %v308_v16  ;;  %v3123_v24 = vld [vmem:[%s4256_s1 + $0x98] sm:$0xff]   ;;  %v348_v25 = vmul.f32 %v3311_v17, %v309_v22  ;;  %v3130_v29 = vld [vmem:[%s4256_s1 + $0x150] sm:$0xff]  }
  0x1e   : > { %393 = vst [vmem:[#allocation2 + $0x31] sm:$0xff] %v360_v1  ;;  %417 = vst [vmem:[#allocation2 + $0x151] sm:$0xff] %v384_v5  ;;  %v3132_v34 = vld [vmem:[%s4256_s1 + $0x110] sm:$0xff]   ;;  %v3126_v39 = vld [vmem:[%s4256_s1 + $0xa0] sm:$0xff]  }
  0x1f   : > { %2565 = vmatpush3.bf16.msra.mxu0 %v3110_v26  ;;  %3086 = vmatpush3.bf16.msra.mxu1 %v3110_v26  ;;  %418 = vst [vmem:[#allocation2 + $0x159] sm:$0xff] %v385_v6  ;;  %v362_v26 = vadd.f32 %v3316_v18, %v323_v20  ;;  %v386_v28 = vadd.f32 %v3316_v18, %v347_v23  ;;  %v3127_v42 = vld [vmem:[%s4256_s1 + $0xe8] sm:$0xff]   ;;  %v3138_v59 = vld [vmem:[%s4256_s1 + $0x118] sm:$0xff]   ;;  %v288_v60 = vld [vmem:[%s3298_s16 + $0x40] sm:$0xff] }
  0x20   : > { %v423_v35 = vld [vmem:[#allocation2] sm:$0xff]  ;;  %2566 = vmatprep.subr.bf16.mxu0 %v3111_v27  ;;  %3079 = vmatprep.subr.bf16.mxu1 %v3111_v27  ;;  %v363_v27 = vadd.f32 %v3316_v18, %v324_v21  ;;  %v387_v31 = vadd.f32 %v3316_v18, %v348_v25  ;;  %v3131_v62 = vld [vmem:[%s4256_s1 + $0xb0] sm:$0xff]   ;;  %v3134_v6 = vld [vmem:[%s4256_s1 + $0xb8] sm:$0xff]  }
  0x21   : > { %v712_v47 = vpack.c.bf16 %v3178_v2, %v423_v35  ;;  %v361_v2 = vadd.f32 %v3316_v18, %v322_v58  ;;  %395 = vst [vmem:[#allocation2 + $0x49] sm:$0xff] %v362_v26  ;;  %419 = vst [vmem:[#allocation2 + $0x169] sm:$0xff] %v386_v28  ;;  %v3139_v15 = vld [vmem:[%s4256_s1 + $0x160] sm:$0xff]  }
  0x22   : > { %v447_v44 = vld [vmem:[#allocation2 + $0x120] sm:$0xff]  ;;  %v448_v45 = vld [vmem:[#allocation2 + $0x128] sm:$0xff]  ;;  %396 = vst [vmem:[#allocation2 + $0x51] sm:$0xff] %v363_v27  ;;  %420 = vst [vmem:[#allocation2 + $0x171] sm:$0xff] %v387_v31  ;;  %v3438_v40 = vpack.c.bf16 %v363_v27, %v362_v26  ;;  %v848_v43 = vpack.c.bf16 %v387_v31, %v386_v28 }
  0x23   : > { %v820_v48 = vpack.c.bf16 %v448_v45, %v447_v44  ;;  %2567 = vmatpush3.bf16.msra.mxu0 %v3112_v30  ;;  %3087 = vmatpush3.bf16.msra.mxu1 %v3112_v30  ;;  %v425_v3 = vld [vmem:[#allocation2 + $0x18] sm:$0xff]  ;;  %v426_v4 = vld [vmem:[#allocation2 + $0x20] sm:$0xff]  ;;  %394 = vst [vmem:[#allocation2 + $0x39] sm:$0xff] %v361_v2  ;;  %v3402_v13 = vpack.c.bf16 %v361_v2, %v360_v1  ;;  %v290_v2 = vld [vmem:[%s3298_s16 + $0x50] sm:$0xff] }
  0x24   : > { %2664 = vmatprep.subr.bf16.mxu1 %v3113_v38  ;;  %2776 = vmatprep.subr.bf16.mxu0 %v3114_v41  ;;  %v449_v7 = vld [vmem:[#allocation2 + $0x138] sm:$0xff]  ;;  %v450_v8 = vld [vmem:[#allocation2 + $0x140] sm:$0xff]  ;;  %v3395_v10 = vpack.c.bf16 %v426_v4, %v425_v3  ;;  %v286_v41 = vld [vmem:[%s3298_s16 + $0x30] sm:$0xff]  ;;  %v329_v5 = vmul.f32 %v3311_v17, %v290_v2 }
  0x25   : > { %v3397_v11 = vpack.c.bf16 %v450_v8, %v449_v7  ;;  %v3125_v30 = vld [vmem:[%s4256_s1 + $0xe0] sm:$0xff]   ;;  %v427_v32 = vld [vmem:[#allocation2 + $0x30] sm:$0xff]  ;;  %v287_v44 = vld [vmem:[%s3298_s16 + $0x38] sm:$0xff]  ;;  %v325_v45 = vmul.f32 %v3311_v17, %v286_v41 }
  0x26   : > { %1465 = vmatmul.mubr.bf16.vlgmr.msra.gmra.mrb[0].mxu0 %v712_v47  ;;  %1561 = vmatmul.mubr.bf16.vlgmr.msra.gmra.mrb[0].mxu1 %v820_v48  ;;  %v451_v35 = vld [vmem:[#allocation2 + $0x150] sm:$0xff]  ;;  %v452_v36 = vld [vmem:[#allocation2 + $0x158] sm:$0xff]  ;;  %v326_v47 = vmul.f32 %v3311_v17, %v287_v44  ;;  %v487_v7 = vld [vmem:[#allocation2 + $0x2] sm:$0xff] }
  0x27   : > { %2665 = vmatpush3.bf16.msra.mxu1 %v3115_v46  ;;  %2777 = vmatpush3.bf16.msra.mxu0 %v3116_v49  ;;  %v3433_v38 = vpack.c.bf16 %v452_v36, %v451_v35  ;;  %v3128_v46 = vld [vmem:[%s4256_s1 + $0xa8] sm:$0xff]   ;;  %v3129_v48 = vld [vmem:[%s4256_s1 + $0xf0] sm:$0xff]   ;;  %v364_v49 = vadd.f32 %v3316_v18, %v325_v45  ;;  %v3133_v3 = vld [vmem:[%s4256_s1 + $0xf8] sm:$0xff]  }
  0x28   : > { %2666 = vmatprep.subr.bf16.mxu1 %v3117_v50  ;;  %1472 = vmatprep.mubr.bf16.mxu0 %v3365_v51  ;;  %v429_v50 = vld [vmem:[#allocation2 + $0x48] sm:$0xff]  ;;  %v365_v54 = vadd.f32 %v3316_v18, %v326_v47  ;;  %v291_v4 = vld [vmem:[%s3298_s16 + $0x58] sm:$0xff]  ;;  %v3135_v16 = vld [vmem:[%s4256_s1 + $0x1c0] sm:$0xff]  }
  0x29   : > { %1568 = vmatprep.mubr.bf16.mxu1 %v830_v56  ;;  %2778 = vmatprep.subr.bf16.mxu0 %v3122_v52  ;;  %v430_v52 = vld [vmem:[#allocation2 + $0x50] sm:$0xff]  ;;  %v453_v53 = vld [vmem:[#allocation2 + $0x168] sm:$0xff]  ;;  %397 = vst [vmem:[#allocation2 + $0x61] sm:$0xff] %v364_v49  ;;  %v3137_v56 = vld [vmem:[%s4256_s1 + $0x158] sm:$0xff]   ;;  %v330_v14 = vmul.f32 %v3311_v17, %v291_v4 }
  0x2a   : > { %v428_v33 = vld [vmem:[#allocation2 + $0x38] sm:$0xff]  ;;  %398 = vst [vmem:[#allocation2 + $0x69] sm:$0xff] %v365_v54  ;;  %v3461_v57 = vpack.c.bf16 %v430_v52, %v429_v50  ;;  %v3473_v63 = vpack.c.bf16 %v365_v54, %v364_v49  ;;  %v488_v8 = vld [vmem:[#allocation2 + $0xa] sm:$0xff]  ;;  %v3141_v23 = vld [vmem:[%s4256_s1 + $0x120] sm:$0xff]  }
  0x2b   : > { %2667 = vmatpush3.bf16.msra.mxu1 %v3118_v55  ;;  %2779 = vmatpush3.bf16.msra.mxu0 %v3124_v0  ;;  %v3431_v37 = vpack.c.bf16 %v428_v33, %v427_v32  ;;  %v454_v55 = vld [vmem:[#allocation2 + $0x170] sm:$0xff]  ;;  %v327_v0 = vmul.f32 %v3311_v17, %v288_v60  ;;  %v369_v21 = vadd.f32 %v3316_v18, %v330_v14  ;;  %v3136_v27 = vld [vmem:[%s4256_s1 + $0x180] sm:$0xff]   ;;  %v3143_v31 = vld [vmem:[%s4256_s1 + $0x168] sm:$0xff]  }
  0x2c   : > { %2668 = vmatprep.subr.bf16.mxu1 %v3119_v61  ;;  %2780 = vmatprep.subr.bf16.mxu0 %v3130_v29  ;;  %v3463_v58 = vpack.c.bf16 %v454_v55, %v453_v53  ;;  %v289_v61 = vld [vmem:[%s3298_s16 + $0x48] sm:$0xff]  ;;  %v714_v26 = vpack.c.bf16 %v488_v8, %v487_v7  ;;  %v295_v41 = vld [vmem:[%s3298_s16 + $0x78] sm:$0xff]  ;;  %v3145_v50 = vld [vmem:[%s4256_s1 + $0x1d0] sm:$0xff]  }
  0x2d   : > { %v328_v1 = vmul.f32 %v3311_v17, %v289_v61  ;;  %402 = vst [vmem:[#allocation2 + $0x99] sm:$0xff] %v369_v21  ;;  %v3140_v32 = vld [vmem:[%s4256_s1 + $0x1c8] sm:$0xff]   ;;  %v296_v52 = vld [vmem:[%s3298_s16 + $0x80] sm:$0xff]  ;;  %v3147_v61 = vld [vmem:[%s4256_s1 + $0x170] sm:$0xff]  }
  0x2e   : > { %1473 = vmatmul.mubr.bf16.gmra.mrb[4].mxu0 %v3395_v10  ;;  %1569 = vmatmul.mubr.bf16.gmra.mrb[4].mxu1 %v3397_v11  ;;  %v3144_v36 = vld [vmem:[%s4256_s1 + $0x128] sm:$0xff]   ;;  %v299_v4 = vld [vmem:[%s3298_s16 + $0x98] sm:$0xff] }
  0x2f   : > { %2669 = vmatpush3.bf16.msra.mxu1 %v3120_v9  ;;  %1480 = vmatprep.mubr.bf16.mxu0 %v3402_v13  ;;  %v366_v9 = vadd.f32 %v3316_v18, %v327_v0  ;;  %v3142_v44 = vld [vmem:[%s4256_s1 + $0x188] sm:$0xff]   ;;  %v3148_v0 = vld [vmem:[%s4256_s1 + $0x130] sm:$0xff]   ;;  %v492_v7 = vld [vmem:[#allocation2 + $0x3a] sm:$0xff] }
  0x30   : > { %2670 = vmatprep.subr.bf16.mxu1 %v3121_v12  ;;  %1576 = vmatprep.mubr.bf16.mxu1 %v839_v19  ;;  %v367_v12 = vadd.f32 %v3316_v18, %v328_v1  ;;  %v368_v19 = vadd.f32 %v3316_v18, %v329_v5  ;;  %v431_v20 = vld [vmem:[#allocation2 + $0x60] sm:$0xff]  ;;  %v297_v55 = vld [vmem:[%s3298_s16 + $0x88] sm:$0xff]  ;;  %v491_v1 = vld [vmem:[#allocation2 + $0x32] sm:$0xff] }
  0x31   : > { %2781 = vmatpush3.bf16.msra.mxu0 %v3132_v34  ;;  %399 = vst [vmem:[#allocation2 + $0x79] sm:$0xff] %v366_v9  ;;  %v432_v22 = vld [vmem:[#allocation2 + $0x68] sm:$0xff]  ;;  %v489_v34 = vld [vmem:[#allocation2 + $0x1a] sm:$0xff]  ;;  %v336_v60 = vmul.f32 %v3311_v17, %v297_v55  ;;  %v3161_v55 = vld [vmem:[%s4256_s1 + $0x1b0] sm:$0xff]  }
  0x32   : > { %2782 = vmatprep.subr.bf16.mxu0 %v3137_v56  ;;  %400 = vst [vmem:[#allocation2 + $0x81] sm:$0xff] %v367_v12  ;;  %401 = vst [vmem:[#allocation2 + $0x91] sm:$0xff] %v368_v19  ;;  %v3505_v25 = vpack.c.bf16 %v432_v22, %v431_v20  ;;  %v3512_v29 = vpack.c.bf16 %v367_v12, %v366_v9  ;;  %v335_v56 = vmul.f32 %v3311_v17, %v296_v52  ;;  %v3149_v12 = vld [vmem:[%s4256_s1 + $0x1d8] sm:$0xff]  }
  0x33   : > { %2671 = vmatpush3.bf16.msra.mxu1 %v3123_v24  ;;  %v292_v24 = vld [vmem:[%s3298_s16 + $0x60] sm:$0xff]  ;;  %v3576_v2 = vadd.f32 %v3316_v18, %v336_v60  ;;  %v338_v9 = vmul.f32 %v3311_v17, %v299_v4  ;;  %v3151_v20 = vld [vmem:[%s4256_s1 + $0x178] sm:$0xff]  }
  0x34   : > { %2672 = vmatprep.subr.bf16.mxu1 %v3125_v30  ;;  %v331_v28 = vmul.f32 %v3311_v17, %v292_v24  ;;  %v3152_v22 = vld [vmem:[%s4256_s1 + $0x138] sm:$0xff]   ;;  %v301_v24 = vld [vmem:[%s3298_s16 + $0xa8] sm:$0xff] }
  0x35   : > { %2783 = vmatpush3.bf16.msra.mxu0 %v3138_v59  ;;  %v3563_v59 = vpack.c.bf16 %v369_v21, %v368_v19  ;;  %408 = vst [vmem:[#allocation2 + $0xe1] sm:$0xff] %v3576_v2  ;;  %v3602_v19 = vpack.c.bf16 %v492_v7, %v491_v1  ;;  %v3164_v1 = vld [vmem:[%s4256_s1 + $0x1b8] sm:$0xff]  }
  0x36   : > { %1481 = vmatmul.mubr.bf16.gmra.mrb[8].mxu0 %v3431_v37  ;;  %1577 = vmatmul.mubr.bf16.gmra.mrb[8].mxu1 %v3433_v38  ;;  %v3522_v33 = vadd.f32 %v3316_v18, %v331_v28  ;;  %v494_v28 = vld [vmem:[#allocation2 + $0x52] sm:$0xff] }
  0x37   : > { %2673 = vmatpush3.bf16.msra.mxu1 %v3126_v39  ;;  %1488 = vmatprep.mubr.bf16.mxu0 %v3438_v40  ;;  %v294_v39 = vld [vmem:[%s3298_s16 + $0x70] sm:$0xff] }
  0x38   : > { %2674 = vmatprep.subr.bf16.mxu1 %v3127_v42  ;;  %1584 = vmatprep.mubr.bf16.mxu1 %v848_v43  ;;  %v433_v42 = vld [vmem:[#allocation2 + $0x78] sm:$0xff]  ;;  %v490_v43 = vld [vmem:[#allocation2 + $0x22] sm:$0xff]  ;;  %403 = vst [vmem:[#allocation2 + $0xa9] sm:$0xff] %v3522_v33  ;;  %v333_v45 = vmul.f32 %v3311_v17, %v294_v39 }
  0x39   : > { %2784 = vmatprep.subr.bf16.mxu0 %v3139_v15  ;;  %v434_v47 = vld [vmem:[#allocation2 + $0x80] sm:$0xff]  ;;  %v3554_v54 = vpack.c.bf16 %v490_v43, %v489_v34  ;;  %v435_v5 = vld [vmem:[#allocation2 + $0x90] sm:$0xff]  ;;  %v3595_v15 = vadd.f32 %v3316_v18, %v338_v9  ;;  %v3156_v43 = vld [vmem:[%s4256_s1 + $0x1e8] sm:$0xff]  }
  0x3a   : > { %2785 = vmatpush3.bf16.msra.mxu0 %v3141_v23  ;;  %v3552_v53 = vpack.c.bf16 %v434_v47, %v433_v42  ;;  %v300_v23 = vld [vmem:[%s3298_s16 + $0xa0] sm:$0xff] }
  0x3b   : > { %2675 = vmatpush3.bf16.msra.mxu1 %v3128_v46  ;;  %2786 = vmatprep.subr.bf16.mxu0 %v3143_v31  ;;  %v334_v46 = vmul.f32 %v3311_v17, %v295_v41  ;;  %410 = vst [vmem:[#allocation2 + $0xf9] sm:$0xff] %v3595_v15  ;;  %v3153_v34 = vld [vmem:[%s4256_s1 + $0x1e0] sm:$0xff]  }
  0x3c   : > { %2676 = vmatprep.subr.bf16.mxu1 %v3129_v48  ;;  %v3543_v48 = vadd.f32 %v3316_v18, %v333_v45  ;;  %v3158_v45 = vld [vmem:[%s4256_s1 + $0x1a8] sm:$0xff]   ;;  %v497_v60 = vld [vmem:[#allocation2 + $0x7a] sm:$0xff] }
  0x3d   : > { %v3546_v49 = vadd.f32 %v3316_v18, %v334_v46 }
  0x3e   : > { %1489 = vmatmul.mubr.bf16.gmra.mrb[12].mxu0 %v3461_v57  ;;  %1585 = vmatmul.mubr.bf16.gmra.mrb[12].mxu1 %v3463_v58  ;;  %405 = vst [vmem:[#allocation2 + $0xc1] sm:$0xff] %v3543_v48 }
  0x3f   : > { %2677 = vmatpush3.bf16.msra.mxu1 %v3131_v62  ;;  %1496 = vmatprep.mubr.bf16.mxu0 %v3473_v63  ;;  %406 = vst [vmem:[#allocation2 + $0xc9] sm:$0xff] %v3546_v49  ;;  %v3570_v62 = vadd.f32 %v3316_v18, %v335_v56  ;;  %v3650_v42 = vpack.c.bf16 %v3546_v49, %v3543_v48  ;;  %v496_v48 = vld [vmem:[#allocation2 + $0x6a] sm:$0xff] }
  0x40   : > { %2678 = vmatprep.subr.bf16.mxu1 %v3133_v3  ;;  %1625 = vmatprep.mubr.bf16.mxu1 %v3395_v10  ;;  %v293_v10 = vld [vmem:[%s3298_s16 + $0x68] sm:$0xff]  ;;  %v298_v3 = vld [vmem:[%s3298_s16 + $0x90] sm:$0xff] }
  0x41   : > { %v332_v30 = vmul.f32 %v3311_v17, %v293_v10  ;;  %2787 = vmatpush3.bf16.msra.mxu0 %v3144_v36  ;;  %407 = vst [vmem:[#allocation2 + $0xd9] sm:$0xff] %v3570_v62  ;;  %v337_v8 = vmul.f32 %v3311_v17, %v298_v3  ;;  %v493_v10 = vld [vmem:[#allocation2 + $0x4a] sm:$0xff]  ;;  %v3155_v36 = vld [vmem:[%s4256_s1 + $0x1a0] sm:$0xff]   ;;  %v311_v3 = vld [vmem:[%s3298_s16 + $0xf8] sm:$0xff] }
  0x42   : > { %2788 = vmatprep.subr.bf16.mxu0 %v3147_v61  ;;  %v3645_v41 = vpack.c.bf16 %v494_v28, %v493_v10  ;;  %v3159_v49 = vld [vmem:[%s4256_s1 + $0x1f0] sm:$0xff]   ;;  %v498_v61 = vld [vmem:[#allocation2 + $0x82] sm:$0xff] }
  0x43   : > { %2679 = vmatpush3.bf16.msra.mxu1 %v3134_v6  ;;  %v3525_v35 = vadd.f32 %v3316_v18, %v332_v30  ;;  %v436_v6 = vld [vmem:[#allocation2 + $0x98] sm:$0xff]  ;;  %v3592_v14 = vadd.f32 %v3316_v18, %v337_v8  ;;  %v340_v30 = vmul.f32 %v3311_v17, %v301_v24  ;;  %v3692_v7 = vpack.c.bf16 %v498_v61, %v497_v60  ;;  %v3167_v60 = vld [vmem:[%s4256_s1 + $0x230] sm:$0xff]  }
  0x44   : > { %2888 = vmatprep.subr.bf16.mxu1 %v3135_v16  ;;  %v3600_v16 = vpack.c.bf16 %v436_v6, %v435_v5  ;;  %v350_v5 = vmul.f32 %v3311_v17, %v311_v3  ;;  %v514_v3 = vld [vmem:[#allocation2 + $0x142] sm:$0xff] }
  0x45   : > { %404 = vst [vmem:[#allocation2 + $0xb1] sm:$0xff] %v3525_v35  ;;  %2789 = vmatpush3.bf16.msra.mxu0 %v3148_v0  ;;  %409 = vst [vmem:[#allocation2 + $0xf1] sm:$0xff] %v3592_v14  ;;  %v3611_v21 = vpack.c.bf16 %v3525_v35, %v3522_v33  ;;  %v3628_v33 = vadd.f32 %v3316_v18, %v340_v30  ;;  %v3637_v35 = vld [vmem:[%s4256_s1 + $0x200] sm:$0xff]   ;;  %v3162_v0 = vld [vmem:[%s4256_s1 + $0x1f8] sm:$0xff]   ;;  %v3696_v8 = vpack.c.bf16 %v3595_v15, %v3592_v14 }
  0x46   : > { %1497 = vmatmul.mubr.bf16.gmra.mrb[16].mxu0 %v3505_v25  ;;  %1626 = vmatmul.mubr.bf16.vlgmr.msra.gmra.mrb[16].mxu1 %v714_v26  ;;  %v339_v26 = vmul.f32 %v3311_v17, %v300_v23  ;;  %v439_v46 = vld [vmem:[#allocation2 + $0xc0] sm:$0xff]  ;;  %v440_v47 = vld [vmem:[#allocation2 + $0xc8] sm:$0xff] }
  0x47   : > { %2889 = vmatpush3.bf16.msra.mxu1 %v3136_v27  ;;  %1504 = vmatprep.mubr.bf16.mxu0 %v3512_v29  ;;  %v437_v27 = vld [vmem:[#allocation2 + $0xa8] sm:$0xff]  ;;  %412 = vst [vmem:[#allocation2 + $0x111] sm:$0xff] %v3628_v33 }
  0x48   : > { %1633 = vmatprep.mubr.bf16.mxu1 %v3431_v37  ;;  %2890 = vmatprep.subr.bf16.mxu1 %v3140_v32  ;;  %v3146_v37 = vld [vmem:[%s4256_s1 + $0x190] sm:$0xff]   ;;  %v3623_v32 = vadd.f32 %v3316_v18, %v339_v26  ;;  %v441_v56 = vld [vmem:[#allocation2 + $0xd8] sm:$0xff] }
  0x49   : > { %2790 = vmatprep.subr.bf16.mxu0 %v3151_v20 }
  0x4a   : > { %2791 = vmatpush3.bf16.msra.mxu0 %v3152_v22  ;;  %411 = vst [vmem:[#allocation2 + $0x109] sm:$0xff] %v3623_v32 }
  0x4b   : > { %2891 = vmatpush3.bf16.msra.mxu1 %v3142_v44  ;;  %3024 = vmatprep.subr.bf16.mxu0 %v3637_v35  ;;  %v495_v44 = vld [vmem:[#allocation2 + $0x62] sm:$0xff] }
  0x4c   : > { %2892 = vmatprep.subr.bf16.mxu1 %v3145_v50  ;;  %v438_v31 = vld [vmem:[#allocation2 + $0xb0] sm:$0xff]  ;;  %v3665_v50 = vpack.c.bf16 %v440_v47, %v439_v46  ;;  %v3667_v52 = vpack.c.bf16 %v496_v48, %v495_v44  ;;  %v444_v22 = vld [vmem:[#allocation2 + $0xf8] sm:$0xff]  ;;  %v542_v46 = vld [vmem:[#allocation2 + $0x128] sm:$0xff] }
  0x4d   : > { %v3643_v39 = vpack.c.bf16 %v438_v31, %v437_v27  ;;  %v443_v20 = vld [vmem:[#allocation2 + $0xf0] sm:$0xff]  ;;  %v503_v31 = vld [vmem:[#allocation2 + $0xc2] sm:$0xff] }
  0x4e   : > { %1505 = vmatmul.mubr.bf16.gmra.mrb[20].mxu0 %v3552_v53  ;;  %1634 = vmatmul.mubr.bf16.gmra.mrb[20].mxu1 %v3554_v54  ;;  %v3704_v14 = vpack.c.bf16 %v444_v22, %v443_v20  ;;  %v501_v23 = vld [vmem:[#allocation2 + $0xaa] sm:$0xff]  ;;  %v502_v27 = vld [vmem:[#allocation2 + $0xb2] sm:$0xff]  ;;  %v3165_v47 = vld [vmem:[%s4256_s1 + $0x220] sm:$0xff]  }
  0x4f   : > { %1512 = vmatprep.mubr.bf16.mxu0 %v3563_v59  ;;  %1641 = vmatprep.mubr.bf16.mxu1 %v3461_v57  ;;  %v3150_v57 = vld [vmem:[%s4256_s1 + $0x198] sm:$0xff]   ;;  %v3718_v28 = vpack.c.bf16 %v502_v27, %v501_v23 }
  0x50   : > { %2893 = vmatpush3.bf16.msra.mxu1 %v3146_v37  ;;  %v3671_v37 = vpack.c.bf16 %v3576_v2, %v3570_v62  ;;  %v442_v62 = vld [vmem:[#allocation2 + $0xe0] sm:$0xff]  ;;  %v310_v2 = vld [vmem:[%s3298_s16 + $0xf0] sm:$0xff]  ;;  %v617_v27 = vld [vmem:[#allocation2 + $0x38] sm:$0xff] }
  0x51   : > { %2894 = vmatprep.subr.bf16.mxu1 %v3149_v12  ;;  %v349_v4 = vmul.f32 %v3311_v17, %v310_v2  ;;  %v3690_v6 = vpack.c.bf16 %v442_v62, %v441_v56  ;;  %v389_v12 = vadd.f32 %v3316_v18, %v350_v5  ;;  %v499_v17 = vld [vmem:[#allocation2 + $0x92] sm:$0xff]  ;;  %v445_v24 = vld [vmem:[#allocation2 + $0x108] sm:$0xff]  ;;  %v513_v2 = vld [vmem:[#allocation2 + $0x13a] sm:$0xff] }
  0x52   : > { %v446_v26 = vld [vmem:[#allocation2 + $0x110] sm:$0xff]  ;;  %v516_v5 = vld [vmem:[#allocation2 + $0x15a] sm:$0xff] }
  0x53   : > { %v388_v9 = vadd.f32 %v3316_v18, %v349_v4  ;;  %422 = vst [vmem:[#allocation2 + $0x189] sm:$0xff] %v389_v12  ;;  %v3710_v18 = vpack.c.bf16 %v3628_v33, %v3623_v32  ;;  %v3716_v10 = vpack.c.bf16 %v446_v26, %v445_v24  ;;  %v504_v32 = vld [vmem:[#allocation2 + $0xca] sm:$0xff]  ;;  %v510_v56 = vld [vmem:[#allocation2 + $0x112] sm:$0xff] }
  0x54   : > { %2895 = vmatpush3.bf16.msra.mxu1 %v3150_v57  ;;  %v500_v57 = vld [vmem:[#allocation2 + $0x9a] sm:$0xff]  ;;  %v3726_v33 = vpack.c.bf16 %v504_v32, %v503_v31  ;;  %v512_v62 = vld [vmem:[#allocation2 + $0x12a] sm:$0xff]  ;;  %v515_v4 = vld [vmem:[#allocation2 + $0x152] sm:$0xff] }
  0x55   : > { %2896 = vmatprep.subr.bf16.mxu1 %v3153_v34  ;;  %421 = vst [vmem:[#allocation2 + $0x181] sm:$0xff] %v388_v9  ;;  %v3706_v15 = vpack.c.bf16 %v500_v57, %v499_v17  ;;  %v3720_v30 = vpack.c.bf16 %v389_v12, %v388_v9  ;;  %v3157_v34 = vld [vmem:[%s4256_s1 + $0x208] sm:$0xff]   ;;  %v3786_v17 = vpack.c.bf16 %v516_v5, %v515_v4  ;;  %v648_v20 = vld [vmem:[#allocation2 + $0x31] sm:$0xff]  ;;  %v649_v22 = vld [vmem:[#allocation2 + $0x39] sm:$0xff] }
  0x56   : > { %1513 = vmatmul.mubr.bf16.gmra.mrb[24].mxu0 %v3600_v16  ;;  %1642 = vmatmul.mubr.bf16.gmra.mrb[24].mxu1 %v3602_v19  ;;  %v517_v57 = vld [vmem:[#allocation2 + $0x16a] sm:$0xff]  ;;  %v719_v24 = vpack.c.bf16 %v649_v22, %v648_v20 }
  0x57   : > { %1520 = vmatprep.mubr.bf16.mxu0 %v3611_v21  ;;  %1649 = vmatprep.mubr.bf16.mxu1 %v3505_v25  ;;  %v616_v26 = vld [vmem:[#allocation2 + $0x30] sm:$0xff] }
  0x58   : > { %2897 = vmatpush3.bf16.msra.mxu1 %v3155_v36  ;;  %v505_v36 = vld [vmem:[#allocation2 + $0xda] sm:$0xff]  ;;  %v650_v31 = vld [vmem:[#allocation2 + $0x49] sm:$0xff]  ;;  %v651_v32 = vld [vmem:[#allocation2 + $0x51] sm:$0xff] }
  0x59   : > { %2898 = vmatprep.subr.bf16.mxu1 %v3156_v43  ;;  %v506_v43 = vld [vmem:[#allocation2 + $0xe2] sm:$0xff] }
  0x5a   : > { %v3739_v44 = vpack.c.bf16 %v506_v43, %v505_v36  ;;  %v728_v36 = vpack.c.bf16 %v651_v32, %v650_v31  ;;  %v618_v43 = vld [vmem:[#allocation2 + $0x48] sm:$0xff] }
  0x5c   : > { %2899 = vmatpush3.bf16.msra.mxu1 %v3158_v45  ;;  %v541_v45 = vld [vmem:[#allocation2 + $0x120] sm:$0xff]  ;;  %v550_v12 = vld [vmem:[#allocation2 + $0x188] sm:$0xff] }
  0x5d   : > { %2900 = vmatprep.subr.bf16.mxu1 %v3159_v49  ;;  %v3753_v49 = vpack.c.bf16 %v542_v46, %v541_v45  ;;  %v549_v9 = vld [vmem:[#allocation2 + $0x180] sm:$0xff] }
  0x5e   : > { %1521 = vmatmul.mubr.bf16.gmra.mrb[28].mxu0 %v3643_v39  ;;  %1650 = vmatmul.mubr.bf16.gmra.mrb[28].mxu1 %v3645_v41  ;;  %v576_v46 = vld [vmem:[#allocation2 + $0x141] sm:$0xff] }
  0x5f   : > { %1528 = vmatprep.mubr.bf16.mxu0 %v3650_v42  ;;  %1657 = vmatprep.mubr.bf16.mxu1 %v3552_v53 }
  0x60   : > { %2901 = vmatpush3.bf16.msra.mxu1 %v3161_v55  ;;  %v509_v55 = vld [vmem:[#allocation2 + $0x10a] sm:$0xff] }
  0x61   : > { %2902 = vmatprep.subr.bf16.mxu1 %v3162_v0  ;;  %v3765_v61 = vpack.c.bf16 %v510_v56, %v509_v55  ;;  %v511_v0 = vld [vmem:[#allocation2 + $0x122] sm:$0xff] }
  0x62   : > { %v613_v55 = vld [vmem:[#allocation2 + $0x182] sm:$0xff] }
  0x64   : > { %2903 = vmatpush3.bf16.msra.mxu1 %v3164_v1  ;;  %v3774_v1 = vpack.c.bf16 %v512_v62, %v511_v0 }
  0x66   : > { %1529 = vmatmul.mubr.bf16.gmra.mrb[32].mxu0 %v3665_v50  ;;  %1658 = vmatmul.mubr.bf16.gmra.mrb[32].mxu1 %v3667_v52 }
  0x67   : > { %1536 = vmatprep.mubr.bf16.mxu0 %v3671_v37  ;;  %1665 = vmatprep.mubr.bf16.mxu1 %v3600_v16 }
  0x6e   : > { %1537 = vmatmul.mubr.bf16.gmra.mrb[36].mxu0 %v3690_v6  ;;  %1666 = vmatmul.mubr.bf16.gmra.mrb[36].mxu1 %v3692_v7 }
  0x6f   : > { %1544 = vmatprep.mubr.bf16.mxu0 %v3696_v8  ;;  %1673 = vmatprep.mubr.bf16.mxu1 %v3643_v39 }
  0x76   : > { %1545 = vmatmul.mubr.bf16.gmra.mrb[40].mxu0 %v3704_v14  ;;  %1674 = vmatmul.mubr.bf16.gmra.mrb[40].mxu1 %v3706_v15 }
  0x77   : > { %1552 = vmatprep.mubr.bf16.mxu0 %v3710_v18  ;;  %1681 = vmatprep.mubr.bf16.mxu1 %v3665_v50 }
  0x7e   : > { %1553 = vmatmul.mubr.bf16.gmra.mrb[44].mxu0 %v3716_v10  ;;  %1682 = vmatmul.mubr.bf16.gmra.mrb[44].mxu1 %v3718_v28 }
  0x7f   : > { %1689 = vmatprep.mubr.bf16.mxu1 %v3690_v6  ;;  %1786 = vmatprep.mubr.bf16.mxu0 %v3554_v54  ;;  %v3160_v54 = vld [vmem:[%s4256_s1 + $0x210] sm:$0xff]  }
  0x86   : > { %1690 = vmatmul.mubr.bf16.gmra.mrb[48].mxu1 %v3726_v33  ;;  %1787 = vmatmul.mubr.bf16.vlgmr.msra.gmra.mrb[48].mxu0 %v3365_v51  ;;  %v3163_v51 = vld [vmem:[%s4256_s1 + $0x218] sm:$0xff]  }
  0x87   : > { %3025 = vmatpush3.bf16.msra.mxu0 %v3637_v35  ;;  %1697 = vmatprep.mubr.bf16.mxu1 %v3704_v14  ;;  %v508_v35 = vld [vmem:[#allocation2 + $0xfa] sm:$0xff] }
  0x88   : > { %1794 = vmatprep.mubr.bf16.mxu0 %v3602_v19  ;;  %3026 = vmatprep.subr.bf16.mxu0 %v3157_v34  ;;  %v507_v19 = vld [vmem:[#allocation2 + $0xf2] sm:$0xff] }
  0x89   : > { %v3751_v48 = vpack.c.bf16 %v508_v35, %v507_v19  ;;  %v573_v19 = vld [vmem:[#allocation2 + $0x121] sm:$0xff]  ;;  %v574_v35 = vld [vmem:[#allocation2 + $0x129] sm:$0xff] }
  0x8a   : > { %v3808_v45 = vpack.c.bf16 %v574_v35, %v573_v19 }
  0x8b   : > { %3027 = vmatpush3.bf16.msra.mxu0 %v3157_v34  ;;  %v718_v34 = vpack.c.bf16 %v617_v27, %v616_v26 }
  0x8c   : > { %3028 = vmatprep.subr.bf16.mxu0 %v3160_v54 }
  0x8e   : > { %1698 = vmatmul.mubr.bf16.gmra.mrb[52].mxu1 %v3739_v44  ;;  %1795 = vmatmul.mubr.bf16.gmra.mrb[52].mxu0 %v3402_v13  ;;  %v3166_v13 = vld [vmem:[%s4256_s1 + $0x228] sm:$0xff]  }
  0x8f   : > { %1705 = vmatprep.mubr.bf16.mxu1 %v3716_v10  ;;  %1802 = vmatprep.mubr.bf16.mxu0 %v3645_v41 }
  0x90   : > { %3029 = vmatpush3.bf16.msra.mxu0 %v3160_v54  ;;  %v619_v54 = vld [vmem:[#allocation2 + $0x50] sm:$0xff] }
  0x91   : > { %3030 = vmatprep.subr.bf16.mxu0 %v3163_v51 }
  0x94   : > { %3031 = vmatpush3.bf16.msra.mxu0 %v3163_v51  ;;  %v727_v51 = vpack.c.bf16 %v619_v54, %v618_v43 }
  0x95   : > { %3032 = vmatprep.subr.bf16.mxu0 %v3165_v47 }
  0x96   : > { %1706 = vmatmul.mubr.bf16.gmra.mrb[56].mxu1 %v3751_v48  ;;  %1803 = vmatmul.mubr.bf16.gmra.mrb[56].mxu0 %v3438_v40  ;;  %v3168_v40 = vld [vmem:[%s4256_s1 + $0x238] sm:$0xff]  }
  0x97   : > { %1713 = vmatprep.mubr.bf16.mxu1 %v3753_v49  ;;  %1810 = vmatprep.mubr.bf16.mxu0 %v3667_v52 }
  0x98   : > { %3033 = vmatpush3.bf16.msra.mxu0 %v3165_v47 }
  0x99   : > { %3034 = vmatprep.subr.bf16.mxu0 %v3166_v13 }
  0x9c   : > { %3035 = vmatpush3.bf16.msra.mxu0 %v3166_v13 }
  0x9d   : > { %3036 = vmatprep.subr.bf16.mxu0 %v3167_v60 }
  0x9e   : > { %1714 = vmatmul.mubr.bf16.gmra.mrb[60].mxu1 %v3765_v61  ;;  %1811 = vmatmul.mubr.bf16.gmra.mrb[60].mxu0 %v3473_v63 }
  0x9f   : > { %1721 = vmatprep.mubr.bf16.mxu1 %v3397_v11  ;;  %1818 = vmatprep.mubr.bf16.mxu0 %v3692_v7  ;;  %v3780_v11 = vpack.c.bf16 %v514_v3, %v513_v2 }
  0xa0   : > { %3037 = vmatpush3.bf16.msra.mxu0 %v3167_v60 }
  0xa1   : > { %3038 = vmatprep.subr.bf16.mxu0 %v3168_v40 }
  0xa4   : > { %3039 = vmatpush3.bf16.msra.mxu0 %v3168_v40 }
  0xa6   : > { %1722 = vmatmul.mubr.bf16.gmra.mrb[64].mxu1 %v3774_v1  ;;  %1819 = vmatmul.mubr.bf16.gmra.mrb[64].mxu0 %v3512_v29 }
  0xa7   : > { %1729 = vmatprep.mubr.bf16.mxu1 %v3433_v38  ;;  %1826 = vmatprep.mubr.bf16.mxu0 %v3706_v15  ;;  %v3788_v38 = vpack.c.bf16 %v550_v12, %v549_v9 }
  0xae   : > { %1730 = vmatmul.mubr.bf16.gmra.mrb[68].mxu1 %v3780_v11  ;;  %1827 = vmatmul.mubr.bf16.gmra.mrb[68].mxu0 %v3563_v59 }
  0xaf   : > { %1737 = vmatprep.mubr.bf16.mxu1 %v3463_v58  ;;  %1834 = vmatprep.mubr.bf16.mxu0 %v3718_v28  ;;  %v518_v58 = vld [vmem:[#allocation2 + $0x172] sm:$0xff] }
  0xb0   : > { %v3794_v23 = vpack.c.bf16 %v518_v58, %v517_v57 }
  0xb6   : > { %1738 = vmatmul.mubr.bf16.gmra.mrb[72].mxu1 %v3786_v17  ;;  %1835 = vmatmul.mubr.bf16.gmra.mrb[72].mxu0 %v3611_v21 }
  0xb7   : > { %1745 = vmatprep.mubr.bf16.mxu1 %v3788_v38  ;;  %1842 = vmatprep.mubr.bf16.mxu0 %v3726_v33 }
  0xbe   : > { %1746 = vmatmul.mubr.bf16.gmra.mrb[76].mxu1 %v3794_v23  ;;  %1843 = vmatmul.mubr.bf16.gmra.mrb[76].mxu0 %v3650_v42 }
  0xbf   : > { %1850 = vmatprep.mubr.bf16.mxu0 %v3739_v44  ;;  %1947 = vmatprep.mubr.bf16.mxu1 %v719_v24 }
  0xc6   : > { %1851 = vmatmul.mubr.bf16.gmra.mrb[80].mxu0 %v3671_v37  ;;  %1948 = vmatmul.mubr.bf16.vlgmr.msra.gmra.mrb[80].mxu1 %v718_v34 }
  0xc7   : > { %1858 = vmatprep.mubr.bf16.mxu0 %v3751_v48  ;;  %1955 = vmatprep.mubr.bf16.mxu1 %v728_v36 }
  0xce   : > { %1859 = vmatmul.mubr.bf16.gmra.mrb[84].mxu0 %v3696_v8  ;;  %1956 = vmatmul.mubr.bf16.gmra.mrb[84].mxu1 %v727_v51 }
  0xcf   : > { %1866 = vmatprep.mubr.bf16.mxu0 %v3765_v61  ;;  %1963 = vmatprep.mubr.bf16.mxu1 %v3473_v63  ;;  %v575_v63 = vld [vmem:[#allocation2 + $0x139] sm:$0xff] }
  0xd0   : > { %v3814_v47 = vpack.c.bf16 %v576_v46, %v575_v63 }
  0xd6   : > { %1867 = vmatmul.mubr.bf16.gmra.mrb[88].mxu0 %v3710_v18  ;;  %1964 = vmatmul.mubr.bf16.gmra.mrb[88].mxu1 %v3505_v25  ;;  %v577_v25 = vld [vmem:[#allocation2 + $0x151] sm:$0xff] }
  0xd7   : > { %1874 = vmatprep.mubr.bf16.mxu0 %v3774_v1  ;;  %1971 = vmatprep.mubr.bf16.mxu1 %v3512_v29  ;;  %v578_v29 = vld [vmem:[#allocation2 + $0x159] sm:$0xff] }
  0xd8   : > { %v3820_v13 = vpack.c.bf16 %v578_v29, %v577_v25 }
  0xde   : > { %1875 = vmatmul.mubr.bf16.gmra.mrb[92].mxu0 %v3808_v45  ;;  %1972 = vmatmul.mubr.bf16.gmra.mrb[92].mxu1 %v3552_v53  ;;  %v579_v53 = vld [vmem:[#allocation2 + $0x169] sm:$0xff] }
  0xdf   : > { %1882 = vmatprep.mubr.bf16.mxu0 %v3780_v11  ;;  %1979 = vmatprep.mubr.bf16.mxu1 %v3563_v59  ;;  %v580_v59 = vld [vmem:[#allocation2 + $0x171] sm:$0xff] }
  0xe0   : > { %v3826_v56 = vpack.c.bf16 %v580_v59, %v579_v53 }
  0xe6   : > { %1883 = vmatmul.mubr.bf16.gmra.mrb[96].mxu0 %v3814_v47  ;;  %1980 = vmatmul.mubr.bf16.gmra.mrb[96].mxu1 %v3600_v16  ;;  %v614_v16 = vld [vmem:[#allocation2 + $0x18a] sm:$0xff] }
  0xe7   : > { %1890 = vmatprep.mubr.bf16.mxu0 %v3786_v17  ;;  %1987 = vmatprep.mubr.bf16.mxu1 %v3611_v21  ;;  %v3828_v60 = vpack.c.bf16 %v614_v16, %v613_v55  ;;  %v680_v21 = vld [vmem:[#allocation2 + $0x32] sm:$0xff] }
  0xee   : > { %1891 = vmatmul.mubr.bf16.gmra.mrb[100].mxu0 %v3820_v13  ;;  %1988 = vmatmul.mubr.bf16.gmra.mrb[100].mxu1 %v3643_v39  ;;  %v681_v39 = vld [vmem:[#allocation2 + $0x3a] sm:$0xff] }
  0xef   : > { %1898 = vmatprep.mubr.bf16.mxu0 %v3794_v23  ;;  %1995 = vmatprep.mubr.bf16.mxu1 %v3650_v42  ;;  %v720_v9 = vpack.c.bf16 %v681_v39, %v680_v21 }
  0xf6   : > { %1899 = vmatmul.mubr.bf16.gmra.mrb[104].mxu0 %v3826_v56  ;;  %1996 = vmatmul.mubr.bf16.gmra.mrb[104].mxu1 %v3665_v50 }
  0xf7   : > { %1906 = vmatprep.mubr.bf16.mxu0 %v3828_v60  ;;  %2003 = vmatprep.mubr.bf16.mxu1 %v3671_v37 }
  0xf9   : > { %v2568_v40 = vpop.f32.mrb[0].mxu0  ;;  %v2640_v42 = vpop.f32.mrb[0].mxu1 }
  0xfa   : > { %v2569_v0 = vpop.f32.mrb[1].mxu0  ;;  %v2641_v62 = vpop.f32.mrb[1].mxu1 }
  0xfb   : > { %v3834_v2 = vadd.f32 %v2569_v0, %v2568_v40  ;;  %v3836_v3 = vadd.f32 %v2641_v62, %v2640_v42  ;;  %v2571_v4 = vpop.f32.mrb[2].mxu0  ;;  %v2643_v5 = vpop.f32.mrb[2].mxu1 }
  0xfc   : > { %v2572_v12 = vpop.f32.mrb[3].mxu0  ;;  %v2644_v57 = vpop.f32.mrb[3].mxu1 }
  0xfd   : > { %v3838_v50 = vadd.f32 %v2572_v12, %v2571_v4  ;;  %v3840_v58 = vadd.f32 %v2644_v57, %v2643_v5 }
  0xfe   : > { %1907 = vmatmul.mubr.bf16.gmra.mrb[108].mxu0 %v3720_v30  ;;  %2004 = vmatmul.mubr.bf16.gmra.mrb[108].mxu1 %v3690_v6 }
  0xff   : > { %2011 = vmatprep.mubr.bf16.mxu1 %v3696_v8  ;;  %3040 = vmatprep.mubr.bf16.mxu0 %v720_v9 }
 0x101   : > { %v2574_v37 = vpop.f32.mrb[4].mxu0  ;;  %v2646_v20 = vpop.f32.mrb[4].mxu1 }
 0x102   : > { %v2575_v22 = vpop.f32.mrb[5].mxu0  ;;  %v2647_v24 = vpop.f32.mrb[5].mxu1 }
 0x103   : > { %v3845_v26 = vadd.f32 %v2575_v22, %v2574_v37  ;;  %v3847_v27 = vadd.f32 %v2647_v24, %v2646_v20  ;;  %v2577_v31 = vpop.f32.mrb[6].mxu0  ;;  %v2649_v32 = vpop.f32.mrb[6].mxu1 }
 0x104   : > { %v2578_v34 = vpop.f32.mrb[7].mxu0  ;;  %v2650_v36 = vpop.f32.mrb[7].mxu1 }
 0x105   : > { %v3849_v43 = vadd.f32 %v2578_v34, %v2577_v31  ;;  %v3851_v54 = vadd.f32 %v2650_v36, %v2649_v32  ;;  %v640_v32 = vld [vmem:[#allocation2 + $0x150] sm:$0xff]  ;;  %v641_v34 = vld [vmem:[#allocation2 + $0x158] sm:$0xff] }
 0x106   : > { %2012 = vmatmul.mubr.bf16.gmra.mrb[112].mxu1 %v3704_v14  ;;  %3041 = vmatmul.mubr.bf16.vlgmr.msra.gmra.mrb[112].mxu0 %v3645_v41 }
 0x107   : > { %2019 = vmatprep.mubr.bf16.mxu1 %v3710_v18  ;;  %3044 = vmatprep.mubr.bf16.mxu0 %v3667_v52 }
 0x109   : > { %v2580_v6 = vpop.f32.mrb[8].mxu0  ;;  %v2652_v8 = vpop.f32.mrb[8].mxu1 }
 0x10a   : > { %v2581_v51 = vpop.f32.mrb[9].mxu0  ;;  %v2653_v19 = vpop.f32.mrb[9].mxu1 }
 0x10b   : > { %v3857_v35 = vadd.f32 %v2581_v51, %v2580_v6  ;;  %v3859_v63 = vadd.f32 %v2653_v19, %v2652_v8  ;;  %v2583_v46 = vpop.f32.mrb[10].mxu0  ;;  %v2655_v25 = vpop.f32.mrb[10].mxu1  ;;  %v826_v51 = vpack.c.bf16 %v641_v34, %v640_v32 }
 0x10c   : > { %v2584_v29 = vpop.f32.mrb[11].mxu0  ;;  %v2656_v53 = vpop.f32.mrb[11].mxu1 }
 0x10d   : > { %v3861_v59 = vadd.f32 %v2584_v29, %v2583_v46  ;;  %v3863_v14 = vadd.f32 %v2656_v53, %v2655_v25 }
 0x10e   : > { %2020 = vmatmul.mubr.bf16.gmra.mrb[116].mxu1 %v3716_v10  ;;  %3045 = vmatmul.mubr.bf16.gmra.mrb[116].mxu0 %v3692_v7  ;;  %v638_v7 = vld [vmem:[#allocation2 + $0x138] sm:$0xff] }
 0x10f   : > { %2027 = vmatprep.mubr.bf16.mxu1 %v3808_v45  ;;  %3048 = vmatprep.mubr.bf16.mxu0 %v3706_v15  ;;  %v639_v15 = vld [vmem:[#allocation2 + $0x140] sm:$0xff] }
 0x110   : > { %v817_v12 = vpack.c.bf16 %v639_v15, %v638_v7 }
 0x111   : > { %v2586_v41 = vpop.f32.mrb[12].mxu0  ;;  %v2658_v52 = vpop.f32.mrb[12].mxu1 }
 0x112   : > { %v2587_v18 = vpop.f32.mrb[13].mxu0  ;;  %v2659_v55 = vpop.f32.mrb[13].mxu1 }
 0x113   : > { %v3869_v16 = vadd.f32 %v2587_v18, %v2586_v41  ;;  %v3871_v21 = vadd.f32 %v2659_v55, %v2658_v52  ;;  %v2589_v39 = vpop.f32.mrb[14].mxu0  ;;  %v2661_v40 = vpop.f32.mrb[14].mxu1  ;;  %v642_v52 = vld [vmem:[#allocation2 + $0x168] sm:$0xff]  ;;  %v643_v18 = vld [vmem:[#allocation2 + $0x170] sm:$0xff] }
 0x114   : > { %v2590_v42 = vpop.f32.mrb[15].mxu0  ;;  %v2662_v0 = vpop.f32.mrb[15].mxu1 }
 0x115   : > { %v3873_v62 = vadd.f32 %v2590_v42, %v2589_v39  ;;  %v3875_v10 = vadd.f32 %v2662_v0, %v2661_v40  ;;  %v835_v42 = vpack.c.bf16 %v643_v18, %v642_v52 }
 0x116   : > { %2028 = vmatmul.mubr.bf16.gmra.mrb[120].mxu1 %v3753_v49  ;;  %3049 = vmatmul.mubr.bf16.gmra.mrb[120].mxu0 %v3718_v28 }
 0x117   : > { %2035 = vmatprep.mubr.bf16.mxu1 %v3814_v47  ;;  %3052 = vmatprep.mubr.bf16.mxu0 %v3726_v33 }
 0x119   : > { %v2592_v45 = vpop.f32.mrb[16].mxu0  ;;  %v2680_v4 = vpop.f32.mrb[16].mxu1 }
 0x11a   : > { %v2593_v5 = vpop.f32.mrb[17].mxu0  ;;  %v2681_v9 = vpop.f32.mrb[17].mxu1 }
 0x11b   : > { %v3881_v57 = vadd.f32 %v2593_v5, %v2592_v45  ;;  %v2682_v37 = vadd.f32 %v2681_v9, %v2680_v4  ;;  %v2595_v20 = vpop.f32.mrb[18].mxu0  ;;  %v2683_v22 = vpop.f32.mrb[18].mxu1  ;;  %v678_v9 = vld [vmem:[#allocation2 + $0x199] sm:$0xff] }
 0x11c   : > { %v2596_v24 = vpop.f32.mrb[19].mxu0  ;;  %v2684_v49 = vpop.f32.mrb[19].mxu1 }
 0x11d   : > { %v3884_v28 = vadd.f32 %v2682_v37, %v3834_v2  ;;  %v3886_v47 = vadd.f32 %v2596_v24, %v2595_v20  ;;  %v2685_v33 = vadd.f32 %v2684_v49, %v2683_v22 }
 0x11e   : > { %2036 = vmatmul.mubr.bf16.gmra.mrb[124].mxu1 %v817_v12  ;;  %3053 = vmatmul.mubr.bf16.gmra.mrb[124].mxu0 %v3739_v44  ;;  %v679_v12 = vld [vmem:[#allocation2 + $0x1a1] sm:$0xff] }
 0x11f   : > { %v3890_v31 = vadd.f32 %v2685_v33, %v3838_v50  ;;  %2043 = vmatprep.mubr.bf16.mxu1 %v3820_v13  ;;  %3056 = vmatprep.mubr.bf16.mxu0 %v3751_v48  ;;  %v854_v34 = vpack.c.bf16 %v679_v12, %v678_v9 }
 0x121   : > { %v2598_v36 = vpop.f32.mrb[20].mxu0  ;;  %v2686_v6 = vpop.f32.mrb[20].mxu1 }
 0x122   : > { %v2599_v8 = vpop.f32.mrb[21].mxu0  ;;  %v2687_v2 = vpop.f32.mrb[21].mxu1 }
 0x123   : > { %v3894_v19 = vadd.f32 %v2599_v8, %v2598_v36  ;;  %v2688_v46 = vadd.f32 %v2687_v2, %v2686_v6  ;;  %v2601_v25 = vpop.f32.mrb[22].mxu0  ;;  %v2689_v29 = vpop.f32.mrb[22].mxu1  ;;  %v646_v8 = vld [vmem:[#allocation2 + $0x198] sm:$0xff] }
 0x124   : > { %v2602_v44 = vpop.f32.mrb[23].mxu0  ;;  %v2690_v53 = vpop.f32.mrb[23].mxu1  ;;  %v710_v2 = vld [vmem:[#allocation2 + $0x19a] sm:$0xff] }
 0x125   : > { %v3897_v50 = vadd.f32 %v2688_v46, %v3845_v26  ;;  %v3899_v13 = vadd.f32 %v2602_v44, %v2601_v25  ;;  %v2691_v48 = vadd.f32 %v2690_v53, %v2689_v29  ;;  %v3169_v44 = vld [vmem:[#allocation2 + $0x8] sm:$0xff] }
 0x126   : > { %2044 = vmatmul.mubr.bf16.gmra.mrb[128].mxu1 %v826_v51  ;;  %3057 = vmatmul.mubr.bf16.gmra.mrb[128].mxu0 %v3765_v61  ;;  %v711_v51 = vld [vmem:[#allocation2 + $0x1a2] sm:$0xff]  ;;  %v853_v53 = vpack.c.bf16 %v3169_v44, %v646_v8 }
 0x127   : > { %v3903_v41 = vadd.f32 %v2691_v48, %v3849_v43  ;;  %2051 = vmatprep.mubr.bf16.mxu1 %v3826_v56  ;;  %3060 = vmatprep.mubr.bf16.mxu0 %v3774_v1  ;;  %v855_v48 = vpack.c.bf16 %v711_v51, %v710_v2 }
 0x129   : > { %v2604_v55 = vpop.f32.mrb[24].mxu0  ;;  %v2692_v39 = vpop.f32.mrb[24].mxu1 }
 0x12a   : > { %v2605_v40 = vpop.f32.mrb[25].mxu0  ;;  %v2693_v26 = vpop.f32.mrb[25].mxu1 }
 0x12b   : > { %v3907_v0 = vadd.f32 %v2605_v40, %v2604_v55  ;;  %v2694_v7 = vadd.f32 %v2693_v26, %v2692_v39  ;;  %v2607_v15 = vpop.f32.mrb[26].mxu0  ;;  %v2695_v45 = vpop.f32.mrb[26].mxu1 }
 0x12c   : > { %v2608_v61 = vpop.f32.mrb[27].mxu0  ;;  %v2696_v4 = vpop.f32.mrb[27].mxu1 }
 0x12d   : > { %v3910_v43 = vadd.f32 %v2694_v7, %v3857_v35  ;;  %v3912_v56 = vadd.f32 %v2608_v61, %v2607_v15  ;;  %v2697_v1 = vadd.f32 %v2696_v4, %v2695_v45 }
 0x12e   : > { %2052 = vmatmul.mubr.bf16.gmra.mrb[132].mxu1 %v835_v42  ;;  %3061 = vmatmul.mubr.bf16.gmra.mrb[132].mxu0 %v3780_v11 }
 0x12f   : > { %v3916_v5 = vadd.f32 %v2697_v1, %v3861_v59  ;;  %2059 = vmatprep.mubr.bf16.mxu1 %v3720_v30  ;;  %3064 = vmatprep.mubr.bf16.mxu0 %v3786_v17 }
 0x131   : > { %v2610_v37 = vpop.f32.mrb[28].mxu0  ;;  %v2698_v20 = vpop.f32.mrb[28].mxu1 }
 0x132   : > { %v2611_v22 = vpop.f32.mrb[29].mxu0  ;;  %v2699_v35 = vpop.f32.mrb[29].mxu1 }
 0x133   : > { %v3920_v24 = vadd.f32 %v2611_v22, %v2610_v37  ;;  %v2700_v49 = vadd.f32 %v2699_v35, %v2698_v20  ;;  %v2613_v33 = vpop.f32.mrb[30].mxu0  ;;  %v2701_v32 = vpop.f32.mrb[30].mxu1 }
 0x134   : > { %v2614_v11 = vpop.f32.mrb[31].mxu0  ;;  %v2702_v36 = vpop.f32.mrb[31].mxu1 }
 0x135   : > { %v3923_v59 = vadd.f32 %v2700_v49, %v3869_v16  ;;  %v3925_v30 = vadd.f32 %v2614_v11, %v2613_v33  ;;  %v2703_v17 = vadd.f32 %v2702_v36, %v2701_v32 }
 0x136   : > { %2060 = vmatmul.mubr.bf16.gmra.mrb[136].mxu1 %v3788_v38  ;;  %3065 = vmatmul.mubr.bf16.gmra.mrb[136].mxu0 %v3794_v23 }
 0x137   : > { %v3930_v6 = vadd.f32 %v2703_v17, %v3873_v62  ;;  %2067 = vmatprep.mubr.bf16.mxu1 %v854_v34  ;;  %3068 = vmatprep.mubr.bf16.mxu0 %v3828_v60 }
 0x139   : > { %v2616_v46 = vpop.f32.mrb[32].mxu0  ;;  %v2704_v25 = vpop.f32.mrb[32].mxu1 }
 0x13a   : > { %v2617_v16 = vpop.f32.mrb[33].mxu0  ;;  %v2705_v29 = vpop.f32.mrb[33].mxu1 }
 0x13b   : > { %v3933_v52 = vadd.f32 %v2617_v16, %v2616_v46  ;;  %v2706_v38 = vadd.f32 %v2705_v29, %v2704_v25  ;;  %v2619_v23 = vpop.f32.mrb[34].mxu0  ;;  %v2707_v18 = vpop.f32.mrb[34].mxu1 }
 0x13c   : > { %v2620_v62 = vpop.f32.mrb[35].mxu0  ;;  %v2708_v55 = vpop.f32.mrb[35].mxu1 }
 0x13d   : > { %v3936_v39 = vadd.f32 %v2706_v38, %v3881_v57  ;;  %v2621_v60 = vadd.f32 %v2620_v62, %v2619_v23  ;;  %v2709_v40 = vadd.f32 %v2708_v55, %v2707_v18 }
 0x13e   : > { %2068 = vmatmul.mubr.bf16.gmra.mrb[140].mxu1 %v853_v53  ;;  %3069 = vmatmul.mubr.bf16.gmra.mrb[140].mxu0 %v855_v48 }
 0x13f   : > { %v3939_v26 = vadd.f32 %v2709_v40, %v3886_v47 }
 0x141   : > { %v2622_v42 = vpop.f32.mrb[36].mxu0  ;;  %v2710_v7 = vpop.f32.mrb[36].mxu1 }
 0x142   : > { %v2623_v15 = vpop.f32.mrb[37].mxu0  ;;  %v2711_v45 = vpop.f32.mrb[37].mxu1 }
 0x143   : > { %v3941_v61 = vadd.f32 %v2623_v15, %v2622_v42  ;;  %v2712_v4 = vadd.f32 %v2711_v45, %v2710_v7  ;;  %v2625_v1 = vpop.f32.mrb[38].mxu0  ;;  %v2713_v9 = vpop.f32.mrb[38].mxu1 }
 0x144   : > { %v2626_v12 = vpop.f32.mrb[39].mxu0  ;;  %v2714_v37 = vpop.f32.mrb[39].mxu1 }
 0x145   : > { %v3944_v57 = vadd.f32 %v2712_v4, %v3894_v19  ;;  %v2627_v20 = vadd.f32 %v2626_v12, %v2625_v1  ;;  %v2715_v22 = vadd.f32 %v2714_v37, %v2713_v9 }
 0x147   : > { %v3947_v35 = vadd.f32 %v2715_v22, %v3899_v13 }
 0x149   : > { %v2628_v47 = vpop.f32.mrb[40].mxu0  ;;  %v2716_v49 = vpop.f32.mrb[40].mxu1 }
 0x14a   : > { %v2629_v33 = vpop.f32.mrb[41].mxu0  ;;  %v2717_v32 = vpop.f32.mrb[41].mxu1 }
 0x14b   : > { %v3949_v34 = vadd.f32 %v2629_v33, %v2628_v47  ;;  %v2718_v11 = vadd.f32 %v2717_v32, %v2716_v49  ;;  %v2631_v36 = vpop.f32.mrb[42].mxu0  ;;  %v2719_v17 = vpop.f32.mrb[42].mxu1 }
 0x14c   : > { %v2632_v8 = vpop.f32.mrb[43].mxu0  ;;  %v2720_v2 = vpop.f32.mrb[43].mxu1 }
 0x14d   : > { %v3952_v51 = vadd.f32 %v2718_v11, %v3907_v0  ;;  %v3954_v19 = vadd.f32 %v2632_v8, %v2631_v36  ;;  %v2721_v46 = vadd.f32 %v2720_v2, %v2719_v17 }
 0x14f   : > { %v3957_v13 = vadd.f32 %v2721_v46, %v3912_v56 }
 0x151   : > { %v2634_v25 = vpop.f32.mrb[44].mxu0  ;;  %v2722_v16 = vpop.f32.mrb[44].mxu1 }
 0x152   : > { %v2635_v29 = vpop.f32.mrb[45].mxu0  ;;  %v2723_v44 = vpop.f32.mrb[45].mxu1 }
 0x153   : > { %v3959_v53 = vadd.f32 %v2635_v29, %v2634_v25  ;;  %v2724_v48 = vadd.f32 %v2723_v44, %v2722_v16  ;;  %v2637_v38 = vpop.f32.mrb[46].mxu0  ;;  %v2725_v23 = vpop.f32.mrb[46].mxu1 }
 0x154   : > { %v2638_v18 = vpop.f32.mrb[47].mxu0  ;;  %v2726_v62 = vpop.f32.mrb[47].mxu1 }
 0x155   : > { %v3962_v0 = vadd.f32 %v2724_v48, %v3920_v24  ;;  %v3964_v55 = vadd.f32 %v2638_v18, %v2637_v38  ;;  %v2727_v40 = vadd.f32 %v2726_v62, %v2725_v23 }
 0x157   : > { %v3967_v56 = vadd.f32 %v2727_v40, %v3925_v30 }
 0x159   : > { %v2728_v42 = vpop.f32.mrb[48].mxu1  ;;  %v2792_v7 = vpop.f32.mrb[48].mxu0 }
 0x15a   : > { %v2729_v15 = vpop.f32.mrb[49].mxu1  ;;  %v2793_v45 = vpop.f32.mrb[49].mxu0 }
 0x15b   : > { %v2730_v4 = vadd.f32 %v2729_v15, %v2728_v42  ;;  %v2794_v1 = vadd.f32 %v2793_v45, %v2792_v7  ;;  %v2731_v9 = vpop.f32.mrb[50].mxu1  ;;  %v2795_v12 = vpop.f32.mrb[50].mxu0 }
 0x15c   : > { %v2732_v37 = vpop.f32.mrb[51].mxu1  ;;  %v2796_v22 = vpop.f32.mrb[51].mxu0 }
 0x15d   : > { %v3970_v47 = vadd.f32 %v2730_v4, %v3933_v52  ;;  %v3973_v24 = vadd.f32 %v2794_v1, %v3884_v28  ;;  %v2733_v49 = vadd.f32 %v2732_v37, %v2731_v9  ;;  %v2797_v33 = vadd.f32 %v2796_v22, %v2795_v12 }
 0x15f   : > { %v3975_v30 = vadd.f32 %v2733_v49, %v2621_v60  ;;  %v3978_v32 = vadd.f32 %v2797_v33, %v3890_v31 }
 0x161   : > { %v2734_v11 = vpop.f32.mrb[52].mxu1  ;;  %v2798_v36 = vpop.f32.mrb[52].mxu0 }
 0x162   : > { %v2735_v17 = vpop.f32.mrb[53].mxu1  ;;  %v2799_v8 = vpop.f32.mrb[53].mxu0 }
 0x163   : > { %v2736_v2 = vadd.f32 %v2735_v17, %v2734_v11  ;;  %v2800_v46 = vadd.f32 %v2799_v8, %v2798_v36  ;;  %v2737_v25 = vpop.f32.mrb[54].mxu1  ;;  %v2801_v16 = vpop.f32.mrb[54].mxu0 }
 0x164   : > { %v2738_v52 = vpop.f32.mrb[55].mxu1  ;;  %v2802_v29 = vpop.f32.mrb[55].mxu0 }
 0x165   : > { %v3981_v28 = vadd.f32 %v2736_v2, %v3941_v61  ;;  %v3984_v44 = vadd.f32 %v2800_v46, %v3897_v50  ;;  %v2739_v60 = vadd.f32 %v2738_v52, %v2737_v25  ;;  %v2803_v48 = vadd.f32 %v2802_v29, %v2801_v16 }
 0x167   : > { %v3986_v31 = vadd.f32 %v2739_v60, %v2627_v20  ;;  %v3989_v38 = vadd.f32 %v2803_v48, %v3903_v41 }
 0x169   : > { %v2740_v23 = vpop.f32.mrb[56].mxu1  ;;  %v2804_v18 = vpop.f32.mrb[56].mxu0 }
 0x16a   : > { %v2741_v62 = vpop.f32.mrb[57].mxu1  ;;  %v2805_v40 = vpop.f32.mrb[57].mxu0 }
 0x16b   : > { %v2742_v42 = vadd.f32 %v2741_v62, %v2740_v23  ;;  %v2806_v7 = vadd.f32 %v2805_v40, %v2804_v18  ;;  %v2743_v15 = vpop.f32.mrb[58].mxu1  ;;  %v2807_v45 = vpop.f32.mrb[58].mxu0 }
 0x16c   : > { %v2744_v61 = vpop.f32.mrb[59].mxu1  ;;  %v2808_v4 = vpop.f32.mrb[59].mxu0 }
 0x16d   : > { %v3992_v50 = vadd.f32 %v2742_v42, %v3949_v34  ;;  %v3995_v1 = vadd.f32 %v2806_v7, %v3910_v43  ;;  %v2745_v20 = vadd.f32 %v2744_v61, %v2743_v15  ;;  %v2809_v9 = vadd.f32 %v2808_v4, %v2807_v45 }
 0x16f   : > { %v3998_v41 = vadd.f32 %v2745_v20, %v3954_v19  ;;  %v4001_v12 = vadd.f32 %v2809_v9, %v3916_v5 }
 0x171   : > { %v2746_v37 = vpop.f32.mrb[60].mxu1  ;;  %v2810_v22 = vpop.f32.mrb[60].mxu0 }
 0x172   : > { %v2747_v49 = vpop.f32.mrb[61].mxu1  ;;  %v2811_v33 = vpop.f32.mrb[61].mxu0 }
 0x173   : > { %v2748_v11 = vadd.f32 %v2747_v49, %v2746_v37  ;;  %v2812_v36 = vadd.f32 %v2811_v33, %v2810_v22  ;;  %v2749_v17 = vpop.f32.mrb[62].mxu1  ;;  %v2813_v34 = vpop.f32.mrb[62].mxu0 }
 0x174   : > { %v2750_v8 = vpop.f32.mrb[63].mxu1  ;;  %v2814_v2 = vpop.f32.mrb[63].mxu0 }
 0x175   : > { %v4004_v43 = vadd.f32 %v2748_v11, %v3959_v53  ;;  %v4007_v46 = vadd.f32 %v2812_v36, %v3923_v59  ;;  %v2751_v19 = vadd.f32 %v2750_v8, %v2749_v17  ;;  %v2815_v25 = vadd.f32 %v2814_v2, %v2813_v34 }
 0x177   : > { %v4010_v5 = vadd.f32 %v2751_v19, %v3964_v55  ;;  %v4013_v16 = vadd.f32 %v2815_v25, %v3930_v6 }
 0x179   : > { %v2752_v52 = vpop.f32.mrb[64].mxu1  ;;  %v2816_v29 = vpop.f32.mrb[64].mxu0 }
 0x17a   : > { %v2753_v60 = vpop.f32.mrb[65].mxu1  ;;  %v2817_v48 = vpop.f32.mrb[65].mxu0 }
 0x17b   : > { %v2754_v23 = vadd.f32 %v2753_v60, %v2752_v52  ;;  %v2818_v18 = vadd.f32 %v2817_v48, %v2816_v29  ;;  %v2755_v62 = vpop.f32.mrb[66].mxu1  ;;  %v2819_v53 = vpop.f32.mrb[66].mxu0 }
 0x17c   : > { %v2756_v40 = vpop.f32.mrb[67].mxu1  ;;  %v2820_v42 = vpop.f32.mrb[67].mxu0 }
 0x17d   : > { %v4016_v59 = vadd.f32 %v2754_v23, %v3836_v3  ;;  %v4019_v7 = vadd.f32 %v2818_v18, %v3936_v39  ;;  %v2757_v55 = vadd.f32 %v2756_v40, %v2755_v62  ;;  %v2821_v15 = vadd.f32 %v2820_v42, %v2819_v53 }
 0x17f   : > { %v4022_v6 = vadd.f32 %v2757_v55, %v3840_v58  ;;  %v4025_v45 = vadd.f32 %v2821_v15, %v3939_v26 }
 0x181   : > { %v2758_v61 = vpop.f32.mrb[68].mxu1  ;;  %v2822_v4 = vpop.f32.mrb[68].mxu0 }
 0x182   : > { %v2759_v20 = vpop.f32.mrb[69].mxu1  ;;  %v2823_v9 = vpop.f32.mrb[69].mxu0 }
 0x183   : > { %v2760_v37 = vadd.f32 %v2759_v20, %v2758_v61  ;;  %v2824_v22 = vadd.f32 %v2823_v9, %v2822_v4  ;;  %v2761_v49 = vpop.f32.mrb[70].mxu1  ;;  %v2825_v3 = vpop.f32.mrb[70].mxu0 }
 0x184   : > { %v2762_v33 = vpop.f32.mrb[71].mxu1  ;;  %v2826_v11 = vpop.f32.mrb[71].mxu0 }
 0x185   : > { %v4028_v39 = vadd.f32 %v2760_v37, %v3847_v27  ;;  %v4031_v36 = vadd.f32 %v2824_v22, %v3944_v57  ;;  %v2763_v58 = vadd.f32 %v2762_v33, %v2761_v49  ;;  %v2827_v17 = vadd.f32 %v2826_v11, %v2825_v3 }
 0x187   : > { %v4034_v26 = vadd.f32 %v2763_v58, %v3851_v54  ;;  %v4037_v34 = vadd.f32 %v2827_v17, %v3947_v35 }
 0x189   : > { %v2764_v8 = vpop.f32.mrb[72].mxu1  ;;  %v2828_v2 = vpop.f32.mrb[72].mxu0 }
 0x18a   : > { %v2765_v19 = vpop.f32.mrb[73].mxu1  ;;  %v2829_v25 = vpop.f32.mrb[73].mxu0 }
 0x18b   : > { %v2766_v52 = vadd.f32 %v2765_v19, %v2764_v8  ;;  %v2830_v29 = vadd.f32 %v2829_v25, %v2828_v2  ;;  %v2767_v60 = vpop.f32.mrb[74].mxu1  ;;  %v2831_v27 = vpop.f32.mrb[74].mxu0 }
 0x18c   : > { %v2768_v48 = vpop.f32.mrb[75].mxu1  ;;  %v2832_v23 = vpop.f32.mrb[75].mxu0 }
 0x18d   : > { %v4040_v57 = vadd.f32 %v2766_v52, %v3859_v63  ;;  %v4043_v18 = vadd.f32 %v2830_v29, %v3952_v51  ;;  %v2769_v54 = vadd.f32 %v2768_v48, %v2767_v60  ;;  %v2833_v62 = vadd.f32 %v2832_v23, %v2831_v27 }
 0x18f   : > { %v4046_v35 = vadd.f32 %v2769_v54, %v3863_v14  ;;  %v4049_v53 = vadd.f32 %v2833_v62, %v3957_v13 }
 0x191   : > { %v2770_v40 = vpop.f32.mrb[76].mxu1  ;;  %v2834_v42 = vpop.f32.mrb[76].mxu0 }
 0x192   : > { %v2771_v55 = vpop.f32.mrb[77].mxu1  ;;  %v2835_v15 = vpop.f32.mrb[77].mxu0 }
 0x193   : > { %v2772_v61 = vadd.f32 %v2771_v55, %v2770_v40  ;;  %v2836_v4 = vadd.f32 %v2835_v15, %v2834_v42  ;;  %v2773_v20 = vpop.f32.mrb[78].mxu1  ;;  %v2837_v63 = vpop.f32.mrb[78].mxu0 }
 0x194   : > { %v2774_v9 = vpop.f32.mrb[79].mxu1  ;;  %v2838_v37 = vpop.f32.mrb[79].mxu0 }
 0x195   : > { %v4052_v51 = vadd.f32 %v2772_v61, %v3871_v21  ;;  %v4055_v22 = vadd.f32 %v2836_v4, %v3962_v0  ;;  %v2775_v14 = vadd.f32 %v2774_v9, %v2773_v20  ;;  %v2839_v49 = vadd.f32 %v2838_v37, %v2837_v63 }
 0x197   : > { %v4058_v13 = vadd.f32 %v2775_v14, %v3875_v10  ;;  %v4061_v3 = vadd.f32 %v2839_v49, %v3967_v56 }
 0x199   : > { %v2840_v33 = vpop.f32.mrb[80].mxu0  ;;  %v2904_v11 = vpop.f32.mrb[80].mxu1 }
 0x19a   : > { %v2841_v58 = vpop.f32.mrb[81].mxu0  ;;  %v2905_v17 = vpop.f32.mrb[81].mxu1 }
 0x19b   : > { %v2842_v8 = vadd.f32 %v2841_v58, %v2840_v33  ;;  %v2906_v2 = vadd.f32 %v2905_v17, %v2904_v11  ;;  %v2843_v19 = vpop.f32.mrb[82].mxu0  ;;  %v2907_v21 = vpop.f32.mrb[82].mxu1 }
 0x19c   : > { %v2844_v25 = vpop.f32.mrb[83].mxu0  ;;  %v2908_v52 = vpop.f32.mrb[83].mxu1 }
 0x19d   : > { %v4064_v0 = vadd.f32 %v2842_v8, %v3970_v47  ;;  %v2845_v29 = vadd.f32 %v2844_v25, %v2843_v19  ;;  %v2909_v60 = vadd.f32 %v2908_v52, %v2907_v21  ;;  %v4067_v10 = vadd.f32 %v2906_v2, %v3973_v24 }
 0x19f   : > { %v4070_v56 = vadd.f32 %v2845_v29, %v3975_v30  ;;  %v4073_v27 = vadd.f32 %v2909_v60, %v3978_v32 }
 0x1a1   : > { %v2846_v48 = vpop.f32.mrb[84].mxu0  ;;  %v2910_v23 = vpop.f32.mrb[84].mxu1 }
 0x1a2   : > { %v2847_v54 = vpop.f32.mrb[85].mxu0  ;;  %v2911_v62 = vpop.f32.mrb[85].mxu1 }
 0x1a3   : > { %v2848_v40 = vadd.f32 %v2847_v54, %v2846_v48  ;;  %v2912_v42 = vadd.f32 %v2911_v62, %v2910_v23  ;;  %v2849_v55 = vpop.f32.mrb[86].mxu0  ;;  %v2913_v47 = vpop.f32.mrb[86].mxu1 }
 0x1a4   : > { %v2850_v15 = vpop.f32.mrb[87].mxu0  ;;  %v2914_v61 = vpop.f32.mrb[87].mxu1 }
 0x1a5   : > { %v4076_v4 = vadd.f32 %v2848_v40, %v3981_v28  ;;  %v2851_v24 = vadd.f32 %v2850_v15, %v2849_v55  ;;  %v2915_v20 = vadd.f32 %v2914_v61, %v2913_v47  ;;  %v4079_v30 = vadd.f32 %v2912_v42, %v3984_v44 }
 0x1a7   : > { %v4082_v32 = vadd.f32 %v2851_v24, %v3986_v31  ;;  %v4085_v63 = vadd.f32 %v2915_v20, %v3989_v38 }
 0x1a9   : > { %v2852_v9 = vpop.f32.mrb[88].mxu0  ;;  %v2916_v37 = vpop.f32.mrb[88].mxu1 }
 0x1aa   : > { %v2853_v14 = vpop.f32.mrb[89].mxu0  ;;  %v2917_v49 = vpop.f32.mrb[89].mxu1 }
 0x1ab   : > { %v2854_v33 = vadd.f32 %v2853_v14, %v2852_v9  ;;  %v2918_v11 = vadd.f32 %v2917_v49, %v2916_v37  ;;  %v2855_v58 = vpop.f32.mrb[90].mxu0  ;;  %v2919_v28 = vpop.f32.mrb[90].mxu1 }
 0x1ac   : > { %v2856_v17 = vpop.f32.mrb[91].mxu0  ;;  %v2920_v8 = vpop.f32.mrb[91].mxu1 }
 0x1ad   : > { %v4088_v2 = vadd.f32 %v2854_v33, %v3992_v50  ;;  %v2857_v44 = vadd.f32 %v2856_v17, %v2855_v58  ;;  %v2921_v19 = vadd.f32 %v2920_v8, %v2919_v28  ;;  %v4091_v31 = vadd.f32 %v2918_v11, %v3995_v1 }
 0x1af   : > { %v4094_v38 = vadd.f32 %v2857_v44, %v3998_v41  ;;  %v4097_v21 = vadd.f32 %v2921_v19, %v4001_v12 }
 0x1b1   : > { %v2858_v25 = vpop.f32.mrb[92].mxu0  ;;  %v2922_v52 = vpop.f32.mrb[92].mxu1 }
 0x1b2   : > { %v2859_v29 = vpop.f32.mrb[93].mxu0  ;;  %v2923_v60 = vpop.f32.mrb[93].mxu1 }
 0x1b3   : > { %v2860_v48 = vadd.f32 %v2859_v29, %v2858_v25  ;;  %v2924_v23 = vadd.f32 %v2923_v60, %v2922_v52  ;;  %v2861_v54 = vpop.f32.mrb[94].mxu0  ;;  %v2925_v50 = vpop.f32.mrb[94].mxu1 }
 0x1b4   : > { %v2862_v62 = vpop.f32.mrb[95].mxu0  ;;  %v2926_v40 = vpop.f32.mrb[95].mxu1 }
 0x1b5   : > { %v4100_v42 = vadd.f32 %v2860_v48, %v4004_v43  ;;  %v2863_v1 = vadd.f32 %v2862_v62, %v2861_v54  ;;  %v2927_v55 = vadd.f32 %v2926_v40, %v2925_v50  ;;  %v4103_v41 = vadd.f32 %v2924_v23, %v4007_v46 }
 0x1b7   : > { %v4106_v12 = vadd.f32 %v2863_v1, %v4010_v5  ;;  %v4109_v47 = vadd.f32 %v2927_v55, %v4013_v16 }
 0x1b9   : > { %v2864_v15 = vpop.f32.mrb[96].mxu0  ;;  %v2928_v61 = vpop.f32.mrb[96].mxu1 }
 0x1ba   : > { %v2865_v24 = vpop.f32.mrb[97].mxu0  ;;  %v2929_v20 = vpop.f32.mrb[97].mxu1 }
 0x1bb   : > { %v2866_v9 = vadd.f32 %v2865_v24, %v2864_v15  ;;  %v2930_v37 = vadd.f32 %v2929_v20, %v2928_v61  ;;  %v2867_v14 = vpop.f32.mrb[98].mxu0  ;;  %v2931_v43 = vpop.f32.mrb[98].mxu1 }
 0x1bc   : > { %v2868_v49 = vpop.f32.mrb[99].mxu0  ;;  %v2932_v33 = vpop.f32.mrb[99].mxu1 }
 0x1bd   : > { %v4112_v11 = vadd.f32 %v2866_v9, %v4016_v59  ;;  %v2869_v46 = vadd.f32 %v2868_v49, %v2867_v14  ;;  %v2933_v58 = vadd.f32 %v2932_v33, %v2931_v43  ;;  %v4115_v5 = vadd.f32 %v2930_v37, %v4019_v7 }
 0x1bf   : > { %v4118_v16 = vadd.f32 %v2869_v46, %v4022_v6  ;;  %v4121_v28 = vadd.f32 %v2933_v58, %v4025_v45 }
 0x1c1   : > { %v2870_v17 = vpop.f32.mrb[100].mxu0  ;;  %v2934_v8 = vpop.f32.mrb[100].mxu1 }
 0x1c2   : > { %v2871_v44 = vpop.f32.mrb[101].mxu0  ;;  %v2935_v19 = vpop.f32.mrb[101].mxu1 }
 0x1c3   : > { %v2872_v25 = vadd.f32 %v2871_v44, %v2870_v17  ;;  %v2936_v52 = vadd.f32 %v2935_v19, %v2934_v8  ;;  %v2873_v29 = vpop.f32.mrb[102].mxu0  ;;  %v2937_v59 = vpop.f32.mrb[102].mxu1 }
 0x1c4   : > { %v2874_v60 = vpop.f32.mrb[103].mxu0  ;;  %v2938_v48 = vpop.f32.mrb[103].mxu1 }
 0x1c5   : > { %v4124_v23 = vadd.f32 %v2872_v25, %v4028_v39  ;;  %v2875_v7 = vadd.f32 %v2874_v60, %v2873_v29  ;;  %v2939_v54 = vadd.f32 %v2938_v48, %v2937_v59  ;;  %v4127_v6 = vadd.f32 %v2936_v52, %v4031_v36 }
 0x1c7   : > { %v4130_v45 = vadd.f32 %v2875_v7, %v4034_v26  ;;  %v4133_v50 = vadd.f32 %v2939_v54, %v4037_v34 }
 0x1c9   : > { %v2876_v62 = vpop.f32.mrb[104].mxu0  ;;  %v2940_v40 = vpop.f32.mrb[104].mxu1 }
 0x1ca   : > { %v2877_v1 = vpop.f32.mrb[105].mxu0  ;;  %v2941_v55 = vpop.f32.mrb[105].mxu1 }
 0x1cb   : > { %v2878_v15 = vadd.f32 %v2877_v1, %v2876_v62  ;;  %v2942_v61 = vadd.f32 %v2941_v55, %v2940_v40  ;;  %v2879_v24 = vpop.f32.mrb[106].mxu0  ;;  %v2943_v39 = vpop.f32.mrb[106].mxu1 }
 0x1cc   : > { %v2880_v20 = vpop.f32.mrb[107].mxu0  ;;  %v2944_v9 = vpop.f32.mrb[107].mxu1 }
 0x1cd   : > { %v4136_v37 = vadd.f32 %v2878_v15, %v4040_v57  ;;  %v2881_v36 = vadd.f32 %v2880_v20, %v2879_v24  ;;  %v2945_v14 = vadd.f32 %v2944_v9, %v2943_v39  ;;  %v4139_v26 = vadd.f32 %v2942_v61, %v4043_v18 }
 0x1cf   : > { %v4142_v34 = vadd.f32 %v2881_v36, %v4046_v35  ;;  %v4145_v43 = vadd.f32 %v2945_v14, %v4049_v53 }
 0x1d1   : > { %v2882_v49 = vpop.f32.mrb[108].mxu0  ;;  %v2946_v33 = vpop.f32.mrb[108].mxu1 }
 0x1d2   : > { %v2883_v46 = vpop.f32.mrb[109].mxu0  ;;  %v2947_v58 = vpop.f32.mrb[109].mxu1 }
 0x1d3   : > { %v2884_v17 = vadd.f32 %v2883_v46, %v2882_v49  ;;  %v2948_v8 = vadd.f32 %v2947_v58, %v2946_v33  ;;  %v2885_v57 = vpop.f32.mrb[110].mxu0  ;;  %v2949_v44 = vpop.f32.mrb[110].mxu1 }
 0x1d4   : > { %v2886_v19 = vpop.f32.mrb[111].mxu0  ;;  %v2950_v25 = vpop.f32.mrb[111].mxu1 }
 0x1d5   : > { %v4148_v18 = vadd.f32 %v2884_v17, %v4052_v51  ;;  %v2887_v52 = vadd.f32 %v2886_v19, %v2885_v57  ;;  %v2951_v35 = vadd.f32 %v2950_v25, %v2949_v44  ;;  %v4151_v29 = vadd.f32 %v2948_v8, %v4055_v22 }
 0x1d7   : > { %v4154_v53 = vadd.f32 %v2887_v52, %v4058_v13  ;;  %v4157_v59 = vadd.f32 %v2951_v35, %v4061_v3 }
 0x1d9   : > { %v2952_v60 = vpop.f32.mrb[112].mxu1  ;;  %v3042_v51 = vpop.f32.mrb[112].mxu0 }
 0x1da   : > { %v2119_v22 = vadd.f32 %v3042_v51, %v4079_v30  ;;  %v2953_v48 = vpop.f32.mrb[113].mxu1  ;;  %v2110_v13 = vpop.f32.mrb[113].mxu0 }
 0x1db   : > { %v2954_v7 = vadd.f32 %v2953_v48, %v2952_v60  ;;  %v2111_v3 = vadd.f32 %v2110_v13, %v4067_v10  ;;  %v2955_v54 = vpop.f32.mrb[114].mxu1  ;;  %v3043_v62 = vpop.f32.mrb[114].mxu0 }
 0x1dc   : > { %2239 = vst [vmem:[%s4164_s24 + $0x10] sm:$0xff] %v2119_v22  ;;  %v2122_v40 = vadd.f32 %v3043_v62, %v4085_v63  ;;  %v2956_v1 = vpop.f32.mrb[115].mxu1  ;;  %v2113_v55 = vpop.f32.mrb[115].mxu0  ;;  %v2308_v9 = vmul.f32 %v2119_v22, %v2119_v22 }
 0x1dd   : > { %2237 = vst [vmem:[%s4164_s24] sm:$0xff] %v2111_v3  ;;  %v2957_v15 = vadd.f32 %v2956_v1, %v2955_v54  ;;  %v2114_v61 = vadd.f32 %v2113_v55, %v4073_v27  ;;  %v4173_v24 = vadd.f32 %v2954_v7, %v4064_v0  ;;  %v2306_v30 = vmul.f32 %v2111_v3, %v2111_v3 }
 0x1de   : > { %2240 = vst [vmem:[%s4164_s24 + $0x18] sm:$0xff] %v2122_v40  ;;  %v2309_v33 = vmul.f32 %v2122_v40, %v2122_v40 }
 0x1df   : > { %2238 = vst [vmem:[%s4164_s24 + $0x8] sm:$0xff] %v2114_v61  ;;  %v2269_v39 = vadd.f32 %v2114_v61, %v2111_v3  ;;  %v2307_v20 = vmul.f32 %v2114_v61, %v2114_v61  ;;  %v4178_v10 = vadd.f32 %v2957_v15, %v4070_v56 }
 0x1e1   : > { %v2270_v63 = vadd.f32 %v2269_v39, %v2119_v22  ;;  %v2338_v36 = vadd.f32 %v2307_v20, %v2306_v30  ;;  %v2958_v14 = vpop.f32.mrb[116].mxu1  ;;  %v3046_v49 = vpop.f32.mrb[116].mxu0 }
 0x1e2   : > { %v2135_v27 = vadd.f32 %v3046_v49, %v4103_v41  ;;  %v2959_v0 = vpop.f32.mrb[117].mxu1  ;;  %v2126_v46 = vpop.f32.mrb[117].mxu0 }
 0x1e3   : > { %v2339_v58 = vadd.f32 %v2338_v36, %v2308_v9  ;;  %v2960_v17 = vadd.f32 %v2959_v0, %v2958_v14  ;;  %v2127_v8 = vadd.f32 %v2126_v46, %v4091_v31  ;;  %v2271_v57 = vadd.f32 %v2270_v63, %v2122_v40  ;;  %v2961_v56 = vpop.f32.mrb[118].mxu1  ;;  %v3047_v44 = vpop.f32.mrb[118].mxu0 }
 0x1e4   : > { %2243 = vst [vmem:[%s4164_s24 + $0x30] sm:$0xff] %v2135_v27  ;;  %v2138_v19 = vadd.f32 %v3047_v44, %v4109_v47  ;;  %v2962_v25 = vpop.f32.mrb[119].mxu1  ;;  %v2129_v52 = vpop.f32.mrb[119].mxu0  ;;  %v2312_v62 = vmul.f32 %v2135_v27, %v2135_v27 }
 0x1e5   : > { %2241 = vst [vmem:[%s4164_s24 + $0x20] sm:$0xff] %v2127_v8  ;;  %v2272_v35 = vadd.f32 %v2271_v57, %v2127_v8  ;;  %v2310_v60 = vmul.f32 %v2127_v8, %v2127_v8  ;;  %v2340_v41 = vadd.f32 %v2339_v58, %v2309_v33  ;;  %v2963_v51 = vadd.f32 %v2962_v25, %v2961_v56 }
 0x1e6   : > { %2244 = vst [vmem:[%s4164_s24 + $0x38] sm:$0xff] %v2138_v19  ;;  %v2130_v22 = vadd.f32 %v2129_v52, %v4097_v21  ;;  %v4188_v48 = vadd.f32 %v2960_v17, %v4076_v4  ;;  %v2313_v39 = vmul.f32 %v2138_v19, %v2138_v19 }
 0x1e7   : > { %v2341_v31 = vadd.f32 %v2340_v41, %v2310_v60  ;;  %v4191_v13 = vadd.f32 %v2963_v51, %v4082_v32 }
 0x1e8   : > { %2242 = vst [vmem:[%s4164_s24 + $0x28] sm:$0xff] %v2130_v22  ;;  %v2273_v7 = vadd.f32 %v2272_v35, %v2130_v22  ;;  %v2311_v47 = vmul.f32 %v2130_v22, %v2130_v22 }
 0x1e9   : > { %v2964_v3 = vpop.f32.mrb[120].mxu1  ;;  %v3050_v54 = vpop.f32.mrb[120].mxu0 }
 0x1ea   : > { %v2274_v40 = vadd.f32 %v2273_v7, %v2135_v27  ;;  %v2342_v1 = vadd.f32 %v2341_v31, %v2311_v47  ;;  %v2151_v55 = vadd.f32 %v3050_v54, %v4127_v6  ;;  %v2965_v21 = vpop.f32.mrb[121].mxu1  ;;  %v2142_v15 = vpop.f32.mrb[121].mxu0 }
 0x1eb   : > { %v2966_v4 = vadd.f32 %v2965_v21, %v2964_v3  ;;  %v2143_v61 = vadd.f32 %v2142_v15, %v4115_v5  ;;  %v2967_v30 = vpop.f32.mrb[122].mxu1  ;;  %v3051_v32 = vpop.f32.mrb[122].mxu0 }
 0x1ec   : > { %v2343_v20 = vadd.f32 %v2342_v1, %v2312_v62  ;;  %2247 = vst [vmem:[%s4164_s24 + $0x50] sm:$0xff] %v2151_v55  ;;  %v2275_v9 = vadd.f32 %v2274_v40, %v2138_v19  ;;  %v2154_v63 = vadd.f32 %v3051_v32, %v4133_v50  ;;  %v2968_v36 = vpop.f32.mrb[123].mxu1  ;;  %v2145_v14 = vpop.f32.mrb[123].mxu0  ;;  %v2316_v56 = vmul.f32 %v2151_v55, %v2151_v55 }
 0x1ed   : > { %2245 = vst [vmem:[%s4164_s24 + $0x40] sm:$0xff] %v2143_v61  ;;  %v2314_v49 = vmul.f32 %v2143_v61, %v2143_v61  ;;  %v2969_v6 = vadd.f32 %v2968_v36, %v2967_v30  ;;  %v2146_v33 = vadd.f32 %v2145_v14, %v4121_v28  ;;  %v4201_v27 = vadd.f32 %v2966_v4, %v4088_v2 }
 0x1ee   : > { %v2276_v5 = vadd.f32 %v2275_v9, %v2143_v61  ;;  %v2344_v0 = vadd.f32 %v2343_v20, %v2313_v39  ;;  %2248 = vst [vmem:[%s4164_s24 + $0x58] sm:$0xff] %v2154_v63  ;;  %v2317_v41 = vmul.f32 %v2154_v63, %v2154_v63 }
 0x1ef   : > { %2246 = vst [vmem:[%s4164_s24 + $0x48] sm:$0xff] %v2146_v33  ;;  %v2315_v46 = vmul.f32 %v2146_v33, %v2146_v33  ;;  %v4206_v58 = vadd.f32 %v2969_v6, %v4094_v38 }
 0x1f0   : > { %v2345_v17 = vadd.f32 %v2344_v0, %v2314_v49  ;;  %v2277_v50 = vadd.f32 %v2276_v5, %v2146_v33 }
 0x1f1   : > { %v2970_v8 = vpop.f32.mrb[124].mxu1  ;;  %v3054_v57 = vpop.f32.mrb[124].mxu0 }
 0x1f2   : > { %v2278_v44 = vadd.f32 %v2277_v50, %v2151_v55  ;;  %v2346_v28 = vadd.f32 %v2345_v17, %v2315_v46  ;;  %v2167_v2 = vadd.f32 %v3054_v57, %v4151_v29  ;;  %v2971_v19 = vpop.f32.mrb[125].mxu1  ;;  %v2158_v25 = vpop.f32.mrb[125].mxu0 }
 0x1f3   : > { %v2972_v52 = vadd.f32 %v2971_v19, %v2970_v8  ;;  %v2159_v35 = vadd.f32 %v2158_v25, %v4139_v26  ;;  %v2973_v60 = vpop.f32.mrb[126].mxu1  ;;  %v3055_v38 = vpop.f32.mrb[126].mxu0 }
 0x1f4   : > { %v2347_v51 = vadd.f32 %v2346_v28, %v2316_v56  ;;  %2251 = vst [vmem:[%s4164_s24 + $0x70] sm:$0xff] %v2167_v2  ;;  %v2279_v22 = vadd.f32 %v2278_v44, %v2154_v63  ;;  %v2170_v31 = vadd.f32 %v3055_v38, %v4157_v59  ;;  %v2974_v7 = vpop.f32.mrb[127].mxu1  ;;  %v2161_v47 = vpop.f32.mrb[127].mxu0  ;;  %v2320_v61 = vmul.f32 %v2167_v2, %v2167_v2 }
 0x1f5   : > { %2249 = vst [vmem:[%s4164_s24 + $0x60] sm:$0xff] %v2159_v35  ;;  %v2318_v3 = vmul.f32 %v2159_v35, %v2159_v35  ;;  %v2975_v29 = vadd.f32 %v2974_v7, %v2973_v60  ;;  %v2162_v54 = vadd.f32 %v2161_v47, %v4145_v43  ;;  %v2038_v62 = vadd.f32 %v2972_v52, %v4100_v42 }
 0x1f6   : > { %v2280_v26 = vadd.f32 %v2279_v22, %v2159_v35  ;;  %v2348_v40 = vadd.f32 %v2347_v51, %v2317_v41  ;;  %2252 = vst [vmem:[%s4164_s24 + $0x78] sm:$0xff] %v2170_v31 }
 0x1f7   : > { %2250 = vst [vmem:[%s4164_s24 + $0x68] sm:$0xff] %v2162_v54  ;;  %v2319_v1 = vmul.f32 %v2162_v54, %v2162_v54  ;;  %v2041_v55 = vadd.f32 %v2975_v29, %v4106_v12  ;;  %v2321_v12 = vmul.f32 %v2170_v31, %v2170_v31 }
 0x1f8   : > { %v2349_v21 = vadd.f32 %v2348_v40, %v2318_v3  ;;  %v2281_v15 = vadd.f32 %v2280_v26, %v2162_v54 }
 0x1f9   : > { %v2976_v59 = vpop.f32.mrb[128].mxu1  ;;  %v3058_v4 = vpop.f32.mrb[128].mxu0 }
 0x1fa   : > { %v2282_v30 = vadd.f32 %v2281_v15, %v2167_v2  ;;  %v2350_v32 = vadd.f32 %v2349_v21, %v2319_v1  ;;  %v2183_v43 = vadd.f32 %v3058_v4, %v4188_v48  ;;  %v2977_v39 = vpop.f32.mrb[129].mxu1  ;;  %v2174_v42 = vpop.f32.mrb[129].mxu0 }
 0x1fb   : > { %v2978_v20 = vadd.f32 %v2977_v39, %v2976_v59  ;;  %v2175_v9 = vadd.f32 %v2174_v42, %v4173_v24  ;;  %v2979_v63 = vpop.f32.mrb[130].mxu1  ;;  %v3059_v36 = vpop.f32.mrb[130].mxu0 }
 0x1fc   : > { %v2351_v14 = vadd.f32 %v2350_v32, %v2320_v61  ;;  %2255 = vst [vmem:[%s4164_s24 + $0x90] sm:$0xff] %v2183_v43  ;;  %v2283_v49 = vadd.f32 %v2282_v30, %v2170_v31  ;;  %v2186_v6 = vadd.f32 %v3059_v36, %v4191_v13  ;;  %v2980_v33 = vpop.f32.mrb[131].mxu1  ;;  %v2177_v5 = vpop.f32.mrb[131].mxu0  ;;  %v2324_v2 = vmul.f32 %v2183_v43, %v2183_v43 }
 0x1fd   : > { %2253 = vst [vmem:[%s4164_s24 + $0x80] sm:$0xff] %v2175_v9  ;;  %v2322_v0 = vmul.f32 %v2175_v9, %v2175_v9  ;;  %v2981_v48 = vadd.f32 %v2980_v33, %v2979_v63  ;;  %v2178_v46 = vadd.f32 %v2177_v5, %v4178_v10  ;;  %v2046_v17 = vadd.f32 %v2978_v20, %v4112_v11 }
 0x1fe   : > { %v2284_v24 = vadd.f32 %v2283_v49, %v2175_v9  ;;  %v2352_v50 = vadd.f32 %v2351_v14, %v2321_v12  ;;  %2256 = vst [vmem:[%s4164_s24 + $0x98] sm:$0xff] %v2186_v6 }
 0x1ff   : > { %2254 = vst [vmem:[%s4164_s24 + $0x88] sm:$0xff] %v2178_v46  ;;  %v2323_v8 = vmul.f32 %v2178_v46, %v2178_v46  ;;  %v2049_v57 = vadd.f32 %v2981_v48, %v4118_v16  ;;  %v2325_v16 = vmul.f32 %v2186_v6, %v2186_v6 }
 0x200   : > { %v2353_v56 = vadd.f32 %v2352_v50, %v2322_v0  ;;  %v2285_v44 = vadd.f32 %v2284_v24, %v2178_v46 }
 0x201   : > { %v2982_v13 = vpop.f32.mrb[132].mxu1  ;;  %v3062_v28 = vpop.f32.mrb[132].mxu0 }
 0x202   : > { %v2286_v19 = vadd.f32 %v2285_v44, %v2183_v43  ;;  %v2354_v25 = vadd.f32 %v2353_v56, %v2323_v8  ;;  %v2199_v52 = vadd.f32 %v3062_v28, %v2038_v62  ;;  %v2983_v10 = vpop.f32.mrb[133].mxu1  ;;  %v2190_v35 = vpop.f32.mrb[133].mxu0 }
 0x203   : > { %v2984_v11 = vadd.f32 %v2983_v10, %v2982_v13  ;;  %v2191_v60 = vadd.f32 %v2190_v35, %v4201_v27  ;;  %v2985_v38 = vpop.f32.mrb[134].mxu1  ;;  %v3063_v41 = vpop.f32.mrb[134].mxu0 }
 0x204   : > { %v2355_v51 = vadd.f32 %v2354_v25, %v2324_v2  ;;  %2259 = vst [vmem:[%s4164_s24 + $0xb0] sm:$0xff] %v2199_v52  ;;  %v2287_v22 = vadd.f32 %v2286_v19, %v2186_v6  ;;  %v2202_v31 = vadd.f32 %v3063_v41, %v2041_v55  ;;  %v2986_v7 = vpop.f32.mrb[135].mxu1  ;;  %v2193_v47 = vpop.f32.mrb[135].mxu0  ;;  %v2328_v4 = vmul.f32 %v2199_v52, %v2199_v52 }
 0x205   : > { %2257 = vst [vmem:[%s4164_s24 + $0xa0] sm:$0xff] %v2191_v60  ;;  %v2326_v3 = vmul.f32 %v2191_v60, %v2191_v60  ;;  %v2987_v29 = vadd.f32 %v2986_v7, %v2985_v38  ;;  %v2194_v54 = vadd.f32 %v2193_v47, %v4206_v58  ;;  %v2054_v62 = vadd.f32 %v2984_v11, %v4124_v23 }
 0x206   : > { %v2288_v26 = vadd.f32 %v2287_v22, %v2191_v60  ;;  %v2356_v27 = vadd.f32 %v2355_v51, %v2325_v16  ;;  %2260 = vst [vmem:[%s4164_s24 + $0xb8] sm:$0xff] %v2202_v31  ;;  %v2329_v9 = vmul.f32 %v2202_v31, %v2202_v31 }
 0x207   : > { %2258 = vst [vmem:[%s4164_s24 + $0xa8] sm:$0xff] %v2194_v54  ;;  %v2327_v40 = vmul.f32 %v2194_v54, %v2194_v54  ;;  %v2057_v1 = vadd.f32 %v2987_v29, %v4130_v45 }
 0x208   : > { %v2357_v21 = vadd.f32 %v2356_v27, %v2326_v3  ;;  %v2289_v15 = vadd.f32 %v2288_v26, %v2194_v54 }
 0x209   : > { %v2988_v55 = vpop.f32.mrb[136].mxu1  ;;  %v3066_v59 = vpop.f32.mrb[136].mxu0 }
 0x20a   : > { %v2290_v61 = vadd.f32 %v2289_v15, %v2199_v52  ;;  %v2358_v30 = vadd.f32 %v2357_v21, %v2327_v40  ;;  %v2215_v32 = vadd.f32 %v3066_v59, %v2054_v62  ;;  %v2989_v58 = vpop.f32.mrb[137].mxu1  ;;  %v2206_v43 = vpop.f32.mrb[137].mxu0 }
 0x20b   : > { %v2990_v23 = vadd.f32 %v2989_v58, %v2988_v55  ;;  %v2207_v39 = vadd.f32 %v2206_v43, %v2046_v17  ;;  %v2991_v42 = vpop.f32.mrb[138].mxu1  ;;  %v3067_v20 = vpop.f32.mrb[138].mxu0 }
 0x20c   : > { %v2359_v45 = vadd.f32 %v2358_v30, %v2328_v4  ;;  %2263 = vst [vmem:[%s4164_s24 + $0xd0] sm:$0xff] %v2215_v32  ;;  %v2291_v63 = vadd.f32 %v2290_v61, %v2202_v31  ;;  %v2218_v36 = vadd.f32 %v3067_v20, %v2057_v1  ;;  %v2992_v12 = vpop.f32.mrb[139].mxu1  ;;  %v2209_v14 = vpop.f32.mrb[139].mxu0  ;;  %v2332_v44 = vmul.f32 %v2215_v32, %v2215_v32 }
 0x20d   : > { %2261 = vst [vmem:[%s4164_s24 + $0xc0] sm:$0xff] %v2207_v39  ;;  %v2330_v49 = vmul.f32 %v2207_v39, %v2207_v39  ;;  %v2993_v6 = vadd.f32 %v2992_v12, %v2991_v42  ;;  %v2210_v33 = vadd.f32 %v2209_v14, %v2049_v57  ;;  %v2062_v5 = vadd.f32 %v2990_v23, %v4136_v37 }
 0x20e   : > { %v2292_v0 = vadd.f32 %v2291_v63, %v2207_v39  ;;  %v2360_v48 = vadd.f32 %v2359_v45, %v2329_v9  ;;  %2264 = vst [vmem:[%s4164_s24 + $0xd8] sm:$0xff] %v2218_v36  ;;  %v2333_v10 = vmul.f32 %v2218_v36, %v2218_v36 }
 0x20f   : > { %2262 = vst [vmem:[%s4164_s24 + $0xc8] sm:$0xff] %v2210_v33  ;;  %v2331_v46 = vmul.f32 %v2210_v33, %v2210_v33  ;;  %v2065_v17 = vadd.f32 %v2993_v6, %v4142_v34 }
 0x210   : > { %v2361_v24 = vadd.f32 %v2360_v48, %v2330_v49  ;;  %v2293_v50 = vadd.f32 %v2292_v0, %v2210_v33 }
 0x211   : > { %v2994_v8 = vpop.f32.mrb[140].mxu1  ;;  %v3070_v56 = vpop.f32.mrb[140].mxu0 }
 0x212   : > { %v2294_v13 = vadd.f32 %v2293_v50, %v2215_v32  ;;  %v2362_v28 = vadd.f32 %v2361_v24, %v2331_v46  ;;  %v2995_v2 = vpop.f32.mrb[141].mxu1  ;;  %v2222_v19 = vpop.f32.mrb[141].mxu0 }
 0x213   : > { %v2996_v57 = vadd.f32 %v2995_v2, %v2994_v8  ;;  %v2223_v25 = vadd.f32 %v2222_v19, %v2062_v5  ;;  %v2997_v37 = vpop.f32.mrb[142].mxu1  ;;  %v3071_v52 = vpop.f32.mrb[142].mxu0 }
 0x214   : > { %v2363_v35 = vadd.f32 %v2362_v28, %v2332_v44  ;;  %v2295_v11 = vadd.f32 %v2294_v13, %v2218_v36  ;;  %v2998_v34 = vpop.f32.mrb[143].mxu1  ;;  %v2225_v60 = vpop.f32.mrb[143].mxu0 }
 0x215   : > { %v2070_v38 = vadd.f32 %v2996_v57, %v4148_v18  ;;  %2265 = vst [vmem:[%s4164_s24 + $0xe0] sm:$0xff] %v2223_v25  ;;  %v2334_v41 = vmul.f32 %v2223_v25, %v2223_v25  ;;  %v2999_v16 = vadd.f32 %v2998_v34, %v2997_v37  ;;  %v2226_v51 = vadd.f32 %v2225_v60, %v2065_v17 }
 0x216   : > { %v2296_v22 = vadd.f32 %v2295_v11, %v2223_v25  ;;  %v2364_v31 = vadd.f32 %v2363_v35, %v2333_v10 }
 0x217   : > { %v2231_v7 = vadd.f32 %v3070_v56, %v2070_v38  ;;  %v2073_v47 = vadd.f32 %v2999_v16, %v4154_v53  ;;  %2266 = vst [vmem:[%s4164_s24 + $0xe8] sm:$0xff] %v2226_v51  ;;  %v2335_v3 = vmul.f32 %v2226_v51, %v2226_v51 }
 0x218   : > { %v2365_v29 = vadd.f32 %v2364_v31, %v2334_v41  ;;  %v2297_v54 = vadd.f32 %v2296_v22, %v2226_v51 }
 0x219   : > { %2267 = vst [vmem:[%s4164_s24 + $0xf0] sm:$0xff] %v2231_v7  ;;  %v2336_v62 = vmul.f32 %v2231_v7, %v2231_v7  ;;  %v2234_v26 = vadd.f32 %v3071_v52, %v2073_v47 }
 0x21a   : > { %v2298_v27 = vadd.f32 %v2297_v54, %v2231_v7  ;;  %v2366_v18 = vadd.f32 %v2365_v29, %v2335_v3 }
 0x21b   : > { %2268 = vst [vmem:[%s4164_s24 + $0xf8] sm:$0xff] %v2234_v26  ;;  %v2337_v40 = vmul.f32 %v2234_v26, %v2234_v26 }
 0x21c   : > { %v2299_v1 = vadd.f32 %v2298_v27, %v2234_v26  ;;  %v2367_v21 = vadd.f32 %v2366_v18, %v2336_v62 }
 0x21e   : > { %v2300_v15 = vrot.slane %v2299_v1, 4  ;;  %v2368_v55 = vadd.f32 %v2367_v21, %v2337_v40 }
 0x220   : > { %v2301_v59 = vadd.f32 %v2300_v15, %v2299_v1  ;;  %v2369_v4 = vrot.slane %v2368_v55, 4 }
 0x222   : > { %v2302_v61 = vrot.slane %v2301_v59, 2  ;;  %v2370_v53 = vadd.f32 %v2369_v4, %v2368_v55 }
 0x224   : > { %v2303_v30 = vadd.f32 %v2302_v61, %v2301_v59  ;;  %v2371_v32 = vrot.slane %v2370_v53, 2 }
 0x226   : > { %v2304_v58 = vrot.slane %v2303_v30, 1  ;;  %v2372_v43 = vadd.f32 %v2371_v32, %v2370_v53 }
 0x228   : > { %v2373_v23 = vrot.slane %v2372_v43, 1  ;;  %v2305_v39 = vadd.f32 %v2304_v58, %v2303_v30 }
 0x22a   : > { %v2374_v42 = vadd.f32 %v2373_v23, %v2372_v43 }
 0x22c   : > { %v2376_v20 = vsel %vm2375_vm0, %v2305_v39, %v2374_v42 }
 0x22d   : > { %2377 = vst [vmem:[%s235_s27] sm:$0x3] %v2376_v20 }
 0x22e PF: > { %s16_s18 = sadd.s32 1, %s3176_s18  }
 0x22f   : > { %p13_p4 = scmp.ge.s32.totalorder %s16_s18, 4  }
 0x231   :  { %15 = sbr.rel (!%p13_p4) target bundleno = 1 (0x1), region = 81 }

// kernel: resnet_small_forward.17
= control target key start
LH: loop header
LB: loop body
LE: loop exit
PB: predicated region body
PF: predicated region fallthrough
CT: control target
= control target key end

     0   :  { %7 = vsyncpa [#allocation3], 0  ;;  %s4733_s0 = inlined_call_operand.vmem [shape: f32[2,16,16,128], index: 0, kind: input, shape index: {}]   ;;  %s4734_s1 = inlined_call_operand.vmem [shape: f32[16,128,128], index: 1, kind: input, shape index: {}]   ;;  %s4735_s2 = inlined_call_operand.hbm [shape: f32[2,1,128], index: 2, kind: output, shape index: {}]  }
   0x1   :  { %9 = vsyncpa [#allocation3 + $0x1], 0  ;;  %s3575_s9 = smov 0   ;;  %s3577_s10 = smov 0  }
   0x2   :  { %s3579_s11 = smov 0   ;;  %s3581_s12 = smov 0  }
   0x3 LB: > { %s3596_s13 = sadd.s32 4294967295, %s3554_s12   ;;  %s1907_s14 = sadd.s32 4294967294, %s3554_s12   ;;  %s3554_s12 = sphi %s3581_s12, %s4741_s12   ;;  %s3550_s11 = sphi %s3579_s11, %s4740_s11   ;;  %s3546_s10 = sphi %s3577_s10, %s4739_s10   ;;  %s3542_s9 = sphi %s3575_s9, %s4738_s9  }
   0x4   : > { %s3600_s15 = sadd.s32 1, %s3554_s12   ;;  %s69_s16 = sadd.s32 1, %s3550_s11 }
   0x5   : > { %s66_s17 = ssub.s32 %s3554_s12, %s3600_s15  ;;  %p79_p0 = scmp.ne.s32.totalorder %s3550_s11, %s3546_s10 }
   0x6   : > { %p67_p1 = scmp.eq.s32.totalorder %s66_s17, 0  ;;  %p80_p2 = scmp.eq.s32.totalorder %s3596_s13, 1 }
   0x7   : > { %p85_p3 = scmp.ne.s32.totalorder %s3546_s10, %s3542_s9  ;;  %p86_p4 = scmp.eq.s32.totalorder %s1907_s14, 1 }
   0x8   : > { %s3611_s18 = scalar_select %p67_p1, %s3550_s11, %s69_s16  }
   0x9   : > { %p3613_p5 = por %p80_p2, %p79_p0  ;;  %p3617_p6 = por %p86_p4, %p85_p3 }
   0xa   : > { %p1910_p7 = scmp.ge.s32.totalorder %s3554_s12, 1  ;;  %p115_p8 = scmp.lt.s32.totalorder %s3554_s12, 3 }
   0xc   : > { %p116_p9 = pnand %p1910_p7, %p115_p8 }
   0xd   : > { %v1913_v0 = vld [vmem:[%s4734_s1 + $0x80] sm:$0xff] (!%p116_p9)  ;;  %v1914_v1 = vld [vmem:[%s4734_s1 + $0x88] sm:$0xff] (!%p116_p9)  ;;  %v3556_v3 = vmov (!%p116_p9), 0.0|0.0   ;;  %v1915_v6 = vld [vmem:[%s4734_s1 + $0x90] sm:$0xff] (!%p116_p9)  ;;  %p136_p10 = scmp.lt.s32.totalorder (!%p116_p9), %s3596_s13, 1  ;;  %vm3557_vm0 = vmmov (!%p116_p9), 0  }
   0xe   : > { %119 = sbr.rel (%p116_p9) target bundleno = 501 (0x1f5), region = 28  ;;  %v2045_v2 = vld [vmem:[%s4734_s1 + $0x400] sm:$0xff] (!%p116_p9)  ;;  %3037 = vmatprep.subr.bf16.mxu1 (!%p116_p9), %v3556_v3  ;;  %3229 = vmatprep.subr.bf16.mxu0 (!%p116_p9), %v3556_v3  ;;  %v3038_v4 = vpack.c.bf16 (!%p116_p9), %v1914_v1, %v1913_v0  ;;  %v2046_v5 = vld [vmem:[%s4734_s1 + $0x408] sm:$0xff] (!%p116_p9)  ;;  %v1916_v7 = vld [vmem:[%s4734_s1 + $0x98] sm:$0xff] (!%p116_p9)  ;;  %v3558_v11 = vmov (!%p116_p9), 0.0   ;;  %vm145_vm1 = vcmask (!%p116_p9), 1043456  }
   0xf   : > { %v3230_v8 = vpack.c.bf16 (!%p116_p9), %v2046_v5, %v2045_v2  ;;  %v2047_v9 = vld [vmem:[%s4734_s1 + $0x410] sm:$0xff] (!%p116_p9)  ;;  %v2048_v10 = vld [vmem:[%s4734_s1 + $0x418] sm:$0xff] (!%p116_p9)  ;;  %2509 = vmatprep.mubr.msk.f32.mxu1 (!%p116_p9), %vm3557_vm0, %v3558_v11  ;;  %2789 = vmatprep.mubr.msk.f32.mxu0 (!%p116_p9), %vm3557_vm0, %v3558_v11  ;;  %v3041_v12 = vpack.c.bf16 (!%p116_p9), %v1916_v7, %v1915_v6  ;;  %v1917_v14 = vld [vmem:[%s4734_s1 + $0xa0] sm:$0xff] (!%p116_p9)  ;;  %s134_s29 = sand.u32 (!%p116_p9), 1, %s3546_s10   ;;  %s2201_s3 = sshll.u32 (!%p116_p9), %s3596_s13, 4 }
  0x10   : > { %3039 = vmatpush3.bf16.msra.mxu1 (!%p116_p9), %v3038_v4  ;;  %v3233_v13 = vpack.c.bf16 (!%p116_p9), %v2048_v10, %v2047_v9  ;;  %v1918_v15 = vld [vmem:[%s4734_s1 + $0xa8] sm:$0xff] (!%p116_p9)  ;;  %v2049_v16 = vld [vmem:[%s4734_s1 + $0x420] sm:$0xff] (!%p116_p9)  ;;  %v1919_v20 = vld [vmem:[%s4734_s1 + $0xb0] sm:$0xff] (!%p116_p9)  ;;  %s135_s4 = scalar_lea.vmem (!%p116_p9), [#allocation2], %s134_s29  ;;  %s4691_s7 = scalar_lea.hbm (!%p116_p9), %s4735_s2, %s2201_s3 }
  0x11   : > { %3231 = vmatpush3.bf16.msra.mxu0 (!%p116_p9), %v3230_v8  ;;  %3040 = vmatprep.subr.bf16.mxu1 (!%p116_p9), %v3556_v3  ;;  %v2050_v17 = vld [vmem:[%s4734_s1 + $0x428] sm:$0xff] (!%p116_p9)  ;;  %v3044_v18 = vpack.c.bf16 (!%p116_p9), %v1918_v15, %v1917_v14  ;;  %v1920_v21 = vld [vmem:[%s4734_s1 + $0xb8] sm:$0xff] (!%p116_p9)  ;;  %v2051_v22 = vld [vmem:[%s4734_s1 + $0x430] sm:$0xff] (!%p116_p9)  ;;  %s1852_s5 = sshll.u32 (!%p116_p9), %s135_s4, 4  ;;  %s1840_s8 = scalar_lea.sflag (!%p116_p9), [#allocation3], %s134_s29  ;;  %s4693_s5 = int_to_ptr.vmem [resolvable:$true] %s1852_s5 }
  0x12   : > { %3232 = vmatprep.subr.bf16.mxu0 (!%p116_p9), %v3556_v3  ;;  %v3236_v19 = vpack.c.bf16 (!%p116_p9), %v2050_v17, %v2049_v16  ;;  %v2052_v23 = vld [vmem:[%s4734_s1 + $0x438] sm:$0xff] (!%p116_p9)  ;;  %v1921_v24 = vld [vmem:[%s4734_s1 + $0xc0] sm:$0xff] (!%p116_p9)  ;;  %v3047_v26 = vpack.c.bf16 (!%p116_p9), %v1920_v21, %v1919_v20  ;;  %v1922_v31 = vld [vmem:[%s4734_s1 + $0xc8] sm:$0xff] (!%p116_p9) }
  0x13   : > { %v3239_v30 = vpack.c.bf16 (!%p116_p9), %v2052_v23, %v2051_v22  ;;  %v2053_v32 = vld [vmem:[%s4734_s1 + $0x440] sm:$0xff] (!%p116_p9)  ;;  %v2054_v33 = vld [vmem:[%s4734_s1 + $0x448] sm:$0xff] (!%p116_p9)  ;;  %v3050_v46 = vpack.c.bf16 (!%p116_p9), %v1922_v31, %v1921_v24  ;;  %v1923_v50 = vld [vmem:[%s4734_s1 + $0xd0] sm:$0xff] (!%p116_p9) }
  0x14   : > { %3042 = vmatpush3.bf16.msra.mxu1 (!%p116_p9), %v3041_v12  ;;  %v3242_v49 = vpack.c.bf16 (!%p116_p9), %v2054_v33, %v2053_v32  ;;  %v1924_v51 = vld [vmem:[%s4734_s1 + $0xd8] sm:$0xff] (!%p116_p9)  ;;  %v2055_v53 = vld [vmem:[%s4734_s1 + $0x450] sm:$0xff] (!%p116_p9)  ;;  %v1925_v61 = vld [vmem:[%s4734_s1 + $0xe0] sm:$0xff] (!%p116_p9) }
  0x15   : > { %s137_s14 = scalar_select %p136_p10, %s3596_s13, 1  ;;  %3234 = vmatpush3.bf16.msra.mxu0 %v3233_v13  ;;  %3043 = vmatprep.subr.bf16.mxu1 %v3556_v3  ;;  %v2056_v54 = vld [vmem:[%s4734_s1 + $0x458] sm:$0xff]  ;;  %v3053_v57 = vpack.c.bf16 %v1924_v51, %v1923_v50  ;;  %v1926_v62 = vld [vmem:[%s4734_s1 + $0xe8] sm:$0xff]  ;;  %v2057_v63 = vld [vmem:[%s4734_s1 + $0x460] sm:$0xff] }
  0x16   : > { %3235 = vmatprep.subr.bf16.mxu0 %v3556_v3  ;;  %v3245_v60 = vpack.c.bf16 %v2056_v54, %v2055_v53  ;;  %v2058_v0 = vld [vmem:[%s4734_s1 + $0x468] sm:$0xff]  ;;  %v3056_v4 = vpack.c.bf16 %v1926_v62, %v1925_v61  ;;  %v1927_v5 = vld [vmem:[%s4734_s1 + $0xf0] sm:$0xff]  ;;  %v1928_v6 = vld [vmem:[%s4734_s1 + $0xf8] sm:$0xff]  ;;  %s3492_s13 = scalar_lea.vmem %s4693_s5, 16 }
  0x17   : > { %s2204_s27 = sshll.u32 %s137_s14, 8  ;;  %v3248_v9 = vpack.c.bf16 %v2058_v0, %v2057_v63  ;;  %v2059_v10 = vld [vmem:[%s4734_s1 + $0x470] sm:$0xff]  ;;  %v2060_v12 = vld [vmem:[%s4734_s1 + $0x478] sm:$0xff]  ;;  %v160_v20 = vld [vmem:[%s4734_s1] sm:$0xff]  ;;  %p3493_p11 = scmp.ne.s32.totalorder %s4693_s5, %s3492_s13 }
  0x18   : > { %s3672_s30 = scalar_lea.vmem %s4733_s0, %s2204_s27  ;;  %3045 = vmatpush3.bf16.msra.mxu1 %v3044_v18  ;;  %v161_v21 = vld [vmem:[%s4734_s1 + $0x8] sm:$0xff]  ;;  %v2068_v53 = vld [vmem:[%s4734_s1 + $0x498] sm:$0xff]  ;;  %s3559_s14 = smov [#allocation2]  }
  0x19   : > { %v176_v25 = vld [vmem:[%s3672_s30 + $0x4] sm:$0xf]  ;;  %v177_v27 = vld [vmem:[%s3672_s30 + $0x14] sm:$0xf]  ;;  %3237 = vmatpush3.bf16.msra.mxu0 %v3236_v19  ;;  %3046 = vmatprep.subr.bf16.mxu1 %v3556_v3  ;;  %v2041_v38 = vld [vmem:[%s3672_s30 + $0x80] sm:$0xf]  ;;  %v3059_v19 = vpack.c.bf16 %v1928_v6, %v1927_v5  ;;  %p3494_p12 = pnand %p3493_p11, %p3613_p5 }
  0x1a   : > { %v178_v28 = vld [vmem:[%s3672_s30 + $0x24] sm:$0xf]  ;;  %v179_v29 = vld [vmem:[%s3672_s30 + $0x34] sm:$0xf]  ;;  %v180_v34 = vsel %vm145_vm1, %v176_v25, 0.0  ;;  %v181_v35 = vsel %vm145_vm1, %v177_v27, 0.0  ;;  %3238 = vmatprep.subr.bf16.mxu0 %v3556_v3 }
  0x1b   : > { %v183_v36 = vsel %vm145_vm1, %v178_v28, 0.0  ;;  %v182_v37 = vadd.f32 %v181_v35, %v180_v34  ;;  %v2042_v39 = vld [vmem:[%s3672_s30 + $0x90] sm:$0xf]  ;;  %v2043_v40 = vld [vmem:[%s3672_s30 + $0xa0] sm:$0xf]  ;;  %v185_v41 = vsel %vm145_vm1, %v179_v29, 0.0  ;;  %v3251_v29 = vpack.c.bf16 %v2060_v12, %v2059_v10  ;;  %p3495_p13 = pneg %p3494_p12 }
  0x1c   : > { %v2044_v42 = vld [vmem:[%s3672_s30 + $0xb0] sm:$0xf]  ;;  %v993_v43 = vsel %vm145_vm1, %v2041_v38, 0.0  ;;  %v994_v44 = vsel %vm145_vm1, %v2042_v39, 0.0  ;;  %v996_v45 = vsel %vm145_vm1, %v2043_v40, 0.0  ;;  %3048 = vmatpush3.bf16.msra.mxu1 %v3047_v26  ;;  %v3062_v40 = vpack.c.bf16 %v161_v21, %v160_v20  ;;  %v2070_v61 = vld [vmem:[%s4734_s1 + $0x4a8] sm:$0xff] }
  0x1d   : > { %v184_v47 = vadd.f32 %v183_v36, %v182_v37  ;;  %v995_v48 = vadd.f32 %v994_v44, %v993_v43  ;;  %3240 = vmatpush3.bf16.msra.mxu0 %v3239_v30  ;;  %3049 = vmatprep.subr.bf16.mxu1 %v3556_v3  ;;  %v998_v52 = vsel %vm145_vm1, %v2044_v42, 0.0  ;;  %v141_v13 = vld [vmem:[%s3672_s30] sm:$0xf]  ;;  %v142_v16 = vld [vmem:[%s3672_s30 + $0x10] sm:$0xf]  ;;  %v2066_v37 = vld [vmem:[%s4734_s1 + $0x488] sm:$0xff] }
  0x1e   : > { %3241 = vmatprep.subr.bf16.mxu0 %v3556_v3  ;;  %v143_v17 = vld [vmem:[%s3672_s30 + $0x20] sm:$0xf]  ;;  %v146_v18 = vsel %vm145_vm1, %v141_v13, 0.0  ;;  %v147_v22 = vsel %vm145_vm1, %v142_v16, 0.0  ;;  %v2061_v27 = vld [vmem:[%s3672_s30 + $0x84] sm:$0xf] }
  0x1f   : > { %v186_v55 = vadd.f32 %v185_v41, %v184_v47  ;;  %v997_v56 = vadd.f32 %v996_v45, %v995_v48  ;;  %v148_v25 = vadd.f32 %v147_v22, %v146_v18  ;;  %v149_v26 = vsel %vm145_vm1, %v143_v17, 0.0  ;;  %v2062_v28 = vld [vmem:[%s3672_s30 + $0x94] sm:$0xf]  ;;  %v144_v30 = vld [vmem:[%s3672_s30 + $0x30] sm:$0xf]  ;;  %v2065_v36 = vld [vmem:[%s4734_s1 + $0x480] sm:$0xff] }
  0x20   : > { %3051 = vmatpush3.bf16.msra.mxu1 %v3050_v46  ;;  %v2063_v31 = vld [vmem:[%s3672_s30 + $0xa4] sm:$0xf]  ;;  %v1099_v32 = vsel %vm145_vm1, %v2061_v27, 0.0  ;;  %v1100_v33 = vsel %vm145_vm1, %v2062_v28, 0.0  ;;  %v2064_v38 = vld [vmem:[%s3672_s30 + $0xb4] sm:$0xf]  ;;  %v3254_v47 = vpack.c.bf16 %v2066_v37, %v2065_v36 }
  0x21   : > { %v187_v58 = vrot.slane %v186_v55, 4  ;;  %v999_v59 = vadd.f32 %v998_v52, %v997_v56  ;;  %3243 = vmatpush3.bf16.msra.mxu0 %v3242_v49  ;;  %3052 = vmatprep.subr.bf16.mxu1 %v3556_v3  ;;  %v1101_v39 = vadd.f32 %v1100_v33, %v1099_v32  ;;  %v150_v41 = vadd.f32 %v149_v26, %v148_v25  ;;  %v162_v48 = vld [vmem:[%s4734_s1 + $0x10] sm:$0xff]  ;;  %v163_v49 = vld [vmem:[%s4734_s1 + $0x18] sm:$0xff]  ;;  %v168_v12 = vld [vmem:[%s4734_s1 + $0x40] sm:$0xff]  ;;  %s3496_s16 = sshll.u32 %s3559_s14, 4  ;;  %s3497_s16 = int_to_ptr.vmem [resolvable:$false] %s3496_s16 }
  0x22   : > { %3244 = vmatprep.subr.bf16.mxu0 %v3556_v3  ;;  %v1102_v42 = vsel %vm145_vm1, %v2063_v31, 0.0  ;;  %v151_v45 = vsel %vm145_vm1, %v144_v30, 0.0  ;;  %v1104_v50 = vsel %vm145_vm1, %v2064_v38, 0.0  ;;  %v2067_v52 = vld [vmem:[%s4734_s1 + $0x490] sm:$0xff]  ;;  %v2072_v6 = vld [vmem:[%s4734_s1 + $0x4b8] sm:$0xff]  ;;  %v169_v13 = vld [vmem:[%s4734_s1 + $0x48] sm:$0xff]  ;;  %p3499_p0 = scmp.lt.s32.totalorder %s4693_s5, %s3497_s16 }
  0x23   : > { %v188_v1 = vadd.f32 %v187_v58, %v186_v55  ;;  %v1000_v2 = vrot.slane %v999_v59, 4  ;;  %v1103_v46 = vadd.f32 %v1102_v42, %v1101_v39  ;;  %v152_v54 = vadd.f32 %v151_v45, %v150_v41  ;;  %v164_v58 = vld [vmem:[%s4734_s1 + $0x20] sm:$0xff]  ;;  %v2071_v5 = vld [vmem:[%s4734_s1 + $0x4b0] sm:$0xff]  ;;  %v171_v21 = vld [vmem:[%s4734_s1 + $0x58] sm:$0xff]  ;;  %s3498_s17 = scalar_lea.vmem %s3497_s16, 32 }
  0x24   : > { %3054 = vmatpush3.bf16.msra.mxu1 %v3053_v57  ;;  %v3065_v55 = vpack.c.bf16 %v163_v49, %v162_v48  ;;  %v3257_v57 = vpack.c.bf16 %v2068_v53, %v2067_v52  ;;  %v3263_v10 = vpack.c.bf16 %v2072_v6, %v2071_v5  ;;  %v3074_v17 = vpack.c.bf16 %v169_v13, %v168_v12  ;;  %v170_v20 = vld [vmem:[%s4734_s1 + $0x50] sm:$0xff]  ;;  %v172_v26 = vld [vmem:[%s4734_s1 + $0x60] sm:$0xff]  ;;  %v173_v27 = vld [vmem:[%s4734_s1 + $0x68] sm:$0xff]  ;;  %p3500_p1 = scmp.lt.s32.totalorder %s3498_s17, %s3492_s13 }
  0x25   : > { %v189_v7 = vrot.slane %v188_v1, 2  ;;  %v1001_v8 = vadd.f32 %v1000_v2, %v999_v59  ;;  %3246 = vmatpush3.bf16.msra.mxu0 %v3245_v60  ;;  %3055 = vmatprep.subr.bf16.mxu1 %v3556_v3  ;;  %v1105_v56 = vadd.f32 %v1104_v50, %v1103_v46  ;;  %v165_v59 = vld [vmem:[%s4734_s1 + $0x28] sm:$0xff]  ;;  %v2069_v60 = vld [vmem:[%s4734_s1 + $0x4a0] sm:$0xff]  ;;  %v153_v62 = vrot.slane %v152_v54, 4  ;;  %v166_v2 = vld [vmem:[%s4734_s1 + $0x30] sm:$0xff] }
  0x26   : > { %3247 = vmatprep.subr.bf16.mxu0 %v3556_v3  ;;  %v3068_v63 = vpack.c.bf16 %v165_v59, %v164_v58  ;;  %v2075_v22 = vld [vmem:[%s4734_s1 + $0x4d0] sm:$0xff]  ;;  %v3077_v25 = vpack.c.bf16 %v171_v21, %v170_v20  ;;  %v2077_v30 = vld [vmem:[%s4734_s1 + $0x4e0] sm:$0xff]  ;;  %v351_v31 = vld [vmem:[%s3672_s30 + $0x8] sm:$0xf]  ;;  %v3080_v37 = vpack.c.bf16 %v173_v27, %v172_v26  ;;  %p3501_p2 = por %p3500_p1, %p3499_p0 }
  0x27   : > { %v190_v14 = vadd.f32 %v189_v7, %v188_v1  ;;  %v1002_v15 = vrot.slane %v1001_v8, 2  ;;  %v1106_v0 = vrot.slane %v1105_v56, 4  ;;  %v3260_v1 = vpack.c.bf16 %v2070_v61, %v2069_v60  ;;  %v352_v32 = vld [vmem:[%s3672_s30 + $0x18] sm:$0xf]  ;;  %v2078_v33 = vld [vmem:[%s4734_s1 + $0x4e8] sm:$0xff]  ;;  %v174_v42 = vld [vmem:[%s4734_s1 + $0x70] sm:$0xff] }
  0x28   : > { %3057 = vmatpush3.bf16.msra.mxu1 %v3056_v4  ;;  %v167_v4 = vld [vmem:[%s4734_s1 + $0x38] sm:$0xff]  ;;  %v154_v7 = vadd.f32 %v153_v62, %v152_v54  ;;  %v355_v39 = vsel %vm145_vm1, %v351_v31, 0.0  ;;  %v3272_v41 = vpack.c.bf16 %v2078_v33, %v2077_v30  ;;  %v2083_v49 = vld [vmem:[%s3672_s30 + $0xa8] sm:$0xf]  ;;  %v2085_v61 = vld [vmem:[%s4734_s1 + $0x500] sm:$0xff]  ;;  %p3502_p3 = pnand %p3501_p2, %p3495_p13 }
  0x29   : > { %v191_v23 = vrot.slane %v190_v14, 1  ;;  %v1003_v24 = vadd.f32 %v1002_v15, %v1001_v8  ;;  %3249 = vmatpush3.bf16.msra.mxu0 %v3248_v9  ;;  %3058 = vmatprep.subr.bf16.mxu1 %v3556_v3  ;;  %v3071_v8 = vpack.c.bf16 %v167_v4, %v166_v2  ;;  %v1107_v9 = vadd.f32 %v1106_v0, %v1105_v56  ;;  %v2074_v15 = vld [vmem:[%s4734_s1 + $0x4c8] sm:$0xff]  ;;  %v2080_v48 = vld [vmem:[%s4734_s1 + $0x4f8] sm:$0xff]  ;;  %v2087_v12 = vld [vmem:[%s4734_s1 + $0x510] sm:$0xff] }
  0x2a   : > { %3250 = vmatprep.subr.bf16.mxu0 %v3556_v3  ;;  %v155_v16 = vrot.slane %v154_v7, 2  ;;  %v1930_v58 = vld [vmem:[%s4734_s1 + $0x108] sm:$0xff]  ;;  %v354_v59 = vld [vmem:[%s3672_s30 + $0x38] sm:$0xf]  ;;  %v1208_v60 = vsel %vm145_vm1, %v2083_v49, 0.0  ;;  %v2089_v20 = vld [vmem:[%s4734_s1 + $0x520] sm:$0xff] }
  0x2b   : > { %v192_v34 = vadd.f32 %v191_v23, %v190_v14  ;;  %v1004_v35 = vrot.slane %v1003_v24, 1  ;;  %v2073_v14 = vld [vmem:[%s4734_s1 + $0x4c0] sm:$0xff]  ;;  %v1108_v18 = vrot.slane %v1107_v9, 2  ;;  %v2076_v23 = vld [vmem:[%s4734_s1 + $0x4d8] sm:$0xff]  ;;  %v2086_v62 = vld [vmem:[%s4734_s1 + $0x508] sm:$0xff]  ;;  %v360_v5 = vsel %vm145_vm1, %v354_v59, 0.0 }
  0x2c   : > { %3060 = vmatpush3.bf16.msra.mxu1 %v3059_v19  ;;  %v3266_v19 = vpack.c.bf16 %v2074_v15, %v2073_v14  ;;  %v2088_v13 = vld [vmem:[%s4734_s1 + $0x518] sm:$0xff]  ;;  %v2090_v21 = vld [vmem:[%s4734_s1 + $0x528] sm:$0xff]  ;;  %v1935_v26 = vld [vmem:[%s4734_s1 + $0x130] sm:$0xff] }
  0x2d   : > { %v193_v43 = vmul.f32 0.0625, %v192_v34  ;;  %v1005_v44 = vadd.f32 %v1004_v35, %v1003_v24  ;;  %3252 = vmatpush3.bf16.msra.mxu0 %v3251_v29  ;;  %3061 = vmatprep.subr.bf16.mxu1 %v3556_v3  ;;  %v156_v24 = vadd.f32 %v155_v16, %v154_v7  ;;  %v1109_v28 = vadd.f32 %v1108_v18, %v1107_v9  ;;  %v2081_v34 = vld [vmem:[%s3672_s30 + $0x88] sm:$0xf]  ;;  %v2082_v35 = vld [vmem:[%s3672_s30 + $0x98] sm:$0xf]  ;;  %v1933_v18 = vld [vmem:[%s4734_s1 + $0x120] sm:$0xff] }
  0x2e   : > { %3253 = vmatprep.subr.bf16.mxu0 %v3556_v3  ;;  %v3269_v29 = vpack.c.bf16 %v2076_v23, %v2075_v22  ;;  %v1205_v45 = vsel %vm145_vm1, %v2081_v34, 0.0  ;;  %v1206_v46 = vsel %vm145_vm1, %v2082_v35, 0.0  ;;  %v3278_v7 = vpack.c.bf16 %v2086_v62, %v2085_v61  ;;  %v1932_v9 = vld [vmem:[%s4734_s1 + $0x118] sm:$0xff]  ;;  %v1937_v34 = vld [vmem:[%s4734_s1 + $0x140] sm:$0xff]  ;;  %v1938_v35 = vld [vmem:[%s4734_s1 + $0x148] sm:$0xff] }
  0x2f   : > { %v1006_v51 = vmul.f32 0.0625, %v1005_v44  ;;  %2510 = vmatmul.mubr.f32.vlgmr.msra.gmra.mrb[0].mxu1 %v193_v43  ;;  %v157_v36 = vrot.slane %v156_v24, 1  ;;  %v1110_v38 = vrot.slane %v1109_v28, 1  ;;  %v175_v43 = vld [vmem:[%s4734_s1 + $0x78] sm:$0xff]  ;;  %v353_v44 = vld [vmem:[%s3672_s30 + $0x28] sm:$0xf] }
  0x30   : > { %3063 = vmatpush3.bf16.msra.mxu1 %v3062_v40  ;;  %2544 = vmatprep.mubr.msk.f32.mxu1 %vm3557_vm0, %v3558_v11  ;;  %v356_v40 = vsel %vm145_vm1, %v352_v32, 0.0  ;;  %v3083_v52 = vpack.c.bf16 %v175_v43, %v174_v42  ;;  %v358_v54 = vsel %vm145_vm1, %v353_v44, 0.0  ;;  %v1936_v27 = vld [vmem:[%s4734_s1 + $0x138] sm:$0xff]  ;;  %v1939_v42 = vld [vmem:[%s4734_s1 + $0x150] sm:$0xff]  ;;  %v1942_v49 = vld [vmem:[%s4734_s1 + $0x168] sm:$0xff] }
  0x31   : > { %2790 = vmatmul.mubr.f32.vlgmr.msra.gmra.mrb[0].mxu0 %v1006_v51  ;;  %3064 = vmatprep.subr.bf16.mxu1 %v3556_v3  ;;  %v158_v50 = vadd.f32 %v157_v36, %v156_v24  ;;  %v357_v51 = vadd.f32 %v356_v40, %v355_v39  ;;  %v1111_v53 = vadd.f32 %v1110_v38, %v1109_v28  ;;  %v2091_v28 = vld [vmem:[%s4734_s1 + $0x530] sm:$0xff]  ;;  %v2093_v36 = vld [vmem:[%s4734_s1 + $0x540] sm:$0xff]  ;;  %v1940_v43 = vld [vmem:[%s4734_s1 + $0x158] sm:$0xff] }
  0x32   : > { %3255 = vmatpush3.bf16.msra.mxu0 %v3254_v47  ;;  %2824 = vmatprep.mubr.msk.f32.mxu0 %vm3557_vm0, %v3558_v11  ;;  %v2079_v47 = vld [vmem:[%s4734_s1 + $0x4f0] sm:$0xff]  ;;  %v3095_v31 = vpack.c.bf16 %v1936_v27, %v1935_v26  ;;  %v3098_v39 = vpack.c.bf16 %v1938_v35, %v1937_v34  ;;  %v2108_v35 = vld [vmem:[%s4734_s1 + $0x598] sm:$0xff] }
  0x33   : > { %3256 = vmatprep.subr.bf16.mxu0 %v3556_v3  ;;  %v3275_v56 = vpack.c.bf16 %v2080_v48, %v2079_v47  ;;  %v159_v0 = vmul.f32 0.0625, %v158_v50  ;;  %v1112_v4 = vmul.f32 0.0625, %v1111_v53  ;;  %v2095_v44 = vld [vmem:[%s4734_s1 + $0x550] sm:$0xff]  ;;  %v3101_v47 = vpack.c.bf16 %v1940_v43, %v1939_v42  ;;  %v1941_v48 = vld [vmem:[%s4734_s1 + $0x160] sm:$0xff]  ;;  %v457_v53 = vld [vmem:[%s3672_s30 + $0xc] sm:$0xf] }
  0x34   : > { %3066 = vmatpush3.bf16.msra.mxu1 %v3065_v55  ;;  %v1207_v55 = vadd.f32 %v1206_v46, %v1205_v45  ;;  %v2096_v45 = vld [vmem:[%s4734_s1 + $0x558] sm:$0xff]  ;;  %v3104_v59 = vpack.c.bf16 %v1942_v49, %v1941_v48  ;;  %v461_v61 = vsel %vm145_vm1, %v457_v53, 0.0  ;;  %v2107_v34 = vld [vmem:[%s4734_s1 + $0x590] sm:$0xff]  ;;  %v2109_v42 = vld [vmem:[%s4734_s1 + $0x5a0] sm:$0xff] }
  0x35   : > { %3067 = vmatprep.subr.bf16.mxu1 %v3556_v3  ;;  %v2110_v43 = vld [vmem:[%s4734_s1 + $0x5a8] sm:$0xff]  ;;  %v1951_v48 = vld [vmem:[%s4734_s1 + $0x1b0] sm:$0xff]  ;;  %v1952_v49 = vld [vmem:[%s4734_s1 + $0x1b8] sm:$0xff] }
  0x36   : > { %3258 = vmatpush3.bf16.msra.mxu0 %v3257_v57  ;;  %v1929_v57 = vld [vmem:[%s4734_s1 + $0x100] sm:$0xff]  ;;  %v1209_v6 = vadd.f32 %v1208_v60, %v1207_v55  ;;  %v2098_v55 = vld [vmem:[%s4734_s1 + $0x568] sm:$0xff]  ;;  %v3119_v53 = vpack.c.bf16 %v1952_v49, %v1951_v48 }
  0x37   : > { %3259 = vmatprep.subr.bf16.mxu0 %v3556_v3  ;;  %v3086_v2 = vpack.c.bf16 %v1930_v58, %v1929_v57  ;;  %v2102_v57 = vld [vmem:[%s3672_s30 + $0x9c] sm:$0xf] }
  0x38   : > { %3069 = vmatpush3.bf16.msra.mxu1 %v3068_v63  ;;  %v2084_v63 = vld [vmem:[%s3672_s30 + $0xb8] sm:$0xf] }
  0x39   : > { %3070 = vmatprep.subr.bf16.mxu1 %v3556_v3 }
  0x3a   : > { %3261 = vmatpush3.bf16.msra.mxu0 %v3260_v1  ;;  %v359_v1 = vadd.f32 %v358_v54, %v357_v51  ;;  %v3293_v51 = vpack.c.bf16 %v2096_v45, %v2095_v44  ;;  %v458_v54 = vld [vmem:[%s3672_s30 + $0x1c] sm:$0xf] }
  0x3b   : > { %3262 = vmatprep.subr.bf16.mxu0 %v3556_v3  ;;  %v462_v62 = vsel %vm145_vm1, %v458_v54, 0.0 }
  0x3c   : > { %3072 = vmatpush3.bf16.msra.mxu1 %v3071_v8  ;;  %v1931_v8 = vld [vmem:[%s4734_s1 + $0x110] sm:$0xff]  ;;  %v361_v14 = vadd.f32 %v360_v5, %v359_v1  ;;  %v1944_v1 = vld [vmem:[%s4734_s1 + $0x178] sm:$0xff]  ;;  %v1312_v5 = vsel %vm145_vm1, %v2102_v57, 0.0  ;;  %v1954_v57 = vld [vmem:[%s4734_s1 + $0x1c8] sm:$0xff] }
  0x3d   : > { %3073 = vmatprep.subr.bf16.mxu1 %v3556_v3  ;;  %v3089_v15 = vpack.c.bf16 %v1932_v9, %v1931_v8  ;;  %v2103_v8 = vld [vmem:[%s3672_s30 + $0xac] sm:$0xf] }
  0x3e   : > { %3264 = vmatpush3.bf16.msra.mxu0 %v3263_v10  ;;  %v1210_v10 = vsel %vm145_vm1, %v2084_v63, 0.0  ;;  %v362_v22 = vrot.slane %v361_v14, 4 }
  0x3f   : > { %3265 = vmatprep.subr.bf16.mxu0 %v3556_v3  ;;  %v1211_v16 = vadd.f32 %v1210_v10, %v1209_v6  ;;  %v2099_v6 = vld [vmem:[%s4734_s1 + $0x570] sm:$0xff]  ;;  %v463_v10 = vadd.f32 %v462_v62, %v461_v61 }
  0x40   : > { %3075 = vmatpush3.bf16.msra.mxu1 %v3074_v17  ;;  %v3281_v17 = vpack.c.bf16 %v2088_v13, %v2087_v12  ;;  %v363_v30 = vadd.f32 %v362_v22, %v361_v14  ;;  %v2106_v22 = vld [vmem:[%s4734_s1 + $0x588] sm:$0xff] }
  0x41   : > { %3076 = vmatprep.subr.bf16.mxu1 %v3556_v3  ;;  %v1212_v24 = vrot.slane %v1211_v16, 4 }
  0x42   : > { %3267 = vmatpush3.bf16.msra.mxu0 %v3266_v19  ;;  %v1934_v19 = vld [vmem:[%s4734_s1 + $0x128] sm:$0xff]  ;;  %v364_v38 = vrot.slane %v363_v30, 2 }
  0x43   : > { %3268 = vmatprep.subr.bf16.mxu0 %v3556_v3  ;;  %v3092_v23 = vpack.c.bf16 %v1934_v19, %v1933_v18  ;;  %v1213_v32 = vadd.f32 %v1212_v24, %v1211_v16  ;;  %v1946_v18 = vld [vmem:[%s4734_s1 + $0x188] sm:$0xff]  ;;  %v460_v19 = vld [vmem:[%s3672_s30 + $0x3c] sm:$0xf] }
  0x44   : > { %3078 = vmatpush3.bf16.msra.mxu1 %v3077_v25  ;;  %v3284_v25 = vpack.c.bf16 %v2090_v21, %v2089_v20  ;;  %v365_v46 = vadd.f32 %v364_v38, %v363_v30  ;;  %v1314_v20 = vsel %vm145_vm1, %v2103_v8, 0.0  ;;  %v2105_v21 = vld [vmem:[%s4734_s1 + $0x580] sm:$0xff]  ;;  %v1958_v8 = vld [vmem:[%s4734_s1 + $0x1e8] sm:$0xff] }
  0x45   : > { %3079 = vmatprep.subr.bf16.mxu1 %v3556_v3  ;;  %v1214_v40 = vrot.slane %v1213_v32, 2  ;;  %v3302_v30 = vpack.c.bf16 %v2106_v22, %v2105_v21 }
  0x46   : > { %3270 = vmatpush3.bf16.msra.mxu0 %v3269_v29  ;;  %v2092_v29 = vld [vmem:[%s4734_s1 + $0x538] sm:$0xff]  ;;  %v366_v58 = vrot.slane %v365_v46, 1 }
  0x47   : > { %3271 = vmatprep.subr.bf16.mxu0 %v3556_v3  ;;  %v3287_v33 = vpack.c.bf16 %v2092_v29, %v2091_v28  ;;  %v1215_v50 = vadd.f32 %v1214_v40, %v1213_v32  ;;  %v466_v28 = vsel %vm145_vm1, %v460_v19, 0.0  ;;  %v1948_v32 = vld [vmem:[%s4734_s1 + $0x198] sm:$0xff]  ;;  %v1949_v40 = vld [vmem:[%s4734_s1 + $0x1a0] sm:$0xff] }
  0x48   : > { %3081 = vmatpush3.bf16.msra.mxu1 %v3080_v37  ;;  %v2094_v37 = vld [vmem:[%s4734_s1 + $0x548] sm:$0xff]  ;;  %v367_v9 = vadd.f32 %v366_v58, %v365_v46  ;;  %v2113_v58 = vld [vmem:[%s4734_s1 + $0x5c0] sm:$0xff] }
  0x49   : > { %3082 = vmatprep.subr.bf16.mxu1 %v3556_v3  ;;  %v1216_v60 = vrot.slane %v1215_v50, 1 }
  0x4a   : > { %3273 = vmatpush3.bf16.msra.mxu0 %v3272_v41  ;;  %v3290_v41 = vpack.c.bf16 %v2094_v37, %v2093_v36  ;;  %v368_v24 = vmul.f32 0.0625, %v367_v9 }
  0x4b   : > { %3274 = vmatprep.subr.bf16.mxu0 %v3556_v3  ;;  %v1217_v13 = vadd.f32 %v1216_v60, %v1215_v50  ;;  %v2111_v50 = vld [vmem:[%s4734_s1 + $0x5b0] sm:$0xff] }
  0x4c   : > { %3084 = vmatpush3.bf16.msra.mxu1 %v3083_v52  ;;  %v2097_v52 = vld [vmem:[%s4734_s1 + $0x560] sm:$0xff] }
  0x4d   : > { %3085 = vmatprep.subr.bf16.mxu1 %v3556_v3  ;;  %v3296_v63 = vpack.c.bf16 %v2098_v55, %v2097_v52  ;;  %v1218_v27 = vmul.f32 0.0625, %v1217_v13  ;;  %v1961_v13 = vld [vmem:[%s3672_s30 + $0x40] sm:$0xf] }
  0x4e   : > { %3276 = vmatpush3.bf16.msra.mxu0 %v3275_v56  ;;  %v2101_v56 = vld [vmem:[%s3672_s30 + $0x8c] sm:$0xf]  ;;  %v568_v21 = vsel %vm145_vm1, %v1961_v13, 0.0 }
  0x4f   : > { %3277 = vmatprep.subr.bf16.mxu0 %v3556_v3  ;;  %2545 = vmatmul.mubr.f32.vlgmr.msra.gmra.mrb[0].mxu1 %v159_v0  ;;  %v1943_v0 = vld [vmem:[%s4734_s1 + $0x170] sm:$0xff] }
  0x50   : > { %3087 = vmatpush3.bf16.msra.mxu1 %v3086_v2  ;;  %2579 = vmatprep.mubr.msk.f32.mxu1 %vm3557_vm0, %v3558_v11  ;;  %v459_v2 = vld [vmem:[%s3672_s30 + $0x2c] sm:$0xf]  ;;  %v3107_v12 = vpack.c.bf16 %v1944_v1, %v1943_v0  ;;  %v1955_v0 = vld [vmem:[%s4734_s1 + $0x1d0] sm:$0xff]  ;;  %v1956_v1 = vld [vmem:[%s4734_s1 + $0x1d8] sm:$0xff] }
  0x51   : > { %2825 = vmatmul.mubr.f32.vlgmr.msra.gmra.mrb[0].mxu0 %v1112_v4  ;;  %3088 = vmatprep.subr.bf16.mxu1 %v3556_v3  ;;  %v1311_v4 = vsel %vm145_vm1, %v2101_v56, 0.0  ;;  %v464_v14 = vsel %vm145_vm1, %v459_v2, 0.0  ;;  %v1953_v56 = vld [vmem:[%s4734_s1 + $0x1c0] sm:$0xff]  ;;  %v2115_v2 = vld [vmem:[%s4734_s1 + $0x5d0] sm:$0xff] }
  0x52   : > { %3279 = vmatpush3.bf16.msra.mxu0 %v3278_v7  ;;  %2859 = vmatprep.mubr.msk.f32.mxu0 %vm3557_vm0, %v3558_v11  ;;  %v2100_v7 = vld [vmem:[%s4734_s1 + $0x578] sm:$0xff]  ;;  %v3122_v61 = vpack.c.bf16 %v1954_v57, %v1953_v56  ;;  %v2127_v56 = vld [vmem:[%s4734_s1 + $0x610] sm:$0xff] }
  0x53   : > { %3280 = vmatprep.subr.bf16.mxu0 %v3556_v3  ;;  %v3299_v16 = vpack.c.bf16 %v2100_v7, %v2099_v6  ;;  %v3125_v6 = vpack.c.bf16 %v1956_v1, %v1955_v0  ;;  %v1957_v7 = vld [vmem:[%s4734_s1 + $0x1e0] sm:$0xff]  ;;  %v2128_v57 = vld [vmem:[%s4734_s1 + $0x618] sm:$0xff]  ;;  %v2130_v1 = vld [vmem:[%s4734_s1 + $0x628] sm:$0xff] }
  0x54   : > { %3090 = vmatpush3.bf16.msra.mxu1 %v3089_v15  ;;  %v1313_v15 = vadd.f32 %v1312_v5, %v1311_v4  ;;  %v2116_v4 = vld [vmem:[%s4734_s1 + $0x5d8] sm:$0xff]  ;;  %v3128_v19 = vpack.c.bf16 %v1958_v8, %v1957_v7  ;;  %v2129_v0 = vld [vmem:[%s4734_s1 + $0x620] sm:$0xff]  ;;  %v1971_v7 = vld [vmem:[%s4734_s1 + $0x230] sm:$0xff] }
  0x55   : > { %3091 = vmatprep.subr.bf16.mxu1 %v3556_v3  ;;  %v1972_v8 = vld [vmem:[%s4734_s1 + $0x238] sm:$0xff] }
  0x56   : > { %3282 = vmatpush3.bf16.msra.mxu0 %v3281_v17  ;;  %v1945_v17 = vld [vmem:[%s4734_s1 + $0x180] sm:$0xff]  ;;  %v1315_v29 = vadd.f32 %v1314_v20, %v1313_v15  ;;  %v2118_v15 = vld [vmem:[%s4734_s1 + $0x5e8] sm:$0xff]  ;;  %v3143_v13 = vpack.c.bf16 %v1972_v8, %v1971_v7 }
  0x57   : > { %3283 = vmatprep.subr.bf16.mxu0 %v3556_v3  ;;  %v3110_v26 = vpack.c.bf16 %v1946_v18, %v1945_v17  ;;  %v2122_v17 = vld [vmem:[%s3672_s30 + $0xd0] sm:$0xf] }
  0x58   : > { %3093 = vmatpush3.bf16.msra.mxu1 %v3092_v23  ;;  %v2104_v23 = vld [vmem:[%s3672_s30 + $0xbc] sm:$0xf] }
  0x59   : > { %3094 = vmatprep.subr.bf16.mxu1 %v3556_v3 }
  0x5a   : > { %3285 = vmatpush3.bf16.msra.mxu0 %v3284_v25  ;;  %v465_v25 = vadd.f32 %v464_v14, %v463_v10  ;;  %v3317_v10 = vpack.c.bf16 %v2116_v4, %v2115_v2  ;;  %v1962_v14 = vld [vmem:[%s3672_s30 + $0x50] sm:$0xf] }
  0x5b   : > { %3286 = vmatprep.subr.bf16.mxu0 %v3556_v3  ;;  %v569_v22 = vsel %vm145_vm1, %v1962_v14, 0.0 }
  0x5c   : > { %3096 = vmatpush3.bf16.msra.mxu1 %v3095_v31  ;;  %v1947_v31 = vld [vmem:[%s4734_s1 + $0x190] sm:$0xff]  ;;  %v467_v36 = vadd.f32 %v466_v28, %v465_v25  ;;  %v1960_v25 = vld [vmem:[%s4734_s1 + $0x1f8] sm:$0xff]  ;;  %v1419_v28 = vsel %vm145_vm1, %v2122_v17, 0.0  ;;  %v1974_v17 = vld [vmem:[%s4734_s1 + $0x248] sm:$0xff] }
  0x5d   : > { %3097 = vmatprep.subr.bf16.mxu1 %v3556_v3  ;;  %v3113_v37 = vpack.c.bf16 %v1948_v32, %v1947_v31  ;;  %v2123_v31 = vld [vmem:[%s3672_s30 + $0xe0] sm:$0xf] }
  0x5e   : > { %3288 = vmatpush3.bf16.msra.mxu0 %v3287_v33  ;;  %v1316_v33 = vsel %vm145_vm1, %v2104_v23, 0.0  ;;  %v468_v44 = vrot.slane %v467_v36, 4 }
  0x5f   : > { %3289 = vmatprep.subr.bf16.mxu0 %v3556_v3  ;;  %v1317_v38 = vadd.f32 %v1316_v33, %v1315_v29  ;;  %v2119_v29 = vld [vmem:[%s4734_s1 + $0x5f0] sm:$0xff]  ;;  %v570_v33 = vadd.f32 %v569_v22, %v568_v21 }
  0x60   : > { %3099 = vmatpush3.bf16.msra.mxu1 %v3098_v39  ;;  %v3305_v39 = vpack.c.bf16 %v2108_v35, %v2107_v34  ;;  %v469_v52 = vadd.f32 %v468_v44, %v467_v36  ;;  %v2126_v44 = vld [vmem:[%s4734_s1 + $0x608] sm:$0xff] }
  0x61   : > { %3100 = vmatprep.subr.bf16.mxu1 %v3556_v3  ;;  %v1318_v46 = vrot.slane %v1317_v38, 4 }
  0x62   : > { %3291 = vmatpush3.bf16.msra.mxu0 %v3290_v41  ;;  %v1950_v41 = vld [vmem:[%s4734_s1 + $0x1a8] sm:$0xff]  ;;  %v470_v60 = vrot.slane %v469_v52, 2 }
  0x63   : > { %3292 = vmatprep.subr.bf16.mxu0 %v3556_v3  ;;  %v3116_v45 = vpack.c.bf16 %v1950_v41, %v1949_v40  ;;  %v1319_v54 = vadd.f32 %v1318_v46, %v1317_v38  ;;  %v1966_v40 = vld [vmem:[%s4734_s1 + $0x208] sm:$0xff]  ;;  %v1964_v41 = vld [vmem:[%s3672_s30 + $0x70] sm:$0xf] }
  0x64   : > { %3102 = vmatpush3.bf16.msra.mxu1 %v3101_v47  ;;  %v3308_v47 = vpack.c.bf16 %v2110_v43, %v2109_v42  ;;  %v471_v5 = vadd.f32 %v470_v60, %v469_v52  ;;  %v1421_v42 = vsel %vm145_vm1, %v2123_v31, 0.0  ;;  %v2125_v43 = vld [vmem:[%s4734_s1 + $0x600] sm:$0xff]  ;;  %v1978_v31 = vld [vmem:[%s4734_s1 + $0x268] sm:$0xff] }
  0x65   : > { %3103 = vmatprep.subr.bf16.mxu1 %v3556_v3  ;;  %v1320_v62 = vrot.slane %v1319_v54, 2  ;;  %v3326_v52 = vpack.c.bf16 %v2126_v44, %v2125_v43 }
  0x66   : > { %3294 = vmatpush3.bf16.msra.mxu0 %v3293_v51  ;;  %v2112_v51 = vld [vmem:[%s4734_s1 + $0x5b8] sm:$0xff]  ;;  %v472_v18 = vrot.slane %v471_v5, 1 }
  0x67   : > { %3295 = vmatprep.subr.bf16.mxu0 %v3556_v3  ;;  %v3311_v55 = vpack.c.bf16 %v2112_v51, %v2111_v50  ;;  %v1321_v9 = vadd.f32 %v1320_v62, %v1319_v54  ;;  %v573_v50 = vsel %vm145_vm1, %v1964_v41, 0.0  ;;  %v1968_v54 = vld [vmem:[%s4734_s1 + $0x218] sm:$0xff]  ;;  %v1969_v62 = vld [vmem:[%s4734_s1 + $0x220] sm:$0xff] }
  0x68   : > { %3105 = vmatpush3.bf16.msra.mxu1 %v3104_v59  ;;  %v2114_v59 = vld [vmem:[%s4734_s1 + $0x5c8] sm:$0xff]  ;;  %v473_v32 = vadd.f32 %v472_v18, %v471_v5  ;;  %v2133_v18 = vld [vmem:[%s4734_s1 + $0x640] sm:$0xff] }
  0x69   : > { %3106 = vmatprep.subr.bf16.mxu1 %v3556_v3  ;;  %v1322_v20 = vrot.slane %v1321_v9, 1 }
  0x6a   : > { %3297 = vmatpush3.bf16.msra.mxu0 %v3296_v63  ;;  %v3314_v63 = vpack.c.bf16 %v2114_v59, %v2113_v58  ;;  %v474_v46 = vmul.f32 0.0625, %v473_v32 }
  0x6b   : > { %3298 = vmatprep.subr.bf16.mxu0 %v3556_v3  ;;  %v1323_v35 = vadd.f32 %v1322_v20, %v1321_v9  ;;  %v2131_v9 = vld [vmem:[%s4734_s1 + $0x630] sm:$0xff] }
  0x6c   : > { %3108 = vmatpush3.bf16.msra.mxu1 %v3107_v12  ;;  %v2117_v12 = vld [vmem:[%s4734_s1 + $0x5e0] sm:$0xff] }
  0x6d   : > { %3109 = vmatprep.subr.bf16.mxu1 %v3556_v3  ;;  %v3320_v23 = vpack.c.bf16 %v2118_v15, %v2117_v12  ;;  %v1324_v49 = vmul.f32 0.0625, %v1323_v35  ;;  %v1981_v35 = vld [vmem:[%s3672_s30 + $0x44] sm:$0xf] }
  0x6e   : > { %3300 = vmatpush3.bf16.msra.mxu0 %v3299_v16  ;;  %v2121_v16 = vld [vmem:[%s3672_s30 + $0xc0] sm:$0xf]  ;;  %v674_v43 = vsel %vm145_vm1, %v1981_v35, 0.0 }
  0x6f   : > { %3301 = vmatprep.subr.bf16.mxu0 %v3556_v3  ;;  %2580 = vmatmul.mubr.f32.vlgmr.msra.gmra.mrb[0].mxu1 %v368_v24  ;;  %v1959_v24 = vld [vmem:[%s4734_s1 + $0x1f0] sm:$0xff] }
  0x70   : > { %3111 = vmatpush3.bf16.msra.mxu1 %v3110_v26  ;;  %2614 = vmatprep.mubr.msk.f32.mxu1 %vm3557_vm0, %v3558_v11  ;;  %v1963_v26 = vld [vmem:[%s3672_s30 + $0x60] sm:$0xf]  ;;  %v3131_v34 = vpack.c.bf16 %v1960_v25, %v1959_v24  ;;  %v1975_v24 = vld [vmem:[%s4734_s1 + $0x250] sm:$0xff]  ;;  %v1976_v25 = vld [vmem:[%s4734_s1 + $0x258] sm:$0xff] }
  0x71   : > { %2860 = vmatmul.mubr.f32.vlgmr.msra.gmra.mrb[0].mxu0 %v1218_v27  ;;  %3112 = vmatprep.subr.bf16.mxu1 %v3556_v3  ;;  %v1418_v27 = vsel %vm145_vm1, %v2121_v16, 0.0  ;;  %v571_v36 = vsel %vm145_vm1, %v1963_v26, 0.0  ;;  %v1973_v16 = vld [vmem:[%s4734_s1 + $0x240] sm:$0xff]  ;;  %v2135_v26 = vld [vmem:[%s4734_s1 + $0x650] sm:$0xff] }
  0x72   : > { %3303 = vmatpush3.bf16.msra.mxu0 %v3302_v30  ;;  %2894 = vmatprep.mubr.msk.f32.mxu0 %vm3557_vm0, %v3558_v11  ;;  %v2120_v30 = vld [vmem:[%s4734_s1 + $0x5f8] sm:$0xff]  ;;  %v3146_v21 = vpack.c.bf16 %v1974_v17, %v1973_v16  ;;  %v2147_v16 = vld [vmem:[%s4734_s1 + $0x690] sm:$0xff] }
  0x73   : > { %3304 = vmatprep.subr.bf16.mxu0 %v3556_v3  ;;  %v3323_v38 = vpack.c.bf16 %v2120_v30, %v2119_v29  ;;  %v3149_v29 = vpack.c.bf16 %v1976_v25, %v1975_v24  ;;  %v1977_v30 = vld [vmem:[%s4734_s1 + $0x260] sm:$0xff]  ;;  %v2148_v17 = vld [vmem:[%s4734_s1 + $0x698] sm:$0xff]  ;;  %v2150_v25 = vld [vmem:[%s4734_s1 + $0x6a8] sm:$0xff] }
  0x74   : > { %3114 = vmatpush3.bf16.msra.mxu1 %v3113_v37  ;;  %v1420_v37 = vadd.f32 %v1419_v28, %v1418_v27  ;;  %v2136_v27 = vld [vmem:[%s4734_s1 + $0x658] sm:$0xff]  ;;  %v3152_v41 = vpack.c.bf16 %v1978_v31, %v1977_v30  ;;  %v2149_v24 = vld [vmem:[%s4734_s1 + $0x6a0] sm:$0xff]  ;;  %v1991_v30 = vld [vmem:[%s4734_s1 + $0x2b0] sm:$0xff] }
  0x75   : > { %3115 = vmatprep.subr.bf16.mxu1 %v3556_v3  ;;  %v1992_v31 = vld [vmem:[%s4734_s1 + $0x2b8] sm:$0xff] }
  0x76   : > { %3306 = vmatpush3.bf16.msra.mxu0 %v3305_v39  ;;  %v1965_v39 = vld [vmem:[%s4734_s1 + $0x200] sm:$0xff]  ;;  %v1422_v51 = vadd.f32 %v1421_v42, %v1420_v37  ;;  %v2138_v37 = vld [vmem:[%s4734_s1 + $0x668] sm:$0xff]  ;;  %v3167_v35 = vpack.c.bf16 %v1992_v31, %v1991_v30 }
  0x77   : > { %3307 = vmatprep.subr.bf16.mxu0 %v3556_v3  ;;  %v3134_v48 = vpack.c.bf16 %v1966_v40, %v1965_v39  ;;  %v2142_v39 = vld [vmem:[%s3672_s30 + $0xd4] sm:$0xf] }
  0x78   : > { %3117 = vmatpush3.bf16.msra.mxu1 %v3116_v45  ;;  %v2124_v45 = vld [vmem:[%s3672_s30 + $0xf0] sm:$0xf] }
  0x79   : > { %3118 = vmatprep.subr.bf16.mxu1 %v3556_v3 }
  0x7a   : > { %3309 = vmatpush3.bf16.msra.mxu0 %v3308_v47  ;;  %v572_v47 = vadd.f32 %v571_v36, %v570_v33  ;;  %v3341_v33 = vpack.c.bf16 %v2136_v27, %v2135_v26  ;;  %v1982_v36 = vld [vmem:[%s3672_s30 + $0x54] sm:$0xf] }
  0x7b   : > { %3310 = vmatprep.subr.bf16.mxu0 %v3556_v3  ;;  %v675_v44 = vsel %vm145_vm1, %v1982_v36, 0.0 }
  0x7c   : > { %3120 = vmatpush3.bf16.msra.mxu1 %v3119_v53  ;;  %v1967_v53 = vld [vmem:[%s4734_s1 + $0x210] sm:$0xff]  ;;  %v574_v58 = vadd.f32 %v573_v50, %v572_v47  ;;  %v1980_v47 = vld [vmem:[%s4734_s1 + $0x278] sm:$0xff]  ;;  %v1525_v50 = vsel %vm145_vm1, %v2142_v39, 0.0  ;;  %v1994_v39 = vld [vmem:[%s4734_s1 + $0x2c8] sm:$0xff] }
  0x7d   : > { %3121 = vmatprep.subr.bf16.mxu1 %v3556_v3  ;;  %v3137_v59 = vpack.c.bf16 %v1968_v54, %v1967_v53  ;;  %v2143_v53 = vld [vmem:[%s3672_s30 + $0xe4] sm:$0xf] }
  0x7e   : > { %3312 = vmatpush3.bf16.msra.mxu0 %v3311_v55  ;;  %v1423_v55 = vsel %vm145_vm1, %v2124_v45, 0.0  ;;  %v575_v2 = vrot.slane %v574_v58, 4 }
  0x7f   : > { %3313 = vmatprep.subr.bf16.mxu0 %v3556_v3  ;;  %v1424_v60 = vadd.f32 %v1423_v55, %v1422_v51  ;;  %v2139_v51 = vld [vmem:[%s4734_s1 + $0x670] sm:$0xff]  ;;  %v676_v55 = vadd.f32 %v675_v44, %v674_v43 }
  0x80   : > { %3123 = vmatpush3.bf16.msra.mxu1 %v3122_v61  ;;  %v3329_v61 = vpack.c.bf16 %v2128_v57, %v2127_v56  ;;  %v576_v12 = vadd.f32 %v575_v2, %v574_v58  ;;  %v2146_v2 = vld [vmem:[%s4734_s1 + $0x688] sm:$0xff] }
  0x81   : > { %3124 = vmatprep.subr.bf16.mxu1 %v3556_v3  ;;  %v1425_v5 = vrot.slane %v1424_v60, 4 }
  0x82   : > { %3315 = vmatpush3.bf16.msra.mxu0 %v3314_v63  ;;  %v1970_v63 = vld [vmem:[%s4734_s1 + $0x228] sm:$0xff]  ;;  %v577_v20 = vrot.slane %v576_v12, 2 }
  0x83   : > { %3316 = vmatprep.subr.bf16.mxu0 %v3556_v3  ;;  %v3140_v4 = vpack.c.bf16 %v1970_v63, %v1969_v62  ;;  %v1426_v14 = vadd.f32 %v1425_v5, %v1424_v60  ;;  %v1986_v62 = vld [vmem:[%s4734_s1 + $0x288] sm:$0xff]  ;;  %v1984_v63 = vld [vmem:[%s3672_s30 + $0x74] sm:$0xf] }
  0x84   : > { %3126 = vmatpush3.bf16.msra.mxu1 %v3125_v6  ;;  %v3332_v6 = vpack.c.bf16 %v2130_v1, %v2129_v0  ;;  %v578_v28 = vadd.f32 %v577_v20, %v576_v12  ;;  %v1527_v0 = vsel %vm145_vm1, %v2143_v53, 0.0  ;;  %v2145_v1 = vld [vmem:[%s4734_s1 + $0x680] sm:$0xff]  ;;  %v1998_v53 = vld [vmem:[%s4734_s1 + $0x2e8] sm:$0xff] }
  0x85   : > { %3127 = vmatprep.subr.bf16.mxu1 %v3556_v3  ;;  %v1427_v22 = vrot.slane %v1426_v14, 2  ;;  %v3350_v12 = vpack.c.bf16 %v2146_v2, %v2145_v1 }
  0x86   : > { %3318 = vmatpush3.bf16.msra.mxu0 %v3317_v10  ;;  %v2132_v10 = vld [vmem:[%s4734_s1 + $0x638] sm:$0xff]  ;;  %v579_v40 = vrot.slane %v578_v28, 1 }
  0x87   : > { %3319 = vmatprep.subr.bf16.mxu0 %v3556_v3  ;;  %v3335_v15 = vpack.c.bf16 %v2132_v10, %v2131_v9  ;;  %v1428_v32 = vadd.f32 %v1427_v22, %v1426_v14  ;;  %v679_v9 = vsel %vm145_vm1, %v1984_v63, 0.0  ;;  %v1988_v14 = vld [vmem:[%s4734_s1 + $0x298] sm:$0xff]  ;;  %v1989_v22 = vld [vmem:[%s4734_s1 + $0x2a0] sm:$0xff] }
  0x88   : > { %3129 = vmatpush3.bf16.msra.mxu1 %v3128_v19  ;;  %v2134_v19 = vld [vmem:[%s4734_s1 + $0x648] sm:$0xff]  ;;  %v580_v54 = vadd.f32 %v579_v40, %v578_v28  ;;  %v2153_v40 = vld [vmem:[%s4734_s1 + $0x6c0] sm:$0xff] }
  0x89   : > { %3130 = vmatprep.subr.bf16.mxu1 %v3556_v3  ;;  %v1429_v42 = vrot.slane %v1428_v32, 1 }
  0x8a   : > { %3321 = vmatpush3.bf16.msra.mxu0 %v3320_v23  ;;  %v3338_v23 = vpack.c.bf16 %v2134_v19, %v2133_v18  ;;  %v581_v5 = vmul.f32 0.0625, %v580_v54 }
  0x8b   : > { %3322 = vmatprep.subr.bf16.mxu0 %v3556_v3  ;;  %v1430_v57 = vadd.f32 %v1429_v42, %v1428_v32  ;;  %v2151_v32 = vld [vmem:[%s4734_s1 + $0x6b0] sm:$0xff] }
  0x8c   : > { %3132 = vmatpush3.bf16.msra.mxu1 %v3131_v34  ;;  %v2137_v34 = vld [vmem:[%s4734_s1 + $0x660] sm:$0xff] }
  0x8d   : > { %3133 = vmatprep.subr.bf16.mxu1 %v3556_v3  ;;  %v3344_v45 = vpack.c.bf16 %v2138_v37, %v2137_v34  ;;  %v1431_v8 = vmul.f32 0.0625, %v1430_v57  ;;  %v2001_v57 = vld [vmem:[%s3672_s30 + $0x48] sm:$0xf] }
  0x8e   : > { %3324 = vmatpush3.bf16.msra.mxu0 %v3323_v38  ;;  %v2141_v38 = vld [vmem:[%s3672_s30 + $0xc4] sm:$0xf]  ;;  %v780_v1 = vsel %vm145_vm1, %v2001_v57, 0.0 }
  0x8f   : > { %3325 = vmatprep.subr.bf16.mxu0 %v3556_v3  ;;  %2615 = vmatmul.mubr.f32.vlgmr.msra.gmra.mrb[0].mxu1 %v474_v46  ;;  %v1979_v46 = vld [vmem:[%s4734_s1 + $0x270] sm:$0xff] }
  0x90   : > { %3135 = vmatpush3.bf16.msra.mxu1 %v3134_v48  ;;  %2649 = vmatprep.mubr.msk.f32.mxu1 %vm3557_vm0, %v3558_v11  ;;  %v1983_v48 = vld [vmem:[%s3672_s30 + $0x64] sm:$0xf]  ;;  %v3155_v56 = vpack.c.bf16 %v1980_v47, %v1979_v46  ;;  %v1995_v46 = vld [vmem:[%s4734_s1 + $0x2d0] sm:$0xff]  ;;  %v1996_v47 = vld [vmem:[%s4734_s1 + $0x2d8] sm:$0xff] }
  0x91   : > { %2895 = vmatmul.mubr.f32.vlgmr.msra.gmra.mrb[0].mxu0 %v1324_v49  ;;  %3136 = vmatprep.subr.bf16.mxu1 %v3556_v3  ;;  %v1524_v49 = vsel %vm145_vm1, %v2141_v38, 0.0  ;;  %v677_v58 = vsel %vm145_vm1, %v1983_v48, 0.0  ;;  %v1993_v38 = vld [vmem:[%s4734_s1 + $0x2c0] sm:$0xff]  ;;  %v2155_v48 = vld [vmem:[%s4734_s1 + $0x6d0] sm:$0xff] }
  0x92   : > { %3327 = vmatpush3.bf16.msra.mxu0 %v3326_v52  ;;  %2929 = vmatprep.mubr.msk.f32.mxu0 %vm3557_vm0, %v3558_v11  ;;  %v2140_v52 = vld [vmem:[%s4734_s1 + $0x678] sm:$0xff]  ;;  %v3170_v43 = vpack.c.bf16 %v1994_v39, %v1993_v38  ;;  %v2167_v38 = vld [vmem:[%s4734_s1 + $0x710] sm:$0xff] }
  0x93   : > { %3328 = vmatprep.subr.bf16.mxu0 %v3556_v3  ;;  %v3347_v60 = vpack.c.bf16 %v2140_v52, %v2139_v51  ;;  %v3173_v51 = vpack.c.bf16 %v1996_v47, %v1995_v46  ;;  %v1997_v52 = vld [vmem:[%s4734_s1 + $0x2e0] sm:$0xff]  ;;  %v2168_v39 = vld [vmem:[%s4734_s1 + $0x718] sm:$0xff]  ;;  %v2170_v47 = vld [vmem:[%s4734_s1 + $0x728] sm:$0xff] }
  0x94   : > { %3138 = vmatpush3.bf16.msra.mxu1 %v3137_v59  ;;  %v1526_v59 = vadd.f32 %v1525_v50, %v1524_v49  ;;  %v2156_v49 = vld [vmem:[%s4734_s1 + $0x6d8] sm:$0xff]  ;;  %v3176_v63 = vpack.c.bf16 %v1998_v53, %v1997_v52  ;;  %v2169_v46 = vld [vmem:[%s4734_s1 + $0x720] sm:$0xff]  ;;  %v2011_v52 = vld [vmem:[%s4734_s1 + $0x330] sm:$0xff] }
  0x95   : > { %3139 = vmatprep.subr.bf16.mxu1 %v3556_v3  ;;  %v2012_v53 = vld [vmem:[%s4734_s1 + $0x338] sm:$0xff] }
  0x96   : > { %3330 = vmatpush3.bf16.msra.mxu0 %v3329_v61  ;;  %v1985_v61 = vld [vmem:[%s4734_s1 + $0x280] sm:$0xff]  ;;  %v1528_v10 = vadd.f32 %v1527_v0, %v1526_v59  ;;  %v2158_v59 = vld [vmem:[%s4734_s1 + $0x6e8] sm:$0xff]  ;;  %v3191_v57 = vpack.c.bf16 %v2012_v53, %v2011_v52 }
  0x97   : > { %3331 = vmatprep.subr.bf16.mxu0 %v3556_v3  ;;  %v3158_v7 = vpack.c.bf16 %v1986_v62, %v1985_v61  ;;  %v2162_v61 = vld [vmem:[%s3672_s30 + $0xd8] sm:$0xf] }
  0x98   : > { %3141 = vmatpush3.bf16.msra.mxu1 %v3140_v4  ;;  %v2144_v4 = vld [vmem:[%s3672_s30 + $0xf4] sm:$0xf] }
  0x99   : > { %3142 = vmatprep.subr.bf16.mxu1 %v3556_v3 }
  0x9a   : > { %3333 = vmatpush3.bf16.msra.mxu0 %v3332_v6  ;;  %v678_v6 = vadd.f32 %v677_v58, %v676_v55  ;;  %v3365_v55 = vpack.c.bf16 %v2156_v49, %v2155_v48  ;;  %v2002_v58 = vld [vmem:[%s3672_s30 + $0x58] sm:$0xf] }
  0x9b   : > { %3334 = vmatprep.subr.bf16.mxu0 %v3556_v3  ;;  %v781_v2 = vsel %vm145_vm1, %v2002_v58, 0.0 }
  0x9c   : > { %3144 = vmatpush3.bf16.msra.mxu1 %v3143_v13  ;;  %v1987_v13 = vld [vmem:[%s4734_s1 + $0x290] sm:$0xff]  ;;  %v680_v18 = vadd.f32 %v679_v9, %v678_v6  ;;  %v2000_v6 = vld [vmem:[%s4734_s1 + $0x2f8] sm:$0xff]  ;;  %v1631_v9 = vsel %vm145_vm1, %v2162_v61, 0.0  ;;  %v2014_v61 = vld [vmem:[%s4734_s1 + $0x348] sm:$0xff] }
  0x9d   : > { %3145 = vmatprep.subr.bf16.mxu1 %v3556_v3  ;;  %v3161_v19 = vpack.c.bf16 %v1988_v14, %v1987_v13  ;;  %v2163_v13 = vld [vmem:[%s3672_s30 + $0xe8] sm:$0xf] }
  0x9e   : > { %3336 = vmatpush3.bf16.msra.mxu0 %v3335_v15  ;;  %v1529_v15 = vsel %vm145_vm1, %v2144_v4, 0.0  ;;  %v681_v26 = vrot.slane %v680_v18, 4 }
  0x9f   : > { %3337 = vmatprep.subr.bf16.mxu0 %v3556_v3  ;;  %v1530_v20 = vadd.f32 %v1529_v15, %v1528_v10  ;;  %v2159_v10 = vld [vmem:[%s4734_s1 + $0x6f0] sm:$0xff]  ;;  %v782_v15 = vadd.f32 %v781_v2, %v780_v1 }
  0xa0   : > { %3147 = vmatpush3.bf16.msra.mxu1 %v3146_v21  ;;  %v3353_v21 = vpack.c.bf16 %v2148_v17, %v2147_v16  ;;  %v682_v34 = vadd.f32 %v681_v26, %v680_v18  ;;  %v2166_v26 = vld [vmem:[%s4734_s1 + $0x708] sm:$0xff] }
  0xa1   : > { %3148 = vmatprep.subr.bf16.mxu1 %v3556_v3  ;;  %v1531_v28 = vrot.slane %v1530_v20, 4 }
  0xa2   : > { %3339 = vmatpush3.bf16.msra.mxu0 %v3338_v23  ;;  %v1990_v23 = vld [vmem:[%s4734_s1 + $0x2a8] sm:$0xff]  ;;  %v683_v42 = vrot.slane %v682_v34, 2 }
  0xa3   : > { %3340 = vmatprep.subr.bf16.mxu0 %v3556_v3  ;;  %v3164_v27 = vpack.c.bf16 %v1990_v23, %v1989_v22  ;;  %v1532_v36 = vadd.f32 %v1531_v28, %v1530_v20  ;;  %v2006_v22 = vld [vmem:[%s4734_s1 + $0x308] sm:$0xff]  ;;  %v2004_v23 = vld [vmem:[%s3672_s30 + $0x78] sm:$0xf] }
  0xa4   : > { %3150 = vmatpush3.bf16.msra.mxu1 %v3149_v29  ;;  %v3356_v29 = vpack.c.bf16 %v2150_v25, %v2149_v24  ;;  %v684_v50 = vadd.f32 %v683_v42, %v682_v34  ;;  %v1633_v24 = vsel %vm145_vm1, %v2163_v13, 0.0  ;;  %v2165_v25 = vld [vmem:[%s4734_s1 + $0x700] sm:$0xff]  ;;  %v2018_v13 = vld [vmem:[%s4734_s1 + $0x368] sm:$0xff] }
  0xa5   : > { %3151 = vmatprep.subr.bf16.mxu1 %v3556_v3  ;;  %v1533_v44 = vrot.slane %v1532_v36, 2  ;;  %v3374_v34 = vpack.c.bf16 %v2166_v26, %v2165_v25 }
  0xa6   : > { %3342 = vmatpush3.bf16.msra.mxu0 %v3341_v33  ;;  %v2152_v33 = vld [vmem:[%s4734_s1 + $0x6b8] sm:$0xff]  ;;  %v685_v62 = vrot.slane %v684_v50, 1 }
  0xa7   : > { %3343 = vmatprep.subr.bf16.mxu0 %v3556_v3  ;;  %v3359_v37 = vpack.c.bf16 %v2152_v33, %v2151_v32  ;;  %v1534_v54 = vadd.f32 %v1533_v44, %v1532_v36  ;;  %v785_v32 = vsel %vm145_vm1, %v2004_v23, 0.0  ;;  %v2008_v36 = vld [vmem:[%s4734_s1 + $0x318] sm:$0xff]  ;;  %v2009_v44 = vld [vmem:[%s4734_s1 + $0x320] sm:$0xff] }
  0xa8   : > { %3153 = vmatpush3.bf16.msra.mxu1 %v3152_v41  ;;  %v2154_v41 = vld [vmem:[%s4734_s1 + $0x6c8] sm:$0xff]  ;;  %v686_v14 = vadd.f32 %v685_v62, %v684_v50  ;;  %v2173_v62 = vld [vmem:[%s4734_s1 + $0x740] sm:$0xff] }
  0xa9   : > { %3154 = vmatprep.subr.bf16.mxu1 %v3556_v3  ;;  %v1535_v0 = vrot.slane %v1534_v54, 1 }
  0xaa   : > { %3345 = vmatpush3.bf16.msra.mxu0 %v3344_v45  ;;  %v3362_v45 = vpack.c.bf16 %v2154_v41, %v2153_v40  ;;  %v687_v28 = vmul.f32 0.0625, %v686_v14 }
  0xab   : > { %3346 = vmatprep.subr.bf16.mxu0 %v3556_v3  ;;  %v1536_v17 = vadd.f32 %v1535_v0, %v1534_v54  ;;  %v2171_v54 = vld [vmem:[%s4734_s1 + $0x730] sm:$0xff] }
  0xac   : > { %3156 = vmatpush3.bf16.msra.mxu1 %v3155_v56  ;;  %v2157_v56 = vld [vmem:[%s4734_s1 + $0x6e0] sm:$0xff] }
  0xad   : > { %3157 = vmatprep.subr.bf16.mxu1 %v3556_v3  ;;  %v3368_v4 = vpack.c.bf16 %v2158_v59, %v2157_v56  ;;  %v1537_v31 = vmul.f32 0.0625, %v1536_v17  ;;  %v2021_v17 = vld [vmem:[%s3672_s30 + $0x4c] sm:$0xf] }
  0xae   : > { %3348 = vmatpush3.bf16.msra.mxu0 %v3347_v60  ;;  %v2161_v60 = vld [vmem:[%s3672_s30 + $0xc8] sm:$0xf]  ;;  %v886_v25 = vsel %vm145_vm1, %v2021_v17, 0.0 }
  0xaf   : > { %3349 = vmatprep.subr.bf16.mxu0 %v3556_v3  ;;  %2650 = vmatmul.mubr.f32.vlgmr.msra.gmra.mrb[0].mxu1 %v581_v5  ;;  %v1999_v5 = vld [vmem:[%s4734_s1 + $0x2f0] sm:$0xff] }
  0xb0   : > { %3159 = vmatpush3.bf16.msra.mxu1 %v3158_v7  ;;  %2684 = vmatprep.mubr.msk.f32.mxu1 %vm3557_vm0, %v3558_v11  ;;  %v2003_v7 = vld [vmem:[%s3672_s30 + $0x68] sm:$0xf]  ;;  %v3179_v16 = vpack.c.bf16 %v2000_v6, %v1999_v5  ;;  %v2015_v5 = vld [vmem:[%s4734_s1 + $0x350] sm:$0xff]  ;;  %v2016_v6 = vld [vmem:[%s4734_s1 + $0x358] sm:$0xff] }
  0xb1   : > { %2930 = vmatmul.mubr.f32.vlgmr.msra.gmra.mrb[0].mxu0 %v1431_v8  ;;  %3160 = vmatprep.subr.bf16.mxu1 %v3556_v3  ;;  %v1630_v8 = vsel %vm145_vm1, %v2161_v60, 0.0  ;;  %v783_v18 = vsel %vm145_vm1, %v2003_v7, 0.0  ;;  %v2013_v60 = vld [vmem:[%s4734_s1 + $0x340] sm:$0xff]  ;;  %v2175_v7 = vld [vmem:[%s4734_s1 + $0x750] sm:$0xff] }
  0xb2   : > { %3351 = vmatpush3.bf16.msra.mxu0 %v3350_v12  ;;  %2964 = vmatprep.mubr.msk.f32.mxu0 %vm3557_vm0, %v3558_v11  ;;  %v2160_v12 = vld [vmem:[%s4734_s1 + $0x6f8] sm:$0xff]  ;;  %v3194_v1 = vpack.c.bf16 %v2014_v61, %v2013_v60  ;;  %v2187_v60 = vld [vmem:[%s4734_s1 + $0x790] sm:$0xff] }
  0xb3   : > { %3352 = vmatprep.subr.bf16.mxu0 %v3556_v3  ;;  %v3371_v20 = vpack.c.bf16 %v2160_v12, %v2159_v10  ;;  %v3197_v10 = vpack.c.bf16 %v2016_v6, %v2015_v5  ;;  %v2017_v12 = vld [vmem:[%s4734_s1 + $0x360] sm:$0xff]  ;;  %v2188_v61 = vld [vmem:[%s4734_s1 + $0x798] sm:$0xff]  ;;  %v2190_v6 = vld [vmem:[%s4734_s1 + $0x7a8] sm:$0xff] }
  0xb4   : > { %3162 = vmatpush3.bf16.msra.mxu1 %v3161_v19  ;;  %v1632_v19 = vadd.f32 %v1631_v9, %v1630_v8  ;;  %v2176_v8 = vld [vmem:[%s4734_s1 + $0x758] sm:$0xff]  ;;  %v3200_v23 = vpack.c.bf16 %v2018_v13, %v2017_v12  ;;  %v2189_v5 = vld [vmem:[%s4734_s1 + $0x7a0] sm:$0xff]  ;;  %v2031_v12 = vld [vmem:[%s4734_s1 + $0x3b0] sm:$0xff] }
  0xb5   : > { %3163 = vmatprep.subr.bf16.mxu1 %v3556_v3  ;;  %v2032_v13 = vld [vmem:[%s4734_s1 + $0x3b8] sm:$0xff] }
  0xb6   : > { %3354 = vmatpush3.bf16.msra.mxu0 %v3353_v21  ;;  %v2005_v21 = vld [vmem:[%s4734_s1 + $0x300] sm:$0xff]  ;;  %v1634_v33 = vadd.f32 %v1633_v24, %v1632_v19  ;;  %v2178_v19 = vld [vmem:[%s4734_s1 + $0x768] sm:$0xff] }
  0xb7   : > { %3355 = vmatprep.subr.bf16.mxu0 %v3556_v3  ;;  %v3182_v30 = vpack.c.bf16 %v2006_v22, %v2005_v21  ;;  %v2182_v21 = vld [vmem:[%s3672_s30 + $0xdc] sm:$0xf] }
  0xb8   : > { %3165 = vmatpush3.bf16.msra.mxu1 %v3164_v27  ;;  %v2164_v27 = vld [vmem:[%s3672_s30 + $0xf8] sm:$0xf] }
  0xb9   : > { %3166 = vmatprep.subr.bf16.mxu1 %v3556_v3 }
  0xba   : > { %3357 = vmatpush3.bf16.msra.mxu0 %v3356_v29  ;;  %v784_v29 = vadd.f32 %v783_v18, %v782_v15  ;;  %v3389_v15 = vpack.c.bf16 %v2176_v8, %v2175_v7  ;;  %v2022_v18 = vld [vmem:[%s3672_s30 + $0x5c] sm:$0xf] }
  0xbb   : > { %3358 = vmatprep.subr.bf16.mxu0 %v3556_v3  ;;  %v887_v26 = vsel %vm145_vm1, %v2022_v18, 0.0 }
  0xbc   : > { %3168 = vmatpush3.bf16.msra.mxu1 %v3167_v35  ;;  %v2007_v35 = vld [vmem:[%s4734_s1 + $0x310] sm:$0xff]  ;;  %v786_v40 = vadd.f32 %v785_v32, %v784_v29  ;;  %v2020_v29 = vld [vmem:[%s4734_s1 + $0x378] sm:$0xff]  ;;  %v1737_v32 = vsel %vm145_vm1, %v2182_v21, 0.0  ;;  %v2193_v21 = vld [vmem:[%s4734_s1 + $0x7c0] sm:$0xff] }
  0xbd   : > { %3169 = vmatprep.subr.bf16.mxu1 %v3556_v3  ;;  %v3185_v41 = vpack.c.bf16 %v2008_v36, %v2007_v35  ;;  %v2183_v35 = vld [vmem:[%s3672_s30 + $0xec] sm:$0xf] }
  0xbe   : > { %3360 = vmatpush3.bf16.msra.mxu0 %v3359_v37  ;;  %v1635_v37 = vsel %vm145_vm1, %v2164_v27, 0.0  ;;  %v787_v48 = vrot.slane %v786_v40, 4 }
  0xbf   : > { %3361 = vmatprep.subr.bf16.mxu0 %v3556_v3  ;;  %v1636_v42 = vadd.f32 %v1635_v37, %v1634_v33  ;;  %v2179_v33 = vld [vmem:[%s4734_s1 + $0x770] sm:$0xff]  ;;  %v888_v37 = vadd.f32 %v887_v26, %v886_v25 }
  0xc0   : > { %3171 = vmatpush3.bf16.msra.mxu1 %v3170_v43  ;;  %v3377_v43 = vpack.c.bf16 %v2168_v39, %v2167_v38  ;;  %v788_v56 = vadd.f32 %v787_v48, %v786_v40  ;;  %v2186_v48 = vld [vmem:[%s4734_s1 + $0x788] sm:$0xff] }
  0xc1   : > { %3172 = vmatprep.subr.bf16.mxu1 %v3556_v3  ;;  %v1637_v50 = vrot.slane %v1636_v42, 4 }
  0xc2   : > { %3363 = vmatpush3.bf16.msra.mxu0 %v3362_v45  ;;  %v2010_v45 = vld [vmem:[%s4734_s1 + $0x328] sm:$0xff]  ;;  %v789_v0 = vrot.slane %v788_v56, 2 }
  0xc3   : > { %3364 = vmatprep.subr.bf16.mxu0 %v3556_v3  ;;  %v3188_v49 = vpack.c.bf16 %v2010_v45, %v2009_v44  ;;  %v1638_v58 = vadd.f32 %v1637_v50, %v1636_v42  ;;  %v2026_v44 = vld [vmem:[%s4734_s1 + $0x388] sm:$0xff]  ;;  %v2024_v45 = vld [vmem:[%s3672_s30 + $0x7c] sm:$0xf] }
  0xc4   : > { %3174 = vmatpush3.bf16.msra.mxu1 %v3173_v51  ;;  %v3380_v51 = vpack.c.bf16 %v2170_v47, %v2169_v46  ;;  %v790_v9 = vadd.f32 %v789_v0, %v788_v56  ;;  %v1739_v46 = vsel %vm145_vm1, %v2183_v35, 0.0  ;;  %v2185_v47 = vld [vmem:[%s4734_s1 + $0x780] sm:$0xff] }
  0xc5   : > { %3175 = vmatprep.subr.bf16.mxu1 %v3556_v3  ;;  %v1639_v2 = vrot.slane %v1638_v58, 2  ;;  %v3398_v56 = vpack.c.bf16 %v2186_v48, %v2185_v47  ;;  %v2037_v35 = vld [vmem:[%s4734_s1 + $0x3e0] sm:$0xff] }
  0xc6   : > { %3366 = vmatpush3.bf16.msra.mxu0 %v3365_v55  ;;  %v2172_v55 = vld [vmem:[%s4734_s1 + $0x738] sm:$0xff]  ;;  %v791_v22 = vrot.slane %v790_v9, 1 }
  0xc7   : > { %3367 = vmatprep.subr.bf16.mxu0 %v3556_v3  ;;  %v3383_v59 = vpack.c.bf16 %v2172_v55, %v2171_v54  ;;  %v1640_v14 = vadd.f32 %v1639_v2, %v1638_v58  ;;  %v891_v54 = vsel %vm145_vm1, %v2024_v45, 0.0  ;;  %v2028_v58 = vld [vmem:[%s4734_s1 + $0x398] sm:$0xff]  ;;  %v2029_v2 = vld [vmem:[%s4734_s1 + $0x3a0] sm:$0xff]  ;;  %v2199_v45 = vld [vmem:[%s4734_s1 + $0x7f0] sm:$0xff] }
  0xc8   : > { %3177 = vmatpush3.bf16.msra.mxu1 %v3176_v63  ;;  %v2174_v63 = vld [vmem:[%s4734_s1 + $0x748] sm:$0xff]  ;;  %v792_v36 = vadd.f32 %v791_v22, %v790_v9 }
  0xc9   : > { %3178 = vmatprep.subr.bf16.mxu1 %v3556_v3  ;;  %v1641_v24 = vrot.slane %v1640_v14, 1  ;;  %v2194_v22 = vld [vmem:[%s4734_s1 + $0x7c8] sm:$0xff] }
  0xca   : > { %3369 = vmatpush3.bf16.msra.mxu0 %v3368_v4  ;;  %v3386_v4 = vpack.c.bf16 %v2174_v63, %v2173_v62  ;;  %v793_v50 = vmul.f32 0.0625, %v792_v36  ;;  %v3410_v26 = vpack.c.bf16 %v2194_v22, %v2193_v21  ;;  %v2038_v36 = vld [vmem:[%s4734_s1 + $0x3e8] sm:$0xff] }
  0xcb   : > { %3370 = vmatprep.subr.bf16.mxu0 %v3556_v3  ;;  %v1642_v39 = vadd.f32 %v1641_v24, %v1640_v14  ;;  %v2192_v14 = vld [vmem:[%s4734_s1 + $0x7b8] sm:$0xff] }
  0xcc   : > { %3180 = vmatpush3.bf16.msra.mxu1 %v3179_v16  ;;  %v2177_v16 = vld [vmem:[%s4734_s1 + $0x760] sm:$0xff] }
  0xcd   : > { %3181 = vmatprep.subr.bf16.mxu1 %v3556_v3  ;;  %v3392_v27 = vpack.c.bf16 %v2178_v19, %v2177_v16  ;;  %v1643_v53 = vmul.f32 0.0625, %v1642_v39  ;;  %v3215_v16 = vpack.c.bf16 %v2032_v13, %v2031_v12  ;;  %v2033_v19 = vld [vmem:[%s4734_s1 + $0x3c0] sm:$0xff] }
  0xce   : > { %3372 = vmatpush3.bf16.msra.mxu0 %v3371_v20  ;;  %v2181_v20 = vld [vmem:[%s3672_s30 + $0xcc] sm:$0xf] }
  0xcf   : > { %3373 = vmatprep.subr.bf16.mxu0 %v3556_v3  ;;  %2685 = vmatmul.mubr.f32.vlgmr.msra.gmra.mrb[0].mxu1 %v687_v28  ;;  %v2019_v28 = vld [vmem:[%s4734_s1 + $0x370] sm:$0xff] }
  0xd0   : > { %3183 = vmatpush3.bf16.msra.mxu1 %v3182_v30  ;;  %2719 = vmatprep.mubr.msk.f32.mxu1 %vm3557_vm0, %v3558_v11  ;;  %v2023_v30 = vld [vmem:[%s3672_s30 + $0x6c] sm:$0xf]  ;;  %v3203_v38 = vpack.c.bf16 %v2020_v29, %v2019_v28  ;;  %v2036_v28 = vld [vmem:[%s4734_s1 + $0x3d8] sm:$0xff]  ;;  %v2195_v29 = vld [vmem:[%s4734_s1 + $0x7d0] sm:$0xff] }
  0xd1   : > { %2965 = vmatmul.mubr.f32.vlgmr.msra.gmra.mrb[0].mxu0 %v1537_v31  ;;  %3184 = vmatprep.subr.bf16.mxu1 %v3556_v3  ;;  %v1736_v31 = vsel %vm145_vm1, %v2181_v20, 0.0  ;;  %v889_v40 = vsel %vm145_vm1, %v2023_v30, 0.0  ;;  %v2034_v20 = vld [vmem:[%s4734_s1 + $0x3c8] sm:$0xff]  ;;  %v2196_v30 = vld [vmem:[%s4734_s1 + $0x7d8] sm:$0xff] }
  0xd2   : > { %3375 = vmatpush3.bf16.msra.mxu0 %v3374_v34  ;;  %2999 = vmatprep.mubr.msk.f32.mxu0 %vm3557_vm0, %v3558_v11  ;;  %v2180_v34 = vld [vmem:[%s4734_s1 + $0x778] sm:$0xff]  ;;  %v3218_v24 = vpack.c.bf16 %v2034_v20, %v2033_v19 }
  0xd3   : > { %3376 = vmatprep.subr.bf16.mxu0 %v3556_v3  ;;  %v3395_v42 = vpack.c.bf16 %v2180_v34, %v2179_v33  ;;  %v3413_v34 = vpack.c.bf16 %v2196_v30, %v2195_v29 }
  0xd4   : > { %3186 = vmatpush3.bf16.msra.mxu1 %v3185_v41  ;;  %v1738_v41 = vadd.f32 %v1737_v32, %v1736_v31 }
  0xd5   : > { %3187 = vmatprep.subr.bf16.mxu1 %v3556_v3 }
  0xd6   : > { %3378 = vmatpush3.bf16.msra.mxu0 %v3377_v43  ;;  %v2025_v43 = vld [vmem:[%s4734_s1 + $0x380] sm:$0xff]  ;;  %v1740_v55 = vadd.f32 %v1739_v46, %v1738_v41  ;;  %v2200_v46 = vld [vmem:[%s4734_s1 + $0x7f8] sm:$0xff] }
  0xd7   : > { %3379 = vmatprep.subr.bf16.mxu0 %v3556_v3  ;;  %v3206_v52 = vpack.c.bf16 %v2026_v44, %v2025_v43  ;;  %v2039_v43 = vld [vmem:[%s4734_s1 + $0x3f0] sm:$0xff]  ;;  %v2040_v44 = vld [vmem:[%s4734_s1 + $0x3f8] sm:$0xff] }
  0xd8   : > { %3189 = vmatpush3.bf16.msra.mxu1 %v3188_v49  ;;  %v2184_v49 = vld [vmem:[%s3672_s30 + $0xfc] sm:$0xf]  ;;  %v3227_v48 = vpack.c.bf16 %v2040_v44, %v2039_v43 }
  0xd9   : > { %3190 = vmatprep.subr.bf16.mxu1 %v3556_v3 }
  0xda   : > { %3381 = vmatpush3.bf16.msra.mxu0 %v3380_v51  ;;  %v890_v51 = vadd.f32 %v889_v40, %v888_v37  ;;  %v2197_v37 = vld [vmem:[%s4734_s1 + $0x7e0] sm:$0xff]  ;;  %v3224_v40 = vpack.c.bf16 %v2038_v36, %v2037_v35 }
  0xdb   : > { %3382 = vmatprep.subr.bf16.mxu0 %v3556_v3 }
  0xdc   : > { %3192 = vmatpush3.bf16.msra.mxu1 %v3191_v57  ;;  %v2027_v57 = vld [vmem:[%s4734_s1 + $0x390] sm:$0xff]  ;;  %v892_v62 = vadd.f32 %v891_v54, %v890_v51 }
  0xdd   : > { %3193 = vmatprep.subr.bf16.mxu1 %v3556_v3  ;;  %v3209_v63 = vpack.c.bf16 %v2028_v58, %v2027_v57 }
  0xde   : > { %3384 = vmatpush3.bf16.msra.mxu0 %v3383_v59  ;;  %v1741_v59 = vsel %vm145_vm1, %v2184_v49, 0.0  ;;  %v893_v7 = vrot.slane %v892_v62, 4 }
  0xdf   : > { %3385 = vmatprep.subr.bf16.mxu0 %v3556_v3  ;;  %v1742_v0 = vadd.f32 %v1741_v59, %v1740_v55 }
  0xe0   : > { %3195 = vmatpush3.bf16.msra.mxu1 %v3194_v1  ;;  %v3401_v1 = vpack.c.bf16 %v2188_v61, %v2187_v60 }
  0xe1   : > { %3196 = vmatprep.subr.bf16.mxu1 %v3556_v3  ;;  %v1743_v9 = vrot.slane %v1742_v0, 4 }
  0xe2   : > { %3387 = vmatpush3.bf16.msra.mxu0 %v3386_v4  ;;  %v2030_v4 = vld [vmem:[%s4734_s1 + $0x3a8] sm:$0xff] }
  0xe3   : > { %3388 = vmatprep.subr.bf16.mxu0 %v3556_v3  ;;  %v3212_v8 = vpack.c.bf16 %v2030_v4, %v2029_v2  ;;  %v1744_v17 = vadd.f32 %v1743_v9, %v1742_v0 }
  0xe4   : > { %3198 = vmatpush3.bf16.msra.mxu1 %v3197_v10  ;;  %v3404_v10 = vpack.c.bf16 %v2190_v6, %v2189_v5 }
  0xe5   : > { %3199 = vmatprep.subr.bf16.mxu1 %v3556_v3  ;;  %v1745_v25 = vrot.slane %v1744_v17, 2 }
  0xe6   : > { %3390 = vmatpush3.bf16.msra.mxu0 %v3389_v15  ;;  %v894_v15 = vadd.f32 %v893_v7, %v892_v62 }
  0xe7   : > { %3391 = vmatprep.subr.bf16.mxu0 %v3556_v3  ;;  %v1746_v33 = vadd.f32 %v1745_v25, %v1744_v17 }
  0xe8   : > { %3201 = vmatpush3.bf16.msra.mxu1 %v3200_v23  ;;  %v895_v23 = vrot.slane %v894_v15, 2 }
  0xe9   : > { %3202 = vmatprep.subr.bf16.mxu1 %v3556_v3  ;;  %v1747_v41 = vrot.slane %v1746_v33, 1 }
  0xea   : > { %3393 = vmatpush3.bf16.msra.mxu0 %v3392_v27  ;;  %v2035_v27 = vld [vmem:[%s4734_s1 + $0x3d0] sm:$0xff]  ;;  %v896_v31 = vadd.f32 %v895_v23, %v894_v15 }
  0xeb   : > { %3394 = vmatprep.subr.bf16.mxu0 %v3556_v3  ;;  %v3221_v32 = vpack.c.bf16 %v2036_v28, %v2035_v27  ;;  %v1748_v49 = vadd.f32 %v1747_v41, %v1746_v33 }
  0xec   : > { %3204 = vmatpush3.bf16.msra.mxu1 %v3203_v38  ;;  %v2198_v38 = vld [vmem:[%s4734_s1 + $0x7e8] sm:$0xff]  ;;  %v897_v39 = vrot.slane %v896_v31, 1 }
  0xed   : > { %3205 = vmatprep.subr.bf16.mxu1 %v3556_v3 }
  0xee   : > { %3396 = vmatpush3.bf16.msra.mxu0 %v3395_v42  ;;  %v3416_v42 = vpack.c.bf16 %v2198_v38, %v2197_v37  ;;  %v898_v47 = vadd.f32 %v897_v39, %v896_v31 }
  0xef   : > { %3397 = vmatprep.subr.bf16.mxu0 %v3556_v3  ;;  %2720 = vmatmul.mubr.f32.vlgmr.msra.gmra.mrb[0].mxu1 %v793_v50  ;;  %v3419_v50 = vpack.c.bf16 %v2200_v46, %v2199_v45 }
  0xf0   : > { %3207 = vmatpush3.bf16.msra.mxu1 %v3206_v52  ;;  %2754 = vmatprep.mubr.msk.f32.mxu1 %vm3557_vm0, %v3558_v11  ;;  %v899_v51 = vmul.f32 0.0625, %v898_v47  ;;  %v1749_v52 = vmul.f32 0.0625, %v1748_v49 }
  0xf1   : > { %3000 = vmatmul.mubr.f32.vlgmr.msra.gmra.mrb[0].mxu0 %v1643_v53  ;;  %3208 = vmatprep.subr.bf16.mxu1 %v3556_v3 }
  0xf2   : > { %3399 = vmatpush3.bf16.msra.mxu0 %v3398_v56  ;;  %3034 = vmatprep.mubr.msk.f32.mxu0 %vm3557_vm0, %v3558_v11  ;;  %v2191_v11 = vld [vmem:[%s4734_s1 + $0x7b0] sm:$0xff] }
  0xf3   : > { %3400 = vmatprep.subr.bf16.mxu0 %v3556_v3  ;;  %v3407_v18 = vpack.c.bf16 %v2192_v14, %v2191_v11 }
  0xf4   : > { %3210 = vmatpush3.bf16.msra.mxu1 %v3209_v63 }
  0xf5   : > { %3211 = vmatprep.subr.bf16.mxu1 %v3556_v3 }
  0xf6   : > { %3402 = vmatpush3.bf16.msra.mxu0 %v3401_v1 }
  0xf7   : > { %3403 = vmatprep.subr.bf16.mxu0 %v3556_v3 }
  0xf8   : > { %3213 = vmatpush3.bf16.msra.mxu1 %v3212_v8 }
  0xf9   : > { %3214 = vmatprep.subr.bf16.mxu1 %v3556_v3 }
  0xfa   : > { %3405 = vmatpush3.bf16.msra.mxu0 %v3404_v10 }
  0xfb   : > { %3406 = vmatprep.subr.bf16.mxu0 %v3556_v3 }
  0xfc   : > { %3216 = vmatpush3.bf16.msra.mxu1 %v3215_v16 }
  0xfd   : > { %3217 = vmatprep.subr.bf16.mxu1 %v3556_v3 }
  0xfe   : > { %3408 = vmatpush3.bf16.msra.mxu0 %v3407_v18 }
  0xff   : > { %3409 = vmatprep.subr.bf16.mxu0 %v3556_v3 }
 0x100   : > { %3219 = vmatpush3.bf16.msra.mxu1 %v3218_v24 }
 0x101   : > { %3220 = vmatprep.subr.bf16.mxu1 %v3556_v3 }
 0x102   : > { %3411 = vmatpush3.bf16.msra.mxu0 %v3410_v26 }
 0x103   : > { %3412 = vmatprep.subr.bf16.mxu0 %v3556_v3 }
 0x104   : > { %3222 = vmatpush3.bf16.msra.mxu1 %v3221_v32 }
 0x105   : > { %3223 = vmatprep.subr.bf16.mxu1 %v3556_v3 }
 0x106   : > { %3414 = vmatpush3.bf16.msra.mxu0 %v3413_v34 }
 0x107   : > { %3415 = vmatprep.subr.bf16.mxu0 %v3556_v3 }
 0x108   : > { %3225 = vmatpush3.bf16.msra.mxu1 %v3224_v40 }
 0x109   : > { %3226 = vmatprep.subr.bf16.mxu1 %v3556_v3 }
 0x10a   : > { %3417 = vmatpush3.bf16.msra.mxu0 %v3416_v42 }
 0x10b   : > { %3418 = vmatprep.subr.bf16.mxu0 %v3556_v3 }
 0x10c   : > { %3228 = vmatpush3.bf16.msra.mxu1 %v3227_v48 }
 0x10e   : > { %3420 = vmatpush3.bf16.msra.mxu0 %v3419_v50 }
 0x10f   : > { %2755 = vmatmul.mubr.f32.vlgmr.msra.gmra.mrb[0].mxu1 %v899_v51 }
 0x111   : > { %3035 = vmatmul.mubr.f32.vlgmr.msra.gmra.mrb[0].mxu0 %v1749_v52 }
 0x1e2   : > { %v983_v53 = vpop.f32.mrb[0].mxu1 }
 0x1e3   : > { %v2756_v55 = vpop.f32.mrb[1].mxu1 }
 0x1e4   : > { %v1833_v54 = vpop.f32.mrb[0].mxu0 }
 0x1e5   : > { %v3421_v56 = vadd.f32 %v1833_v54, %v983_v53  ;;  %v3036_v57 = vpop.f32.mrb[1].mxu0 }
 0x1e7   : > { %1838 = vst [vmem:[%s135_s4] sm:$0x1] %v3421_v56 }
 0x1e8   : > { %3505 = shalt.err (!%p3502_p3)
}
 0x1e9   : > { %s3506_s21 = scalar_lea.hbm %s4691_s7, 16  ;;  %s3510_s24 = scalar_lea.hbm %s4735_s2, 32 }
 0x1ea   : > { %p3507_p4 = scmp.ne.s32.totalorder %s4691_s7, %s3506_s21  ;;  %p3511_p9 = scmp.lt.u32.totalorder %s4691_s7, %s4735_s2 }
 0x1eb   : > { %p3512_p10 = scmp.lt.u32.totalorder %s3510_s24, %s3506_s21  ;;  %p3514_p12 = scmp.lt.u32.totalorder %s3506_s21, %s4691_s7 }
 0x1ec   : > { %p3508_p7 = pnand %p3507_p4, %p3613_p5 }
 0x1ed   : > { %p3513_p11 = por %p3512_p10, %p3511_p9 }
 0x1ee   : > { %p3509_p8 = pneg %p3508_p7 }
 0x1ef   : > { %p3515_p13 = por %p3514_p12, %p3513_p11 }
 0x1f1   : > { %p3516_p0 = pnand %p3515_p13, %p3509_p8 }
 0x1f3   : > { %3519 = shalt.err (!%p3516_p0)
}
 0x1f4   : > { %3450 = dma.vmem_to_hbm [thread:$0]  (%p3613_p5), %s4693_s5, 16, %s4691_s7, %s1840_s8  }
 0x1f5 PF: > { %p3456_p1 = scmp.ge.s32.totalorder %s3554_s12, 2  ;;  %s1864_s27 = sand.u32 1, %s3542_s9  }
 0x1f6   : > { %s1865_s28 = scalar_lea.sflag [#allocation3], %s1864_s27 }
 0x1f7   : > { %p3453_p2 = pnand %p3456_p1, %p3617_p6 }
 0x1f9   : > { %3537 = dma.done.wait (!%p3453_p2), %s1865_s28, 16  }
 0x1fa   : > { %3539 = vsyncadd (!%p3453_p2), %s1865_s28, 4294967280  ;;  %p12_p3 = scmp.ge.s32.totalorder %s3600_s15, 4   ;;  %s4738_s9 = smov %s3546_s10 }
 0x1fb   : > { %s4739_s10 = smov %s3550_s11  ;;  %s4740_s11 = smov %s3611_s18 }
 0x1fc   : > { %s4741_s12 = smov %s3600_s15  ;;  %14 = sbr.rel (!%p12_p3) target bundleno = 3 (0x3), region = 81 }
 0x203   :  { %1869 = vsyncpa [#allocation3], 1 }
 0x204   :  { %1871 = vsyncpa [#allocation3 + $0x1], 1 }

</bundles_post_ra>
